<compile_context>
chip_gen: v7x
topology: tpu7x:2x2x1
jax: 0.10.0
libtpu: 0.0.40
codegen_flags: <defaults>
</compile_context>

<pallas_src>
import jax
import jax.numpy as jnp
import numpy as np
from jax.experimental import pallas as pl
from jax.experimental.pallas import tpu as pltpu

D = 256.0  # self.d = float(2 ** 8)


# ---------------------------------------------------------------------------
# In-kernel helpers
# ---------------------------------------------------------------------------
def _reflect_pad1(v):
    """ReflectionPad2d(1) on axes (1, 2) of an (N, H, W[, C]) VMEM value."""
    v = jnp.concatenate([v[:, 1:2], v, v[:, -2:-1]], axis=1)          # pad H
    v = jnp.concatenate([v[:, :, 1:2], v, v[:, :, -2:-1]], axis=2)    # pad W
    return v


def _conv3x3_c16(vp, w_ref, b_ref):
    """3x3 VALID conv, 16->16 channels, as one (N*H*W, 144) @ (144, 16) bf16 MXU matmul.

    vp:    (N, H+2, W+2, 16) f32, already reflect-padded
    w_ref: (144, 16) bf16   tap-major layout: row = (ki*3 + kj)*16 + cin
    b_ref: (1, 16)   f32
    """
    n, hp, wp, c = vp.shape
    h, w = hp - 2, wp - 2
    taps = [vp[:, ki:ki + h, kj:kj + w, :] for ki in range(3) for kj in range(3)]
    patches = jnp.concatenate(taps, axis=-1).reshape(n * h * w, 9 * c)
    acc = jnp.dot(patches.astype(jnp.bfloat16), w_ref[...],
                  preferred_element_type=jnp.float32)                  # f32 accumulate
    return acc.reshape(n, h, w, c) + b_ref[...]


# ---------------------------------------------------------------------------
# Fused kernel: whole lifting step for one batch element
# ---------------------------------------------------------------------------
def _fused_kernel(x_ref, w0_ref, b0_ref, w1_ref, b1_ref, w2_ref, b2_ref,
                  w3_ref, sc_ref, out_ref):
    n, h, w = x_ref.shape
    x = x_ref[...]                                                     # (1, H, W) f32

    # stage 0: x_2 = tanh(conv0(pad(x / d)))      1 -> 16 channels (VPU broadcast FMAs)
    xp = _reflect_pad1(x * jnp.float32(1.0 / D))                       # (1, H+2, W+2)
    acc0 = jnp.zeros((n, h, w, 16), jnp.float32)
    for k in range(9):
        ki, kj = divmod(k, 3)
        acc0 = acc0 + xp[:, ki:ki + h, kj:kj + w, None] * w0_ref[k]    # w0_ref[k]: (1, 16)
    x2 = jnp.tanh(acc0 + b0_ref[...])                                  # (1, H, W, 16)

    # stage 1: x_3 = conv1(pad(x_2)); x_4 = tanh(x_3)
    x3 = _conv3x3_c16(_reflect_pad1(x2), w1_ref, b1_ref)
    x4 = jnp.tanh(x3)

    # stage 2: x_6 = x_3 + conv2(pad(x_4))
    x6 = x3 + _conv3x3_c16(_reflect_pad1(x4), w2_ref, b2_ref)

    # stage 3: out = conv3(pad(x_6)) * d * alpha + x      16 -> 1 channel
    x6p = _reflect_pad1(x6)                                            # (1, H+2, W+2, 16)
    acc16 = jnp.zeros((n, h, w, 16), jnp.float32)
    for k in range(9):
        ki, kj = divmod(k, 3)
        acc16 = acc16 + x6p[:, ki:ki + h, kj:kj + w, :] * w3_ref[k]    # w3_ref[k]: (1, 16)
    y = jnp.sum(acc16, axis=-1)                                        # single lane reduce
    b3 = sc_ref[0]
    alpha = sc_ref[1]
    out = (y + b3) * (jnp.float32(D) * alpha) + x                      # (1, H, W)

    out_ref[...] = out.reshape(n, 1, h * w)                            # lane-dense store


# ---------------------------------------------------------------------------
# Wrapper (accepts / returns PyTorch-style NCHW with C == 1)
# ---------------------------------------------------------------------------
def variant_b_forward(x_nchw, params):
    B, C, H, W = x_nchw.shape
    assert C == 1
    f32, bf16 = jnp.float32, jnp.bfloat16

    x = x_nchw.reshape(B, H, W).astype(f32)          # NCHW with C=1 -> free reshape

    # Kernel-friendly parameter layouts (weights stored HWIO in params).
    w0 = params["w0"].reshape(9, 1, 16).astype(f32)                       # (3,3,1,16)
    b0 = params["b0"].reshape(1, 16).astype(f32)
    w1 = params["w1"].reshape(144, 16).astype(bf16)                       # (3,3,16,16)
    b1 = params["b1"].reshape(1, 16).astype(f32)
    w2 = params["w2"].reshape(144, 16).astype(bf16)
    b2 = params["b2"].reshape(1, 16).astype(f32)
    w3 = jnp.transpose(params["w3"].reshape(9, 16, 1), (0, 2, 1)).astype(f32)  # (9,1,16)
    scalars = jnp.stack([params["b3"].reshape(()),
                         jnp.asarray(params["alpha"], f32).reshape(())]).astype(f32)

    def wspec(shape):
        return pl.BlockSpec(shape, lambda b, _s=shape: (0,) * len(_s))

    out = pl.pallas_call(
        _fused_kernel,
        out_shape=jax.ShapeDtypeStruct((B, 1, H * W), f32),
        grid_spec=pltpu.PrefetchScalarGridSpec(
            num_scalar_prefetch=0,
            grid=(B,),
            in_specs=[
                pl.BlockSpec((1, H, W), lambda b: (b, 0, 0)),   # x (one image per step)
                wspec((9, 1, 16)),   # w0
                wspec((1, 16)),      # b0
                wspec((144, 16)),    # w1 (bf16)
                wspec((1, 16)),      # b1
                wspec((144, 16)),    # w2 (bf16)
                wspec((1, 16)),      # b2
                wspec((9, 1, 16)),   # w3
                pl.BlockSpec(memory_space=pltpu.MemorySpace.SMEM),   # [b3, alpha]
            ],
            out_specs=pl.BlockSpec((1, 1, H * W), lambda b: (b, 0, 0)),
        ),
        compiler_params=pltpu.CompilerParams(
            dimension_semantics=("parallel",),        # batch axis -> 2 TCs on v7x
            vmem_limit_bytes=32 * 1024 * 1024,
        ),
    )(x, w0, b0, w1, b1, w2, b2, w3, scalars)

    return out.reshape(B, 1, H, W)                   # free reshape back to NCHW


# ---------------------------------------------------------------------------
# Pure-JAX reference (full f32, HIGHEST precision) for correctness check
# ---------------------------------------------------------------------------
def _rpad_host(v):
    return jnp.pad(v, ((0, 0), (1, 1), (1, 1), (0, 0)), mode="reflect")


def reference_forward(x_nchw, params):
    x = jnp.transpose(x_nchw, (0, 2, 3, 1)).astype(jnp.float32)

    def conv(v, w, b):
        p = _rpad_host(v)
        o = jax.lax.conv_general_dilated(
            p, w, (1, 1), "VALID",
            dimension_numbers=("NHWC", "HWIO", "NHWC"),
            precision=jax.lax.Precision.HIGHEST)
        return o + b.reshape(1, 1, 1, -1)

    x1 = conv(x / D, params["w0"], params["b0"])
    x2 = jnp.tanh(x1)
    x3 = conv(x2, params["w1"], params["b1"])
    x4 = jnp.tanh(x3)
    x5 = conv(x4, params["w2"], params["b2"])
    x6 = x3 + x5
    out = conv(x6, params["w3"], params["b3"])
    out = out * D * params["alpha"]
    out = out + x
    return jnp.transpose(out, (0, 3, 1, 2))


def init_params(key):
    ks = jax.random.split(key, 8)
    f32 = jnp.float32
    return {
        "w0": jax.random.normal(ks[0], (3, 3, 1, 16), f32) * 0.2,
        "b0": jax.random.normal(ks[1], (16,), f32) * 0.1,
        "w1": jax.random.normal(ks[2], (3, 3, 16, 16), f32) * 0.05,
        "b1": jax.random.normal(ks[3], (16,), f32) * 0.1,
        "w2": jax.random.normal(ks[4], (3, 3, 16, 16), f32) * 0.05,
        "b2": jax.random.normal(ks[5], (16,), f32) * 0.1,
        "w3": jax.random.normal(ks[6], (3, 3, 16, 1), f32) * 0.05,
        "b3": jax.random.normal(ks[7], (1,), f32) * 0.1,
        "alpha": jnp.asarray(0.1, f32),
    }


if __name__ == "__main__":
    key = jax.random.PRNGKey(0)
    k_params, k_x = jax.random.split(key)
    params = init_params(k_params)

    # Pixel-like input, matching the module's /256 normalization assumption.
    x = jax.random.uniform(k_x, (2, 1, 16, 16), jnp.float32) * 255.0

    out = jax.jit(variant_b_forward)(x, params)
    out = jax.block_until_ready(out)

    ref = jax.block_until_ready(reference_forward(x, params))
    # Tolerance accounts for bf16 MXU operands (f32 accumulation) in the two 16->16
    # convs; the final residual is amplified by d*alpha = 25.6, hence atol=1e-1.
    np.testing.assert_allclose(np.asarray(out), np.asarray(ref), rtol=5e-3, atol=1e-1)

    print("KERNEL_OK")
</pallas_src>

<mosaic_0001>
module attributes {stable_mosaic.version = 11 : i64} {
  func.func @_fused_kernel(%arg0: i32, %arg1: memref<1x16x16xf32, #tpu.memory_space<vmem>>, %arg2: memref<9x1x16xf32, #tpu.memory_space<vmem>>, %arg3: memref<1x16xf32, #tpu.memory_space<vmem>>, %arg4: memref<144x16xbf16, #tpu.memory_space<vmem>>, %arg5: memref<1x16xf32, #tpu.memory_space<vmem>>, %arg6: memref<144x16xbf16, #tpu.memory_space<vmem>>, %arg7: memref<1x16xf32, #tpu.memory_space<vmem>>, %arg8: memref<9x1x16xf32, #tpu.memory_space<vmem>>, %arg9: memref<2xf32, #tpu.memory_space<smem>>, %arg10: memref<1x1x256xf32, #tpu.memory_space<vmem>>) attributes {dimension_semantics = [#tpu.dimension_semantics<parallel>], iteration_bounds = array<i64: 2>, scalar_prefetch = 0 : i64, scratch_operands = 0 : i64, tpu.core_type = #tpu.core_type<tc>, window_params = [{transform_indices = @transform_0, window_bounds = array<i64: 1, 16, 16>}, {pipeline_mode = #tpu.pipeline_mode<synchronous>, transform_indices = @transform_1, window_bounds = array<i64: 9, 1, 16>}, {pipeline_mode = #tpu.pipeline_mode<synchronous>, transform_indices = @transform_2, window_bounds = array<i64: 1, 16>}, {pipeline_mode = #tpu.pipeline_mode<synchronous>, transform_indices = @transform_3, window_bounds = array<i64: 144, 16>}, {pipeline_mode = #tpu.pipeline_mode<synchronous>, transform_indices = @transform_4, window_bounds = array<i64: 1, 16>}, {pipeline_mode = #tpu.pipeline_mode<synchronous>, transform_indices = @transform_5, window_bounds = array<i64: 144, 16>}, {pipeline_mode = #tpu.pipeline_mode<synchronous>, transform_indices = @transform_6, window_bounds = array<i64: 1, 16>}, {pipeline_mode = #tpu.pipeline_mode<synchronous>, transform_indices = @transform_7, window_bounds = array<i64: 9, 1, 16>}, {transform_indices = @transform_8, window_bounds = array<i64: 2>}, {transform_indices = @transform_9, window_bounds = array<i64: 1, 1, 256>}]} {
    %c0 = arith.constant 0 : index
    %c0_0 = arith.constant 0 : index
    %c0_1 = arith.constant 0 : index
    %0 = vector.load %arg1[%c0, %c0_0, %c0_1] : memref<1x16x16xf32, #tpu.memory_space<vmem>>, vector<1x16x16xf32>
    %cst = arith.constant 3.906250e-03 : f32
    %1 = vector.broadcast %cst : f32 to vector<1x16x16xf32>
    %2 = arith.mulf %0, %1 : vector<1x16x16xf32>
    %3 = vector.extract_strided_slice %2 {offsets = [0, 1, 0], sizes = [1, 1, 16], strides = [1, 1, 1]} : vector<1x16x16xf32> to vector<1x1x16xf32>
    %4 = vector.extract_strided_slice %2 {offsets = [0, 14, 0], sizes = [1, 1, 16], strides = [1, 1, 1]} : vector<1x16x16xf32> to vector<1x1x16xf32>
    %5 = tpu.concatenate %3, %2, %4 in 1 : vector<1x1x16xf32>, vector<1x16x16xf32>, vector<1x1x16xf32> -> vector<1x18x16xf32>
    %6 = vector.extract_strided_slice %5 {offsets = [0, 0, 1], sizes = [1, 18, 1], strides = [1, 1, 1]} : vector<1x18x16xf32> to vector<1x18x1xf32>
    %7 = vector.extract_strided_slice %5 {offsets = [0, 0, 14], sizes = [1, 18, 1], strides = [1, 1, 1]} : vector<1x18x16xf32> to vector<1x18x1xf32>
    %8 = tpu.concatenate %6, %5, %7 in 2 : vector<1x18x1xf32>, vector<1x18x16xf32>, vector<1x18x1xf32> -> vector<1x18x18xf32>
    %cst_2 = arith.constant 0.000000e+00 : f32
    %9 = vector.broadcast %cst_2 : f32 to vector<1x16x16x16xf32>
    %10 = vector.extract_strided_slice %8 {offsets = [0, 0, 0], sizes = [1, 16, 16], strides = [1, 1, 1]} : vector<1x18x18xf32> to vector<1x16x16xf32>
    %11 = vector.shape_cast %10 : vector<1x16x16xf32> to vector<1x16x16x1xf32>
    %c0_3 = arith.constant 0 : index
    %c0_4 = arith.constant 0 : index
    %c0_5 = arith.constant 0 : index
    %12 = vector.load %arg2[%c0_3, %c0_4, %c0_5] : memref<9x1x16xf32, #tpu.memory_space<vmem>>, vector<1x1x16xf32>
    %13 = vector.shape_cast %12 : vector<1x1x16xf32> to vector<1x16xf32>
    %14 = vector.shape_cast %13 : vector<1x16xf32> to vector<1x1x1x16xf32>
    %15 = vector.broadcast %11 : vector<1x16x16x1xf32> to vector<1x16x16x16xf32>
    %16 = vector.broadcast %14 : vector<1x1x1x16xf32> to vector<1x16x16x16xf32>
    %17 = arith.mulf %15, %16 : vector<1x16x16x16xf32>
    %18 = arith.addf %9, %17 : vector<1x16x16x16xf32>
    %19 = vector.extract_strided_slice %8 {offsets = [0, 0, 1], sizes = [1, 16, 16], strides = [1, 1, 1]} : vector<1x18x18xf32> to vector<1x16x16xf32>
    %20 = vector.shape_cast %19 : vector<1x16x16xf32> to vector<1x16x16x1xf32>
    %c1 = arith.constant 1 : index
    %c0_6 = arith.constant 0 : index
    %c0_7 = arith.constant 0 : index
    %21 = vector.load %arg2[%c1, %c0_6, %c0_7] : memref<9x1x16xf32, #tpu.memory_space<vmem>>, vector<1x1x16xf32>
    %22 = vector.shape_cast %21 : vector<1x1x16xf32> to vector<1x16xf32>
    %23 = vector.shape_cast %22 : vector<1x16xf32> to vector<1x1x1x16xf32>
    %24 = vector.broadcast %20 : vector<1x16x16x1xf32> to vector<1x16x16x16xf32>
    %25 = vector.broadcast %23 : vector<1x1x1x16xf32> to vector<1x16x16x16xf32>
    %26 = arith.mulf %24, %25 : vector<1x16x16x16xf32>
    %27 = arith.addf %18, %26 : vector<1x16x16x16xf32>
    %28 = vector.extract_strided_slice %8 {offsets = [0, 0, 2], sizes = [1, 16, 16], strides = [1, 1, 1]} : vector<1x18x18xf32> to vector<1x16x16xf32>
    %29 = vector.shape_cast %28 : vector<1x16x16xf32> to vector<1x16x16x1xf32>
    %c2 = arith.constant 2 : index
    %c0_8 = arith.constant 0 : index
    %c0_9 = arith.constant 0 : index
    %30 = vector.load %arg2[%c2, %c0_8, %c0_9] : memref<9x1x16xf32, #tpu.memory_space<vmem>>, vector<1x1x16xf32>
    %31 = vector.shape_cast %30 : vector<1x1x16xf32> to vector<1x16xf32>
    %32 = vector.shape_cast %31 : vector<1x16xf32> to vector<1x1x1x16xf32>
    %33 = vector.broadcast %29 : vector<1x16x16x1xf32> to vector<1x16x16x16xf32>
    %34 = vector.broadcast %32 : vector<1x1x1x16xf32> to vector<1x16x16x16xf32>
    %35 = arith.mulf %33, %34 : vector<1x16x16x16xf32>
    %36 = arith.addf %27, %35 : vector<1x16x16x16xf32>
    %37 = vector.extract_strided_slice %8 {offsets = [0, 1, 0], sizes = [1, 16, 16], strides = [1, 1, 1]} : vector<1x18x18xf32> to vector<1x16x16xf32>
    %38 = vector.shape_cast %37 : vector<1x16x16xf32> to vector<1x16x16x1xf32>
    %c3 = arith.constant 3 : index
    %c0_10 = arith.constant 0 : index
    %c0_11 = arith.constant 0 : index
    %39 = vector.load %arg2[%c3, %c0_10, %c0_11] : memref<9x1x16xf32, #tpu.memory_space<vmem>>, vector<1x1x16xf32>
    %40 = vector.shape_cast %39 : vector<1x1x16xf32> to vector<1x16xf32>
    %41 = vector.shape_cast %40 : vector<1x16xf32> to vector<1x1x1x16xf32>
    %42 = vector.broadcast %38 : vector<1x16x16x1xf32> to vector<1x16x16x16xf32>
    %43 = vector.broadcast %41 : vector<1x1x1x16xf32> to vector<1x16x16x16xf32>
    %44 = arith.mulf %42, %43 : vector<1x16x16x16xf32>
    %45 = arith.addf %36, %44 : vector<1x16x16x16xf32>
    %46 = vector.extract_strided_slice %8 {offsets = [0, 1, 1], sizes = [1, 16, 16], strides = [1, 1, 1]} : vector<1x18x18xf32> to vector<1x16x16xf32>
    %47 = vector.shape_cast %46 : vector<1x16x16xf32> to vector<1x16x16x1xf32>
    %c4 = arith.constant 4 : index
    %c0_12 = arith.constant 0 : index
    %c0_13 = arith.constant 0 : index
    %48 = vector.load %arg2[%c4, %c0_12, %c0_13] : memref<9x1x16xf32, #tpu.memory_space<vmem>>, vector<1x1x16xf32>
    %49 = vector.shape_cast %48 : vector<1x1x16xf32> to vector<1x16xf32>
    %50 = vector.shape_cast %49 : vector<1x16xf32> to vector<1x1x1x16xf32>
    %51 = vector.broadcast %47 : vector<1x16x16x1xf32> to vector<1x16x16x16xf32>
    %52 = vector.broadcast %50 : vector<1x1x1x16xf32> to vector<1x16x16x16xf32>
    %53 = arith.mulf %51, %52 : vector<1x16x16x16xf32>
    %54 = arith.addf %45, %53 : vector<1x16x16x16xf32>
    %55 = vector.extract_strided_slice %8 {offsets = [0, 1, 2], sizes = [1, 16, 16], strides = [1, 1, 1]} : vector<1x18x18xf32> to vector<1x16x16xf32>
    %56 = vector.shape_cast %55 : vector<1x16x16xf32> to vector<1x16x16x1xf32>
    %c5 = arith.constant 5 : index
    %c0_14 = arith.constant 0 : index
    %c0_15 = arith.constant 0 : index
    %57 = vector.load %arg2[%c5, %c0_14, %c0_15] : memref<9x1x16xf32, #tpu.memory_space<vmem>>, vector<1x1x16xf32>
    %58 = vector.shape_cast %57 : vector<1x1x16xf32> to vector<1x16xf32>
    %59 = vector.shape_cast %58 : vector<1x16xf32> to vector<1x1x1x16xf32>
    %60 = vector.broadcast %56 : vector<1x16x16x1xf32> to vector<1x16x16x16xf32>
    %61 = vector.broadcast %59 : vector<1x1x1x16xf32> to vector<1x16x16x16xf32>
    %62 = arith.mulf %60, %61 : vector<1x16x16x16xf32>
    %63 = arith.addf %54, %62 : vector<1x16x16x16xf32>
    %64 = vector.extract_strided_slice %8 {offsets = [0, 2, 0], sizes = [1, 16, 16], strides = [1, 1, 1]} : vector<1x18x18xf32> to vector<1x16x16xf32>
    %65 = vector.shape_cast %64 : vector<1x16x16xf32> to vector<1x16x16x1xf32>
    %c6 = arith.constant 6 : index
    %c0_16 = arith.constant 0 : index
    %c0_17 = arith.constant 0 : index
    %66 = vector.load %arg2[%c6, %c0_16, %c0_17] : memref<9x1x16xf32, #tpu.memory_space<vmem>>, vector<1x1x16xf32>
    %67 = vector.shape_cast %66 : vector<1x1x16xf32> to vector<1x16xf32>
    %68 = vector.shape_cast %67 : vector<1x16xf32> to vector<1x1x1x16xf32>
    %69 = vector.broadcast %65 : vector<1x16x16x1xf32> to vector<1x16x16x16xf32>
    %70 = vector.broadcast %68 : vector<1x1x1x16xf32> to vector<1x16x16x16xf32>
    %71 = arith.mulf %69, %70 : vector<1x16x16x16xf32>
    %72 = arith.addf %63, %71 : vector<1x16x16x16xf32>
    %73 = vector.extract_strided_slice %8 {offsets = [0, 2, 1], sizes = [1, 16, 16], strides = [1, 1, 1]} : vector<1x18x18xf32> to vector<1x16x16xf32>
    %74 = vector.shape_cast %73 : vector<1x16x16xf32> to vector<1x16x16x1xf32>
    %c7 = arith.constant 7 : index
    %c0_18 = arith.constant 0 : index
    %c0_19 = arith.constant 0 : index
    %75 = vector.load %arg2[%c7, %c0_18, %c0_19] : memref<9x1x16xf32, #tpu.memory_space<vmem>>, vector<1x1x16xf32>
    %76 = vector.shape_cast %75 : vector<1x1x16xf32> to vector<1x16xf32>
    %77 = vector.shape_cast %76 : vector<1x16xf32> to vector<1x1x1x16xf32>
    %78 = vector.broadcast %74 : vector<1x16x16x1xf32> to vector<1x16x16x16xf32>
    %79 = vector.broadcast %77 : vector<1x1x1x16xf32> to vector<1x16x16x16xf32>
    %80 = arith.mulf %78, %79 : vector<1x16x16x16xf32>
    %81 = arith.addf %72, %80 : vector<1x16x16x16xf32>
    %82 = vector.extract_strided_slice %8 {offsets = [0, 2, 2], sizes = [1, 16, 16], strides = [1, 1, 1]} : vector<1x18x18xf32> to vector<1x16x16xf32>
    %83 = vector.shape_cast %82 : vector<1x16x16xf32> to vector<1x16x16x1xf32>
    %c8 = arith.constant 8 : index
    %c0_20 = arith.constant 0 : index
    %c0_21 = arith.constant 0 : index
    %84 = vector.load %arg2[%c8, %c0_20, %c0_21] : memref<9x1x16xf32, #tpu.memory_space<vmem>>, vector<1x1x16xf32>
    %85 = vector.shape_cast %84 : vector<1x1x16xf32> to vector<1x16xf32>
    %86 = vector.shape_cast %85 : vector<1x16xf32> to vector<1x1x1x16xf32>
    %87 = vector.broadcast %83 : vector<1x16x16x1xf32> to vector<1x16x16x16xf32>
    %88 = vector.broadcast %86 : vector<1x1x1x16xf32> to vector<1x16x16x16xf32>
    %89 = arith.mulf %87, %88 : vector<1x16x16x16xf32>
    %90 = arith.addf %81, %89 : vector<1x16x16x16xf32>
    %c0_22 = arith.constant 0 : index
    %c0_23 = arith.constant 0 : index
    %91 = vector.load %arg3[%c0_22, %c0_23] : memref<1x16xf32, #tpu.memory_space<vmem>>, vector<1x16xf32>
    %92 = vector.shape_cast %91 : vector<1x16xf32> to vector<1x1x1x16xf32>
    %93 = vector.broadcast %92 : vector<1x1x1x16xf32> to vector<1x16x16x16xf32>
    %94 = arith.addf %90, %93 : vector<1x16x16x16xf32>
    %95 = math.tanh %94 : vector<1x16x16x16xf32>
    %96 = vector.extract_strided_slice %95 {offsets = [0, 1, 0, 0], sizes = [1, 1, 16, 16], strides = [1, 1, 1, 1]} : vector<1x16x16x16xf32> to vector<1x1x16x16xf32>
    %97 = vector.extract_strided_slice %95 {offsets = [0, 14, 0, 0], sizes = [1, 1, 16, 16], strides = [1, 1, 1, 1]} : vector<1x16x16x16xf32> to vector<1x1x16x16xf32>
    %98 = tpu.concatenate %96, %95, %97 in 1 : vector<1x1x16x16xf32>, vector<1x16x16x16xf32>, vector<1x1x16x16xf32> -> vector<1x18x16x16xf32>
    %99 = vector.extract_strided_slice %98 {offsets = [0, 0, 1, 0], sizes = [1, 18, 1, 16], strides = [1, 1, 1, 1]} : vector<1x18x16x16xf32> to vector<1x18x1x16xf32>
    %100 = vector.extract_strided_slice %98 {offsets = [0, 0, 14, 0], sizes = [1, 18, 1, 16], strides = [1, 1, 1, 1]} : vector<1x18x16x16xf32> to vector<1x18x1x16xf32>
    %101 = tpu.concatenate %99, %98, %100 in 2 : vector<1x18x1x16xf32>, vector<1x18x16x16xf32>, vector<1x18x1x16xf32> -> vector<1x18x18x16xf32>
    %102 = vector.extract_strided_slice %101 {offsets = [0, 0, 0, 0], sizes = [1, 16, 16, 16], strides = [1, 1, 1, 1]} : vector<1x18x18x16xf32> to vector<1x16x16x16xf32>
    %103 = vector.extract_strided_slice %101 {offsets = [0, 0, 1, 0], sizes = [1, 16, 16, 16], strides = [1, 1, 1, 1]} : vector<1x18x18x16xf32> to vector<1x16x16x16xf32>
    %104 = vector.extract_strided_slice %101 {offsets = [0, 0, 2, 0], sizes = [1, 16, 16, 16], strides = [1, 1, 1, 1]} : vector<1x18x18x16xf32> to vector<1x16x16x16xf32>
    %105 = vector.extract_strided_slice %101 {offsets = [0, 1, 0, 0], sizes = [1, 16, 16, 16], strides = [1, 1, 1, 1]} : vector<1x18x18x16xf32> to vector<1x16x16x16xf32>
    %106 = vector.extract_strided_slice %101 {offsets = [0, 1, 1, 0], sizes = [1, 16, 16, 16], strides = [1, 1, 1, 1]} : vector<1x18x18x16xf32> to vector<1x16x16x16xf32>
    %107 = vector.extract_strided_slice %101 {offsets = [0, 1, 2, 0], sizes = [1, 16, 16, 16], strides = [1, 1, 1, 1]} : vector<1x18x18x16xf32> to vector<1x16x16x16xf32>
    %108 = vector.extract_strided_slice %101 {offsets = [0, 2, 0, 0], sizes = [1, 16, 16, 16], strides = [1, 1, 1, 1]} : vector<1x18x18x16xf32> to vector<1x16x16x16xf32>
    %109 = vector.extract_strided_slice %101 {offsets = [0, 2, 1, 0], sizes = [1, 16, 16, 16], strides = [1, 1, 1, 1]} : vector<1x18x18x16xf32> to vector<1x16x16x16xf32>
    %110 = vector.extract_strided_slice %101 {offsets = [0, 2, 2, 0], sizes = [1, 16, 16, 16], strides = [1, 1, 1, 1]} : vector<1x18x18x16xf32> to vector<1x16x16x16xf32>
    %111 = tpu.concatenate %102, %103, %104, %105, %106, %107, %108, %109, %110 in 3 : vector<1x16x16x16xf32>, vector<1x16x16x16xf32>, vector<1x16x16x16xf32>, vector<1x16x16x16xf32>, vector<1x16x16x16xf32>, vector<1x16x16x16xf32>, vector<1x16x16x16xf32>, vector<1x16x16x16xf32>, vector<1x16x16x16xf32> -> vector<1x16x16x144xf32>
    %112 = vector.shape_cast %111 : vector<1x16x16x144xf32> to vector<256x144xf32>
    %113 = arith.truncf %112 : vector<256x144xf32> to vector<256x144xbf16>
    %c0_24 = arith.constant 0 : index
    %c0_25 = arith.constant 0 : index
    %114 = vector.load %arg4[%c0_24, %c0_25] : memref<144x16xbf16, #tpu.memory_space<vmem>>, vector<144x16xbf16>
    %cst_26 = arith.constant dense<0.000000e+00> : vector<256x16xf32>
    %115 = tpu.matmul %113, %114, %cst_26 {dimension_numbers = #tpu.dot_dimension_numbers<[1], [0], [0], [1], [0, 0, 1, 1], [], []>} : vector<256x144xbf16>, vector<144x16xbf16>, vector<256x16xf32> -> vector<256x16xf32>
    %116 = vector.shape_cast %115 : vector<256x16xf32> to vector<1x16x16x16xf32>
    %c0_27 = arith.constant 0 : index
    %c0_28 = arith.constant 0 : index
    %117 = vector.load %arg5[%c0_27, %c0_28] : memref<1x16xf32, #tpu.memory_space<vmem>>, vector<1x16xf32>
    %118 = vector.shape_cast %117 : vector<1x16xf32> to vector<1x1x1x16xf32>
    %119 = vector.broadcast %118 : vector<1x1x1x16xf32> to vector<1x16x16x16xf32>
    %120 = arith.addf %116, %119 : vector<1x16x16x16xf32>
    %121 = math.tanh %120 : vector<1x16x16x16xf32>
    %122 = vector.extract_strided_slice %121 {offsets = [0, 1, 0, 0], sizes = [1, 1, 16, 16], strides = [1, 1, 1, 1]} : vector<1x16x16x16xf32> to vector<1x1x16x16xf32>
    %123 = vector.extract_strided_slice %121 {offsets = [0, 14, 0, 0], sizes = [1, 1, 16, 16], strides = [1, 1, 1, 1]} : vector<1x16x16x16xf32> to vector<1x1x16x16xf32>
    %124 = tpu.concatenate %122, %121, %123 in 1 : vector<1x1x16x16xf32>, vector<1x16x16x16xf32>, vector<1x1x16x16xf32> -> vector<1x18x16x16xf32>
    %125 = vector.extract_strided_slice %124 {offsets = [0, 0, 1, 0], sizes = [1, 18, 1, 16], strides = [1, 1, 1, 1]} : vector<1x18x16x16xf32> to vector<1x18x1x16xf32>
    %126 = vector.extract_strided_slice %124 {offsets = [0, 0, 14, 0], sizes = [1, 18, 1, 16], strides = [1, 1, 1, 1]} : vector<1x18x16x16xf32> to vector<1x18x1x16xf32>
    %127 = tpu.concatenate %125, %124, %126 in 2 : vector<1x18x1x16xf32>, vector<1x18x16x16xf32>, vector<1x18x1x16xf32> -> vector<1x18x18x16xf32>
    %128 = vector.extract_strided_slice %127 {offsets = [0, 0, 0, 0], sizes = [1, 16, 16, 16], strides = [1, 1, 1, 1]} : vector<1x18x18x16xf32> to vector<1x16x16x16xf32>
    %129 = vector.extract_strided_slice %127 {offsets = [0, 0, 1, 0], sizes = [1, 16, 16, 16], strides = [1, 1, 1, 1]} : vector<1x18x18x16xf32> to vector<1x16x16x16xf32>
    %130 = vector.extract_strided_slice %127 {offsets = [0, 0, 2, 0], sizes = [1, 16, 16, 16], strides = [1, 1, 1, 1]} : vector<1x18x18x16xf32> to vector<1x16x16x16xf32>
    %131 = vector.extract_strided_slice %127 {offsets = [0, 1, 0, 0], sizes = [1, 16, 16, 16], strides = [1, 1, 1, 1]} : vector<1x18x18x16xf32> to vector<1x16x16x16xf32>
    %132 = vector.extract_strided_slice %127 {offsets = [0, 1, 1, 0], sizes = [1, 16, 16, 16], strides = [1, 1, 1, 1]} : vector<1x18x18x16xf32> to vector<1x16x16x16xf32>
    %133 = vector.extract_strided_slice %127 {offsets = [0, 1, 2, 0], sizes = [1, 16, 16, 16], strides = [1, 1, 1, 1]} : vector<1x18x18x16xf32> to vector<1x16x16x16xf32>
    %134 = vector.extract_strided_slice %127 {offsets = [0, 2, 0, 0], sizes = [1, 16, 16, 16], strides = [1, 1, 1, 1]} : vector<1x18x18x16xf32> to vector<1x16x16x16xf32>
    %135 = vector.extract_strided_slice %127 {offsets = [0, 2, 1, 0], sizes = [1, 16, 16, 16], strides = [1, 1, 1, 1]} : vector<1x18x18x16xf32> to vector<1x16x16x16xf32>
    %136 = vector.extract_strided_slice %127 {offsets = [0, 2, 2, 0], sizes = [1, 16, 16, 16], strides = [1, 1, 1, 1]} : vector<1x18x18x16xf32> to vector<1x16x16x16xf32>
    %137 = tpu.concatenate %128, %129, %130, %131, %132, %133, %134, %135, %136 in 3 : vector<1x16x16x16xf32>, vector<1x16x16x16xf32>, vector<1x16x16x16xf32>, vector<1x16x16x16xf32>, vector<1x16x16x16xf32>, vector<1x16x16x16xf32>, vector<1x16x16x16xf32>, vector<1x16x16x16xf32>, vector<1x16x16x16xf32> -> vector<1x16x16x144xf32>
    %138 = vector.shape_cast %137 : vector<1x16x16x144xf32> to vector<256x144xf32>
    %139 = arith.truncf %138 : vector<256x144xf32> to vector<256x144xbf16>
    %c0_29 = arith.constant 0 : index
    %c0_30 = arith.constant 0 : index
    %140 = vector.load %arg6[%c0_29, %c0_30] : memref<144x16xbf16, #tpu.memory_space<vmem>>, vector<144x16xbf16>
    %cst_31 = arith.constant dense<0.000000e+00> : vector<256x16xf32>
    %141 = tpu.matmul %139, %140, %cst_31 {dimension_numbers = #tpu.dot_dimension_numbers<[1], [0], [0], [1], [0, 0, 1, 1], [], []>} : vector<256x144xbf16>, vector<144x16xbf16>, vector<256x16xf32> -> vector<256x16xf32>
    %142 = vector.shape_cast %141 : vector<256x16xf32> to vector<1x16x16x16xf32>
    %c0_32 = arith.constant 0 : index
    %c0_33 = arith.constant 0 : index
    %143 = vector.load %arg7[%c0_32, %c0_33] : memref<1x16xf32, #tpu.memory_space<vmem>>, vector<1x16xf32>
    %144 = vector.shape_cast %143 : vector<1x16xf32> to vector<1x1x1x16xf32>
    %145 = vector.broadcast %144 : vector<1x1x1x16xf32> to vector<1x16x16x16xf32>
    %146 = arith.addf %142, %145 : vector<1x16x16x16xf32>
    %147 = arith.addf %120, %146 : vector<1x16x16x16xf32>
    %148 = vector.extract_strided_slice %147 {offsets = [0, 1, 0, 0], sizes = [1, 1, 16, 16], strides = [1, 1, 1, 1]} : vector<1x16x16x16xf32> to vector<1x1x16x16xf32>
    %149 = vector.extract_strided_slice %147 {offsets = [0, 14, 0, 0], sizes = [1, 1, 16, 16], strides = [1, 1, 1, 1]} : vector<1x16x16x16xf32> to vector<1x1x16x16xf32>
    %150 = tpu.concatenate %148, %147, %149 in 1 : vector<1x1x16x16xf32>, vector<1x16x16x16xf32>, vector<1x1x16x16xf32> -> vector<1x18x16x16xf32>
    %151 = vector.extract_strided_slice %150 {offsets = [0, 0, 1, 0], sizes = [1, 18, 1, 16], strides = [1, 1, 1, 1]} : vector<1x18x16x16xf32> to vector<1x18x1x16xf32>
    %152 = vector.extract_strided_slice %150 {offsets = [0, 0, 14, 0], sizes = [1, 18, 1, 16], strides = [1, 1, 1, 1]} : vector<1x18x16x16xf32> to vector<1x18x1x16xf32>
    %153 = tpu.concatenate %151, %150, %152 in 2 : vector<1x18x1x16xf32>, vector<1x18x16x16xf32>, vector<1x18x1x16xf32> -> vector<1x18x18x16xf32>
    %cst_34 = arith.constant 0.000000e+00 : f32
    %154 = vector.broadcast %cst_34 : f32 to vector<1x16x16x16xf32>
    %155 = vector.extract_strided_slice %153 {offsets = [0, 0, 0, 0], sizes = [1, 16, 16, 16], strides = [1, 1, 1, 1]} : vector<1x18x18x16xf32> to vector<1x16x16x16xf32>
    %c0_35 = arith.constant 0 : index
    %c0_36 = arith.constant 0 : index
    %c0_37 = arith.constant 0 : index
    %156 = vector.load %arg8[%c0_35, %c0_36, %c0_37] : memref<9x1x16xf32, #tpu.memory_space<vmem>>, vector<1x1x16xf32>
    %157 = vector.shape_cast %156 : vector<1x1x16xf32> to vector<1x16xf32>
    %158 = vector.shape_cast %157 : vector<1x16xf32> to vector<1x1x1x16xf32>
    %159 = vector.broadcast %158 : vector<1x1x1x16xf32> to vector<1x16x16x16xf32>
    %160 = arith.mulf %155, %159 : vector<1x16x16x16xf32>
    %161 = arith.addf %154, %160 : vector<1x16x16x16xf32>
    %162 = vector.extract_strided_slice %153 {offsets = [0, 0, 1, 0], sizes = [1, 16, 16, 16], strides = [1, 1, 1, 1]} : vector<1x18x18x16xf32> to vector<1x16x16x16xf32>
    %c1_38 = arith.constant 1 : index
    %c0_39 = arith.constant 0 : index
    %c0_40 = arith.constant 0 : index
    %163 = vector.load %arg8[%c1_38, %c0_39, %c0_40] : memref<9x1x16xf32, #tpu.memory_space<vmem>>, vector<1x1x16xf32>
    %164 = vector.shape_cast %163 : vector<1x1x16xf32> to vector<1x16xf32>
    %165 = vector.shape_cast %164 : vector<1x16xf32> to vector<1x1x1x16xf32>
    %166 = vector.broadcast %165 : vector<1x1x1x16xf32> to vector<1x16x16x16xf32>
    %167 = arith.mulf %162, %166 : vector<1x16x16x16xf32>
    %168 = arith.addf %161, %167 : vector<1x16x16x16xf32>
    %169 = vector.extract_strided_slice %153 {offsets = [0, 0, 2, 0], sizes = [1, 16, 16, 16], strides = [1, 1, 1, 1]} : vector<1x18x18x16xf32> to vector<1x16x16x16xf32>
    %c2_41 = arith.constant 2 : index
    %c0_42 = arith.constant 0 : index
    %c0_43 = arith.constant 0 : index
    %170 = vector.load %arg8[%c2_41, %c0_42, %c0_43] : memref<9x1x16xf32, #tpu.memory_space<vmem>>, vector<1x1x16xf32>
    %171 = vector.shape_cast %170 : vector<1x1x16xf32> to vector<1x16xf32>
    %172 = vector.shape_cast %171 : vector<1x16xf32> to vector<1x1x1x16xf32>
    %173 = vector.broadcast %172 : vector<1x1x1x16xf32> to vector<1x16x16x16xf32>
    %174 = arith.mulf %169, %173 : vector<1x16x16x16xf32>
    %175 = arith.addf %168, %174 : vector<1x16x16x16xf32>
    %176 = vector.extract_strided_slice %153 {offsets = [0, 1, 0, 0], sizes = [1, 16, 16, 16], strides = [1, 1, 1, 1]} : vector<1x18x18x16xf32> to vector<1x16x16x16xf32>
    %c3_44 = arith.constant 3 : index
    %c0_45 = arith.constant 0 : index
    %c0_46 = arith.constant 0 : index
    %177 = vector.load %arg8[%c3_44, %c0_45, %c0_46] : memref<9x1x16xf32, #tpu.memory_space<vmem>>, vector<1x1x16xf32>
    %178 = vector.shape_cast %177 : vector<1x1x16xf32> to vector<1x16xf32>
    %179 = vector.shape_cast %178 : vector<1x16xf32> to vector<1x1x1x16xf32>
    %180 = vector.broadcast %179 : vector<1x1x1x16xf32> to vector<1x16x16x16xf32>
    %181 = arith.mulf %176, %180 : vector<1x16x16x16xf32>
    %182 = arith.addf %175, %181 : vector<1x16x16x16xf32>
    %183 = vector.extract_strided_slice %153 {offsets = [0, 1, 1, 0], sizes = [1, 16, 16, 16], strides = [1, 1, 1, 1]} : vector<1x18x18x16xf32> to vector<1x16x16x16xf32>
    %c4_47 = arith.constant 4 : index
    %c0_48 = arith.constant 0 : index
    %c0_49 = arith.constant 0 : index
    %184 = vector.load %arg8[%c4_47, %c0_48, %c0_49] : memref<9x1x16xf32, #tpu.memory_space<vmem>>, vector<1x1x16xf32>
    %185 = vector.shape_cast %184 : vector<1x1x16xf32> to vector<1x16xf32>
    %186 = vector.shape_cast %185 : vector<1x16xf32> to vector<1x1x1x16xf32>
    %187 = vector.broadcast %186 : vector<1x1x1x16xf32> to vector<1x16x16x16xf32>
    %188 = arith.mulf %183, %187 : vector<1x16x16x16xf32>
    %189 = arith.addf %182, %188 : vector<1x16x16x16xf32>
    %190 = vector.extract_strided_slice %153 {offsets = [0, 1, 2, 0], sizes = [1, 16, 16, 16], strides = [1, 1, 1, 1]} : vector<1x18x18x16xf32> to vector<1x16x16x16xf32>
    %c5_50 = arith.constant 5 : index
    %c0_51 = arith.constant 0 : index
    %c0_52 = arith.constant 0 : index
    %191 = vector.load %arg8[%c5_50, %c0_51, %c0_52] : memref<9x1x16xf32, #tpu.memory_space<vmem>>, vector<1x1x16xf32>
    %192 = vector.shape_cast %191 : vector<1x1x16xf32> to vector<1x16xf32>
    %193 = vector.shape_cast %192 : vector<1x16xf32> to vector<1x1x1x16xf32>
    %194 = vector.broadcast %193 : vector<1x1x1x16xf32> to vector<1x16x16x16xf32>
    %195 = arith.mulf %190, %194 : vector<1x16x16x16xf32>
    %196 = arith.addf %189, %195 : vector<1x16x16x16xf32>
    %197 = vector.extract_strided_slice %153 {offsets = [0, 2, 0, 0], sizes = [1, 16, 16, 16], strides = [1, 1, 1, 1]} : vector<1x18x18x16xf32> to vector<1x16x16x16xf32>
    %c6_53 = arith.constant 6 : index
    %c0_54 = arith.constant 0 : index
    %c0_55 = arith.constant 0 : index
    %198 = vector.load %arg8[%c6_53, %c0_54, %c0_55] : memref<9x1x16xf32, #tpu.memory_space<vmem>>, vector<1x1x16xf32>
    %199 = vector.shape_cast %198 : vector<1x1x16xf32> to vector<1x16xf32>
    %200 = vector.shape_cast %199 : vector<1x16xf32> to vector<1x1x1x16xf32>
    %201 = vector.broadcast %200 : vector<1x1x1x16xf32> to vector<1x16x16x16xf32>
    %202 = arith.mulf %197, %201 : vector<1x16x16x16xf32>
    %203 = arith.addf %196, %202 : vector<1x16x16x16xf32>
    %204 = vector.extract_strided_slice %153 {offsets = [0, 2, 1, 0], sizes = [1, 16, 16, 16], strides = [1, 1, 1, 1]} : vector<1x18x18x16xf32> to vector<1x16x16x16xf32>
    %c7_56 = arith.constant 7 : index
    %c0_57 = arith.constant 0 : index
    %c0_58 = arith.constant 0 : index
    %205 = vector.load %arg8[%c7_56, %c0_57, %c0_58] : memref<9x1x16xf32, #tpu.memory_space<vmem>>, vector<1x1x16xf32>
    %206 = vector.shape_cast %205 : vector<1x1x16xf32> to vector<1x16xf32>
    %207 = vector.shape_cast %206 : vector<1x16xf32> to vector<1x1x1x16xf32>
    %208 = vector.broadcast %207 : vector<1x1x1x16xf32> to vector<1x16x16x16xf32>
    %209 = arith.mulf %204, %208 : vector<1x16x16x16xf32>
    %210 = arith.addf %203, %209 : vector<1x16x16x16xf32>
    %211 = vector.extract_strided_slice %153 {offsets = [0, 2, 2, 0], sizes = [1, 16, 16, 16], strides = [1, 1, 1, 1]} : vector<1x18x18x16xf32> to vector<1x16x16x16xf32>
    %c8_59 = arith.constant 8 : index
    %c0_60 = arith.constant 0 : index
    %c0_61 = arith.constant 0 : index
    %212 = vector.load %arg8[%c8_59, %c0_60, %c0_61] : memref<9x1x16xf32, #tpu.memory_space<vmem>>, vector<1x1x16xf32>
    %213 = vector.shape_cast %212 : vector<1x1x16xf32> to vector<1x16xf32>
    %214 = vector.shape_cast %213 : vector<1x16xf32> to vector<1x1x1x16xf32>
    %215 = vector.broadcast %214 : vector<1x1x1x16xf32> to vector<1x16x16x16xf32>
    %216 = arith.mulf %211, %215 : vector<1x16x16x16xf32>
    %217 = arith.addf %210, %216 : vector<1x16x16x16xf32>
    %cst_62 = arith.constant dense<0.000000e+00> : vector<1x16x16xf32>
    %218 = vector.multi_reduction <add>, %217, %cst_62 [3] : vector<1x16x16x16xf32> to vector<1x16x16xf32>
    %c0_63 = arith.constant 0 : index
    %219 = memref.load %arg9[%c0_63] : memref<2xf32, #tpu.memory_space<smem>>
    %c1_64 = arith.constant 1 : index
    %220 = memref.load %arg9[%c1_64] : memref<2xf32, #tpu.memory_space<smem>>
    %221 = vector.broadcast %219 : f32 to vector<1x16x16xf32>
    %222 = arith.addf %218, %221 : vector<1x16x16xf32>
    %cst_65 = arith.constant 2.560000e+02 : f32
    %223 = arith.mulf %cst_65, %220 : f32
    %224 = vector.broadcast %223 : f32 to vector<1x16x16xf32>
    %225 = arith.mulf %222, %224 : vector<1x16x16xf32>
    %226 = arith.addf %225, %0 : vector<1x16x16xf32>
    %227 = vector.shape_cast %226 : vector<1x16x16xf32> to vector<1x1x256xf32>
    %c0_66 = arith.constant 0 : index
    %c0_67 = arith.constant 0 : index
    %c0_68 = arith.constant 0 : index
    %228 = vector.load %arg10[%c0_66, %c0_67, %c0_68] : memref<1x1x256xf32, #tpu.memory_space<vmem>>, vector<1x1x256xf32>
    tpu.vector_store %arg10[%c0_66, %c0_67, %c0_68], %227 {strides = array<i32>} : memref<1x1x256xf32, #tpu.memory_space<vmem>>, vector<1x1x256xf32>,
    return
  }
  func.func @transform_0(%arg0: i32) -> (i32, i32, i32) {
    %c0_i32 = arith.constant 0 : i32
    %c0_i32_0 = arith.constant 0 : i32
    %c0_i32_1 = arith.constant 0 : i32
    return %arg0, %c0_i32, %c0_i32_0 : i32, i32, i32
  }
  func.func @transform_1(%arg0: i32) -> (i32, i32, i32) {
    %c0_i32 = arith.constant 0 : i32
    %c0_i32_0 = arith.constant 0 : i32
    %c0_i32_1 = arith.constant 0 : i32
    %c0_i32_2 = arith.constant 0 : i32
    return %c0_i32, %c0_i32_0, %c0_i32_1 : i32, i32, i32
  }
  func.func @transform_2(%arg0: i32) -> (i32, i32) {
    %c0_i32 = arith.constant 0 : i32
    %c0_i32_0 = arith.constant 0 : i32
    %c0_i32_1 = arith.constant 0 : i32
    return %c0_i32, %c0_i32_0 : i32, i32
  }
  func.func @transform_3(%arg0: i32) -> (i32, i32) {
    %c0_i32 = arith.constant 0 : i32
    %c0_i32_0 = arith.constant 0 : i32
    %c0_i32_1 = arith.constant 0 : i32
    return %c0_i32, %c0_i32_0 : i32, i32
  }
  func.func @transform_4(%arg0: i32) -> (i32, i32) {
    %c0_i32 = arith.constant 0 : i32
    %c0_i32_0 = arith.constant 0 : i32
    %c0_i32_1 = arith.constant 0 : i32
    return %c0_i32, %c0_i32_0 : i32, i32
  }
  func.func @transform_5(%arg0: i32) -> (i32, i32) {
    %c0_i32 = arith.constant 0 : i32
    %c0_i32_0 = arith.constant 0 : i32
    %c0_i32_1 = arith.constant 0 : i32
    return %c0_i32, %c0_i32_0 : i32, i32
  }
  func.func @transform_6(%arg0: i32) -> (i32, i32) {
    %c0_i32 = arith.constant 0 : i32
    %c0_i32_0 = arith.constant 0 : i32
    %c0_i32_1 = arith.constant 0 : i32
    return %c0_i32, %c0_i32_0 : i32, i32
  }
  func.func @transform_7(%arg0: i32) -> (i32, i32, i32) {
    %c0_i32 = arith.constant 0 : i32
    %c0_i32_0 = arith.constant 0 : i32
    %c0_i32_1 = arith.constant 0 : i32
    %c0_i32_2 = arith.constant 0 : i32
    return %c0_i32, %c0_i32_0, %c0_i32_1 : i32, i32, i32
  }
  func.func @transform_8(%arg0: i32) -> i32 {
    %c0_i32 = arith.constant 0 : i32
    %c0_i32_0 = arith.constant 0 : i32
    return %c0_i32 : i32
  }
  func.func @transform_9(%arg0: i32) -> (i32, i32, i32) {
    %c0_i32 = arith.constant 0 : i32
    %c0_i32_0 = arith.constant 0 : i32
    %c0_i32_1 = arith.constant 0 : i32
    return %arg0, %c0_i32, %c0_i32_0 : i32, i32, i32
  }
}

</mosaic_0001>

<bundles_post_ra>
// kernel: variant_b_forward.1
= control target key start
LH: loop header
LB: loop body
LE: loop exit
PB: predicated region body
PF: predicated region fallthrough
CT: control target
= control target key end

     0   :  { %14 = vsyncpa [#allocation3], 0  ;;  %s9313_s30 = smov 0   ;;  %s15655_s0 = inlined_call_operand.vmem [shape: f32[2,16,16], index: 0, kind: input, shape index: {}]   ;;  %s15656_s1 = inlined_call_operand.vmem [shape: f32[9,1,16], index: 1, kind: input, shape index: {}]   ;;  %s15657_s2 = inlined_call_operand.vmem [shape: f32[1,16], index: 2, kind: input, shape index: {}]   ;;  %s15658_s3 = inlined_call_operand.vmem [shape: bf16[144,16], index: 3, kind: input, shape index: {}]   ;;  %s15659_s4 = inlined_call_operand.vmem [shape: f32[1,16], index: 4, kind: input, shape index: {}]   ;;  %s15660_s5 = inlined_call_operand.vmem [shape: bf16[144,16], index: 5, kind: input, shape index: {}]   ;;  %s15661_s6 = inlined_call_operand.vmem [shape: f32[1,16], index: 6, kind: input, shape index: {}]   ;;  %s15662_s7 = inlined_call_operand.vmem [shape: f32[9,1,16], index: 7, kind: input, shape index: {}]   ;;  %s15663_s8 = inlined_call_operand.vmem [shape: f32[2], index: 8, kind: input, shape index: {}]   ;;  %s15664_s9 = inlined_call_operand.vmem [shape: f32[2,1,256], index: 9, kind: output, shape index: {}]  }
   0x1 LB: > { %s7827_s10 = sadd.s32 4294967295, %s9245_s30   ;;  %p7829_p0 = scmp.ge.s32.totalorder %s9245_s30, 1  ;;  %s9245_s30 = sphi %s9313_s30, %s20_s30  }
   0x2   : > { %p245_p1 = scmp.lt.s32.totalorder %s9245_s30, 3  ;;  %s279_s13 = sshll.u32 %s15663_s8, 4  ;;  %s280_s13 = int_to_ptr.vmem [resolvable:$true] %s279_s13 }
   0x3   : > { %p7936_p3 = scmp.eq.s32.totalorder %s7827_s10, 0  ;;  %s9220_s15 = scalar_lea.vmem %s280_s13, 16 }
   0x4   : > { %p9324_p2 = pnand %p7829_p0, %p245_p1  ;;  %p9221_p6 = scmp.ne.s32.totalorder %s280_s13, %s9220_s15 }
   0x5   : > { %p9228_p10 = scmp.lt.s32.totalorder %s280_s13, %s280_s13  ;;  %p9229_p11 = scmp.lt.s32.totalorder %s9220_s15, %s9220_s15 }
   0x6   : > { %p7932_p4 = pneg %p9324_p2 }
   0x7   : > { %p9230_p12 = por %p9229_p11, %p9228_p10 }
   0x8   : > { %p7933_p5 = pnand %p7936_p3, %p7932_p4 }
   0xa   : > { %p9222_p7 = pneg %p7933_p5 }
   0xc   : > { %p9223_p8 = pnand %p9222_p7, %p9221_p6 }
   0xe   : > { %p9224_p9 = pneg %p9223_p8 }
  0x10   : > { %p9231_p13 = pnand %p9230_p12, %p9224_p9 }
  0x12   : > { %9234 = shalt.err (!%p9231_p13)
}
  0x13   : > { %s9247_s16 = smov [#allocation2]   ;;  %300 = sbr.rel (%p9324_p2) target bundleno = 2146 (0x862), region = 56 }
  0x14   : > { %7935 = dma.vmem_to_smem (!%p7933_p5), %s280_s13, 16, %s9247_s16, [#allocation3]  }
  0x1a   : > { %9240 = dma.done.wait (%p7936_p3), [#allocation3], 16  }
  0x1b   : > { %9242 = vsyncadd (%p7936_p3), [#allocation3], 4294967280 }
  0x1c   : > { %306 = sfence }
  0x1d   : > { %p336_p0 = scmp.lt.s32.totalorder %s7827_s10, 1  ;;  %vm354_vm0 = vcmask 1040384   ;;  %s9248_s21 = smov 127   ;;  %v15665_v13 = vlaneseq  ;;  %vm393_vm1 = vcmask 7168   ;;  %vm397_vm2 = vcmask 138240  }
  0x1e   : > { %s9249_s22 = smov 1   ;;  %s9250_s23 = smov 3   ;;  %vm1858_vm3 = vcmask 1046528   ;;  %vm2024_vm4 = vcmask 1045504   ;;  %vm2700_vm5 = vcmask 130048   ;;  %vm2731_vm6 = vcmask 261120  }
  0x1f   : > { %s16503_s10 = smov (!%p336_p0, %s7827_s10), 1  ;;  %v9349_v15 = vshrl.u32 %v15665_v13, 7  ;;  %s9251_s26 = smov 16   ;;  %vm2762_vm7 = vcmask 392192   ;;  %vm2795_vm8 = vcmask 523264   ;;  %vm2828_vm9 = vcmask 654336  }
  0x20   : > { %s7927_s17 = sshll.u32 %s16503_s10, 4  ;;  %s9252_s25 = smov 32   ;;  %vm2861_vm10 = vcmask 785408   ;;  %vm2894_vm11 = vcmask 916480   ;;  %vm7411_vm12 = vcmask 130112   ;;  %vm7548_vm13 = vcmask 1041409  }
  0x21   : > { %s9341_s20 = scalar_lea.vmem %s15655_s0, %s7927_s17  ;;  %15872 = vst [vmem:[#allocation5_spill] sm:$0xff] %v9349_v15  ;;  %v9352_v18 = vsub.s32 0, %v9349_v15  ;;  %v9360_v24 = vsub.s32 1, %v9349_v15  ;;  %v9372_v29 = vsub.s32 2, %v9349_v15  ;;  %v9380_v31 = vsub.s32 3, %v9349_v15  ;;  %s9253_s27 = smov 48  }
  0x22   : > { %v347_v0 = vld [vmem:[%s9341_s20 + $0x8] sm:$0xff]  ;;  %v346_v1 = vld [vmem:[%s9341_s20] sm:$0xff]  ;;  %v9388_v33 = vsub.s32 4, %v9349_v15  ;;  %v9396_v35 = vsub.s32 5, %v9349_v15  ;;  %v9404_v37 = vsub.s32 6, %v9349_v15  ;;  %v9412_v39 = vsub.s32 7, %v9349_v15 }
  0x23   : > { %v349_v2 = vmul.f32 0.00390625, %v347_v0  ;;  %v348_v3 = vmul.f32 0.00390625, %v346_v1  ;;  %15873 = vst [vmem:[#allocation6_spill] sm:$0xff] %v9352_v18  ;;  %15874 = vst [vmem:[#allocation7_spill] sm:$0xff] %v9360_v24  ;;  %s9255_s19 = smov 64   ;;  %s9256_s13 = smov 80  }
  0x24   : > { %15875 = vst [vmem:[#allocation8_spill] sm:$0xff] %v9372_v29  ;;  %15876 = vst [vmem:[#allocation9_spill] sm:$0xff] %v9380_v31  ;;  %s9257_s14 = smov 96   ;;  %s9258_s15 = smov 112   ;;  %vm7550_vm14 = vcmask 1042434   ;;  %vm7552_vm15 = vcmask 1043459  }
  0x25   : > { %v356_v4 = vrot.slane %v349_v2, 7  ;;  %v360_v5 = vrot.slane %v349_v2, 5  ;;  %v351_v6 = vrot.slane %v348_v3, 1  ;;  %v355_v7 = vrot.slane %v348_v3, 7  ;;  %15877 = vst [vmem:[#allocation10_spill] sm:$0xff] %v9388_v33  ;;  %15878 = vst [vmem:[#allocation11_spill] sm:$0xff] %v9396_v35 }
  0x26   : > { %15879 = vst [vmem:[#allocation12_spill] sm:$0xff] %v9404_v37  ;;  %15880 = vst [vmem:[#allocation13_spill] sm:$0xff] %v9412_v39  ;;  %s7924_s11 = sld [smem:[#allocation2 + $0x1]] }
  0x27   : > { %v363_v8 = vsel %vm354_vm0, %v356_v4, %v360_v5  ;;  %v362_v9 = vsel %vm354_vm0, %v351_v6, %v355_v7  ;;  %v357_v10 = vsel %vm354_vm0, %v355_v7, %v356_v4 }
  0x28   : > { %370 = vrot.lane.b32.xlu1 %v363_v8, %s9248_s21  ;;  %366 = vrot.lane.b32.xlu0 %v362_v9, %s9248_s21 }
  0x2c   : > { %375 = vrot.lane.b32.xlu1 %v362_v9, %s9249_s22  ;;  %368 = vrot.lane.b32.xlu0 %v357_v10, %s9248_s21  ;;  %s6996_s12 = smul.f32 256.0, %s7924_s11 }
  0x30   : > { %379 = vrot.lane.b32.xlu1 %v363_v8, %s9249_s22  ;;  %377 = vrot.lane.b32.xlu0 %v357_v10, %s9249_s22 }
  0x34   : > { %386 = vrot.lane.b32.xlu1 %v357_v10, %s9250_s23  ;;  %384 = vrot.lane.b32.xlu0 %v362_v9, %s9250_s23 }
  0x38   : > { %388 = vrot.lane.b32.xlu0 %v363_v8, %s9250_s23 }
  0x9a   : > { %v367_v11 = vpop.permute.xlu0 %366  ;;  %v371_v12 = vpop.permute.xlu1 %370 }
  0x9e   : > { %v369_v14 = vpop.permute.xlu0 %368  ;;  %v376_v16 = vpop.permute.xlu1 %375 }
  0x9f   : > { %v394_v19 = vsel %vm393_vm1, %v367_v11, %v376_v16 }
  0xa2   : > { %v378_v17 = vpop.permute.xlu0 %377  ;;  %v380_v21 = vpop.permute.xlu1 %379 }
  0xa3   : > { %v396_v25 = vsel %vm393_vm1, %v371_v12, %v380_v21  ;;  %v395_v41 = vsel %vm393_vm1, %v369_v14, %v378_v17  ;;  %vm7556_vm1 = vcmask 1045509  }
  0xa6   : > { %v385_v20 = vpop.permute.xlu0 %384  ;;  %v387_v40 = vpop.permute.xlu1 %386 }
  0xa7   : > { %v398_v22 = vsel %vm397_vm2, %v394_v19, %v385_v20  ;;  %v399_v43 = vsel %vm397_vm2, %v395_v41, %v387_v40  ;;  %v9612_v40 = vld [vmem:[%s15656_s1] ss:$0 sm:$0xff]  ;;  %v9617_v41 = vld [vmem:[%s15656_s1 + $0x3] ss:$0 sm:$0xff] }
  0xa8   : > { %v9357_v23 = vrot.slane %v398_v22, %v9352_v18  ;;  %v9369_v28 = vrot.slane %v398_v22, %v9360_v24  ;;  %v9377_v30 = vrot.slane %v398_v22, %v9372_v29  ;;  %v9385_v32 = vrot.slane %v398_v22, %v9380_v31 }
  0xa9   : > { %v9393_v34 = vrot.slane %v398_v22, %v9388_v33  ;;  %v9401_v36 = vrot.slane %v398_v22, %v9396_v35  ;;  %v9409_v38 = vrot.slane %v398_v22, %v9404_v37  ;;  %v9418_v42 = vrot.slane %v398_v22, %v9412_v39 }
  0xaa   : > { %410 = vbcast.lane.b32.xlu0 %v9357_v23, 264  ;;  %406 = vbcast.lane.b32.xlu1 %v9357_v23, 256  ;;  %v389_v26 = vpop.permute.xlu0 %388  ;;  %v9424_v44 = vrot.slane %v399_v43, %v9352_v18  ;;  %v9429_v45 = vrot.slane %v399_v43, %v9360_v24  ;;  %v9434_v46 = vrot.slane %v399_v43, %v9372_v29 }
  0xab   : > { %v9366_v27 = vsel %vm397_vm2, %v396_v25, %v389_v26  ;;  %v9439_v47 = vrot.slane %v399_v43, %v9380_v31  ;;  %v9444_v48 = vrot.slane %v399_v43, %v9388_v33  ;;  %v9449_v49 = vrot.slane %v399_v43, %v9396_v35 }
  0xac   : > { %v9454_v50 = vrot.slane %v399_v43, %v9404_v37  ;;  %v9459_v51 = vrot.slane %v399_v43, %v9412_v39  ;;  %vm7558_vm2 = vcmask 1046534  }
  0xae   : > { %421 = vbcast.lane.b32.xlu0 %v9369_v28, 264  ;;  %417 = vbcast.lane.b32.xlu1 %v9369_v28, 256 }
  0xb2   : > { %432 = vbcast.lane.b32.xlu0 %v9377_v30, 264  ;;  %428 = vbcast.lane.b32.xlu1 %v9377_v30, 256 }
  0xb6   : > { %443 = vbcast.lane.b32.xlu0 %v9385_v32, 264  ;;  %439 = vbcast.lane.b32.xlu1 %v9385_v32, 256 }
  0xba   : > { %454 = vbcast.lane.b32.xlu0 %v9393_v34, 264  ;;  %450 = vbcast.lane.b32.xlu1 %v9393_v34, 256 }
  0xbe   : > { %465 = vbcast.lane.b32.xlu0 %v9401_v36, 264  ;;  %461 = vbcast.lane.b32.xlu1 %v9401_v36, 256 }
  0xc2   : > { %476 = vbcast.lane.b32.xlu0 %v9409_v38, 264  ;;  %472 = vbcast.lane.b32.xlu1 %v9409_v38, 256 }
  0xc6   : > { %487 = vbcast.lane.b32.xlu0 %v9418_v42, 264  ;;  %483 = vbcast.lane.b32.xlu1 %v9418_v42, 256 }
  0xca   : > { %498 = vbcast.lane.b32.xlu0 %v9424_v44, 264  ;;  %494 = vbcast.lane.b32.xlu1 %v9424_v44, 256 }
  0xce   : > { %509 = vbcast.lane.b32.xlu0 %v9429_v45, 264  ;;  %505 = vbcast.lane.b32.xlu1 %v9429_v45, 256 }
  0xd2   : > { %520 = vbcast.lane.b32.xlu0 %v9434_v46, 264  ;;  %516 = vbcast.lane.b32.xlu1 %v9434_v46, 256 }
  0xd6   : > { %531 = vbcast.lane.b32.xlu0 %v9439_v47, 264  ;;  %527 = vbcast.lane.b32.xlu1 %v9439_v47, 256 }
  0xda   : > { %542 = vbcast.lane.b32.xlu0 %v9444_v48, 264  ;;  %538 = vbcast.lane.b32.xlu1 %v9444_v48, 256 }
  0xde   : > { %553 = vbcast.lane.b32.xlu0 %v9449_v49, 264  ;;  %549 = vbcast.lane.b32.xlu1 %v9449_v49, 256 }
  0xe2   : > { %564 = vbcast.lane.b32.xlu0 %v9454_v50, 264  ;;  %560 = vbcast.lane.b32.xlu1 %v9454_v50, 256 }
  0xe6   : > { %575 = vbcast.lane.b32.xlu0 %v9459_v51, 264  ;;  %571 = vbcast.lane.b32.xlu1 %v9459_v51, 256 }
  0xea   : > { %654 = vbcast.lane.b32.xlu0 %v9357_v23, 265  ;;  %650 = vbcast.lane.b32.xlu1 %v9357_v23, 257 }
  0xee   : > { %662 = vbcast.lane.b32.xlu0 %v9369_v28, 265  ;;  %658 = vbcast.lane.b32.xlu1 %v9369_v28, 257 }
  0xf2   : > { %670 = vbcast.lane.b32.xlu0 %v9377_v30, 265  ;;  %666 = vbcast.lane.b32.xlu1 %v9377_v30, 257 }
  0xf6   : > { %678 = vbcast.lane.b32.xlu0 %v9385_v32, 265  ;;  %674 = vbcast.lane.b32.xlu1 %v9385_v32, 257 }
  0xfa   : > { %686 = vbcast.lane.b32.xlu0 %v9393_v34, 265  ;;  %682 = vbcast.lane.b32.xlu1 %v9393_v34, 257 }
  0xfe   : > { %694 = vbcast.lane.b32.xlu0 %v9401_v36, 265  ;;  %690 = vbcast.lane.b32.xlu1 %v9401_v36, 257 }
 0x102   : > { %702 = vbcast.lane.b32.xlu0 %v9409_v38, 265  ;;  %698 = vbcast.lane.b32.xlu1 %v9409_v38, 257 }
 0x106   : > { %710 = vbcast.lane.b32.xlu0 %v9418_v42, 265  ;;  %706 = vbcast.lane.b32.xlu1 %v9418_v42, 257 }
 0x10a   : > { %718 = vbcast.lane.b32.xlu0 %v9424_v44, 265  ;;  %714 = vbcast.lane.b32.xlu1 %v9424_v44, 257 }
 0x10e   : > { %726 = vbcast.lane.b32.xlu0 %v9429_v45, 265  ;;  %722 = vbcast.lane.b32.xlu1 %v9429_v45, 257 }
 0x112   : > { %734 = vbcast.lane.b32.xlu0 %v9434_v46, 265  ;;  %730 = vbcast.lane.b32.xlu1 %v9434_v46, 257 }
 0x116   : > { %742 = vbcast.lane.b32.xlu0 %v9439_v47, 265  ;;  %738 = vbcast.lane.b32.xlu1 %v9439_v47, 257 }
 0x11a   : > { %750 = vbcast.lane.b32.xlu0 %v9444_v48, 265  ;;  %746 = vbcast.lane.b32.xlu1 %v9444_v48, 257 }
 0x11c   : > { %v9489_v52 = vpop.permute.xlu1 %406  ;;  %v9491_v53 = vpop.permute.xlu0 %410 }
 0x11e   : > { %758 = vbcast.lane.b32.xlu0 %v9449_v49, 265  ;;  %754 = vbcast.lane.b32.xlu1 %v9449_v49, 257 }
 0x120   : > { %v9495_v54 = vpop.permute.xlu1 %417  ;;  %v9497_v55 = vpop.permute.xlu0 %421 }
 0x122   : > { %766 = vbcast.lane.b32.xlu0 %v9454_v50, 265  ;;  %762 = vbcast.lane.b32.xlu1 %v9454_v50, 257 }
 0x124   : > { %v9501_v56 = vpop.permute.xlu1 %428  ;;  %v9503_v57 = vpop.permute.xlu0 %432 }
 0x125   : > { %v9678_v15 = vmul.f32 %v9617_v41, %v9503_v57 }
 0x126   : > { %774 = vbcast.lane.b32.xlu0 %v9459_v51, 265  ;;  %770 = vbcast.lane.b32.xlu1 %v9459_v51, 257 }
 0x127   : > { %15885 = vst [vmem:[#allocation18_spill] sm:$0xff] %v9678_v15 }
 0x128   : > { %v9507_v58 = vpop.permute.xlu1 %439  ;;  %v9509_v59 = vpop.permute.xlu0 %443 }
 0x129   : > { %v9690_v37 = vmul.f32 %v9617_v41, %v9507_v58  ;;  %v9698_v33 = vmul.f32 %v9612_v40, %v9509_v59 }
 0x12a   : > { %854 = vbcast.lane.b32.xlu0 %v9357_v23, 266  ;;  %850 = vbcast.lane.b32.xlu1 %v9357_v23, 258 }
 0x12b   : > { %15887 = vst [vmem:[#allocation20_spill] sm:$0xff] %v9690_v37 }
 0x12c   : > { %v9513_v60 = vpop.permute.xlu1 %450  ;;  %v9515_v61 = vpop.permute.xlu0 %454 }
 0x12d   : > { %v9710_v29 = vmul.f32 %v9612_v40, %v9513_v60 }
 0x12e   : > { %862 = vbcast.lane.b32.xlu0 %v9369_v28, 266  ;;  %858 = vbcast.lane.b32.xlu1 %v9369_v28, 258 }
 0x130   : > { %v9519_v62 = vpop.permute.xlu1 %461  ;;  %v9521_v63 = vpop.permute.xlu0 %465 }
 0x132   : > { %870 = vbcast.lane.b32.xlu0 %v9377_v30, 266  ;;  %866 = vbcast.lane.b32.xlu1 %v9377_v30, 258 }
 0x134   : > { %v9525_v0 = vpop.permute.xlu1 %472  ;;  %v9527_v1 = vpop.permute.xlu0 %476 }
 0x136   : > { %878 = vbcast.lane.b32.xlu0 %v9385_v32, 266  ;;  %874 = vbcast.lane.b32.xlu1 %v9385_v32, 258 }
 0x138   : > { %v9531_v2 = vpop.permute.xlu1 %483  ;;  %v9533_v3 = vpop.permute.xlu0 %487 }
 0x13a   : > { %886 = vbcast.lane.b32.xlu0 %v9393_v34, 266  ;;  %882 = vbcast.lane.b32.xlu1 %v9393_v34, 258  ;;  %v1051_v34 = vrot.slane %v9366_v27, %v9352_v18  ;;  %v9722_v18 = vmul.f32 %v9612_v40, %v9515_v61 }
 0x13c   : > { %v9537_v4 = vpop.permute.xlu1 %494  ;;  %v9539_v5 = vpop.permute.xlu0 %498 }
 0x13e   : > { %894 = vbcast.lane.b32.xlu0 %v9401_v36, 266  ;;  %890 = vbcast.lane.b32.xlu1 %v9401_v36, 258 }
 0x140   : > { %v9543_v6 = vpop.permute.xlu1 %505  ;;  %v9545_v7 = vpop.permute.xlu0 %509 }
 0x142   : > { %902 = vbcast.lane.b32.xlu0 %v9409_v38, 266  ;;  %898 = vbcast.lane.b32.xlu1 %v9409_v38, 258 }
 0x144   : > { %v9549_v8 = vpop.permute.xlu1 %516  ;;  %v9551_v9 = vpop.permute.xlu0 %520 }
 0x145   : > { %v605_v15 = vmul.f32 %v9612_v40, %v9551_v9 }
 0x146   : > { %910 = vbcast.lane.b32.xlu0 %v9418_v42, 266  ;;  %906 = vbcast.lane.b32.xlu1 %v9418_v42, 258 }
 0x148   : > { %v9555_v10 = vpop.permute.xlu1 %527  ;;  %v9557_v11 = vpop.permute.xlu0 %531 }
 0x14a   : > { %918 = vbcast.lane.b32.xlu0 %v9424_v44, 266  ;;  %914 = vbcast.lane.b32.xlu1 %v9424_v44, 258  ;;  %v9626_v44 = vld [vmem:[%s15656_s1 + $0x6] ss:$0 sm:$0xff] }
 0x14b   : > { %v9682_v39 = vmul.f32 %v9626_v44, %v9503_v57  ;;  %v9694_v35 = vmul.f32 %v9626_v44, %v9507_v58  ;;  %v9706_v31 = vmul.f32 %v9626_v44, %v9509_v59  ;;  %v9812_v37 = vmul.f32 %v9626_v44, %v9533_v3 }
 0x14c   : > { %v9561_v12 = vpop.permute.xlu1 %538  ;;  %v9563_v14 = vpop.permute.xlu0 %542 }
 0x14d   : > { %15886 = vst [vmem:[#allocation19_spill] sm:$0xff] %v9682_v39  ;;  %15888 = vst [vmem:[#allocation21_spill] sm:$0xff] %v9694_v35  ;;  %v9746_v35 = vmul.f32 %v9626_v44, %v9519_v62  ;;  %v601_v39 = vmul.f32 %v9612_v40, %v9539_v5 }
 0x14e   : > { %926 = vbcast.lane.b32.xlu0 %v9429_v45, 266  ;;  %922 = vbcast.lane.b32.xlu1 %v9429_v45, 258  ;;  %v9630_v45 = vrot.slane %v9366_v27, %v9360_v24  ;;  %v9650_v27 = vmul.f32 %v9612_v40, %v9497_v55  ;;  %15890 = vst [vmem:[#allocation23_spill] sm:$0xff] %v9706_v31  ;;  %15906 = vst [vmem:[#allocation39_spill] sm:$0xff] %v9812_v37 }
 0x14f   : > { %v9718_v24 = vmul.f32 %v9626_v44, %v9513_v60  ;;  %v9734_v31 = vmul.f32 %v9612_v40, %v9519_v62  ;;  %15896 = vst [vmem:[#allocation29_spill] sm:$0xff] %v9746_v35  ;;  %v9772_v35 = vmul.f32 %v9626_v44, %v9525_v0  ;;  %v9850_v37 = vmul.f32 %v9617_v41, %v9545_v7 }
 0x150   : > { %v9567_v16 = vpop.permute.xlu1 %549  ;;  %v9569_v17 = vpop.permute.xlu0 %553 }
 0x151   : > { %15892 = vst [vmem:[#allocation25_spill] sm:$0xff] %v9718_v24  ;;  %v9742_v24 = vmul.f32 %v9617_v41, %v9519_v62  ;;  %v9766_v62 = vmul.f32 %v9617_v41, %v9525_v0  ;;  %15900 = vst [vmem:[#allocation33_spill] sm:$0xff] %v9772_v35  ;;  %v9796_v35 = vmul.f32 %v9626_v44, %v9531_v2 }
 0x152   : > { %934 = vbcast.lane.b32.xlu0 %v9434_v46, 266  ;;  %930 = vbcast.lane.b32.xlu1 %v9434_v46, 258  ;;  %v9634_v46 = vmul.f32 %v9612_v40, %v9489_v52  ;;  %v9662_v52 = vmul.f32 %v9617_v41, %v9501_v56  ;;  %15913 = vst [vmem:[#allocation46_spill] sm:$0xff] %v9850_v37 }
 0x153   : > { %15895 = vst [vmem:[#allocation28_spill] sm:$0xff] %v9742_v24  ;;  %15899 = vst [vmem:[#allocation32_spill] sm:$0xff] %v9766_v62  ;;  %v9788_v62 = vmul.f32 %v9612_v40, %v9531_v2  ;;  %v9800_v24 = vmul.f32 %v9612_v40, %v9533_v3 }
 0x154   : > { %v9573_v19 = vpop.permute.xlu1 %560  ;;  %v9575_v20 = vpop.permute.xlu0 %564  ;;  %15883 = vst [vmem:[#allocation16_spill] sm:$0xff] %v9662_v52  ;;  %15904 = vst [vmem:[#allocation37_spill] sm:$0xff] %v9796_v35  ;;  %v9818_v35 = vmul.f32 %v9617_v41, %v9537_v4  ;;  %v9883_v52 = vmul.f32 %v9617_v41, %v9551_v9 }
 0x156   : > { %942 = vbcast.lane.b32.xlu0 %v9439_v47, 266  ;;  %938 = vbcast.lane.b32.xlu1 %v9439_v47, 258  ;;  %v9638_v47 = vmul.f32 %v9612_v40, %v9491_v53  ;;  %v9666_v53 = vmul.f32 %v9626_v44, %v9501_v56  ;;  %15907 = vst [vmem:[#allocation40_spill] sm:$0xff] %v9818_v35  ;;  %15917 = vst [vmem:[#allocation50_spill] sm:$0xff] %v9883_v52 }
 0x157   : > { %v602_v35 = vmul.f32 %v9612_v40, %v9543_v6  ;;  %v9903_v52 = vmul.f32 %v9626_v44, %v9555_v10 }
 0x158   : > { %v9579_v21 = vpop.permute.xlu1 %571  ;;  %v9581_v22 = vpop.permute.xlu0 %575  ;;  %15884 = vst [vmem:[#allocation17_spill] sm:$0xff] %v9666_v53  ;;  %v9869_v53 = vmul.f32 %v9617_v41, %v9549_v8 }
 0x159   : > { %15922 = vst [vmem:[#allocation55_spill] sm:$0xff] %v9903_v52  ;;  %v9947_v52 = vmul.f32 %v9612_v40, %v9567_v16 }
 0x15a   : > { %950 = vbcast.lane.b32.xlu0 %v9444_v48, 266  ;;  %946 = vbcast.lane.b32.xlu1 %v9444_v48, 258  ;;  %v9642_v48 = vmul.f32 %v9612_v40, %v9495_v54  ;;  %15915 = vst [vmem:[#allocation48_spill] sm:$0xff] %v9869_v53  ;;  %v9887_v53 = vmul.f32 %v9626_v44, %v9551_v9 }
 0x15b   : > { %v607_v9 = vmul.f32 %v9612_v40, %v9557_v11 }
 0x15c   : > { %v9585_v23 = vpop.permute.xlu1 %650  ;;  %v9587_v25 = vpop.permute.xlu0 %654  ;;  %15918 = vst [vmem:[#allocation51_spill] sm:$0xff] %v9887_v53  ;;  %v9913_v53 = vmul.f32 %v9626_v44, %v9557_v11 }
 0x15e   : > { %958 = vbcast.lane.b32.xlu0 %v9449_v49, 266  ;;  %954 = vbcast.lane.b32.xlu1 %v9449_v49, 258  ;;  %v9646_v49 = vmul.f32 %v9617_v41, %v9495_v54  ;;  %v9670_v54 = vmul.f32 %v9612_v40, %v9503_v57  ;;  %v9702_v57 = vmul.f32 %v9617_v41, %v9509_v59 }
 0x15f   : > { %v9726_v59 = vmul.f32 %v9617_v41, %v9515_v61  ;;  %15924 = vst [vmem:[#allocation57_spill] sm:$0xff] %v9913_v53  ;;  %v609_v53 = vmul.f32 %v9612_v40, %v9563_v14 }
 0x160   : > { %v9591_v26 = vpop.permute.xlu1 %658  ;;  %v9593_v28 = vpop.permute.xlu0 %662  ;;  %15881 = vst [vmem:[#allocation14_spill] sm:$0xff] %v9646_v49  ;;  %15889 = vst [vmem:[#allocation22_spill] sm:$0xff] %v9702_v57  ;;  %v9762_v57 = vmul.f32 %v9612_v40, %v9525_v0  ;;  %v9792_v0 = vmul.f32 %v9617_v41, %v9531_v2  ;;  %v600_v2 = vmul.f32 %v9612_v40, %v9537_v4 }
 0x161   : > { %15893 = vst [vmem:[#allocation26_spill] sm:$0xff] %v9726_v59  ;;  %v9758_v59 = vmul.f32 %v9626_v44, %v9521_v63 }
 0x162   : > { %966 = vbcast.lane.b32.xlu0 %v9454_v50, 266  ;;  %962 = vbcast.lane.b32.xlu1 %v9454_v50, 258  ;;  %v9654_v50 = vmul.f32 %v9617_v41, %v9497_v55  ;;  %15903 = vst [vmem:[#allocation36_spill] sm:$0xff] %v9792_v0  ;;  %v9822_v0 = vmul.f32 %v9626_v44, %v9537_v4 }
 0x163   : > { %15898 = vst [vmem:[#allocation31_spill] sm:$0xff] %v9758_v59  ;;  %v9780_v59 = vmul.f32 %v9617_v41, %v9527_v1  ;;  %v9840_v4 = vmul.f32 %v9617_v41, %v9543_v6 }
 0x164   : > { %v9597_v30 = vpop.permute.xlu1 %666  ;;  %v9599_v32 = vpop.permute.xlu0 %670  ;;  %15882 = vst [vmem:[#allocation15_spill] sm:$0xff] %v9654_v50  ;;  %15908 = vst [vmem:[#allocation41_spill] sm:$0xff] %v9822_v0  ;;  %v9844_v0 = vmul.f32 %v9626_v44, %v9543_v6 }
 0x165   : > { %15901 = vst [vmem:[#allocation34_spill] sm:$0xff] %v9780_v59  ;;  %15911 = vst [vmem:[#allocation44_spill] sm:$0xff] %v9840_v4  ;;  %v9861_v4 = vld [vmem:[%s15656_s1 + $0x1] ss:$0 sm:$0xff] }
 0x166   : > { %974 = vbcast.lane.b32.xlu0 %v9459_v51, 266  ;;  %970 = vbcast.lane.b32.xlu1 %v9459_v51, 258  ;;  %v9658_v51 = vmul.f32 %v9612_v40, %v9501_v56  ;;  %v9686_v56 = vmul.f32 %v9612_v40, %v9507_v58  ;;  %v9714_v58 = vmul.f32 %v9617_v41, %v9513_v60 }
 0x167   : > { %15912 = vst [vmem:[#allocation45_spill] sm:$0xff] %v9844_v0 }
 0x168   : > { %v9605_v36 = vpop.permute.xlu1 %674  ;;  %v9607_v38 = vpop.permute.xlu0 %678  ;;  %15891 = vst [vmem:[#allocation24_spill] sm:$0xff] %v9714_v58 }
 0x16a   : > { %1057 = vbcast.lane.b32.xlu0 %v1051_v34, 264  ;;  %1053 = vbcast.lane.b32.xlu1 %v1051_v34, 256 }
 0x16c   : > { %v9619_v42 = vpop.permute.xlu1 %682  ;;  %v9621_v43 = vpop.permute.xlu0 %686 }
 0x16e   : > { %1133 = vbcast.lane.b32.xlu1 %v1051_v34, 257  ;;  %1137 = vbcast.lane.b32.xlu0 %v1051_v34, 265 }
 0x170   : > { %v9672_v13 = vpop.permute.xlu1 %690  ;;  %v9674_v55 = vpop.permute.xlu0 %694 }
 0x172   : > { %1213 = vbcast.lane.b32.xlu1 %v1051_v34, 258  ;;  %1217 = vbcast.lane.b32.xlu0 %v1051_v34, 266  ;;  %v9730_v34 = vmul.f32 %v9626_v44, %v9515_v61  ;;  %v9750_v61 = vmul.f32 %v9612_v40, %v9521_v63 }
 0x174   : > { %15894 = vst [vmem:[#allocation27_spill] sm:$0xff] %v9730_v34  ;;  %v9736_v58 = vpop.permute.xlu1 %698  ;;  %v9738_v60 = vpop.permute.xlu0 %702  ;;  %v9754_v34 = vmul.f32 %v9617_v41, %v9521_v63  ;;  %v9776_v63 = vmul.f32 %v9612_v40, %v9527_v1 }
 0x176   : > { %15897 = vst [vmem:[#allocation30_spill] sm:$0xff] %v9754_v34  ;;  %1296 = vbcast.lane.b32.xlu1 %v9630_v45, 256  ;;  %1300 = vbcast.lane.b32.xlu0 %v9630_v45, 264  ;;  %v9784_v34 = vmul.f32 %v9626_v44, %v9527_v1 }
 0x178   : > { %15902 = vst [vmem:[#allocation35_spill] sm:$0xff] %v9784_v34  ;;  %v9802_v59 = vpop.permute.xlu1 %706  ;;  %v9804_v1 = vpop.permute.xlu0 %710  ;;  %v9808_v34 = vmul.f32 %v9617_v41, %v9533_v3  ;;  %v9834_v3 = vmul.f32 %v9626_v44, %v9539_v5 }
 0x17a   : > { %15905 = vst [vmem:[#allocation38_spill] sm:$0xff] %v9808_v34  ;;  %v9828_v34 = vmul.f32 %v9617_v41, %v9539_v5  ;;  %1376 = vbcast.lane.b32.xlu1 %v9630_v45, 257  ;;  %1380 = vbcast.lane.b32.xlu0 %v9630_v45, 265  ;;  %15910 = vst [vmem:[#allocation43_spill] sm:$0xff] %v9834_v3  ;;  %v9854_v5 = vmul.f32 %v9626_v44, %v9545_v7 }
 0x17b   : > { %v604_v3 = vmul.f32 %v9612_v40, %v9549_v8 }
 0x17c   : > { %15909 = vst [vmem:[#allocation42_spill] sm:$0xff] %v9828_v34  ;;  %v603_v34 = vmul.f32 %v9612_v40, %v9545_v7  ;;  %15914 = vst [vmem:[#allocation47_spill] sm:$0xff] %v9854_v5  ;;  %v9863_v6 = vpop.permute.xlu1 %714  ;;  %v9865_v0 = vpop.permute.xlu0 %718  ;;  %v9873_v7 = vmul.f32 %v9626_v44, %v9549_v8  ;;  %v606_v8 = vmul.f32 %v9612_v40, %v9555_v10 }
 0x17d   : > { %v800_v5 = vmul.f32 %v9861_v4, %v9863_v6  ;;  %v801_v37 = vmul.f32 %v9861_v4, %v9865_v0 }
 0x17e   : > { %15916 = vst [vmem:[#allocation49_spill] sm:$0xff] %v9873_v7  ;;  %1456 = vbcast.lane.b32.xlu1 %v9630_v45, 258  ;;  %1460 = vbcast.lane.b32.xlu0 %v9630_v45, 266  ;;  %v9895_v7 = vmul.f32 %v9617_v41, %v9555_v10  ;;  %v9909_v45 = vmul.f32 %v9617_v41, %v9557_v11 }
 0x17f   : > { %v9897_v50 = vadd.f32 %v800_v5, %v600_v2  ;;  %v9899_v49 = vadd.f32 %v801_v37, %v601_v39  ;;  %v9921_v37 = vmul.f32 %v9612_v40, %v9561_v12  ;;  %v9925_v39 = vmul.f32 %v9617_v41, %v9561_v12 }
 0x180   : > { %15919 = vst [vmem:[#allocation52_spill] sm:$0xff] %v9895_v7  ;;  %15923 = vst [vmem:[#allocation56_spill] sm:$0xff] %v9909_v45  ;;  %v9915_v7 = vpop.permute.xlu1 %722  ;;  %v9917_v2 = vpop.permute.xlu0 %726  ;;  %v9933_v11 = vmul.f32 %v9626_v44, %v9561_v12  ;;  %v9939_v45 = vmul.f32 %v9617_v41, %v9563_v14 }
 0x181   : > { %15920 = vst [vmem:[#allocation53_spill] sm:$0xff] %v9897_v50  ;;  %15921 = vst [vmem:[#allocation54_spill] sm:$0xff] %v9899_v49  ;;  %v802_v10 = vmul.f32 %v9861_v4, %v9915_v7  ;;  %v803_v5 = vmul.f32 %v9861_v4, %v9917_v2  ;;  %v9951_v49 = vmul.f32 %v9617_v41, %v9567_v16 }
 0x182   : > { %15925 = vst [vmem:[#allocation58_spill] sm:$0xff] %v9925_v39  ;;  %15926 = vst [vmem:[#allocation59_spill] sm:$0xff] %v9933_v11  ;;  %v9943_v39 = vmul.f32 %v9626_v44, %v9563_v14  ;;  %v9959_v50 = vmul.f32 %v9626_v44, %v9567_v16  ;;  %v9963_v14 = vmul.f32 %v9612_v40, %v9569_v17 }
 0x183   : > { %15927 = vst [vmem:[#allocation60_spill] sm:$0xff] %v9939_v45  ;;  %15929 = vst [vmem:[#allocation62_spill] sm:$0xff] %v9951_v49  ;;  %v9953_v12 = vadd.f32 %v802_v10, %v602_v35  ;;  %v9955_v11 = vadd.f32 %v803_v5, %v603_v34  ;;  %v9971_v45 = vmul.f32 %v9626_v44, %v9569_v17 }
 0x184   : > { %15928 = vst [vmem:[#allocation61_spill] sm:$0xff] %v9943_v39  ;;  %15932 = vst [vmem:[#allocation65_spill] sm:$0xff] %v9959_v50  ;;  %v9967_v39 = vmul.f32 %v9617_v41, %v9569_v17  ;;  %v9973_v35 = vpop.permute.xlu1 %730  ;;  %v9975_v34 = vpop.permute.xlu0 %734  ;;  %v9979_v16 = vmul.f32 %v9612_v40, %v9573_v19  ;;  %v9983_v10 = vmul.f32 %v9617_v41, %v9573_v19 }
 0x185   : > { %15930 = vst [vmem:[#allocation63_spill] sm:$0xff] %v9953_v12  ;;  %15931 = vst [vmem:[#allocation64_spill] sm:$0xff] %v9955_v11  ;;  %v804_v5 = vmul.f32 %v9861_v4, %v9973_v35  ;;  %v9991_v17 = vmul.f32 %v9626_v44, %v9573_v19  ;;  %v784_v50 = vmul.f32 %v9861_v4, %v9585_v23 }
 0x186   : > { %15933 = vst [vmem:[#allocation66_spill] sm:$0xff] %v9967_v39  ;;  %15934 = vst [vmem:[#allocation67_spill] sm:$0xff] %v9971_v45  ;;  %v805_v39 = vmul.f32 %v9861_v4, %v9975_v34  ;;  %v9995_v45 = vmul.f32 %v9612_v40, %v9575_v20  ;;  %v10003_v49 = vmul.f32 %v9617_v41, %v9575_v20 }
 0x187   : > { %15935 = vst [vmem:[#allocation68_spill] sm:$0xff] %v9983_v10  ;;  %15936 = vst [vmem:[#allocation69_spill] sm:$0xff] %v9991_v17  ;;  %v785_v10 = vmul.f32 %v9861_v4, %v9587_v25  ;;  %v10007_v11 = vmul.f32 %v9626_v44, %v9575_v20  ;;  %v10009_v19 = vadd.f32 %v804_v5, %v604_v3  ;;  %v10040_v5 = vld [vmem:[%s15656_s1 + $0x4] ss:$0 sm:$0xff] }
 0x188   : > { %15937 = vst [vmem:[#allocation70_spill] sm:$0xff] %v10003_v49  ;;  %v10011_v17 = vadd.f32 %v805_v39, %v605_v15  ;;  %v10015_v12 = vmul.f32 %v9612_v40, %v9579_v21  ;;  %v10019_v23 = vmul.f32 %v9617_v41, %v9579_v21  ;;  %v786_v25 = vmul.f32 %v9861_v4, %v9591_v26  ;;  %v10025_v20 = vpop.permute.xlu1 %738  ;;  %v10027_v3 = vpop.permute.xlu0 %742 }
 0x189   : > { %15938 = vst [vmem:[#allocation71_spill] sm:$0xff] %v10007_v11  ;;  %15939 = vst [vmem:[#allocation72_spill] sm:$0xff] %v10009_v19  ;;  %v787_v49 = vmul.f32 %v9861_v4, %v9593_v28  ;;  %v10031_v15 = vmul.f32 %v9626_v44, %v9579_v21  ;;  %v10035_v39 = vmul.f32 %v9612_v40, %v9581_v22  ;;  %v10063_v19 = vld [vmem:[%s15656_s1 + $0x7] ss:$0 sm:$0xff] }
 0x18a   : > { %15940 = vst [vmem:[#allocation73_spill] sm:$0xff] %v10011_v17  ;;  %15941 = vst [vmem:[#allocation74_spill] sm:$0xff] %v10019_v23  ;;  %v806_v23 = vmul.f32 %v9861_v4, %v10025_v20  ;;  %v807_v11 = vmul.f32 %v9861_v4, %v10027_v3  ;;  %v10048_v17 = vmul.f32 %v9617_v41, %v9581_v22 }
 0x18b   : > { %15942 = vst [vmem:[#allocation75_spill] sm:$0xff] %v10027_v3  ;;  %15943 = vst [vmem:[#allocation76_spill] sm:$0xff] %v10031_v15  ;;  %v10052_v21 = vmul.f32 %v9626_v44, %v9581_v22  ;;  %v10055_v40 = vadd.f32 %v784_v50, %v9634_v46  ;;  %v10058_v15 = vadd.f32 %v785_v10, %v9638_v47 }
 0x18c   : > { %15944 = vst [vmem:[#allocation77_spill] sm:$0xff] %v10048_v17  ;;  %v788_v3 = vmul.f32 %v9861_v4, %v9597_v30  ;;  %v789_v41 = vmul.f32 %v9861_v4, %v9599_v32  ;;  %v10069_v17 = vadd.f32 %v806_v23, %v606_v8  ;;  %v10071_v22 = vadd.f32 %v807_v11, %v607_v9  ;;  %v10087_v10 = vpop.permute.xlu1 %746  ;;  %v10089_v8 = vpop.permute.xlu0 %750 }
 0x18d   : > { %15945 = vst [vmem:[#allocation78_spill] sm:$0xff] %v10052_v21  ;;  %v10074_v44 = vadd.f32 %v786_v25, %v9642_v48  ;;  %v10078_v46 = vmul.f32 %v10040_v5, %v9591_v26  ;;  %v10081_v47 = vadd.f32 %v787_v49, %v9650_v27  ;;  %v10085_v50 = vmul.f32 %v10040_v5, %v9593_v28 }
 0x18e   : > { %15946 = vst [vmem:[#allocation79_spill] sm:$0xff] %v10069_v17  ;;  %15947 = vst [vmem:[#allocation80_spill] sm:$0xff] %v10071_v22  ;;  %v10093_v9 = vmul.f32 %v10040_v5, %v9597_v30  ;;  %v10097_v48 = vmul.f32 %v10063_v19, %v9597_v30  ;;  %v808_v26 = vmul.f32 %v9861_v4, %v10087_v10 }
 0x18f   : > { %v809_v49 = vmul.f32 %v9861_v4, %v10089_v8  ;;  %v10105_v28 = vmul.f32 %v10040_v5, %v9599_v32  ;;  %v10109_v27 = vmul.f32 %v10063_v19, %v9599_v32  ;;  %v790_v11 = vmul.f32 %v9861_v4, %v9605_v36 }
 0x190   : > { %v791_v30 = vmul.f32 %v9861_v4, %v9607_v38  ;;  %v10116_v23 = vadd.f32 %v788_v3, %v9658_v51  ;;  %v10119_v25 = vadd.f32 %v789_v41, %v9670_v54  ;;  %v10122_v21 = vadd.f32 %v808_v26, %v9921_v37  ;;  %v10138_v3 = vpop.permute.xlu1 %754  ;;  %v10140_v37 = vpop.permute.xlu0 %758 }
 0x191   : > { %v10124_v22 = vadd.f32 %v809_v49, %v609_v53  ;;  %v10128_v32 = vmul.f32 %v10040_v5, %v9605_v36  ;;  %v10132_v17 = vmul.f32 %v10063_v19, %v9605_v36  ;;  %v792_v51 = vmul.f32 %v9861_v4, %v9619_v42 }
 0x192   : > { %15948 = vst [vmem:[#allocation81_spill] sm:$0xff] %v10122_v21  ;;  %v793_v54 = vmul.f32 %v9861_v4, %v9621_v43  ;;  %v10144_v53 = vmul.f32 %v10040_v5, %v9607_v38  ;;  %v10148_v41 = vmul.f32 %v10063_v19, %v9607_v38  ;;  %v810_v36 = vmul.f32 %v9861_v4, %v10138_v3 }
 0x193   : > { %15949 = vst [vmem:[#allocation82_spill] sm:$0xff] %v10124_v22  ;;  %15950 = vst [vmem:[#allocation83_spill] sm:$0xff] %v10132_v17  ;;  %v811_v26 = vmul.f32 %v9861_v4, %v10140_v37  ;;  %v10155_v49 = vadd.f32 %v790_v11, %v9686_v56  ;;  %v10158_v22 = vadd.f32 %v791_v30, %v9698_v33 }
 0x194   : > { %15951 = vst [vmem:[#allocation84_spill] sm:$0xff] %v10148_v41  ;;  %v10162_v21 = vmul.f32 %v10040_v5, %v9619_v42  ;;  %v10166_v38 = vmul.f32 %v10063_v19, %v9619_v42  ;;  %v794_v41 = vmul.f32 %v9861_v4, %v9672_v13  ;;  %v795_v17 = vmul.f32 %v9861_v4, %v9674_v55 }
 0x195   : > { %v10173_v56 = vadd.f32 %v810_v36, %v9947_v52  ;;  %v10176_v33 = vadd.f32 %v811_v26, %v9963_v14  ;;  %v10179_v11 = vadd.f32 %v792_v51, %v9710_v29  ;;  %v10182_v30 = vadd.f32 %v793_v54, %v9722_v18  ;;  %v10194_v52 = vpop.permute.xlu0 %766 }
 0x196   : > { %15952 = vst [vmem:[#allocation85_spill] sm:$0xff] %v10162_v21  ;;  %15953 = vst [vmem:[#allocation86_spill] sm:$0xff] %v10166_v38  ;;  %v10186_v42 = vmul.f32 %v10040_v5, %v9621_v43  ;;  %v10190_v38 = vmul.f32 %v10063_v19, %v9621_v43  ;;  %v10192_v21 = vpop.permute.xlu1 %762  ;;  %v10198_v14 = vmul.f32 %v10040_v5, %v9672_v13 }
 0x197   : > { %15954 = vst [vmem:[#allocation87_spill] sm:$0xff] %v10173_v56  ;;  %15955 = vst [vmem:[#allocation88_spill] sm:$0xff] %v10176_v33  ;;  %v10202_v18 = vmul.f32 %v10063_v19, %v9672_v13  ;;  %v812_v29 = vmul.f32 %v9861_v4, %v10192_v21  ;;  %v813_v51 = vmul.f32 %v9861_v4, %v10194_v52 }
 0x198   : > { %15956 = vst [vmem:[#allocation89_spill] sm:$0xff] %v10190_v38  ;;  %v10210_v43 = vmul.f32 %v10040_v5, %v9674_v55  ;;  %v10214_v54 = vmul.f32 %v10063_v19, %v9674_v55  ;;  %v796_v36 = vmul.f32 %v9861_v4, %v9736_v58  ;;  %v797_v13 = vmul.f32 %v9861_v4, %v9738_v60 }
 0x199   : > { %v10221_v26 = vadd.f32 %v794_v41, %v9734_v31  ;;  %v10224_v33 = vadd.f32 %v795_v17, %v9750_v61  ;;  %v10227_v56 = vadd.f32 %v812_v29, %v9979_v16  ;;  %v10230_v38 = vadd.f32 %v813_v51, %v9995_v45  ;;  %v10246_v16 = vpop.permute.xlu0 %774 }
 0x19a   : > { %15957 = vst [vmem:[#allocation90_spill] sm:$0xff] %v10214_v54  ;;  %v10234_v55 = vmul.f32 %v10040_v5, %v9736_v58  ;;  %v10238_v54 = vmul.f32 %v10063_v19, %v9736_v58  ;;  %v798_v31 = vmul.f32 %v9861_v4, %v9802_v59  ;;  %v799_v61 = vmul.f32 %v9861_v4, %v9804_v1  ;;  %v10244_v17 = vpop.permute.xlu1 %770 }
 0x19b   : > { %15958 = vst [vmem:[#allocation91_spill] sm:$0xff] %v10227_v56  ;;  %15959 = vst [vmem:[#allocation92_spill] sm:$0xff] %v10230_v38  ;;  %v10250_v45 = vmul.f32 %v10040_v5, %v9738_v60  ;;  %v10254_v41 = vmul.f32 %v10063_v19, %v9738_v60  ;;  %v814_v58 = vmul.f32 %v9861_v4, %v10244_v17 }
 0x19c   : > { %v815_v29 = vmul.f32 %v9861_v4, %v10246_v16  ;;  %v10261_v51 = vadd.f32 %v796_v36, %v9762_v57  ;;  %v10264_v38 = vadd.f32 %v797_v13, %v9776_v63  ;;  %v10268_v56 = vmul.f32 %v10040_v5, %v9802_v59 }
 0x19d   : > { %15960 = vst [vmem:[#allocation93_spill] sm:$0xff] %v10254_v41  ;;  %v10272_v60 = vmul.f32 %v10063_v19, %v9802_v59  ;;  %v10277_v41 = vld [vmem:[%s15656_s1 + $0x2] ss:$0 sm:$0xff]  ;;  %v10281_v57 = vmul.f32 %v10040_v5, %v9804_v1  ;;  %v10285_v63 = vmul.f32 %v10063_v19, %v9804_v1  ;;  %v10288_v4 = vadd.f32 %v814_v58, %v10015_v12  ;;  %v855_v12 = vpop.permute.xlu0 %854 }
 0x19e   : > { %v10291_v36 = vadd.f32 %v815_v29, %v10035_v39  ;;  %v10294_v59 = vadd.f32 %v798_v31, %v9788_v62  ;;  %v10297_v13 = vadd.f32 %v799_v61, %v9800_v24  ;;  %v10305_v1 = vmul.f32 %v10063_v19, %v9863_v6 }
 0x19f   : > { %15961 = vst [vmem:[#allocation94_spill] sm:$0xff] %v10272_v60  ;;  %15962 = vst [vmem:[#allocation95_spill] sm:$0xff] %v10285_v63  ;;  %v10301_v60 = vmul.f32 %v10040_v5, %v9863_v6  ;;  %v851_v63 = vpop.permute.xlu1 %850  ;;  %v10309_v39 = vmul.f32 %v10040_v5, %v9865_v0  ;;  %v10313_v62 = vmul.f32 %v10063_v19, %v9865_v0 }
 0x1a0   : > { %15963 = vst [vmem:[#allocation96_spill] sm:$0xff] %v10288_v4  ;;  %15964 = vst [vmem:[#allocation97_spill] sm:$0xff] %v10291_v36  ;;  %v984_v24 = vmul.f32 %v10277_v41, %v851_v63  ;;  %v985_v31 = vmul.f32 %v10277_v41, %v855_v12  ;;  %v10319_v61 = vmul.f32 %v10040_v5, %v9915_v7  ;;  %v10346_v36 = vld [vmem:[%s15656_s1 + $0x5] ss:$0 sm:$0xff] }
 0x1a1   : > { %v10323_v6 = vmul.f32 %v10063_v19, %v9915_v7  ;;  %v10327_v58 = vmul.f32 %v10040_v5, %v9917_v2  ;;  %v10331_v0 = vmul.f32 %v10063_v19, %v9917_v2  ;;  %v10335_v29 = vmul.f32 %v10040_v5, %v9973_v35 }
 0x1a2   : > { %v10339_v63 = vmul.f32 %v10063_v19, %v9973_v35  ;;  %v1016_v12 = vadd.f32 %v984_v24, %v10055_v40  ;;  %v1017_v7 = vadd.f32 %v985_v31, %v10058_v15  ;;  %v10350_v2 = vmul.f32 %v10040_v5, %v9975_v34  ;;  %v863_v24 = vpop.permute.xlu0 %862  ;;  %v15973_v31 = vld [vmem:[#allocation75_spill] sm:$0xff] }
 0x1a3   : > { %15965 = vst [vmem:[#allocation98_spill] sm:$0xff] %v10327_v58  ;;  %15966 = vst [vmem:[#allocation99_spill] sm:$0xff] %v10331_v0  ;;  %v10354_v4 = vmul.f32 %v10063_v19, %v9975_v34  ;;  %v10358_v35 = vmul.f32 %v10040_v5, %v10025_v20  ;;  %v10362_v15 = vmul.f32 %v10063_v19, %v10025_v20  ;;  %v859_v40 = vpop.permute.xlu1 %858  ;;  %v15976_v0 = vld [vmem:[#allocation15_spill] sm:$0xff] }
 0x1a4   : > { %15967 = vst [vmem:[#allocation100_spill] sm:$0xff] %v10335_v29  ;;  %15968 = vst [vmem:[#allocation101_spill] sm:$0xff] %v10339_v63  ;;  %v10366_v63 = vmul.f32 %v10040_v5, %v15973_v31  ;;  %v15975_v29 = vld [vmem:[#allocation14_spill] sm:$0xff]  ;;  %v1100_v58 = vadd.f32 %v15976_v0, %v1017_v7  ;;  %v986_v34 = vmul.f32 %v10277_v41, %v859_v40 }
 0x1a5   : > { %15969 = vst [vmem:[#allocation102_spill] sm:$0xff] %v10350_v2  ;;  %15970 = vst [vmem:[#allocation103_spill] sm:$0xff] %v10354_v4  ;;  %v1099_v2 = vadd.f32 %v15975_v29, %v1016_v12  ;;  %v10373_v4 = vmul.f32 %v10063_v19, %v15973_v31  ;;  %v10377_v20 = vmul.f32 %v10040_v5, %v10087_v10 }
 0x1a6   : > { %15971 = vst [vmem:[#allocation104_spill] sm:$0xff] %v10358_v35  ;;  %15972 = vst [vmem:[#allocation105_spill] sm:$0xff] %v10362_v15  ;;  %v1227_v15 = vmul.f32 %v10346_v36, %v859_v40  ;;  %v987_v35 = vmul.f32 %v10277_v41, %v863_v24  ;;  %v1018_v29 = vadd.f32 %v986_v34, %v10074_v44  ;;  %v871_v44 = vpop.permute.xlu0 %870  ;;  %v15981_v34 = vld [vmem:[#allocation16_spill] sm:$0xff] }
 0x1a7   : > { %15974 = vst [vmem:[#allocation75_spill] sm:$0xff] %v10366_v63  ;;  %15977 = vst [vmem:[#allocation14_spill] sm:$0xff] %v10373_v4  ;;  %v1179_v63 = vadd.f32 %v10078_v46, %v1099_v2  ;;  %v1180_v0 = vadd.f32 %v10085_v50, %v1100_v58  ;;  %v1228_v12 = vmul.f32 %v10346_v36, %v863_v24  ;;  %v867_v2 = vpop.permute.xlu1 %866 }
 0x1a8   : > { %v10387_v7 = vmul.f32 %v10063_v19, %v10087_v10  ;;  %v10391_v31 = vmul.f32 %v10040_v5, %v10089_v8  ;;  %v10395_v40 = vmul.f32 %v10063_v19, %v10089_v8  ;;  %v1019_v46 = vadd.f32 %v987_v35, %v10081_v47  ;;  %v15983_v8 = vld [vmem:[#allocation18_spill] sm:$0xff] }
 0x1a9   : > { %v1101_v50 = vadd.f32 %v15981_v34, %v1018_v29  ;;  %v1259_v58 = vadd.f32 %v1227_v15, %v1179_v63  ;;  %v1260_v24 = vadd.f32 %v1228_v12, %v1180_v0  ;;  %v988_v4 = vmul.f32 %v10277_v41, %v867_v2  ;;  %v10415_v63 = vld [vmem:[%s15656_s1 + $0x8] ss:$0 sm:$0xff]  ;;  %v15985_v12 = vld [vmem:[#allocation19_spill] sm:$0xff] }
 0x1aa   : > { %15978 = vst [vmem:[#allocation15_spill] sm:$0xff] %v10387_v7  ;;  %15979 = vst [vmem:[#allocation106_spill] sm:$0xff] %v10391_v31  ;;  %v10402_v10 = vmul.f32 %v10040_v5, %v10138_v3  ;;  %v10406_v31 = vmul.f32 %v10063_v19, %v10138_v3  ;;  %v989_v47 = vmul.f32 %v10277_v41, %v871_v44  ;;  %v15984_v7 = vld [vmem:[#allocation17_spill] sm:$0xff] }
 0x1ab   : > { %15980 = vst [vmem:[#allocation107_spill] sm:$0xff] %v10395_v40  ;;  %v1102_v40 = vadd.f32 %v15983_v8, %v1019_v46  ;;  %v1181_v35 = vadd.f32 %v10093_v9, %v1101_v50  ;;  %v1342_v29 = vadd.f32 %v15984_v7, %v1259_v58  ;;  %v1020_v15 = vadd.f32 %v988_v4, %v10116_v23  ;;  %v875_v9 = vpop.permute.xlu1 %874  ;;  %v15986_v58 = vld [vmem:[#allocation20_spill] sm:$0xff] }
 0x1ac   : > { %15982 = vst [vmem:[#allocation16_spill] sm:$0xff] %v10406_v31  ;;  %v1229_v0 = vmul.f32 %v10346_v36, %v867_v2  ;;  %v1343_v34 = vadd.f32 %v15985_v12, %v1260_v24  ;;  %v1021_v46 = vadd.f32 %v989_v47, %v10119_v25  ;;  %v1230_v8 = vmul.f32 %v10346_v36, %v871_v44  ;;  %v879_v24 = vpop.permute.xlu0 %878 }
 0x1ad   : > { %v1182_v3 = vadd.f32 %v10105_v28, %v1102_v40  ;;  %v10425_v7 = vmul.f32 %v10040_v5, %v10140_v37  ;;  %v1422_v50 = vadd.f32 %v10097_v48, %v1342_v29  ;;  %v1103_v31 = vadd.f32 %v15986_v58, %v1020_v15  ;;  %v15988_v29 = vld [vmem:[#allocation22_spill] sm:$0xff] }
 0x1ae   : > { %v1261_v23 = vadd.f32 %v1229_v0, %v1181_v35  ;;  %v10431_v4 = vmul.f32 %v10063_v19, %v10140_v37  ;;  %v1470_v28 = vmul.f32 %v10415_v63, %v867_v2  ;;  %v990_v25 = vmul.f32 %v10277_v41, %v875_v9 }
 0x1af   : > { %v1262_v40 = vadd.f32 %v1230_v8, %v1182_v3  ;;  %v10437_v47 = vmul.f32 %v10040_v5, %v10192_v21  ;;  %v10441_v48 = vmul.f32 %v10063_v19, %v10192_v21  ;;  %v1104_v35 = vadd.f32 %v15988_v29, %v1021_v46  ;;  %v10459_v21 = vld [vmem:[%s15657_s2] ss:$0 sm:$0xff] }
 0x1b0   : > { %v1183_v15 = vadd.f32 %v10128_v32, %v1103_v31  ;;  %v1423_v37 = vadd.f32 %v10109_v27, %v1343_v34  ;;  %v1502_v0 = vadd.f32 %v1470_v28, %v1422_v50  ;;  %v1022_v2 = vadd.f32 %v990_v25, %v10155_v49  ;;  %v15991_v32 = vld [vmem:[#allocation21_spill] sm:$0xff]  ;;  %v15992_v31 = vld [vmem:[#allocation23_spill] sm:$0xff]  ;;  %v883_v49 = vpop.permute.xlu1 %882  ;;  %v15993_v50 = vld [vmem:[#allocation24_spill] sm:$0xff] }
 0x1b1   : > { %15987 = vst [vmem:[#allocation18_spill] sm:$0xff] %v10441_v48  ;;  %v1231_v3 = vmul.f32 %v10346_v36, %v875_v9  ;;  %v10450_v12 = vmul.f32 %v10040_v5, %v10194_v52  ;;  %v10454_v8 = vmul.f32 %v10063_v19, %v10194_v52  ;;  %v1344_v27 = vadd.f32 %v15991_v32, %v1261_v23  ;;  %v16005_v48 = vld [vmem:[#allocation27_spill] sm:$0xff] }
 0x1b2   : > { %v1345_v34 = vadd.f32 %v15992_v31, %v1262_v40  ;;  %v1471_v46 = vmul.f32 %v10415_v63, %v871_v44  ;;  %v1105_v58 = vadd.f32 %v15993_v50, %v1022_v2  ;;  %v991_v25 = vmul.f32 %v10277_v41, %v879_v24  ;;  %v887_v31 = vpop.permute.xlu0 %886  ;;  %v15998_v50 = vld [vmem:[#allocation83_spill] sm:$0xff] }
 0x1b3   : > { %15989 = vst [vmem:[#allocation17_spill] sm:$0xff] %v10450_v12  ;;  %15990 = vst [vmem:[#allocation19_spill] sm:$0xff] %v10454_v8  ;;  %v1263_v28 = vadd.f32 %v1231_v3, %v1183_v15  ;;  %v10468_v52 = vmul.f32 %v10040_v5, %v10244_v17  ;;  %v10472_v29 = vmul.f32 %v10063_v19, %v10244_v17  ;;  %v15997_v3 = vld [vmem:[#allocation85_spill] sm:$0xff]  ;;  %v15999_v8 = vld [vmem:[#allocation84_spill] sm:$0xff] }
 0x1b4   : > { %v10476_v23 = vmul.f32 %v10040_v5, %v10246_v16  ;;  %v1184_v40 = vadd.f32 %v10144_v53, %v1104_v35  ;;  %v1541_v44 = vadd.f32 %v10459_v21, %v1502_v0  ;;  %v1503_v2 = vadd.f32 %v1471_v46, %v1423_v37  ;;  %v16000_v5 = vld [vmem:[#allocation25_spill] sm:$0xff]  ;;  %v16001_v35 = vld [vmem:[#allocation26_spill] sm:$0xff] }
 0x1b5   : > { %15994 = vst [vmem:[#allocation20_spill] sm:$0xff] %v10468_v52  ;;  %15995 = vst [vmem:[#allocation22_spill] sm:$0xff] %v10472_v29  ;;  %v1023_v15 = vadd.f32 %v991_v25, %v10158_v22  ;;  %v1185_v32 = vadd.f32 %v15997_v3, %v1105_v58  ;;  %v1424_v52 = vadd.f32 %v15998_v50, %v1344_v27  ;;  %v16002_v50 = vld [vmem:[#allocation28_spill] sm:$0xff] }
 0x1b6   : > { %15996 = vst [vmem:[#allocation21_spill] sm:$0xff] %v10476_v23  ;;  %v1425_v12 = vadd.f32 %v15999_v8, %v1345_v34  ;;  %v1232_v17 = vmul.f32 %v10346_v36, %v879_v24  ;;  %v992_v29 = vmul.f32 %v10277_v41, %v883_v49  ;;  %v1346_v23 = vadd.f32 %v16000_v5, %v1263_v28  ;;  %v891_v8 = vpop.permute.xlu1 %890 }
 0x1b7   : > { %v1472_v53 = vmul.f32 %v10415_v63, %v875_v9  ;;  %v1106_v0 = vadd.f32 %v16001_v35, %v1023_v15  ;;  %v1233_v37 = vmul.f32 %v10346_v36, %v883_v49  ;;  %v1473_v46 = vmul.f32 %v10415_v63, %v879_v24  ;;  %v16004_v24 = vld [vmem:[#allocation29_spill] sm:$0xff] }
 0x1b8   : > { %v1264_v22 = vadd.f32 %v1232_v17, %v1184_v40  ;;  %v1024_v58 = vadd.f32 %v992_v29, %v10179_v11  ;;  %v993_v27 = vmul.f32 %v10277_v41, %v887_v31  ;;  %9062 = vtanh.f32 %v1541_v44  ;;  %v16003_v40 = vld [vmem:[#allocation86_spill] sm:$0xff]  ;;  %v895_v44 = vpop.permute.xlu0 %894 }
 0x1b9   : > { %v1542_v34 = vadd.f32 %v10459_v21, %v1503_v2  ;;  %v1265_v25 = vadd.f32 %v1233_v37, %v1185_v32  ;;  %v1186_v28 = vadd.f32 %v10186_v42, %v1106_v0  ;;  %v1504_v3 = vadd.f32 %v1472_v53, %v1424_v52  ;;  %v16006_v32 = vld [vmem:[#allocation30_spill] sm:$0xff] }
 0x1ba   : > { %v1505_v9 = vadd.f32 %v1473_v46, %v1425_v12  ;;  %v1107_v15 = vadd.f32 %v16002_v50, %v1024_v58  ;;  %v1025_v5 = vadd.f32 %v993_v27, %v10182_v30  ;;  %v1426_v17 = vadd.f32 %v16003_v40, %v1346_v23  ;;  %v16007_v58 = vld [vmem:[#allocation32_spill] sm:$0xff]  ;;  %v16009_v50 = vld [vmem:[#allocation33_spill] sm:$0xff] }
 0x1bb   : > { %v1348_v35 = vadd.f32 %v16004_v24, %v1265_v25  ;;  %v1234_v11 = vmul.f32 %v10346_v36, %v887_v31  ;;  %v994_v29 = vmul.f32 %v10277_v41, %v891_v8  ;;  %v1347_v2 = vadd.f32 %v16005_v48, %v1264_v22  ;;  %v899_v25 = vpop.permute.xlu1 %898 }
 0x1bc   : > { %v1108_v37 = vadd.f32 %v16006_v32, %v1025_v5  ;;  %v1187_v42 = vadd.f32 %v10198_v14, %v1107_v15  ;;  %v1235_v12 = vmul.f32 %v10346_v36, %v891_v8  ;;  %v1474_v52 = vmul.f32 %v10415_v63, %v883_v49 }
 0x1bd   : > { %v1266_v30 = vadd.f32 %v1234_v11, %v1186_v28  ;;  %v1428_v23 = vadd.f32 %v10202_v18, %v1348_v35  ;;  %v1026_v53 = vadd.f32 %v994_v29, %v10221_v26  ;;  %v10510_v0 = vmul.f32 %v10063_v19, %v10246_v16  ;;  %v16008_v28 = vld [vmem:[#allocation89_spill] sm:$0xff]  ;;  %v16010_v16 = vld [vmem:[#allocation31_spill] sm:$0xff] }
 0x1be   : > { %9064 = vtanh.f32 %v1542_v34  ;;  %v1543_v48 = vadd.f32 %v10459_v21, %v1504_v3  ;;  %v1267_v22 = vadd.f32 %v1235_v12, %v1187_v42  ;;  %v1506_v46 = vadd.f32 %v1474_v52, %v1426_v17  ;;  %v903_v17 = vpop.permute.xlu0 %902  ;;  %v16012_v12 = vld [vmem:[#allocation90_spill] sm:$0xff] }
 0x1bf   : > { %v1109_v14 = vadd.f32 %v16007_v58, %v1026_v53  ;;  %v1476_v27 = vmul.f32 %v10415_v63, %v891_v8  ;;  %v1188_v49 = vadd.f32 %v10210_v43, %v1108_v37  ;;  %v1544_v18 = vadd.f32 %v10459_v21, %v1505_v9  ;;  %v907_v53 = vpop.permute.xlu1 %906 }
 0x1c0   : > { %v1427_v26 = vadd.f32 %v16008_v28, %v1347_v2  ;;  %v1350_v15 = vadd.f32 %v16009_v50, %v1267_v22  ;;  %v995_v19 = vmul.f32 %v10277_v41, %v895_v44  ;;  %v1349_v34 = vadd.f32 %v16010_v16, %v1266_v30  ;;  %v16013_v22 = vld [vmem:[#allocation36_spill] sm:$0xff]  ;;  %v16015_v28 = vld [vmem:[#allocation37_spill] sm:$0xff] }
 0x1c1   : > { %v1508_v3 = vadd.f32 %v1476_v27, %v1428_v23  ;;  %v1236_v5 = vmul.f32 %v10346_v36, %v895_v44  ;;  %v1189_v40 = vadd.f32 %v10234_v55, %v1109_v14  ;;  %v1475_v8 = vmul.f32 %v10415_v63, %v887_v31  ;;  %v16011_v55 = vld [vmem:[#allocation34_spill] sm:$0xff] }
 0x1c2   : > { %v1027_v43 = vadd.f32 %v995_v19, %v10224_v33  ;;  %v1430_v9 = vadd.f32 %v10238_v54, %v1350_v15  ;;  %v996_v24 = vmul.f32 %v10277_v41, %v899_v25  ;;  %v10527_v35 = vpop.eup %9062  ;;  %v1545_v11 = vadd.f32 %v10459_v21, %v1506_v46  ;;  %v16016_v19 = vld [vmem:[#allocation38_spill] sm:$0xff] }
 0x1c3   : > { %v1268_v29 = vadd.f32 %v1236_v5, %v1188_v49  ;;  %v1237_v2 = vmul.f32 %v10346_v36, %v899_v25  ;;  %v1478_v32 = vmul.f32 %v10415_v63, %v899_v25  ;;  %v1507_v37 = vadd.f32 %v1475_v8, %v1427_v26  ;;  %v16014_v49 = vld [vmem:[#allocation35_spill] sm:$0xff]  ;;  %v16017_v5 = vld [vmem:[#allocation94_spill] sm:$0xff] }
 0x1c4   : > { %v1110_v42 = vadd.f32 %v16011_v55, %v1027_v43  ;;  %v1028_v31 = vadd.f32 %v996_v24, %v10261_v51  ;;  %v997_v33 = vmul.f32 %v10277_v41, %v903_v17  ;;  %v1547_v54 = vadd.f32 %v10459_v21, %v1508_v3  ;;  %v16019_v24 = vld [vmem:[#allocation39_spill] sm:$0xff] }
 0x1c5   : > { %v1429_v52 = vadd.f32 %v16012_v12, %v1349_v34  ;;  %v1269_v30 = vadd.f32 %v1237_v2, %v1189_v40  ;;  %v1510_v23 = vadd.f32 %v1478_v32, %v1430_v9  ;;  %v1238_v27 = vmul.f32 %v10346_v36, %v903_v17  ;;  %v915_v2 = vpop.permute.xlu1 %914 }
 0x1c6   : > { %v1111_v46 = vadd.f32 %v16013_v22, %v1028_v31  ;;  %v1190_v58 = vadd.f32 %v10250_v45, %v1110_v42  ;;  %v1029_v14 = vadd.f32 %v997_v33, %v10264_v38  ;;  %9066 = vtanh.f32 %v1545_v11  ;;  %v911_v45 = vpop.permute.xlu0 %910  ;;  %v16022_v22 = vld [vmem:[#allocation95_spill] sm:$0xff] }
 0x1c7   : > { %v1351_v51 = vadd.f32 %v16014_v49, %v1268_v29  ;;  %v1477_v25 = vmul.f32 %v10415_v63, %v895_v44  ;;  %v1352_v26 = vadd.f32 %v16015_v28, %v1269_v30  ;;  %9068 = vtanh.f32 %v1543_v48  ;;  %v16018_v48 = vld [vmem:[#allocation93_spill] sm:$0xff] }
 0x1c8   : > { %v10544_v50 = vpop.eup %9064  ;;  %v1549_v15 = vadd.f32 %v10459_v21, %v1510_v23  ;;  %v1112_v16 = vadd.f32 %v16016_v19, %v1029_v14  ;;  %v1270_v34 = vadd.f32 %v1238_v27, %v1190_v58  ;;  %9070 = vtanh.f32 %v1544_v18 }
 0x1c9   : > { %v1509_v38 = vadd.f32 %v1477_v25, %v1429_v52  ;;  %v1191_v3 = vadd.f32 %v10268_v56, %v1111_v46  ;;  %v1432_v40 = vadd.f32 %v16017_v5, %v1352_v26  ;;  %v1546_v8 = vadd.f32 %v10459_v21, %v1507_v37  ;;  %v16021_v52 = vld [vmem:[#allocation41_spill] sm:$0xff]  ;;  %v16023_v46 = vld [vmem:[#allocation42_spill] sm:$0xff]  ;;  %v16025_v5 = vld [vmem:[#allocation44_spill] sm:$0xff] }
 0x1ca   : > { %9072 = vtanh.f32 %v1547_v54  ;;  %v998_v44 = vmul.f32 %v10277_v41, %v907_v53  ;;  %v1239_v43 = vmul.f32 %v10346_v36, %v907_v53  ;;  %v1431_v9 = vadd.f32 %v16018_v48, %v1351_v51  ;;  %v16020_v54 = vld [vmem:[#allocation40_spill] sm:$0xff]  ;;  %v919_v14 = vpop.permute.xlu0 %918  ;;  %v16024_v26 = vld [vmem:[#allocation53_spill] sm:$0xff] }
 0x1cb   : > { %v1353_v11 = vadd.f32 %v16019_v24, %v1270_v34  ;;  %v1480_v29 = vmul.f32 %v10415_v63, %v907_v53  ;;  %v999_v18 = vmul.f32 %v10277_v41, %v911_v45  ;;  %9074 = vtanh.f32 %v1549_v15 }
 0x1cc   : > { %v1030_v56 = vadd.f32 %v998_v44, %v10294_v59  ;;  %v1271_v32 = vadd.f32 %v1239_v43, %v1191_v3  ;;  %v1192_v37 = vadd.f32 %v10281_v57, %v1112_v16  ;;  %v1548_v55 = vadd.f32 %v10459_v21, %v1509_v38  ;;  %v923_v44 = vpop.permute.xlu1 %922 }
 0x1cd   : > { %v1479_v42 = vmul.f32 %v10415_v63, %v903_v17  ;;  %v1512_v31 = vadd.f32 %v1480_v29, %v1432_v40  ;;  %v1031_v33 = vadd.f32 %v999_v18, %v10297_v13  ;;  %v1240_v23 = vmul.f32 %v10346_v36, %v911_v45 }
 0x1ce   : > { %v1113_v12 = vadd.f32 %v16020_v54, %v1030_v56  ;;  %v1354_v30 = vadd.f32 %v16021_v52, %v1271_v32  ;;  %v1000_v53 = vmul.f32 %v10277_v41, %v915_v2  ;;  %v1622_v59 = vrot.slane %v10527_v35, 1  ;;  %v16028_v56 = vld [vmem:[#allocation45_spill] sm:$0xff] }
 0x1cf   : > { %9076 = vtanh.f32 %v1546_v8  ;;  %v1433_v57 = vadd.f32 %v16022_v22, %v1353_v11  ;;  %v1114_v58 = vadd.f32 %v16023_v46, %v1031_v33  ;;  %v1511_v17 = vadd.f32 %v1479_v42, %v1431_v9  ;;  %v16026_v9 = vld [vmem:[#allocation43_spill] sm:$0xff]  ;;  %v16027_v11 = vld [vmem:[#allocation54_spill] sm:$0xff] }
 0x1d0   : > { %v1272_v27 = vadd.f32 %v1240_v23, %v1192_v37  ;;  %v1481_v13 = vmul.f32 %v10415_v63, %v911_v45  ;;  %v1193_v49 = vadd.f32 %v10301_v60, %v1113_v12  ;;  %v10571_v51 = vpop.eup %9066  ;;  %v1551_v25 = vadd.f32 %v10459_v21, %v1512_v31  ;;  %v16030_v46 = vld [vmem:[#allocation63_spill] sm:$0xff] }
 0x1d1   : > { %v1434_v28 = vadd.f32 %v10305_v1, %v1354_v30  ;;  %v1032_v15 = vadd.f32 %v1000_v53, %v16024_v26  ;;  %v1241_v19 = vmul.f32 %v10346_v36, %v915_v2  ;;  %v10577_v16 = vpop.eup %9068  ;;  %v1672_v34 = vrot.slane %v10527_v35, 7  ;;  %v16032_v26 = vld [vmem:[#allocation47_spill] sm:$0xff] }
 0x1d2   : > { %9078 = vtanh.f32 %v1548_v55  ;;  %v1194_v38 = vadd.f32 %v10309_v39, %v1114_v58  ;;  %v1001_v45 = vmul.f32 %v10277_v41, %v919_v14  ;;  %v10582_v60 = vpop.eup %9070  ;;  %v1513_v3 = vadd.f32 %v1481_v13, %v1433_v57 }
 0x1d3   : > { %v1115_v40 = vadd.f32 %v16025_v5, %v1032_v15  ;;  %v1273_v8 = vadd.f32 %v1241_v19, %v1193_v49  ;;  %v1482_v1 = vmul.f32 %v10415_v63, %v915_v2  ;;  %v1623_v48 = vrot.slane %v10571_v51, 1  ;;  %v16029_v2 = vld [vmem:[#allocation46_spill] sm:$0xff] }
 0x1d4   : > { %v10586_v43 = vpop.eup %9072  ;;  %v1355_v24 = vadd.f32 %v16026_v9, %v1272_v27  ;;  %v1033_v29 = vadd.f32 %v1001_v45, %v16027_v11  ;;  %v1242_v39 = vmul.f32 %v10346_v36, %v919_v14  ;;  %v1550_v18 = vadd.f32 %v10459_v21, %v1511_v17  ;;  %v16031_v49 = vld [vmem:[#allocation98_spill] sm:$0xff] }
 0x1d5   : > { %9080 = vtanh.f32 %v1551_v25  ;;  %v1356_v32 = vadd.f32 %v16028_v56, %v1273_v8  ;;  %v1514_v37 = vadd.f32 %v1482_v1, %v1434_v28  ;;  %v10594_v55 = vpop.eup %9074  ;;  %v1195_v33 = vadd.f32 %v10319_v61, %v1115_v40  ;;  %v927_v61 = vpop.permute.xlu0 %926  ;;  %v16033_v40 = vld [vmem:[#allocation48_spill] sm:$0xff] }
 0x1d6   : > { %v1116_v42 = vadd.f32 %v16029_v2, %v1033_v29  ;;  %v1274_v31 = vadd.f32 %v1242_v39, %v1194_v38  ;;  %v1002_v54 = vmul.f32 %v10277_v41, %v923_v44  ;;  %v1675_v12 = vrot.slane %v10571_v51, 7  ;;  %v931_v39 = vpop.permute.xlu1 %930 }
 0x1d7   : > { %v1624_v52 = vrot.slane %v10586_v43, 1  ;;  %v1552_v30 = vadd.f32 %v10459_v21, %v1513_v3  ;;  %v1243_v23 = vmul.f32 %v10346_v36, %v923_v44  ;;  %v1678_v53 = vrot.slane %v10586_v43, 7 }
 0x1d8   : > { %v1435_v22 = vadd.f32 %v10313_v62, %v1355_v24  ;;  %v1436_v57 = vadd.f32 %v10323_v6, %v1356_v32  ;;  %v1034_v58 = vadd.f32 %v1002_v54, %v16030_v46  ;;  %v1625_v27 = vrot.slane %v10594_v55, 1  ;;  %v16034_v24 = vld [vmem:[#allocation49_spill] sm:$0xff] }
 0x1d9   : > { %v10607_v17 = vpop.eup %9076  ;;  %9082 = vtanh.f32 %v1550_v18  ;;  %v1275_v13 = vadd.f32 %v1243_v23, %v1195_v33  ;;  %v1196_v25 = vadd.f32 %v16031_v49, %v1116_v42  ;;  %v1553_v28 = vadd.f32 %v10459_v21, %v1514_v37  ;;  %v16035_v18 = vld [vmem:[#allocation99_spill] sm:$0xff]  ;;  %v16036_v42 = vld [vmem:[#allocation64_spill] sm:$0xff] }
 0x1da   : > { %v1357_v15 = vadd.f32 %v16032_v26, %v1274_v31  ;;  %v1483_v19 = vmul.f32 %v10415_v63, %v919_v14  ;;  %v1484_v62 = vmul.f32 %v10415_v63, %v923_v44  ;;  %v1681_v6 = vrot.slane %v10594_v55, 7  ;;  %v16087_v55 = vld [vmem:[#allocation71_spill] sm:$0xff] }
 0x1db   : > { %9084 = vtanh.f32 %v1552_v30  ;;  %v1003_v38 = vmul.f32 %v10277_v41, %v927_v61  ;;  %v1244_v45 = vmul.f32 %v10346_v36, %v927_v61  ;;  %v1117_v8 = vadd.f32 %v16033_v40, %v1034_v58  ;;  %v16037_v30 = vld [vmem:[#allocation100_spill] sm:$0xff] }
 0x1dc   : > { %v10618_v3 = vpop.eup %9078  ;;  %v1515_v5 = vadd.f32 %v1483_v19, %v1435_v22  ;;  %v1516_v1 = vadd.f32 %v1484_v62, %v1436_v57  ;;  %v1673_v9 = vrot.slane %v10544_v50, 7  ;;  %v1358_v11 = vadd.f32 %v16034_v24, %v1275_v13  ;;  %v16038_v57 = vld [vmem:[#allocation51_spill] sm:$0xff]  ;;  %v16040_v62 = vld [vmem:[#allocation50_spill] sm:$0xff] }
 0x1dd   : > { %v1276_v14 = vadd.f32 %v1244_v45, %v1196_v25  ;;  %v1765_v44 = vrot.slane %v10544_v50, 5  ;;  %v10627_v29 = vsel %vm354_vm0, %v1622_v59, %v1672_v34  ;;  %9086 = vtanh.f32 %v1553_v28 }
 0x1de   : > { %v1437_v56 = vadd.f32 %v16035_v18, %v1357_v15  ;;  %v1485_v32 = vmul.f32 %v10415_v63, %v927_v61  ;;  %v10632_v37 = vsel %vm354_vm0, %v1672_v34, %v1673_v9  ;;  %v1035_v31 = vadd.f32 %v1003_v38, %v16036_v42  ;;  %v16039_v61 = vld [vmem:[#allocation101_spill] sm:$0xff]  ;;  %v935_v15 = vpop.permute.xlu0 %934 }
 0x1df   : > { %v10634_v2 = vpop.eup %9080  ;;  %v10638_v50 = vsel %vm354_vm0, %v1673_v9, %v1765_v44  ;;  %v1864_v35 = vrot.slane %v10627_v29, 1  ;;  %v1865_v59 = vrot.slane %v10632_v37, 1  ;;  %v1555_v33 = vadd.f32 %v10459_v21, %v1516_v1  ;;  %v16043_v44 = vld [vmem:[#allocation103_spill] sm:$0xff] }
 0x1e0   : > { %v1867_v54 = vrot.slane %v10638_v50, 1  ;;  %v1197_v23 = vadd.f32 %v16037_v30, %v1117_v8  ;;  %v1004_v34 = vmul.f32 %v10277_v41, %v931_v39  ;;  %v1554_v22 = vadd.f32 %v10459_v21, %v1515_v5  ;;  %v16042_v5 = vld [vmem:[#allocation72_spill] sm:$0xff] }
 0x1e1   : > { %v1359_v46 = vadd.f32 %v16038_v57, %v1276_v14  ;;  %v1866_v58 = vsel %vm1858_vm3, %v1864_v35, %v1865_v59  ;;  %v1438_v13 = vadd.f32 %v16039_v61, %v1358_v11  ;;  %v1517_v25 = vadd.f32 %v1485_v32, %v1437_v56  ;;  %v16044_v35 = vld [vmem:[#allocation52_spill] sm:$0xff]  ;;  %v16047_v57 = vld [vmem:[#allocation55_spill] sm:$0xff] }
 0x1e2   : > { %v1868_v28 = vsel %vm1858_vm3, %v1865_v59, %v1867_v54  ;;  %v1245_v26 = vmul.f32 %v10346_v36, %v931_v39  ;;  %v1118_v38 = vadd.f32 %v16040_v62, %v1035_v31  ;;  %v1036_v40 = vadd.f32 %v1004_v34, %v16042_v5 }
 0x1e3   : > { %v10653_v19 = vpop.eup %9082  ;;  %v10656_v45 = vpack.i.bf16 %v1868_v28, %v1866_v58  ;;  %v1486_v8 = vmul.f32 %v10415_v63, %v931_v39  ;;  %v1684_v1 = vrot.slane %v10634_v2, 7  ;;  %9088 = vtanh.f32 %v1555_v33  ;;  %v16045_v33 = vld [vmem:[#allocation102_spill] sm:$0xff]  ;;  %v939_v58 = vpop.permute.xlu1 %938 }
 0x1e4   : > { %v1277_v9 = vadd.f32 %v1245_v26, %v1197_v23  ;;  %v1621_v24 = vrot.slane %v10577_v16, 1  ;;  %v1439_v18 = vadd.f32 %v16043_v44, %v1359_v46  ;;  %v1005_v56 = vmul.f32 %v10277_v41, %v935_v15 }
 0x1e5   : > { %16041 = vst [vmem:[#allocation23_spill] sm:$0xff] %v10656_v45  ;;  %v10662_v11 = vpop.eup %9084  ;;  %7968 = vrot.lane.b32.xlu0 %v10656_v45, %s9251_s26  ;;  %v1518_v14 = vadd.f32 %v1486_v8, %v1438_v13  ;;  %v1669_v39 = vrot.slane %v10577_v16, 7  ;;  %9090 = vtanh.f32 %v1554_v22  ;;  %v1556_v32 = vadd.f32 %v10459_v21, %v1517_v25  ;;  %v16049_v13 = vld [vmem:[#allocation73_spill] sm:$0xff] }
 0x1e6   : > { %v1670_v42 = vrot.slane %v10582_v60, 7  ;;  %v1764_v31 = vrot.slane %v10582_v60, 5  ;;  %v1119_v59 = vadd.f32 %v16044_v35, %v1036_v40  ;;  %v1198_v54 = vadd.f32 %v16045_v33, %v1118_v38 }
 0x1e7   : > { %v1487_v30 = vmul.f32 %v10415_v63, %v935_v15  ;;  %v10676_v23 = vsel %vm354_vm0, %v1621_v24, %v1669_v39  ;;  %v10678_v34 = vpop.eup %9086  ;;  %v1360_v16 = vadd.f32 %v16047_v57, %v1277_v9  ;;  %v1246_v22 = vmul.f32 %v10346_v36, %v935_v15  ;;  %v16050_v9 = vld [vmem:[#allocation104_spill] sm:$0xff] }
 0x1e8   : > { %16046 = vst [vmem:[#allocation24_spill] sm:$0xff] %v10676_v23  ;;  %v10683_v46 = vsel %vm354_vm0, %v1669_v39, %v1670_v42  ;;  %v1812_v60 = vsel %vm354_vm0, %v1670_v42, %v1764_v31  ;;  %v1557_v61 = vadd.f32 %v10459_v21, %v1518_v14  ;;  %v1037_v25 = vadd.f32 %v1005_v56, %v16049_v13  ;;  %v943_v31 = vpop.permute.xlu0 %942 }
 0x1e9   : > { %16048 = vst [vmem:[#allocation85_spill] sm:$0xff] %v10683_v46  ;;  %v1519_v28 = vadd.f32 %v1487_v30, %v1439_v18  ;;  %v2025_v26 = vrot.slane %v10676_v23, 2  ;;  %v1862_v62 = vrot.slane %v1812_v60, 1  ;;  %v2026_v38 = vrot.slane %v10683_v46, 2  ;;  %v16051_v18 = vld [vmem:[#allocation105_spill] sm:$0xff] }
 0x1ea   : > { %v2028_v5 = vrot.slane %v1812_v60, 2  ;;  %v1859_v40 = vrot.slane %v10676_v23, 1  ;;  %v1278_v15 = vadd.f32 %v1246_v22, %v1198_v54  ;;  %v1860_v8 = vrot.slane %v10683_v46, 1  ;;  %v16053_v22 = vld [vmem:[#allocation79_spill] sm:$0xff] }
 0x1eb   : > { %v1199_v24 = vadd.f32 %v16050_v9, %v1119_v59  ;;  %v1006_v44 = vmul.f32 %v10277_v41, %v939_v58  ;;  %v2027_v14 = vsel %vm2024_vm4, %v2025_v26, %v2026_v38  ;;  %v1440_v39 = vadd.f32 %v16051_v18, %v1360_v16  ;;  %v16057_v18 = vld [vmem:[#allocation57_spill] sm:$0xff] }
 0x1ec   : > { %v2029_v56 = vsel %vm2024_vm4, %v2026_v38, %v2028_v5  ;;  %v1247_v42 = vmul.f32 %v10346_v36, %v939_v58  ;;  %v1861_v54 = vsel %vm1858_vm3, %v1859_v40, %v1860_v8  ;;  %9092 = vtanh.f32 %v1557_v61 }
 0x1ed   : > { %v10698_v35 = vpack.i.bf16 %v2029_v56, %v2027_v14  ;;  %v2928_v33 = vpack.c.bf16 %v2029_v56, %v2027_v14  ;;  %v10701_v30 = vpop.eup %9088  ;;  %v1558_v59 = vadd.f32 %v10459_v21, %v1519_v28  ;;  %v1863_v57 = vsel %vm1858_vm3, %v1860_v8, %v1862_v62  ;;  %v16055_v28 = vld [vmem:[#allocation56_spill] sm:$0xff]  ;;  %v16056_v8 = vld [vmem:[#allocation58_spill] sm:$0xff]  ;;  %v16066_v14 = vld [vmem:[#allocation81_spill] sm:$0xff] }
 0x1ee   : > { %v1038_v60 = vadd.f32 %v1006_v44, %v16053_v22  ;;  %v10707_v16 = vpack.i.bf16 %v1863_v57, %v1861_v54  ;;  %v1279_v13 = vadd.f32 %v1247_v42, %v1199_v24  ;;  %v1488_v26 = vmul.f32 %v10415_v63, %v939_v58  ;;  %v16059_v54 = vld [vmem:[#allocation80_spill] sm:$0xff]  ;;  %v16062_v22 = vld [vmem:[#allocation75_spill] sm:$0xff] }
 0x1ef   : > { %16052 = vst [vmem:[#allocation83_spill] sm:$0xff] %v10698_v35  ;;  %7864 = vmatprep.mubr.msk.bf16.mxu0 %vm2700_vm5, %v2928_v33  ;;  %v1007_v38 = vmul.f32 %v10277_v41, %v943_v31  ;;  %v10711_v5 = vpop.eup %9090  ;;  %9094 = vtanh.f32 %v1556_v32  ;;  %v1120_v62 = vadd.f32 %v16055_v28, %v1037_v25  ;;  %v1676_v24 = vrot.slane %v10607_v17, 7  ;;  %v947_v32 = vpop.permute.xlu1 %946  ;;  %v16058_v33 = vld [vmem:[#allocation59_spill] sm:$0xff] }
 0x1f0   : > { %16054 = vst [vmem:[#allocation84_spill] sm:$0xff] %v10707_v16  ;;  %7963 = vrot.lane.b32.xlu1 %v10707_v16, %s9251_s26  ;;  %v1121_v9 = vadd.f32 %v16056_v8, %v1038_v60  ;;  %v1520_v44 = vadd.f32 %v1488_v26, %v1440_v39  ;;  %v1766_v58 = vrot.slane %v10607_v17, 5  ;;  %v1361_v42 = vadd.f32 %v16057_v18, %v1278_v15  ;;  %v10748_v8 = vpop.permute.xlu0 %950  ;;  %v16064_v18 = vld [vmem:[#allocation60_spill] sm:$0xff] }
 0x1f1   : > { %9096 = vtanh.f32 %v1558_v59  ;;  %v1362_v25 = vadd.f32 %v16058_v33, %v1279_v13  ;;  %v1039_v57 = vadd.f32 %v1007_v38, %v16059_v54  ;;  %v10729_v39 = vsel %vm354_vm0, %v1675_v12, %v1676_v24  ;;  %v16065_v54 = vld [vmem:[#allocation15_spill] sm:$0xff] }
 0x1f2   : > { %16060 = vst [vmem:[#allocation25_spill] sm:$0xff] %v10729_v39  ;;  %v10736_v17 = vsel %vm354_vm0, %v1623_v48, %v1675_v12  ;;  %v1200_v15 = vadd.f32 %v16062_v22, %v1120_v62  ;;  %v10740_v59 = vsel %vm354_vm0, %v1676_v24, %v1766_v58  ;;  %v1870_v13 = vrot.slane %v10729_v39, 1  ;;  %v16063_v48 = vld [vmem:[#allocation14_spill] sm:$0xff] }
 0x1f3   : > { %16061 = vst [vmem:[#allocation26_spill] sm:$0xff] %v10736_v17  ;;  %v1869_v60 = vrot.slane %v10736_v17, 1  ;;  %v1559_v26 = vadd.f32 %v10459_v21, %v1520_v44  ;;  %v1872_v38 = vrot.slane %v10740_v59, 1  ;;  %v1201_v28 = vadd.f32 %v10377_v20, %v1121_v9 }
 0x1f4   : > { %v1008_v51 = vmul.f32 %v10277_v41, %v947_v32  ;;  %v1441_v12 = vadd.f32 %v16063_v48, %v1361_v42  ;;  %v1248_v62 = vmul.f32 %v10346_v36, %v943_v31  ;;  %v1249_v58 = vmul.f32 %v10346_v36, %v947_v32 }
 0x1f5   : > { %v1871_v24 = vsel %vm1858_vm3, %v1869_v60, %v1870_v13  ;;  %v1122_v33 = vadd.f32 %v16064_v18, %v1039_v57  ;;  %v1873_v44 = vsel %vm1858_vm3, %v1870_v13, %v1872_v38  ;;  %v1442_v22 = vadd.f32 %v16065_v54, %v1362_v25 }
 0x1f6   : > { %v1040_v20 = vadd.f32 %v1008_v51, %v16066_v14  ;;  %v10758_v9 = vpop.eup %9092  ;;  %v1489_v56 = vmul.f32 %v10415_v63, %v943_v31  ;;  %v10761_v40 = vpack.i.bf16 %v1873_v44, %v1871_v24  ;;  %v1281_v42 = vadd.f32 %v1249_v58, %v1201_v28  ;;  %v16068_v14 = vld [vmem:[#allocation62_spill] sm:$0xff]  ;;  %v16069_v31 = vld [vmem:[#allocation65_spill] sm:$0xff] }
 0x1f7   : > { %v1009_v60 = vmul.f32 %v10277_v41, %v10748_v8  ;;  %9098 = vtanh.f32 %v1559_v26  ;;  %v1280_v48 = vadd.f32 %v1248_v62, %v1200_v15  ;;  %v1490_v57 = vmul.f32 %v10415_v63, %v947_v32  ;;  %v16070_v24 = vld [vmem:[#allocation82_spill] sm:$0xff] }
 0x1f8   : > { %16067 = vst [vmem:[#allocation28_spill] sm:$0xff] %v10761_v40  ;;  %v1679_v13 = vrot.slane %v10618_v3, 7  ;;  %7973 = vrot.lane.b32.xlu1 %v10761_v40, %s9251_s26  ;;  %v1123_v25 = vadd.f32 %v16068_v14, %v1040_v20  ;;  %v1364_v51 = vadd.f32 %v16069_v31, %v1281_v42  ;;  %v1767_v58 = vrot.slane %v10618_v3, 5  ;;  %v16071_v26 = vld [vmem:[#allocation106_spill] sm:$0xff]  ;;  %v955_v42 = vpop.permute.xlu1 %954 }
 0x1f9   : > { %v10767_v38 = vpop.eup %9094  ;;  %v1041_v28 = vadd.f32 %v1009_v60, %v16070_v24  ;;  %v1522_v18 = vadd.f32 %v1490_v57, %v1442_v22  ;;  %v1202_v15 = vadd.f32 %v16071_v26, %v1122_v33  ;;  %v10786_v62 = vsel %vm354_vm0, %v1624_v52, %v1678_v53  ;;  %v16074_v3 = vld [vmem:[#allocation66_spill] sm:$0xff]  ;;  %v16075_v57 = vld [vmem:[#allocation61_spill] sm:$0xff] }
 0x1fa   : > { %v10779_v32 = vsel %vm354_vm0, %v1678_v53, %v1679_v13  ;;  %16073 = vst [vmem:[#allocation29_spill] sm:$0xff] %v10786_v62  ;;  %v10793_v33 = vsel %vm354_vm0, %v1679_v13, %v1767_v58  ;;  %v1874_v20 = vrot.slane %v10786_v62, 1  ;;  %v1363_v14 = vadd.f32 %v16075_v57, %v1280_v48  ;;  %v959_v48 = vpop.permute.xlu0 %958 }
 0x1fb   : > { %16072 = vst [vmem:[#allocation86_spill] sm:$0xff] %v10779_v32  ;;  %v10788_v44 = vpop.eup %9096  ;;  %v1124_v22 = vadd.f32 %v16074_v3, %v1041_v28  ;;  %v1521_v43 = vadd.f32 %v1489_v56, %v1441_v12  ;;  %v1250_v52 = vmul.f32 %v10346_v36, %v10748_v8  ;;  %v1875_v53 = vrot.slane %v10779_v32, 1  ;;  %v16076_v28 = vld [vmem:[#allocation16_spill] sm:$0xff] }
 0x1fc   : > { %v1877_v31 = vrot.slane %v10793_v33, 1  ;;  %v1203_v24 = vadd.f32 %v10402_v10, %v1123_v25  ;;  %v1444_v13 = vadd.f32 %v16076_v28, %v1364_v51  ;;  %v1561_v58 = vadd.f32 %v10459_v21, %v1522_v18  ;;  %v16078_v51 = vld [vmem:[#allocation87_spill] sm:$0xff] }
 0x1fd   : > { %v1282_v26 = vadd.f32 %v1250_v52, %v1202_v15  ;;  %v1010_v3 = vmul.f32 %v10277_v41, %v955_v42  ;;  %v1251_v54 = vmul.f32 %v10346_v36, %v955_v42  ;;  %v1876_v56 = vsel %vm1858_vm3, %v1874_v20, %v1875_v53 }
 0x1fe   : > { %v1878_v12 = vsel %vm1858_vm3, %v1875_v53, %v1877_v31  ;;  %v1492_v57 = vmul.f32 %v10415_v63, %v955_v42  ;;  %v1204_v60 = vadd.f32 %v10425_v7, %v1124_v22  ;;  %v1560_v10 = vadd.f32 %v10459_v21, %v1521_v43  ;;  %v16079_v42 = vld [vmem:[#allocation107_spill] sm:$0xff]  ;;  %v16080_v7 = vld [vmem:[#allocation68_spill] sm:$0xff] }
 0x1ff   : > { %v10812_v25 = vpack.i.bf16 %v1878_v12, %v1876_v56  ;;  %v1042_v18 = vadd.f32 %v1010_v3, %v16078_v51  ;;  %v1283_v15 = vadd.f32 %v1251_v54, %v1203_v24  ;;  %v1011_v28 = vmul.f32 %v10277_v41, %v959_v48  ;;  %v16081_v54 = vld [vmem:[#allocation67_spill] sm:$0xff]  ;;  %v16082_v24 = vld [vmem:[#allocation88_spill] sm:$0xff] }
 0x200   : > { %v1524_v52 = vadd.f32 %v1492_v57, %v1444_v13  ;;  %v1252_v61 = vmul.f32 %v10346_v36, %v959_v48  ;;  %v1682_v20 = vrot.slane %v10653_v19, 7  ;;  %9100 = vtanh.f32 %v1561_v58  ;;  %v16084_v58 = vld [vmem:[#allocation69_spill] sm:$0xff]  ;;  %v16086_v57 = vld [vmem:[#allocation70_spill] sm:$0xff] }
 0x201   : > { %16077 = vst [vmem:[#allocation27_spill] sm:$0xff] %v10812_v25  ;;  %v10818_v49 = vpop.eup %9098  ;;  %v1443_v53 = vadd.f32 %v16079_v42, %v1363_v14  ;;  %7978 = vrot.lane.b32.xlu0 %v10812_v25, %s9251_s26  ;;  %v1125_v22 = vadd.f32 %v16080_v7, %v1042_v18  ;;  %v1768_v43 = vrot.slane %v10653_v19, 5  ;;  %v1365_v31 = vadd.f32 %v16081_v54, %v1282_v26  ;;  %v16088_v54 = vld [vmem:[#allocation18_spill] sm:$0xff] }
 0x202   : > { %v1043_v13 = vadd.f32 %v1011_v28, %v16082_v24  ;;  %v1284_v3 = vadd.f32 %v1252_v61, %v1204_v60  ;;  %v10830_v56 = vsel %vm354_vm0, %v1681_v6, %v1682_v20  ;;  %v1366_v12 = vadd.f32 %v16084_v58, %v1283_v15  ;;  %v963_v15 = vpop.permute.xlu1 %962 }
 0x203   : > { %16083 = vst [vmem:[#allocation30_spill] sm:$0xff] %v10830_v56  ;;  %v10838_v14 = vsel %vm354_vm0, %v1625_v27, %v1681_v6  ;;  %v10841_v19 = vsel %vm354_vm0, %v1682_v20, %v1768_v43  ;;  %v1880_v26 = vrot.slane %v10830_v56, 1  ;;  %v1491_v61 = vmul.f32 %v10415_v63, %v10748_v8 }
 0x204   : > { %16085 = vst [vmem:[#allocation32_spill] sm:$0xff] %v10838_v14  ;;  %v1563_v60 = vadd.f32 %v10459_v21, %v1524_v52  ;;  %v1126_v51 = vadd.f32 %v16086_v57, %v1043_v13  ;;  %v1879_v18 = vrot.slane %v10838_v14, 1  ;;  %9102 = vtanh.f32 %v1560_v10  ;;  %v967_v52 = vpop.permute.xlu0 %966  ;;  %v16089_v13 = vld [vmem:[#allocation17_spill] sm:$0xff] }
 0x205   : > { %v1367_v28 = vadd.f32 %v16087_v55, %v1284_v3  ;;  %v1882_v27 = vrot.slane %v10841_v19, 1  ;;  %v1205_v6 = vadd.f32 %v10437_v47, %v1125_v22  ;;  %v1523_v42 = vadd.f32 %v1491_v61, %v1443_v53 }
 0x206   : > { %v1445_v7 = vadd.f32 %v10431_v4, %v1365_v31  ;;  %v1881_v8 = vsel %vm1858_vm3, %v1879_v18, %v1880_v26  ;;  %v1446_v24 = vadd.f32 %v16088_v54, %v1366_v12  ;;  %v1253_v10 = vmul.f32 %v10346_v36, %v963_v15  ;;  %v16091_v31 = vld [vmem:[#allocation19_spill] sm:$0xff] }
 0x207   : > { %v1883_v43 = vsel %vm1858_vm3, %v1880_v26, %v1882_v27  ;;  %v1206_v3 = vadd.f32 %v16089_v13, %v1126_v51  ;;  %9104 = vtanh.f32 %v1563_v60  ;;  %v1493_v58 = vmul.f32 %v10415_v63, %v959_v48  ;;  %v16092_v27 = vld [vmem:[#allocation76_spill] sm:$0xff] }
 0x208   : > { %v10860_v47 = vpack.i.bf16 %v1883_v43, %v1881_v8  ;;  %v1012_v53 = vmul.f32 %v10277_v41, %v963_v15  ;;  %v1285_v22 = vadd.f32 %v1253_v10, %v1205_v6  ;;  %v1494_v4 = vmul.f32 %v10415_v63, %v963_v15  ;;  %v971_v10 = vpop.permute.xlu1 %970  ;;  %v975_v13 = vpop.permute.xlu0 %974 }
 0x209   : > { %v1447_v61 = vadd.f32 %v16091_v31, %v1367_v28  ;;  %v1254_v26 = vmul.f32 %v10346_v36, %v967_v52  ;;  %v1562_v12 = vadd.f32 %v10459_v21, %v1523_v42  ;;  %v1525_v57 = vadd.f32 %v1493_v58, %v1445_v7  ;;  %v16098_v31 = vld [vmem:[#allocation92_spill] sm:$0xff] }
 0x20a   : > { %16090 = vst [vmem:[#allocation89_spill] sm:$0xff] %v10860_v47  ;;  %7983 = vrot.lane.b32.xlu1 %v10860_v47, %s9251_s26  ;;  %v1685_v60 = vrot.slane %v10662_v11, 7  ;;  %v1769_v48 = vrot.slane %v10662_v11, 5  ;;  %v10871_v51 = vpop.eup %9100  ;;  %v1526_v18 = vadd.f32 %v1494_v4, %v1446_v24  ;;  %v1013_v55 = vmul.f32 %v10277_v41, %v967_v52  ;;  %v16096_v41 = vld [vmem:[#allocation91_spill] sm:$0xff] }
 0x20b   : > { %v1286_v15 = vadd.f32 %v1254_v26, %v1206_v3  ;;  %v1495_v28 = vmul.f32 %v10415_v63, %v967_v52  ;;  %v1368_v36 = vadd.f32 %v16092_v27, %v1285_v22  ;;  %v16094_v42 = vrot.slane %v10634_v2, 1  ;;  %v16097_v52 = vld [vmem:[#allocation78_spill] sm:$0xff] }
 0x20c   : > { %v10879_v6 = vsel %vm354_vm0, %v1684_v1, %v1685_v60  ;;  %v10889_v7 = vsel %vm354_vm0, %v1685_v60, %v1769_v48  ;;  %v1044_v8 = vadd.f32 %v1012_v53, %v16096_v41  ;;  %9106 = vtanh.f32 %v1562_v12  ;;  %v16099_v48 = vld [vmem:[#allocation22_spill] sm:$0xff]  ;;  %v16111_v53 = vld [vmem:[#allocation96_spill] sm:$0xff] }
 0x20d   : > { %16093 = vst [vmem:[#allocation33_spill] sm:$0xff] %v10879_v6  ;;  %v10886_v11 = vsel %vm354_vm0, %v16094_v42, %v1684_v1  ;;  %v1369_v43 = vadd.f32 %v16097_v52, %v1286_v15  ;;  %v1527_v54 = vadd.f32 %v1495_v28, %v1447_v61  ;;  %v1885_v2 = vrot.slane %v10879_v6, 1  ;;  %v16100_v28 = vld [vmem:[#allocation74_spill] sm:$0xff] }
 0x20e   : > { %16095 = vst [vmem:[#allocation31_spill] sm:$0xff] %v10886_v11  ;;  %v1884_v24 = vrot.slane %v10886_v11, 1  ;;  %v1887_v1 = vrot.slane %v10889_v7, 1  ;;  %v10897_v58 = vpop.eup %9102  ;;  %v1564_v4 = vadd.f32 %v10459_v21, %v1525_v57  ;;  %v1045_v61 = vadd.f32 %v1013_v55, %v16098_v31  ;;  %v10929_v31 = vpop.permute.xlu0 %1057 }
 0x20f   : > { %v1565_v26 = vadd.f32 %v10459_v21, %v1526_v18  ;;  %v1448_v15 = vadd.f32 %v16099_v48, %v1368_v36  ;;  %v1127_v27 = vadd.f32 %v16100_v28, %v1044_v8  ;;  %v1566_v42 = vadd.f32 %v10459_v21, %v1527_v54  ;;  %v16105_v54 = vld [vmem:[#allocation77_spill] sm:$0xff] }
 0x210   : > { %v1886_v60 = vsel %vm1858_vm3, %v1884_v24, %v1885_v2  ;;  %v1888_v12 = vsel %vm1858_vm3, %v1885_v2, %v1887_v1  ;;  %v1449_v52 = vadd.f32 %v10510_v0, %v1369_v43  ;;  %v1496_v57 = vmul.f32 %v10415_v63, %v971_v10  ;;  %v1054_v1 = vpop.permute.xlu1 %1053 }
 0x211   : > { %v10909_v41 = vpack.i.bf16 %v1888_v12, %v1886_v60  ;;  %v10912_v22 = vpop.eup %9104  ;;  %v1688_v18 = vrot.slane %v10711_v5, 7  ;;  %v1770_v55 = vrot.slane %v10711_v5, 5  ;;  %v16102_v24 = vrot.slane %v10678_v34, 7 }
 0x212   : > { %v16103_v36 = vrot.slane %v10678_v34, 1  ;;  %9108 = vtanh.f32 %v1564_v4  ;;  %v1128_v2 = vadd.f32 %v16105_v54, %v1045_v61  ;;  %v1497_v0 = vmul.f32 %v10415_v63, %v975_v13  ;;  %v9190_v61 = vld [vmem:[%s15656_s1 + $0x2] ss:$0 sm:$0xff] }
 0x213   : > { %16101 = vst [vmem:[#allocation34_spill] sm:$0xff] %v10909_v41  ;;  %7988 = vrot.lane.b32.xlu0 %v10909_v41, %s9251_s26  ;;  %9110 = vtanh.f32 %v1565_v26  ;;  %v1528_v5 = vadd.f32 %v1496_v57, %v1448_v15  ;;  %v16106_v60 = vmov %v16102_v24  ;;  %v10937_v4 = vsel %vm354_vm0, %v1688_v18, %v1770_v55  ;;  %v16108_v15 = vld [vmem:[#allocation20_spill] sm:$0xff]  ;;  %v16109_v54 = vld [vmem:[#allocation21_spill] sm:$0xff] }
 0x214   : > { %v10922_v8 = vsel %vm354_vm0, %v16103_v36, %v16102_v24  ;;  %v10934_v12 = vsel %vm354_vm0, %v16106_v60, %v1688_v18  ;;  %v1014_v63 = vmul.f32 %v9190_v61, %v971_v10  ;;  %v1529_v48 = vadd.f32 %v1497_v0, %v1449_v52  ;;  %v10950_v18 = vld [vmem:[%s15656_s1 + $0x5] ss:$0 sm:$0xff] }
 0x215   : > { %16104 = vst [vmem:[#allocation90_spill] sm:$0xff] %v10922_v8  ;;  %v1889_v43 = vrot.slane %v10922_v8, 1  ;;  %16107 = vst [vmem:[#allocation36_spill] sm:$0xff] %v10934_v12  ;;  %v1890_v28 = vrot.slane %v10934_v12, 1  ;;  %v1892_v24 = vrot.slane %v10937_v4, 1  ;;  %9112 = vtanh.f32 %v1566_v42 }
 0x216   : > { %v1207_v57 = vadd.f32 %v16108_v15, %v1127_v27  ;;  %v1255_v55 = vmul.f32 %v10950_v18, %v971_v10  ;;  %v1208_v0 = vadd.f32 %v16109_v54, %v1128_v2  ;;  %v10956_v60 = vpop.eup %9106  ;;  %v1567_v26 = vadd.f32 %v10459_v21, %v1528_v5  ;;  %v9192_v27 = vld [vmem:[%s15656_s1 + $0x3] ss:$0 sm:$0xff]  ;;  %v10968_v54 = vpop.permute.xlu0 %1137 }
 0x217   : > { %v1891_v52 = vsel %vm1858_vm3, %v1889_v43, %v1890_v28  ;;  %v1893_v36 = vsel %vm1858_vm3, %v1890_v28, %v1892_v24  ;;  %v1015_v42 = vmul.f32 %v9190_v61, %v975_v13  ;;  %v1097_v15 = vmul.f32 %v9192_v27, %v1054_v1  ;;  %v1134_v24 = vpop.permute.xlu1 %1133  ;;  %v10975_v61 = vld [vmem:[%s15656_s1 + $0x6] ss:$0 sm:$0xff] }
 0x218   : > { %v10959_v34 = vpack.i.bf16 %v1893_v36, %v1891_v52  ;;  %v1256_v10 = vmul.f32 %v10950_v18, %v975_v13  ;;  %v1568_v43 = vadd.f32 %v10459_v21, %v1529_v48  ;;  %v1046_v28 = vadd.f32 %v1014_v63, %v16111_v53 }
 0x219   : > { %v1691_v2 = vrot.slane %v10767_v38, 7  ;;  %v1287_v5 = vadd.f32 %v1255_v55, %v1207_v57  ;;  %v1338_v13 = vmul.f32 %v10975_v61, %v1054_v1  ;;  %v1771_v21 = vrot.slane %v10767_v38, 5 }
 0x21a   : > { %16110 = vst [vmem:[#allocation35_spill] sm:$0xff] %v10959_v34  ;;  %7993 = vrot.lane.b32.xlu1 %v10959_v34, %s9251_s26  ;;  %v16112_v53 = vrot.slane %v10701_v30, 7  ;;  %v16113_v63 = vrot.slane %v10701_v30, 1  ;;  %v1288_v52 = vadd.f32 %v1256_v10, %v1208_v0  ;;  %v1339_v57 = vmul.f32 %v10975_v61, %v10929_v31  ;;  %v16116_v0 = vld [vmem:[#allocation97_spill] sm:$0xff]  ;;  %v11030_v45 = vpop.permute.xlu0 %1217 }
 0x21b   : > { %9114 = vtanh.f32 %v1567_v26  ;;  %v10994_v38 = vadd.f32 %v1097_v15, %v1046_v28  ;;  %v10997_v20 = vsel %vm354_vm0, %v1691_v2, %v1771_v21  ;;  %v1047_v10 = vadd.f32 %v1015_v42, %v16116_v0  ;;  %v11007_v30 = vld [vmem:[%s15656_s1 + $0x7] ss:$0 sm:$0xff]  ;;  %v1214_v16 = vpop.permute.xlu1 %1213 }
 0x21c   : > { %v10984_v48 = vsel %vm354_vm0, %v16113_v63, %v16112_v53  ;;  %v16115_v55 = vmov %v16112_v53  ;;  %v11000_v63 = vpop.eup %9108  ;;  %v1897_v3 = vrot.slane %v10997_v20, 1  ;;  %v1418_v26 = vmul.f32 %v11007_v30, %v1134_v24 }
 0x21d   : > { %16114 = vst [vmem:[#allocation37_spill] sm:$0xff] %v10984_v48  ;;  %v10991_v36 = vsel %vm354_vm0, %v16115_v55, %v1691_v2  ;;  %v1894_v1 = vrot.slane %v10984_v48, 1  ;;  %v1694_v15 = vrot.slane %v10788_v44, 7  ;;  %v11011_v28 = vpop.eup %9110  ;;  %v1419_v21 = vmul.f32 %v11007_v30, %v10968_v54 }
 0x21e   : > { %v1895_v53 = vrot.slane %v10991_v36, 1  ;;  %v1772_v42 = vrot.slane %v10788_v44, 5  ;;  %v16117_v55 = vrot.slane %v10758_v9, 7  ;;  %v16118_v0 = vrot.slane %v10758_v9, 1 }
 0x21f   : > { %v1370_v41 = vadd.f32 %v1338_v13, %v1287_v5  ;;  %v1371_v47 = vadd.f32 %v1339_v57, %v1288_v52  ;;  %v11032_v44 = vpop.eup %9112  ;;  %9116 = vtanh.f32 %v1568_v43  ;;  %v11049_v57 = vld [vmem:[%s15656_s1 + $0x8] ss:$0 sm:$0xff]  ;;  %v1697_v43 = vrot.slane %v10897_v58, 7 }
 0x220   : > { %v1896_v2 = vsel %vm1858_vm3, %v1894_v1, %v1895_v53  ;;  %v11022_v34 = vsel %vm354_vm0, %v16118_v0, %v16117_v55  ;;  %v1898_v25 = vsel %vm1858_vm3, %v1895_v53, %v1897_v3  ;;  %v16120_v40 = vmov %v16117_v55 }
 0x221   : > { %16119 = vst [vmem:[#allocation38_spill] sm:$0xff] %v11022_v34  ;;  %v11028_v1 = vsel %vm354_vm0, %v16120_v40, %v1694_v15  ;;  %v11034_v46 = vpack.i.bf16 %v1898_v25, %v1896_v2  ;;  %v11037_v23 = vsel %vm354_vm0, %v1694_v15, %v1772_v42  ;;  %v1899_v5 = vrot.slane %v11022_v34, 1 }
 0x222   : > { %16121 = vst [vmem:[#allocation94_spill] sm:$0xff] %v11028_v1  ;;  %v1900_v13 = vrot.slane %v11028_v1, 1  ;;  %v1450_v9 = vadd.f32 %v1418_v26, %v1370_v41  ;;  %v1902_v40 = vrot.slane %v11037_v23, 1  ;;  %v1451_v52 = vadd.f32 %v1419_v21, %v1371_v47 }
 0x223   : > { %16122 = vst [vmem:[#allocation93_spill] sm:$0xff] %v11034_v46  ;;  %7998 = vrot.lane.b32.xlu0 %v11034_v46, %s9251_s26  ;;  %v1498_v53 = vmul.f32 %v11049_v57, %v1214_v16  ;;  %v1499_v15 = vmul.f32 %v11049_v57, %v11030_v45  ;;  %v1773_v26 = vrot.slane %v10897_v58, 5  ;;  %v16123_v47 = vrot.slane %v10818_v49, 7 }
 0x224   : > { %v1901_v25 = vsel %vm1858_vm3, %v1899_v5, %v1900_v13  ;;  %v1903_v41 = vsel %vm1858_vm3, %v1900_v13, %v1902_v40  ;;  %v16124_v2 = vrot.slane %v10818_v49, 1  ;;  %v1098_v42 = vmul.f32 %v9192_v27, %v10929_v31  ;;  %v9196_v13 = vld [vmem:[%s15656_s1 + $0x4] ss:$0 sm:$0xff]  ;;  %v11086_v27 = vld [vmem:[%s15657_s2] ss:$0 sm:$0xff] }
 0x225   : > { %v11065_v55 = vpack.i.bf16 %v1903_v41, %v1901_v25  ;;  %v1530_v0 = vadd.f32 %v1498_v53, %v1450_v9  ;;  %v1531_v5 = vadd.f32 %v1499_v15, %v1451_v52  ;;  %v1177_v40 = vmul.f32 %v9196_v13, %v1134_v24  ;;  %v11079_v31 = vpop.eup %9114 }
 0x226   : > { %v11062_v21 = vsel %vm354_vm0, %v16124_v2, %v16123_v47  ;;  %v16127_v58 = vmov %v16123_v47  ;;  %v11076_v46 = vsel %vm354_vm0, %v1697_v43, %v1773_v26  ;;  %v1705_v25 = vrot.slane %v11011_v28, 7 }
 0x227   : > { %16125 = vst [vmem:[#allocation39_spill] sm:$0xff] %v11062_v21  ;;  %16126 = vst [vmem:[#allocation40_spill] sm:$0xff] %v11065_v55  ;;  %v11073_v3 = vsel %vm354_vm0, %v16127_v58, %v1697_v43  ;;  %v1904_v47 = vrot.slane %v11062_v21, 1  ;;  %8003 = vrot.lane.b32.xlu1 %v11065_v55, %s9251_s26  ;;  %v1569_v49 = vadd.f32 %v11086_v27, %v1530_v0  ;;  %v1907_v52 = vrot.slane %v11076_v46, 1 }
 0x228   : > { %16128 = vst [vmem:[#allocation41_spill] sm:$0xff] %v11073_v3  ;;  %16129 = vst [vmem:[#allocation95_spill] sm:$0xff] %v11076_v46  ;;  %v1570_v24 = vadd.f32 %v11086_v27, %v1531_v5  ;;  %v1905_v9 = vrot.slane %v11073_v3, 1  ;;  %v1178_v53 = vmul.f32 %v9196_v13, %v10968_v54  ;;  %v1700_v15 = vrot.slane %v10956_v60, 7  ;;  %v1297_v54 = vpop.permute.xlu1 %1296 }
 0x229   : > { %v1774_v41 = vrot.slane %v10956_v60, 5  ;;  %9118 = vtanh.f32 %v1569_v49  ;;  %v16130_v2 = vrot.slane %v10871_v51, 7  ;;  %v16131_v0 = vrot.slane %v10871_v51, 1  ;;  %v1301_v49 = vpop.permute.xlu0 %1300 }
 0x22a   : > { %v1906_v43 = vsel %vm1858_vm3, %v1904_v47, %v1905_v9  ;;  %v1908_v26 = vsel %vm1858_vm3, %v1905_v9, %v1907_v52  ;;  %v1130_v58 = vadd.f32 %v1098_v42, %v1047_v10  ;;  %9120 = vtanh.f32 %v1570_v24  ;;  %v9117_v10 = vpop.eup %9116 }
 0x22b   : > { %v11103_v5 = vsel %vm354_vm0, %v16131_v0, %v16130_v2  ;;  %v11105_v55 = vpack.i.bf16 %v1908_v26, %v1906_v43  ;;  %v16134_v13 = vmov %v16130_v2  ;;  %v1209_v47 = vadd.f32 %v1177_v40, %v10994_v38 }
 0x22c   : > { %16132 = vst [vmem:[#allocation42_spill] sm:$0xff] %v11103_v5  ;;  %v11110_v60 = vsel %vm354_vm0, %v16134_v13, %v1700_v15  ;;  %v11114_v9 = vsel %vm354_vm0, %v1700_v15, %v1774_v41  ;;  %v1909_v52 = vrot.slane %v11103_v5, 1  ;;  %v1257_v42 = vmul.f32 %v10950_v18, %v1214_v16 }
 0x22d   : > { %16133 = vst [vmem:[#allocation53_spill] sm:$0xff] %v11105_v55  ;;  %16135 = vst [vmem:[#allocation44_spill] sm:$0xff] %v11110_v60  ;;  %v1910_v2 = vrot.slane %v11110_v60, 1  ;;  %8008 = vrot.lane.b32.xlu0 %v11105_v55, %s9251_s26  ;;  %v1912_v51 = vrot.slane %v11114_v9, 1  ;;  %v1703_v24 = vrot.slane %v11000_v63, 7  ;;  %v1775_v38 = vrot.slane %v11000_v63, 5 }
 0x22e   : > { %v1634_v40 = vrot.slane %v11079_v31, 1  ;;  %v1210_v15 = vadd.f32 %v1178_v53, %v1130_v58  ;;  %v16136_v43 = vrot.slane %v10912_v22, 7  ;;  %v16137_v26 = vrot.slane %v10912_v22, 1  ;;  %v1377_v22 = vpop.permute.xlu1 %1376 }
 0x22f   : > { %v1911_v41 = vsel %vm1858_vm3, %v1909_v52, %v1910_v2  ;;  %v1708_v0 = vrot.slane %v11079_v31, 7  ;;  %v1913_v13 = vsel %vm1858_vm3, %v1910_v2, %v1912_v51  ;;  %v11141_v53 = vsel %vm354_vm0, %v1703_v24, %v1775_v38 }
 0x230   : > { %v11131_v16 = vsel %vm354_vm0, %v16137_v26, %v16136_v43  ;;  %v16139_v55 = vmov %v16136_v43  ;;  %16141 = vst [vmem:[#allocation45_spill] sm:$0xff] %v11141_v53  ;;  %v11143_v58 = vpack.i.bf16 %v1913_v13, %v1911_v41  ;;  %v1917_v43 = vrot.slane %v11141_v53, 1 }
 0x231   : > { %16138 = vst [vmem:[#allocation43_spill] sm:$0xff] %v11131_v16  ;;  %v11138_v63 = vsel %vm354_vm0, %v16139_v55, %v1703_v24  ;;  %v1914_v52 = vrot.slane %v11131_v16, 1  ;;  %v1258_v31 = vmul.f32 %v10950_v18, %v11030_v45  ;;  %v1340_v2 = vmul.f32 %v10975_v61, %v1297_v54  ;;  %v1381_v24 = vpop.permute.xlu0 %1380 }
 0x232   : > { %16140 = vst [vmem:[#allocation54_spill] sm:$0xff] %v11138_v63  ;;  %16142 = vst [vmem:[#allocation46_spill] sm:$0xff] %v11143_v58  ;;  %v1915_v46 = vrot.slane %v11138_v63, 1  ;;  %v1706_v55 = vrot.slane %v11032_v44, 7  ;;  %v1776_v51 = vrot.slane %v11032_v44, 5  ;;  %8013 = vrot.lane.b32.xlu1 %v11143_v58, %s9251_s26  ;;  %v16143_v26 = vrot.slane %v11011_v28, 1 }
 0x233   : > { %v1709_v45 = vrot.slane %v9117_v10, 7  ;;  %v1289_v18 = vadd.f32 %v1257_v42, %v1209_v47  ;;  %v1341_v54 = vmul.f32 %v10975_v61, %v1301_v49  ;;  %v9119_v58 = vpop.eup %9118  ;;  %v1290_v42 = vadd.f32 %v1258_v31, %v1210_v15 }
 0x234   : > { %v1916_v38 = vsel %vm1858_vm3, %v1914_v52, %v1915_v46  ;;  %v1918_v41 = vsel %vm1858_vm3, %v1915_v46, %v1917_v43  ;;  %v11160_v13 = vsel %vm354_vm0, %v16143_v26, %v1705_v25  ;;  %v11166_v44 = vsel %vm354_vm0, %v1705_v25, %v1706_v55  ;;  %v9121_v43 = vpop.eup %9120  ;;  %v1457_v26 = vpop.permute.xlu1 %1456 }
 0x235   : > { %16144 = vst [vmem:[#allocation63_spill] sm:$0xff] %v11160_v13  ;;  %v11163_v53 = vpack.i.bf16 %v1918_v41, %v1916_v38  ;;  %16146 = vst [vmem:[#allocation47_spill] sm:$0xff] %v11166_v44  ;;  %v11169_v63 = vsel %vm354_vm0, %v1706_v55, %v1776_v51  ;;  %v1919_v46 = vrot.slane %v11160_v13, 1  ;;  %v1920_v28 = vrot.slane %v11166_v44, 1 }
 0x236   : > { %v11174_v52 = vsel %vm354_vm0, %v1708_v0, %v1709_v45  ;;  %v1711_v47 = vrot.slane %v9119_v58, 7  ;;  %v1372_v61 = vadd.f32 %v1340_v2, %v1289_v18  ;;  %v1420_v49 = vmul.f32 %v11007_v30, %v1377_v22  ;;  %v1461_v22 = vpop.permute.xlu0 %1460 }
 0x237   : > { %16145 = vst [vmem:[#allocation98_spill] sm:$0xff] %v11163_v53  ;;  %16147 = vst [vmem:[#allocation48_spill] sm:$0xff] %v11174_v52  ;;  %8018 = vrot.lane.b32.xlu0 %v11163_v53, %s9251_s26  ;;  %v1635_v25 = vrot.slane %v9119_v58, 1  ;;  %v1712_v38 = vrot.slane %v9121_v43, 7  ;;  %v1921_v55 = vsel %vm1858_vm3, %v1919_v46, %v1920_v28  ;;  %v1922_v51 = vrot.slane %v11169_v63, 1 }
 0x238   : > { %v1778_v41 = vrot.slane %v9121_v43, 5  ;;  %v1777_v44 = vrot.slane %v9117_v10, 5  ;;  %v11182_v13 = vsel %vm354_vm0, %v1634_v40, %v1708_v0  ;;  %v1925_v15 = vrot.slane %v11174_v52, 1 }
 0x239   : > { %16148 = vst [vmem:[#allocation49_spill] sm:$0xff] %v11182_v13  ;;  %v1373_v31 = vadd.f32 %v1341_v54, %v1290_v42  ;;  %v1421_v2 = vmul.f32 %v11007_v30, %v1381_v24  ;;  %v1923_v18 = vsel %vm1858_vm3, %v1920_v28, %v1922_v51  ;;  %v1924_v58 = vrot.slane %v11182_v13, 1 }
 0x23a   : > { %v1452_v53 = vadd.f32 %v1420_v49, %v1372_v61  ;;  %v11188_v46 = vpack.i.bf16 %v1923_v18, %v1921_v55  ;;  %v11191_v43 = vsel %vm354_vm0, %v1709_v45, %v1777_v44  ;;  %v11194_v10 = vsel %vm354_vm0, %v1711_v47, %v1712_v38 }
 0x23b   : > { %16150 = vst [vmem:[#allocation64_spill] sm:$0xff] %v11194_v10  ;;  %v1500_v40 = vmul.f32 %v11049_v57, %v1457_v26  ;;  %v1926_v0 = vsel %vm1858_vm3, %v1924_v58, %v1925_v15  ;;  %v1927_v30 = vrot.slane %v11191_v43, 1  ;;  %v11200_v24 = vsel %vm354_vm0, %v1635_v25, %v1711_v47 }
 0x23c   : > { %16149 = vst [vmem:[#allocation99_spill] sm:$0xff] %v11188_v46  ;;  %16151 = vst [vmem:[#allocation100_spill] sm:$0xff] %v11200_v24  ;;  %v1501_v54 = vmul.f32 %v11049_v57, %v1461_v22  ;;  %8023 = vrot.lane.b32.xlu1 %v11188_v46, %s9251_s26  ;;  %v11206_v45 = vsel %vm354_vm0, %v1712_v38, %v1778_v41  ;;  %v1929_v44 = vrot.slane %v11200_v24, 1  ;;  %v1930_v28 = vrot.slane %v11194_v10, 1  ;;  %v16169_v46 = vld [vmem:[#allocation45_spill] sm:$0xff] }
 0x23d   : > { %v1453_v42 = vadd.f32 %v1421_v2, %v1373_v31  ;;  %v1928_v61 = vsel %vm1858_vm3, %v1925_v15, %v1927_v30  ;;  %v2035_v49 = vrot.slane %v10736_v17, 2  ;;  %v1932_v47 = vrot.slane %v11206_v45, 1 }
 0x23e   : > { %v11213_v25 = vpack.i.bf16 %v1928_v61, %v1926_v0  ;;  %v2036_v57 = vrot.slane %v10729_v39, 2  ;;  %v2038_v55 = vrot.slane %v10740_v59, 2  ;;  %v1931_v38 = vsel %vm1858_vm3, %v1929_v44, %v1930_v28 }
 0x23f   : > { %v1933_v51 = vsel %vm1858_vm3, %v1930_v28, %v1932_v47  ;;  %v2030_v41 = vrot.slane %v10627_v29, 2  ;;  %v2031_v26 = vrot.slane %v10632_v37, 2  ;;  %v2033_v15 = vrot.slane %v10638_v50, 2 }
 0x240   : > { %16152 = vst [vmem:[#allocation51_spill] sm:$0xff] %v11213_v25  ;;  %v1532_v31 = vadd.f32 %v1500_v40, %v1452_v53  ;;  %v1533_v2 = vadd.f32 %v1501_v54, %v1453_v42  ;;  %8028 = vrot.lane.b32.xlu0 %v11213_v25, %s9251_s26  ;;  %v11224_v22 = vpack.i.bf16 %v1933_v51, %v1931_v38  ;;  %v2040_v50 = vrot.slane %v10786_v62, 2 }
 0x241   : > { %v2032_v18 = vsel %vm2024_vm4, %v2030_v41, %v2031_v26  ;;  %v2034_v59 = vsel %vm2024_vm4, %v2031_v26, %v2033_v15  ;;  %v11229_v58 = vsel %vm2024_vm4, %v2035_v49, %v2036_v57  ;;  %v11232_v0 = vsel %vm2024_vm4, %v2036_v57, %v2038_v55 }
 0x242   : > { %16153 = vst [vmem:[#allocation101_spill] sm:$0xff] %v11224_v22  ;;  %8033 = vrot.lane.b32.xlu1 %v11224_v22, %s9251_s26  ;;  %v2041_v53 = vrot.slane %v10779_v32, 2  ;;  %v2045_v40 = vrot.slane %v10838_v14, 2  ;;  %v2046_v30 = vrot.slane %v10830_v56, 2  ;;  %v2048_v54 = vrot.slane %v10841_v19, 2  ;;  %v16165_v22 = vld [vmem:[#allocation54_spill] sm:$0xff] }
 0x243   : > { %v2043_v44 = vrot.slane %v10793_v33, 2  ;;  %v1571_v28 = vadd.f32 %v11086_v27, %v1532_v31  ;;  %v1572_v42 = vadd.f32 %v11086_v27, %v1533_v2  ;;  %v11246_v61 = vpack.i.bf16 %v2034_v59, %v2032_v18 }
 0x244   : > { %8038 = vrot.lane.b32.xlu0 %v10698_v35, %s9252_s25  ;;  %v11249_v49 = vsel %vm2024_vm4, %v2040_v50, %v2041_v53  ;;  %v2050_v19 = vrot.slane %v10886_v11, 2  ;;  %v2051_v33 = vrot.slane %v10879_v6, 2  ;;  %v11258_v57 = vpack.i.bf16 %v11232_v0, %v11229_v58 }
 0x245   : > { %16154 = vst [vmem:[#allocation50_spill] sm:$0xff] %v11246_v61  ;;  %v11252_v47 = vsel %vm2024_vm4, %v2041_v53, %v2043_v44  ;;  %v2055_v27 = vrot.slane %v10922_v8, 2  ;;  %v2056_v55 = vrot.slane %v10934_v12, 2  ;;  %v2053_v38 = vrot.slane %v10889_v7, 2 }
 0x246   : > { %16155 = vst [vmem:[#allocation72_spill] sm:$0xff] %v11258_v57  ;;  %8043 = vrot.lane.b32.xlu1 %v11246_v61, %s9252_s25  ;;  %v11266_v51 = vsel %vm2024_vm4, %v2045_v40, %v2046_v30  ;;  %v11269_v41 = vsel %vm2024_vm4, %v2046_v30, %v2048_v54  ;;  %v2058_v26 = vrot.slane %v10937_v4, 2  ;;  %9122 = vtanh.f32 %v1571_v28 }
 0x247   : > { %v11276_v15 = vpack.i.bf16 %v11252_v47, %v11249_v49  ;;  %v2060_v31 = vrot.slane %v10984_v48, 2  ;;  %v2061_v7 = vrot.slane %v10991_v36, 2  ;;  %9124 = vtanh.f32 %v1572_v42 }
 0x248   : > { %8048 = vrot.lane.b32.xlu0 %v11258_v57, %s9252_s25  ;;  %v11281_v2 = vsel %vm2024_vm4, %v2050_v19, %v2051_v33  ;;  %v11284_v18 = vsel %vm2024_vm4, %v2051_v33, %v2053_v38  ;;  %v2063_v4 = vrot.slane %v10997_v20, 2  ;;  %v11289_v59 = vpack.i.bf16 %v11269_v41, %v11266_v51 }
 0x249   : > { %16156 = vst [vmem:[#allocation103_spill] sm:$0xff] %v11276_v15  ;;  %v11292_v50 = vsel %vm2024_vm4, %v2055_v27, %v2056_v55  ;;  %v2065_v53 = vrot.slane %v11022_v34, 2  ;;  %v11298_v40 = vsel %vm2024_vm4, %v2056_v55, %v2058_v26  ;;  %v2066_v30 = vrot.slane %v11028_v1, 2  ;;  %v16159_v55 = vld [vmem:[#allocation95_spill] sm:$0xff] }
 0x24a   : > { %16157 = vst [vmem:[#allocation52_spill] sm:$0xff] %v11289_v59  ;;  %8053 = vrot.lane.b32.xlu1 %v11276_v15, %s9252_s25  ;;  %v2068_v54 = vrot.slane %v11037_v23, 2  ;;  %v2075_v20 = vrot.slane %v11103_v5, 2  ;;  %v11307_v44 = vpack.i.bf16 %v11284_v18, %v11281_v2  ;;  %v2076_v28 = vrot.slane %v11110_v60, 2 }
 0x24b   : > { %v2078_v42 = vrot.slane %v11114_v9, 2  ;;  %v11312_v19 = vsel %vm2024_vm4, %v2060_v31, %v2061_v7  ;;  %v11315_v33 = vsel %vm2024_vm4, %v2061_v7, %v2063_v4  ;;  %v2070_v23 = vrot.slane %v11062_v21, 2 }
 0x24c   : > { %8058 = vrot.lane.b32.xlu0 %v11289_v59, %s9252_s25  ;;  %16158 = vst [vmem:[#allocation102_spill] sm:$0xff] %v11307_v44  ;;  %v2071_v27 = vrot.slane %v11073_v3, 2  ;;  %v2073_v38 = vrot.slane %v16159_v55, 2  ;;  %v11322_v26 = vpack.i.bf16 %v11298_v40, %v11292_v50  ;;  %v11327_v9 = vsel %vm2024_vm4, %v2065_v53, %v2066_v30  ;;  %v16171_v59 = vld [vmem:[#allocation63_spill] sm:$0xff] }
 0x24d   : > { %16161 = vst [vmem:[#allocation73_spill] sm:$0xff] %v11327_v9  ;;  %v11330_v31 = vsel %vm2024_vm4, %v2066_v30, %v2068_v54  ;;  %v11335_v7 = vsel %vm2024_vm4, %v2075_v20, %v2076_v28  ;;  %v11339_v4 = vpack.i.bf16 %v11315_v33, %v11312_v19  ;;  %v2080_v55 = vrot.slane %v11131_v16, 2 }
 0x24e   : > { %16160 = vst [vmem:[#allocation55_spill] sm:$0xff] %v11322_v26  ;;  %8063 = vrot.lane.b32.xlu1 %v11307_v44, %s9252_s25  ;;  %16162 = vst [vmem:[#allocation104_spill] sm:$0xff] %v11330_v31  ;;  %v2081_v25 = vrot.slane %v16165_v22, 2  ;;  %v11344_v53 = vsel %vm2024_vm4, %v2076_v28, %v2078_v42  ;;  %v11347_v30 = vsel %vm2024_vm4, %v2070_v23, %v2071_v27  ;;  %v2083_v20 = vrot.slane %v16169_v46, 2  ;;  %v16172_v28 = vld [vmem:[#allocation47_spill] sm:$0xff] }
 0x24f   : > { %16163 = vst [vmem:[#allocation105_spill] sm:$0xff] %v11335_v7  ;;  %16164 = vst [vmem:[#allocation79_spill] sm:$0xff] %v11339_v4  ;;  %v11350_v54 = vsel %vm2024_vm4, %v2071_v27, %v2073_v38  ;;  %v11355_v44 = vpack.i.bf16 %v11330_v31, %v11327_v9  ;;  %v2085_v15 = vrot.slane %v16171_v59, 2  ;;  %v2086_v42 = vrot.slane %v16172_v28, 2 }
 0x250   : > { %8068 = vrot.lane.b32.xlu0 %v11322_v26, %s9252_s25  ;;  %16166 = vst [vmem:[#allocation56_spill] sm:$0xff] %v11344_v53  ;;  %16167 = vst [vmem:[#allocation58_spill] sm:$0xff] %v11347_v30  ;;  %v9123_v26 = vpop.eup %9122  ;;  %v2088_v23 = vrot.slane %v11169_v63, 2  ;;  %v11366_v46 = vpack.i.bf16 %v11344_v53, %v11335_v7  ;;  %v11370_v27 = vpack.i.bf16 %v11350_v54, %v11347_v30  ;;  %v2090_v35 = vrot.slane %v11182_v13, 2 }
 0x251   : > { %16168 = vst [vmem:[#allocation57_spill] sm:$0xff] %v11350_v54  ;;  %16170 = vst [vmem:[#allocation59_spill] sm:$0xff] %v11355_v44  ;;  %v9125_v57 = vpop.eup %9124  ;;  %v11373_v38 = vsel %vm2024_vm4, %v2080_v55, %v2081_v25  ;;  %v2091_v63 = vrot.slane %v11174_v52, 2  ;;  %v11382_v61 = vsel %vm2024_vm4, %v2085_v15, %v2086_v42  ;;  %v1636_v28 = vrot.slane %v9123_v26, 1 }
 0x252   : > { %8073 = vrot.lane.b32.xlu1 %v11339_v4, %s9252_s25  ;;  %16173 = vst [vmem:[#allocation80_spill] sm:$0xff] %v11366_v46  ;;  %16174 = vst [vmem:[#allocation75_spill] sm:$0xff] %v11370_v27  ;;  %v11376_v4 = vsel %vm2024_vm4, %v2081_v25, %v2083_v20  ;;  %v1714_v59 = vrot.slane %v9123_v26, 7  ;;  %v1715_v22 = vrot.slane %v9125_v57, 7  ;;  %v11387_v55 = vsel %vm2024_vm4, %v2086_v42, %v2088_v23 }
 0x253   : > { %16175 = vst [vmem:[#allocation14_spill] sm:$0xff] %v11373_v38  ;;  %16176 = vst [vmem:[#allocation60_spill] sm:$0xff] %v11376_v4  ;;  %v2095_v25 = vrot.slane %v11200_v24, 2  ;;  %v2096_v20 = vrot.slane %v11194_v10, 2  ;;  %v2098_v52 = vrot.slane %v11206_v45, 2  ;;  %v11401_v42 = vsel %vm2024_vm4, %v2090_v35, %v2091_v63 }
 0x254   : > { %8078 = vrot.lane.b32.xlu0 %v11355_v44, %s9252_s25  ;;  %v2093_v44 = vrot.slane %v11191_v43, 2  ;;  %16177 = vst [vmem:[#allocation15_spill] sm:$0xff] %v11382_v61  ;;  %16178 = vst [vmem:[#allocation81_spill] sm:$0xff] %v11387_v55  ;;  %v11396_v43 = vpack.i.bf16 %v11376_v4, %v11373_v38  ;;  %v1716_v15 = vsel %vm354_vm0, %v1714_v59, %v1715_v22  ;;  %v16203_v38 = vld [vmem:[#allocation72_spill] sm:$0xff]  ;;  %v16204_v4 = vld [vmem:[#allocation103_spill] sm:$0xff] }
 0x255   : > { %v1811_v26 = vsel %vm354_vm0, %v1636_v28, %v1714_v59  ;;  %16179 = vst [vmem:[#allocation62_spill] sm:$0xff] %v11401_v42  ;;  %v11410_v45 = vpack.i.bf16 %v11387_v55, %v11382_v61  ;;  %v2099_v10 = vsel %vm2024_vm4, %v2096_v20, %v2098_v52  ;;  %v16182_v28 = vld [vmem:[#allocation24_spill] sm:$0xff]  ;;  %v16183_v52 = vld [vmem:[#allocation85_spill] sm:$0xff] }
 0x256   : > { %8083 = vrot.lane.b32.xlu1 %v11370_v27, %s9252_s25  ;;  %v11404_v23 = vsel %vm2024_vm4, %v2091_v63, %v2093_v44  ;;  %v11406_v27 = vpack.i.bf16 %v1716_v15, %v1811_v26  ;;  %v8112_v44 = vpack.i.bf16 %v10632_v37, %v10627_v29  ;;  %v11432_v63 = vpack.i.bf16 %v16183_v52, %v16182_v28  ;;  %v9052_v61 = vld [vmem:[%s15658_s3 + $0x40] sm:$0xff]  }
 0x257   : > { %16180 = vst [vmem:[#allocation65_spill] sm:$0xff] %v11404_v23  ;;  %v11420_v35 = vpack.i.bf16 %v11404_v23, %v11401_v42  ;;  %v11449_v28 = vpack.i.bf16 %v10879_v6, %v10886_v11  ;;  %v2389_v52 = vrot.slane %v1811_v26, 2  ;;  %v2390_v11 = vrot.slane %v1716_v15, 2  ;;  %v9047_v23 = vld [vmem:[%s15658_s3 + $0x18] sm:$0xff]   ;;  %v16199_v55 = vld [vmem:[#allocation93_spill] sm:$0xff] }
 0x258   : > { %8088 = vrot.lane.b32.xlu0 %v11366_v46, %s9252_s25  ;;  %v2097_v46 = vsel %vm2024_vm4, %v2095_v25, %v2096_v20  ;;  %v1779_v25 = vrot.slane %v9125_v57, 5  ;;  %v11439_v20 = vpack.i.bf16 %v10729_v39, %v10736_v17  ;;  %v11453_v57 = vpack.i.bf16 %v10830_v56, %v10838_v14  ;;  %v9046_v14 = vld [vmem:[%s15658_s3 + $0x10] sm:$0xff]  }
 0x259   : > { %v11422_v59 = vpack.i.bf16 %v2099_v10, %v2097_v46  ;;  %v2289_v17 = vrot.slane %v1716_v15, 1  ;;  %v11479_v15 = vsel %vm2024_vm4, %v2389_v52, %v2390_v11  ;;  %v11523_v52 = vpack.i.bf16 %v11073_v3, %v11062_v21 }
 0x25a   : > { %8093 = vrot.lane.b32.xlu1 %v11396_v43, %s9252_s25  ;;  %16184 = vst [vmem:[#allocation106_spill] sm:$0xff] %v11479_v15 }
 0x25b   : > { %16181 = vst [vmem:[#allocation82_spill] sm:$0xff] %v11422_v59 }
 0x25c   : > { %8098 = vrot.lane.b32.xlu0 %v11410_v45, %s9252_s25 }
 0x25e   : > { %8103 = vrot.lane.b32.xlu1 %v11420_v35, %s9252_s25 }
 0x260   : > { %8108 = vrot.lane.b32.xlu0 %v11422_v59, %s9252_s25  ;;  %v11443_v59 = vpack.i.bf16 %v10779_v32, %v10786_v62  ;;  %v1827_v62 = vsel %vm354_vm0, %v1715_v22, %v1779_v25  ;;  %v2288_v32 = vrot.slane %v1811_v26, 1  ;;  %v16189_v22 = vld [vmem:[#allocation47_spill] sm:$0xff] }
 0x261   : > { %v2291_v39 = vrot.slane %v1827_v62, 1  ;;  %v2392_v6 = vrot.slane %v1827_v62, 2 }
 0x262   : > { %8113 = vrot.lane.b32.xlu1 %v8112_v44, %s9253_s27  ;;  %v11457_v44 = vpack.i.bf16 %v10934_v12, %v10922_v8  ;;  %v2290_v12 = vsel %vm1858_vm3, %v2288_v32, %v2289_v17  ;;  %v11508_v32 = vpack.c.bf16 %v2099_v10, %v2097_v46  ;;  %v15762_v10 = vmov 0  }
 0x263   : > { %v2292_v56 = vsel %vm1858_vm3, %v2289_v17, %v2291_v39  ;;  %v11482_v25 = vsel %vm2024_vm4, %v2390_v11, %v2392_v6  ;;  %v11514_v6 = vpack.i.bf16 %v11028_v1, %v11022_v34  ;;  %3075 = vmatprep.subr.bf16.mxu0 %v15762_v10  ;;  %4768 = vmatprep.subr.bf16.mxu1 %v15762_v10  ;;  %v9045_v11 = vld [vmem:[%s15658_s3 + $0x8] sm:$0xff]   ;;  %v16188_v17 = vld [vmem:[#allocation63_spill] sm:$0xff]  ;;  %v16190_v39 = vld [vmem:[#allocation48_spill] sm:$0xff] }
 0x264   : > { %8118 = vrot.lane.b32.xlu0 %v11432_v63, %s9253_s27  ;;  %v11476_v62 = vpack.i.bf16 %v2292_v56, %v2290_v12  ;;  %16185 = vst [vmem:[#allocation66_spill] sm:$0xff] %v11482_v25  ;;  %v11494_v56 = vpack.i.bf16 %v10991_v36, %v10984_v48  ;;  %16186 = vst [vmem:[#allocation61_spill] sm:$0xff] %v11508_v32  ;;  %v9044_v12 = vld [vmem:[%s15658_s3] sm:$0xff]   ;;  %v11533_v46 = vpack.i.bf16 %v11110_v60, %v11103_v5  ;;  %v16208_v5 = vld [vmem:[#allocation52_spill] sm:$0xff] }
 0x265   : > { %3076 = vmatpush1.bf16.msra.mxu0 %v9044_v12  ;;  %9042 = vset.pattern.permute.xlu1 %v15762_v10  ;;  %v16187_v12 = vld [vmem:[#allocation54_spill] sm:$0xff]  ;;  %v11551_v8 = vpack.i.bf16 %v16189_v22, %v16188_v17  ;;  %v11559_v32 = vpack.i.bf16 %v16190_v39, %v11182_v13  ;;  %v16194_v13 = vld [vmem:[#allocation28_spill] sm:$0xff]  ;;  %v16195_v39 = vld [vmem:[#allocation27_spill] sm:$0xff] }
 0x266   : > { %8123 = vrot.lane.b32.xlu1 %v11439_v20, %s9253_s27  ;;  %3077 = vmatprep.subr.bf16.mxu0 %v15762_v10  ;;  %v11543_v26 = vpack.i.bf16 %v16187_v12, %v11131_v16  ;;  %v9051_v17 = vld [vmem:[%s15658_s3 + $0x38] sm:$0xff]   ;;  %v16197_v22 = vld [vmem:[#allocation34_spill] sm:$0xff]  ;;  %v11617_v12 = vpop.permute.xlu1 %7963 }
 0x267   : > { %9043 = vset.pattern.permute.xlu0 %v15762_v10  ;;  %v16201_v16 = vld [vmem:[#allocation50_spill] sm:$0xff] }
 0x268   : > { %8128 = vrot.lane.b32.xlu0 %v11443_v59, %s9253_s27  ;;  %v16212_v60 = vld [vmem:[#allocation102_spill] sm:$0xff] }
 0x269   : > { %3078 = vmatpush1.bf16.msra.mxu0 %v9045_v11  ;;  %v16191_v11 = vld [vmem:[#allocation64_spill] sm:$0xff] }
 0x26a   : > { %8133 = vrot.lane.b32.xlu1 %v11453_v57, %s9253_s27  ;;  %3079 = vmatprep.subr.bf16.mxu0 %v15762_v10  ;;  %v11567_v42 = vpack.i.bf16 %v16191_v11, %v11200_v24  ;;  %v16192_v24 = vld [vmem:[#allocation23_spill] sm:$0xff]  ;;  %v16193_v11 = vld [vmem:[#allocation84_spill] sm:$0xff] }
 0x26c   : > { %8138 = vrot.lane.b32.xlu0 %v11449_v28, %s9253_s27 }
 0x26d   : > { %3080 = vmatpush1.bf16.msra.mxu0 %v9046_v14  ;;  %v9048_v14 = vld [vmem:[%s15658_s3 + $0x20] sm:$0xff]  }
 0x26e   : > { %8143 = vrot.lane.b32.xlu1 %v11457_v44, %s9253_s27  ;;  %3081 = vmatprep.subr.bf16.mxu0 %v15762_v10 }
 0x270   : > { %8148 = vrot.lane.b32.xlu0 %v11494_v56, %s9253_s27 }
 0x271   : > { %3082 = vmatpush1.bf16.msra.mxu0 %v9047_v23  ;;  %v9049_v23 = vld [vmem:[%s15658_s3 + $0x28] sm:$0xff]  }
 0x272   : > { %8153 = vrot.lane.b32.xlu1 %v11514_v6, %s9253_s27  ;;  %3083 = vmatprep.subr.bf16.mxu0 %v15762_v10 }
 0x274   : > { %8158 = vrot.lane.b32.xlu0 %v11523_v52, %s9253_s27 }
 0x275   : > { %3084 = vmatpush1.bf16.msra.mxu0 %v9048_v14  ;;  %v16196_v14 = vld [vmem:[#allocation89_spill] sm:$0xff] }
 0x276   : > { %8163 = vrot.lane.b32.xlu1 %v11533_v46, %s9253_s27  ;;  %3085 = vmatprep.subr.bf16.mxu0 %v15762_v10 }
 0x278   : > { %8168 = vrot.lane.b32.xlu0 %v11543_v26, %s9253_s27 }
 0x279   : > { %3086 = vmatpush1.bf16.msra.mxu0 %v9049_v23  ;;  %v16198_v23 = vld [vmem:[#allocation35_spill] sm:$0xff] }
 0x27a   : > { %8173 = vrot.lane.b32.xlu1 %v11551_v8, %s9253_s27  ;;  %3087 = vmatprep.subr.bf16.mxu0 %v15762_v10 }
 0x27c   : > { %8178 = vrot.lane.b32.xlu0 %v11559_v32, %s9253_s27 }
 0x27e   : > { %8183 = vrot.lane.b32.xlu1 %v11567_v42, %s9253_s27 }
 0x280   : > { %8188 = vrot.lane.b32.xlu0 %v11406_v27, %s9253_s27 }
 0x282   : > { %8193 = vrot.lane.b32.xlu1 %v16192_v24, %s9255_s19  ;;  %v9050_v24 = vld [vmem:[%s15658_s3 + $0x30] sm:$0xff]  }
 0x283   : > { %3088 = vmatpush1.bf16.msra.mxu0 %v9050_v24  ;;  %v16200_v24 = vld [vmem:[#allocation40_spill] sm:$0xff] }
 0x284   : > { %8198 = vrot.lane.b32.xlu0 %v16193_v11, %s9255_s19  ;;  %3089 = vmatprep.subr.bf16.mxu0 %v15762_v10 }
 0x286   : > { %8203 = vrot.lane.b32.xlu1 %v16194_v13, %s9255_s19 }
 0x287   : > { %3090 = vmatpush1.bf16.msra.mxu0 %v9051_v17  ;;  %v11623_v17 = vpop.permute.xlu0 %7968 }
 0x288   : > { %8208 = vrot.lane.b32.xlu0 %v16195_v39, %s9255_s19  ;;  %3091 = vmatprep.subr.bf16.mxu0 %v15762_v10  ;;  %v16202_v10 = vld [vmem:[#allocation83_spill] sm:$0xff] }
 0x28a   : > { %8213 = vrot.lane.b32.xlu1 %v16196_v14, %s9255_s19 }
 0x28b   : > { %3092 = vmatpush1.bf16.msra.mxu0 %v9052_v61  ;;  %v11627_v61 = vpop.permute.xlu1 %7973 }
 0x28c   : > { %8218 = vrot.lane.b32.xlu0 %v16197_v22, %s9255_s19 }
 0x28e   : > { %8223 = vrot.lane.b32.xlu1 %v16198_v23, %s9255_s19 }
 0x290   : > { %8228 = vrot.lane.b32.xlu0 %v16199_v55, %s9255_s19 }
 0x292   : > { %8233 = vrot.lane.b32.xlu1 %v16200_v24, %s9255_s19 }
 0x294   : > { %8238 = vrot.lane.b32.xlu0 %v16201_v16, %s9256_s13  ;;  %v11631_v16 = vpop.permute.xlu0 %7978 }
 0x296   : > { %8243 = vrot.lane.b32.xlu1 %v11432_v63, %s9257_s14  ;;  %v11635_v63 = vpop.permute.xlu1 %7983 }
 0x298   : > { %8248 = vrot.lane.b32.xlu0 %v16193_v11, %s9258_s15  ;;  %v11639_v11 = vpop.permute.xlu0 %7988 }
 0x29a   : > { %8253 = vrot.lane.b32.xlu1 %v16202_v10, %s9256_s13  ;;  %v11643_v10 = vpop.permute.xlu1 %7993 }
 0x29c   : > { %8258 = vrot.lane.b32.xlu0 %v11439_v20, %s9257_s14  ;;  %v11647_v20 = vpop.permute.xlu0 %7998 }
 0x29e   : > { %8263 = vrot.lane.b32.xlu1 %v16194_v13, %s9258_s15  ;;  %v11651_v13 = vpop.permute.xlu1 %8003 }
 0x29f   : > { %16205 = vst [vmem:[#allocation16_spill] sm:$0xff] %v11651_v13 }
 0x2a0   : > { %8268 = vrot.lane.b32.xlu0 %v16203_v38, %s9256_s13  ;;  %v11655_v38 = vpop.permute.xlu0 %8008 }
 0x2a1   : > { %16206 = vst [vmem:[#allocation87_spill] sm:$0xff] %v11655_v38  ;;  %v7965_v38 = vunpack.i.l.bf16 %v11617_v12 }
 0x2a2   : > { %8273 = vrot.lane.b32.xlu1 %v11443_v59, %s9257_s14 }
 0x2a4   : > { %8278 = vrot.lane.b32.xlu0 %v16195_v39, %s9258_s15  ;;  %v11659_v59 = vpop.permute.xlu1 %8013 }
 0x2a5   : > { %16207 = vst [vmem:[#allocation107_spill] sm:$0xff] %v11659_v59 }
 0x2a6   : > { %8283 = vrot.lane.b32.xlu1 %v16204_v4, %s9256_s13 }
 0x2a8   : > { %8288 = vrot.lane.b32.xlu0 %v11453_v57, %s9257_s14 }
 0x2a9   : > { %v11663_v39 = vpop.permute.xlu0 %8018 }
 0x2aa   : > { %8293 = vrot.lane.b32.xlu1 %v16196_v14, %s9258_s15  ;;  %16209 = vst [vmem:[#allocation68_spill] sm:$0xff] %v11663_v39 }
 0x2ac   : > { %8298 = vrot.lane.b32.xlu0 %v16208_v5, %s9256_s13 }
 0x2ae   : > { %8303 = vrot.lane.b32.xlu1 %v11449_v28, %s9257_s14  ;;  %v11667_v4 = vpop.permute.xlu1 %8023  ;;  %v16214_v28 = vld [vmem:[#allocation55_spill] sm:$0xff] }
 0x2af   : > { %16210 = vst [vmem:[#allocation67_spill] sm:$0xff] %v11667_v4 }
 0x2b0   : > { %8308 = vrot.lane.b32.xlu0 %v16197_v22, %s9258_s15 }
 0x2b2   : > { %v11671_v57 = vpop.permute.xlu0 %8028  ;;  %8313 = vrot.lane.b32.xlu1 %v16212_v60, %s9256_s13 }
 0x2b3   : > { %16211 = vst [vmem:[#allocation88_spill] sm:$0xff] %v11671_v57 }
 0x2b4   : > { %8318 = vrot.lane.b32.xlu0 %v11457_v44, %s9257_s14  ;;  %v11677_v14 = vpop.permute.xlu1 %8033 }
 0x2b5   : > { %16213 = vst [vmem:[#allocation69_spill] sm:$0xff] %v11677_v14  ;;  %v16215_v14 = vld [vmem:[#allocation79_spill] sm:$0xff] }
 0x2b6   : > { %v11679_v5 = vpop.permute.xlu0 %8038  ;;  %8323 = vrot.lane.b32.xlu1 %v16198_v23, %s9258_s15 }
 0x2b8   : > { %8328 = vrot.lane.b32.xlu0 %v16214_v28, %s9256_s13  ;;  %v11685_v4 = vpop.permute.xlu1 %8043 }
 0x2b9   : > { %v8045_v34 = vunpack.i.l.bf16 %v11685_v4 }
 0x2ba   : > { %v11687_v22 = vpop.permute.xlu0 %8048  ;;  %8333 = vrot.lane.b32.xlu1 %v11494_v56, %s9257_s14  ;;  %v16216_v56 = vld [vmem:[#allocation59_spill] sm:$0xff] }
 0x2bc   : > { %8338 = vrot.lane.b32.xlu0 %v16199_v55, %s9258_s15  ;;  %v11693_v60 = vpop.permute.xlu1 %8053 }
 0x2be   : > { %v11695_v44 = vpop.permute.xlu0 %8058  ;;  %8343 = vrot.lane.b32.xlu1 %v16215_v14, %s9256_s13  ;;  %v16218_v14 = vld [vmem:[#allocation53_spill] sm:$0xff] }
 0x2c0   : > { %8348 = vrot.lane.b32.xlu0 %v11514_v6, %s9257_s14  ;;  %v11701_v23 = vpop.permute.xlu1 %8063 }
 0x2c2   : > { %v11703_v28 = vpop.permute.xlu0 %8068  ;;  %8353 = vrot.lane.b32.xlu1 %v16200_v24, %s9258_s15  ;;  %v16221_v24 = vld [vmem:[#allocation75_spill] sm:$0xff] }
 0x2c4   : > { %8358 = vrot.lane.b32.xlu0 %v16216_v56, %s9256_s13  ;;  %v11709_v55 = vpop.permute.xlu1 %8073 }
 0x2c6   : > { %v11711_v57 = vpop.permute.xlu0 %8078  ;;  %8363 = vrot.lane.b32.xlu1 %v11523_v52, %s9257_s14  ;;  %v16224_v52 = vld [vmem:[#allocation46_spill] sm:$0xff] }
 0x2c7   : > { %16217 = vst [vmem:[#allocation70_spill] sm:$0xff] %v11711_v57 }
 0x2c8   : > { %8368 = vrot.lane.b32.xlu0 %v16218_v14, %s9258_s15  ;;  %v11717_v6 = vpop.permute.xlu1 %8083 }
 0x2c9   : > { %16219 = vst [vmem:[#allocation71_spill] sm:$0xff] %v11717_v6 }
 0x2ca   : > { %v11719_v39 = vpop.permute.xlu0 %8088  ;;  %8373 = vrot.lane.b32.xlu1 %v16218_v14, %s9255_s19  ;;  %v16227_v14 = vld [vmem:[#allocation80_spill] sm:$0xff] }
 0x2cb   : > { %16220 = vst [vmem:[#allocation18_spill] sm:$0xff] %v11719_v39 }
 0x2cc   : > { %8378 = vrot.lane.b32.xlu0 %v16221_v24, %s9256_s13  ;;  %v11725_v56 = vpop.permute.xlu1 %8093 }
 0x2cd   : > { %16222 = vst [vmem:[#allocation17_spill] sm:$0xff] %v11725_v56 }
 0x2ce   : > { %v11727_v59 = vpop.permute.xlu0 %8098  ;;  %8383 = vrot.lane.b32.xlu1 %v11533_v46, %s9257_s14  ;;  %v16228_v46 = vld [vmem:[#allocation98_spill] sm:$0xff] }
 0x2cf   : > { %16223 = vst [vmem:[#allocation19_spill] sm:$0xff] %v11727_v59 }
 0x2d0   : > { %8388 = vrot.lane.b32.xlu0 %v16224_v52, %s9258_s15  ;;  %v11733_v7 = vpop.permute.xlu1 %8103 }
 0x2d1   : > { %16225 = vst [vmem:[#allocation76_spill] sm:$0xff] %v11733_v7 }
 0x2d2   : > { %v11735_v53 = vpop.permute.xlu0 %8108  ;;  %8393 = vrot.lane.b32.xlu1 %v16224_v52, %s9255_s19 }
 0x2d3   : > { %16226 = vst [vmem:[#allocation91_spill] sm:$0xff] %v11735_v53 }
 0x2d4   : > { %8398 = vrot.lane.b32.xlu0 %v16227_v14, %s9256_s13  ;;  %v11741_v24 = vpop.permute.xlu1 %8113 }
 0x2d6   : > { %v11743_v56 = vpop.permute.xlu0 %8118  ;;  %8403 = vrot.lane.b32.xlu1 %v11543_v26, %s9257_s14  ;;  %v16229_v26 = vld [vmem:[#allocation99_spill] sm:$0xff] }
 0x2d8   : > { %8408 = vrot.lane.b32.xlu0 %v16228_v46, %s9258_s15  ;;  %v11749_v59 = vpop.permute.xlu1 %8123 }
 0x2da   : > { %v11751_v7 = vpop.permute.xlu0 %8128  ;;  %8413 = vrot.lane.b32.xlu1 %v16228_v46, %s9255_s19 }
 0x2dc   : > { %8418 = vrot.lane.b32.xlu0 %v11396_v43, %s9256_s13  ;;  %v11757_v52 = vpop.permute.xlu1 %8133 }
 0x2de   : > { %v11759_v14 = vpop.permute.xlu0 %8138  ;;  %8423 = vrot.lane.b32.xlu1 %v11551_v8, %s9257_s14  ;;  %v16232_v8 = vld [vmem:[#allocation51_spill] sm:$0xff] }
 0x2e0   : > { %8428 = vrot.lane.b32.xlu0 %v16229_v26, %s9258_s15  ;;  %v11765_v53 = vpop.permute.xlu1 %8143 }
 0x2e2   : > { %v11767_v39 = vpop.permute.xlu0 %8148  ;;  %8433 = vrot.lane.b32.xlu1 %v16229_v26, %s9255_s19 }
 0x2e4   : > { %8438 = vrot.lane.b32.xlu0 %v11410_v45, %s9256_s13  ;;  %v11773_v43 = vpop.permute.xlu1 %8153 }
 0x2e5   : > { %16230 = vst [vmem:[#allocation78_spill] sm:$0xff] %v11773_v43 }
 0x2e6   : > { %v11775_v46 = vpop.permute.xlu0 %8158  ;;  %8443 = vrot.lane.b32.xlu1 %v11559_v32, %s9257_s14  ;;  %v16237_v32 = vld [vmem:[#allocation101_spill] sm:$0xff] }
 0x2e7   : > { %16231 = vst [vmem:[#allocation92_spill] sm:$0xff] %v11775_v46  ;;  %v16243_v46 = vld [vmem:[#allocation24_spill] sm:$0xff] }
 0x2e8   : > { %8448 = vrot.lane.b32.xlu0 %v16232_v8, %s9258_s15  ;;  %v11781_v21 = vpop.permute.xlu1 %8163 }
 0x2e9   : > { %16233 = vst [vmem:[#allocation22_spill] sm:$0xff] %v11781_v21 }
 0x2ea   : > { %v11783_v3 = vpop.permute.xlu0 %8168  ;;  %8453 = vrot.lane.b32.xlu1 %v16232_v8, %s9255_s19  ;;  %v16240_v8 = vld [vmem:[#allocation82_spill] sm:$0xff] }
 0x2eb   : > { %16234 = vst [vmem:[#allocation74_spill] sm:$0xff] %v11783_v3  ;;  %v7966_v3 = vunpack.i.h.bf16 %v11617_v12  ;;  %v16242_v12 = vld [vmem:[#allocation85_spill] sm:$0xff] }
 0x2ec   : > { %8458 = vrot.lane.b32.xlu0 %v11420_v35, %s9256_s13  ;;  %v11789_v45 = vpop.permute.xlu1 %8173 }
 0x2ed   : > { %16235 = vst [vmem:[#allocation77_spill] sm:$0xff] %v11789_v45  ;;  %v2702_v1 = vsel %vm2700_vm5, %v16242_v12, %v7966_v3  ;;  %v8121_v12 = vunpack.i.h.bf16 %v11743_v56 }
 0x2ee   : > { %v11791_v26 = vpop.permute.xlu0 %8178  ;;  %8463 = vrot.lane.b32.xlu1 %v11567_v42, %s9257_s14 }
 0x2ef   : > { %16236 = vst [vmem:[#allocation20_spill] sm:$0xff] %v11791_v26 }
 0x2f0   : > { %8468 = vrot.lane.b32.xlu0 %v16237_v32, %s9258_s15  ;;  %v11797_v6 = vpop.permute.xlu1 %8183 }
 0x2f1   : > { %16238 = vst [vmem:[#allocation21_spill] sm:$0xff] %v11797_v6 }
 0x2f2   : > { %v11799_v21 = vpop.permute.xlu0 %8188  ;;  %8473 = vrot.lane.b32.xlu1 %v16237_v32, %s9255_s19  ;;  %v16241_v32 = vpack.i.bf16 %v11482_v25, %v11479_v15  ;;  %v8041_v15 = vunpack.i.h.bf16 %v11679_v5  ;;  %v8040_v25 = vunpack.i.l.bf16 %v11679_v5 }
 0x2f3   : > { %16239 = vst [vmem:[#allocation96_spill] sm:$0xff] %v11799_v21  ;;  %v7971_v21 = vunpack.i.h.bf16 %v11623_v17 }
 0x2f4   : > { %8478 = vrot.lane.b32.xlu0 %v16240_v8, %s9256_s13  ;;  %v8194_v35 = vpop.permute.xlu1 %8193  ;;  %v11850_v9 = vsel %vm2731_vm6, %v2702_v1, %v8041_v15 }
 0x2f5   : > { %v8196_v5 = vunpack.i.h.bf16 %v8194_v35  ;;  %v8195_v57 = vunpack.i.l.bf16 %v8194_v35 }
 0x2f6   : > { %v11805_v45 = vpop.permute.xlu0 %8198  ;;  %8483 = vrot.lane.b32.xlu1 %v11406_v27, %s9257_s14  ;;  %v7970_v27 = vunpack.i.l.bf16 %v11623_v17  ;;  %v8046_v17 = vunpack.i.h.bf16 %v11685_v4 }
 0x2f8   : > { %8488 = vrot.lane.b32.xlu0 %v11476_v62, %s9258_s15  ;;  %v11811_v42 = vpop.permute.xlu1 %8203 }
 0x2fa   : > { %v11813_v6 = vpop.permute.xlu0 %8208  ;;  %8493 = vrot.lane.b32.xlu1 %v11476_v62, %s9255_s19  ;;  %v2704_v62 = vsel %vm2700_vm5, %v10632_v37, %v7971_v21  ;;  %v2701_v37 = vsel %vm2700_vm5, %v16243_v46, %v7965_v38  ;;  %v8115_v21 = vunpack.i.l.bf16 %v11741_v24 }
 0x2fb   : > { %v2732_v4 = vsel %vm2731_vm6, %v2701_v37, %v8040_v25  ;;  %v2735_v38 = vsel %vm2731_vm6, %v2704_v62, %v8046_v17  ;;  %v8201_v62 = vunpack.i.h.bf16 %v11805_v45 }
 0x2fc   : > { %8498 = vrot.lane.b32.xlu0 %v16241_v32, %s9256_s13  ;;  %v11821_v8 = vpop.permute.xlu1 %8213  ;;  %v2703_v32 = vsel %vm2700_vm5, %v10627_v29, %v7970_v27  ;;  %v8116_v29 = vunpack.i.h.bf16 %v11741_v24  ;;  %v2763_v35 = vsel %vm2762_vm7, %v2732_v4, %v8115_v21 }
 0x2fd   : > { %v2734_v3 = vsel %vm2731_vm6, %v2703_v32, %v8045_v34  ;;  %v2796_v25 = vsel %vm2795_vm8, %v2763_v35, %v8195_v57 }
 0x2fe   : > { %v11825_v26 = vpop.permute.xlu0 %8218  ;;  %v2764_v1 = vsel %vm2762_vm7, %v11850_v9, %v8116_v29 }
 0x2ff   : > { %v2797_v37 = vsel %vm2795_vm8, %v2764_v1, %v8196_v5  ;;  %v2766_v5 = vsel %vm2762_vm7, %v2735_v38, %v8121_v12 }
 0x300   : > { %v11829_v30 = vpop.permute.xlu1 %8223 }
 0x302   : > { %v11837_v54 = vpop.permute.xlu0 %8228 }
 0x304   : > { %v11847_v27 = vpop.permute.xlu1 %8233 }
 0x305   : > { %16244 = vst [vmem:[#allocation97_spill] sm:$0xff] %v11847_v27  ;;  %v8120_v27 = vunpack.i.l.bf16 %v11743_v56 }
 0x306   : > { %v8239_v31 = vpop.permute.xlu0 %8238 }
 0x307   : > { %v8241_v46 = vunpack.i.h.bf16 %v8239_v31  ;;  %v8240_v24 = vunpack.i.l.bf16 %v8239_v31  ;;  %v8200_v31 = vunpack.i.l.bf16 %v11805_v45  ;;  %v2765_v57 = vsel %vm2762_vm7, %v2734_v3, %v8120_v27 }
 0x308   : > { %v8244_v15 = vpop.permute.xlu1 %8243  ;;  %v7976_v27 = vunpack.i.h.bf16 %v11627_v61 }
 0x309   : > { %v8246_v43 = vunpack.i.h.bf16 %v8244_v15  ;;  %v8245_v34 = vunpack.i.l.bf16 %v8244_v15  ;;  %v2829_v32 = vsel %vm2828_vm9, %v2796_v25, %v8240_v24  ;;  %v2830_v56 = vsel %vm2828_vm9, %v2797_v37, %v8241_v46 }
 0x30a   : > { %v8249_v17 = vpop.permute.xlu0 %8248  ;;  %v2798_v46 = vsel %vm2795_vm8, %v2765_v57, %v8200_v31  ;;  %v2799_v25 = vsel %vm2795_vm8, %v2766_v5, %v8201_v62  ;;  %v16245_v62 = vpack.c.bf16 %v11232_v0, %v11229_v58 }
 0x30b   : > { %v8251_v21 = vunpack.i.h.bf16 %v8249_v17  ;;  %v8250_v13 = vunpack.i.l.bf16 %v8249_v17  ;;  %v2862_v29 = vsel %vm2861_vm10, %v2829_v32, %v8245_v34  ;;  %v2863_v48 = vsel %vm2861_vm10, %v2830_v56, %v8246_v43 }
 0x30c   : > { %v8254_v35 = vpop.permute.xlu1 %8253  ;;  %v8206_v56 = vunpack.i.h.bf16 %v11811_v42 }
 0x30d   : > { %v8256_v1 = vunpack.i.h.bf16 %v8254_v35  ;;  %v8255_v15 = vunpack.i.l.bf16 %v8254_v35  ;;  %v2895_v45 = vsel %vm2894_vm11, %v2862_v29, %v8250_v13  ;;  %v2896_v24 = vsel %vm2894_vm11, %v2863_v48, %v8251_v21 }
 0x30e   : > { %v8259_v37 = vpop.permute.xlu0 %8258  ;;  %v2927_v17 = vpack.c.bf16 %v2896_v24, %v2895_v45  ;;  %v8126_v13 = vunpack.i.h.bf16 %v11749_v59  ;;  %v8125_v48 = vunpack.i.l.bf16 %v11749_v59  ;;  %v8205_v21 = vunpack.i.l.bf16 %v11811_v42 }
 0x30f   : > { %v2831_v34 = vsel %vm2828_vm9, %v2798_v46, %v8255_v15  ;;  %v2832_v43 = vsel %vm2828_vm9, %v2799_v25, %v8256_v1  ;;  %v8261_v3 = vunpack.i.h.bf16 %v8259_v37  ;;  %v8260_v38 = vunpack.i.l.bf16 %v8259_v37 }
 0x310   : > { %3108 = vmatmul.mubr.bf16.vlgmr.msra.gmra.mrb[0].mxu0 %v2927_v17  ;;  %v8264_v12 = vpop.permute.xlu1 %8263  ;;  %v2767_v58 = vsel %vm2762_vm7, %v2732_v4, %v8125_v48  ;;  %v2768_v0 = vsel %vm2762_vm7, %v11850_v9, %v8126_v13  ;;  %v7975_v25 = vunpack.i.l.bf16 %v11627_v61  ;;  %v8051_v4 = vunpack.i.h.bf16 %v11687_v22 }
 0x311   : > { %v8266_v32 = vunpack.i.h.bf16 %v8264_v12  ;;  %v8265_v31 = vunpack.i.l.bf16 %v8264_v12  ;;  %7865 = vmatprep.mubr.msk.bf16.mxu0 %vm2700_vm5, %v16245_v62  ;;  %v2864_v57 = vsel %vm2861_vm10, %v2831_v34, %v8260_v38  ;;  %v2865_v5 = vsel %vm2861_vm10, %v2832_v43, %v8261_v3  ;;  %v16246_v43 = vld [vmem:[#allocation25_spill] sm:$0xff] }
 0x312   : > { %v8269_v29 = vpop.permute.xlu0 %8268  ;;  %v2800_v37 = vsel %vm2795_vm8, %v2767_v58, %v8205_v21  ;;  %v2801_v17 = vsel %vm2795_vm8, %v2768_v0, %v8206_v56  ;;  %v2706_v3 = vsel %vm2700_vm5, %v16246_v43, %v7976_v27  ;;  %v8050_v9 = vunpack.i.l.bf16 %v11687_v22  ;;  %v16248_v21 = vld [vmem:[#allocation26_spill] sm:$0xff] }
 0x313   : > { %v8271_v35 = vunpack.i.h.bf16 %v8269_v29  ;;  %v8270_v1 = vunpack.i.l.bf16 %v8269_v29  ;;  %v2897_v59 = vsel %vm2894_vm11, %v2864_v57, %v8265_v31  ;;  %v2898_v15 = vsel %vm2894_vm11, %v2865_v5, %v8266_v32 }
 0x314   : > { %v8274_v45 = vpop.permute.xlu1 %8273  ;;  %v2929_v24 = vpack.c.bf16 %v2898_v15, %v2897_v59  ;;  %v8131_v32 = vunpack.i.h.bf16 %v11751_v7  ;;  %v8130_v31 = vunpack.i.l.bf16 %v11751_v7  ;;  %v16247_v56 = vpack.c.bf16 %v11252_v47, %v11249_v49 }
 0x315   : > { %v8276_v46 = vunpack.i.h.bf16 %v8274_v45  ;;  %v8275_v42 = vunpack.i.l.bf16 %v8274_v45  ;;  %v2833_v38 = vsel %vm2828_vm9, %v2800_v37, %v8270_v1  ;;  %v2834_v12 = vsel %vm2828_vm9, %v2801_v17, %v8271_v35 }
 0x316   : > { %v8279_v34 = vpop.permute.xlu0 %8278  ;;  %v2705_v22 = vsel %vm2700_vm5, %v16248_v21, %v7975_v25  ;;  %v7981_v29 = vunpack.i.h.bf16 %v11631_v16  ;;  %v8211_v57 = vunpack.i.h.bf16 %v11813_v6  ;;  %v8210_v5 = vunpack.i.l.bf16 %v11813_v6 }
 0x317   : > { %v2866_v61 = vsel %vm2861_vm10, %v2833_v38, %v8275_v42  ;;  %v2867_v48 = vsel %vm2861_vm10, %v2834_v12, %v8276_v46  ;;  %v8281_v62 = vunpack.i.h.bf16 %v8279_v34  ;;  %v8280_v27 = vunpack.i.l.bf16 %v8279_v34  ;;  %v16249_v46 = vld [vmem:[#allocation86_spill] sm:$0xff] }
 0x318   : > { %3116 = vmatmul.mubr.bf16.gmra.mrb[4].mxu0 %v2929_v24  ;;  %v8284_v13 = vpop.permute.xlu1 %8283  ;;  %v2737_v49 = vsel %vm2731_vm6, %v2706_v3, %v8051_v4  ;;  %v2736_v47 = vsel %vm2731_vm6, %v2705_v22, %v8050_v9  ;;  %v7980_v24 = vunpack.i.l.bf16 %v11631_v16  ;;  %v2708_v6 = vsel %vm2700_vm5, %v16249_v46, %v7981_v29 }
 0x319   : > { %7866 = vmatprep.mubr.msk.bf16.mxu0 %vm2700_vm5, %v16247_v56  ;;  %v8286_v1 = vunpack.i.h.bf16 %v8284_v13  ;;  %v8285_v59 = vunpack.i.l.bf16 %v8284_v13  ;;  %v2899_v7 = vsel %vm2894_vm11, %v2866_v61, %v8280_v27  ;;  %v2900_v15 = vsel %vm2894_vm11, %v2867_v48, %v8281_v62  ;;  %v16250_v61 = vld [vmem:[#allocation29_spill] sm:$0xff] }
 0x31a   : > { %v8289_v35 = vpop.permute.xlu0 %8288  ;;  %v2769_v58 = vsel %vm2762_vm7, %v2736_v47, %v8130_v31  ;;  %v2770_v0 = vsel %vm2762_vm7, %v2737_v49, %v8131_v32  ;;  %v2931_v17 = vpack.c.bf16 %v2900_v15, %v2899_v7  ;;  %v8056_v16 = vunpack.i.h.bf16 %v11693_v60 }
 0x31b   : > { %v2802_v42 = vsel %vm2795_vm8, %v2769_v58, %v8210_v5  ;;  %v2803_v25 = vsel %vm2795_vm8, %v2770_v0, %v8211_v57  ;;  %v8055_v12 = vunpack.i.l.bf16 %v11693_v60  ;;  %v8291_v4 = vunpack.i.h.bf16 %v8289_v35  ;;  %v16252_v0 = vld [vmem:[#allocation30_spill] sm:$0xff] }
 0x31c   : > { %v8294_v45 = vpop.permute.xlu1 %8293  ;;  %v2835_v34 = vsel %vm2828_vm9, %v2802_v42, %v8285_v59  ;;  %v2836_v43 = vsel %vm2828_vm9, %v2803_v25, %v8286_v1  ;;  %v8290_v9 = vunpack.i.l.bf16 %v8289_v35  ;;  %v2707_v48 = vsel %vm2700_vm5, %v16250_v61, %v7980_v24 }
 0x31d   : > { %v8296_v3 = vunpack.i.h.bf16 %v8294_v45  ;;  %v8295_v38 = vunpack.i.l.bf16 %v8294_v45  ;;  %v7986_v32 = vunpack.i.h.bf16 %v11635_v63  ;;  %v8136_v31 = vunpack.i.h.bf16 %v11757_v52 }
 0x31e   : > { %v8299_v37 = vpop.permute.xlu0 %8298  ;;  %v8135_v62 = vunpack.i.l.bf16 %v11757_v52  ;;  %v16251_v27 = vpack.c.bf16 %v11269_v41, %v11266_v51  ;;  %v8216_v60 = vunpack.i.h.bf16 %v11821_v8  ;;  %v8215_v56 = vunpack.i.l.bf16 %v11821_v8 }
 0x31f   : > { %v2868_v22 = vsel %vm2861_vm10, %v2835_v34, %v8290_v9  ;;  %v2869_v29 = vsel %vm2861_vm10, %v2836_v43, %v8291_v4  ;;  %v8301_v57 = vunpack.i.h.bf16 %v8299_v37  ;;  %v8300_v5 = vunpack.i.l.bf16 %v8299_v37  ;;  %v16254_v4 = vld [vmem:[#allocation32_spill] sm:$0xff] }
 0x320   : > { %3124 = vmatmul.mubr.bf16.gmra.mrb[8].mxu0 %v2931_v17  ;;  %v8304_v13 = vpop.permute.xlu1 %8303  ;;  %v2901_v35 = vsel %vm2894_vm11, %v2868_v22, %v8295_v38  ;;  %v2902_v52 = vsel %vm2894_vm11, %v2869_v29, %v8296_v3  ;;  %v2738_v1 = vsel %vm2731_vm6, %v2707_v48, %v8055_v12  ;;  %v2739_v51 = vsel %vm2731_vm6, %v2708_v6, %v8056_v16  ;;  %v16255_v22 = vld [vmem:[#allocation33_spill] sm:$0xff] }
 0x321   : > { %7867 = vmatprep.mubr.msk.bf16.mxu0 %vm2700_vm5, %v16251_v27  ;;  %v8306_v41 = vunpack.i.h.bf16 %v8304_v13  ;;  %v8305_v59 = vunpack.i.l.bf16 %v8304_v13  ;;  %v2771_v8 = vsel %vm2762_vm7, %v2738_v1, %v8135_v62  ;;  %v2772_v15 = vsel %vm2762_vm7, %v2739_v51, %v8136_v31 }
 0x322   : > { %v8309_v21 = vpop.permute.xlu0 %8308  ;;  %v7985_v49 = vunpack.i.l.bf16 %v11635_v63  ;;  %v2804_v47 = vsel %vm2795_vm8, %v2771_v8, %v8215_v56  ;;  %v2805_v45 = vsel %vm2795_vm8, %v2772_v15, %v8216_v60  ;;  %v2933_v58 = vpack.c.bf16 %v2902_v52, %v2901_v35 }
 0x323   : > { %v2710_v46 = vsel %vm2700_vm5, %v16252_v0, %v7986_v32  ;;  %v2837_v6 = vsel %vm2828_vm9, %v2804_v47, %v8300_v5  ;;  %v2838_v42 = vsel %vm2828_vm9, %v2805_v45, %v8301_v57  ;;  %v8061_v25 = vunpack.i.h.bf16 %v11695_v44 }
 0x324   : > { %v8314_v7 = vpop.permute.xlu1 %8313  ;;  %v8060_v37 = vunpack.i.l.bf16 %v11695_v44  ;;  %v2870_v63 = vsel %vm2861_vm10, %v2837_v6, %v8305_v59  ;;  %v2871_v34 = vsel %vm2861_vm10, %v2838_v42, %v8306_v41  ;;  %v8141_v43 = vunpack.i.h.bf16 %v11759_v14 }
 0x325   : > { %v8140_v3 = vunpack.i.l.bf16 %v11759_v14  ;;  %v8311_v38 = vunpack.i.h.bf16 %v8309_v21  ;;  %v8310_v16 = vunpack.i.l.bf16 %v8309_v21  ;;  %v16253_v12 = vpack.c.bf16 %v11284_v18, %v11281_v2 }
 0x326   : > { %v8319_v24 = vpop.permute.xlu0 %8318  ;;  %v2709_v44 = vsel %vm2700_vm5, %v16254_v4, %v7985_v49  ;;  %v7991_v9 = vunpack.i.h.bf16 %v11639_v11  ;;  %v8221_v13 = vunpack.i.h.bf16 %v11825_v26  ;;  %v8220_v61 = vunpack.i.l.bf16 %v11825_v26  ;;  %v16256_v49 = vld [vmem:[#allocation31_spill] sm:$0xff] }
 0x327   : > { %v8316_v32 = vunpack.i.h.bf16 %v8314_v7  ;;  %v8315_v31 = vunpack.i.l.bf16 %v8314_v7  ;;  %v2903_v14 = vsel %vm2894_vm11, %v2870_v63, %v8310_v16  ;;  %v2904_v62 = vsel %vm2894_vm11, %v2871_v34, %v8311_v38 }
 0x328   : > { %3132 = vmatmul.mubr.bf16.gmra.mrb[12].mxu0 %v2933_v58  ;;  %v8324_v17 = vpop.permute.xlu1 %8323  ;;  %v2741_v2 = vsel %vm2731_vm6, %v2710_v46, %v8061_v25  ;;  %v2740_v18 = vsel %vm2731_vm6, %v2709_v44, %v8060_v37  ;;  %v7990_v60 = vunpack.i.l.bf16 %v11639_v11  ;;  %v2712_v26 = vsel %vm2700_vm5, %v16255_v22, %v7991_v9  ;;  %v16260_v22 = vld [vmem:[#allocation90_spill] sm:$0xff] }
 0x329   : > { %7868 = vmatprep.mubr.msk.bf16.mxu0 %vm2700_vm5, %v16253_v12  ;;  %v2773_v56 = vsel %vm2762_vm7, %v2740_v18, %v8140_v3  ;;  %v2774_v21 = vsel %vm2762_vm7, %v2741_v2, %v8141_v43  ;;  %v2935_v35 = vpack.c.bf16 %v2904_v62, %v2903_v14  ;;  %v8326_v51 = vunpack.i.h.bf16 %v8324_v17 }
 0x32a   : > { %v8329_v48 = vpop.permute.xlu0 %8328  ;;  %v2806_v29 = vsel %vm2795_vm8, %v2773_v56, %v8220_v61  ;;  %v2807_v57 = vsel %vm2795_vm8, %v2774_v21, %v8221_v13  ;;  %v8325_v41 = vunpack.i.l.bf16 %v8324_v17  ;;  %v8066_v11 = vunpack.i.h.bf16 %v11701_v23  ;;  %v16258_v13 = vld [vmem:[#allocation36_spill] sm:$0xff] }
 0x32b   : > { %v2839_v52 = vsel %vm2828_vm9, %v2806_v29, %v8315_v31  ;;  %v2840_v1 = vsel %vm2828_vm9, %v2807_v57, %v8316_v32  ;;  %v8065_v59 = vunpack.i.l.bf16 %v11701_v23  ;;  %v8321_v7 = vunpack.i.h.bf16 %v8319_v24 }
 0x32c   : > { %v8334_v27 = vpop.permute.xlu1 %8333  ;;  %v8320_v8 = vunpack.i.l.bf16 %v8319_v24  ;;  %v2711_v47 = vsel %vm2700_vm5, %v16256_v49, %v7990_v60  ;;  %v7996_v45 = vunpack.i.h.bf16 %v11643_v10  ;;  %v8146_v58 = vunpack.i.h.bf16 %v11765_v53 }
 0x32d   : > { %v8145_v0 = vunpack.i.l.bf16 %v11765_v53  ;;  %v16257_v46 = vpack.c.bf16 %v11298_v40, %v11292_v50  ;;  %v8226_v23 = vunpack.i.h.bf16 %v11829_v30  ;;  %v8225_v24 = vunpack.i.l.bf16 %v11829_v30 }
 0x32e   : > { %v8339_v5 = vpop.permute.xlu0 %8338  ;;  %v2872_v42 = vsel %vm2861_vm10, %v2839_v52, %v8320_v8  ;;  %v2873_v25 = vsel %vm2861_vm10, %v2840_v1, %v8321_v7  ;;  %v8331_v37 = vunpack.i.h.bf16 %v8329_v48  ;;  %v8330_v17 = vunpack.i.l.bf16 %v8329_v48 }
 0x32f   : > { %v2905_v63 = vsel %vm2894_vm11, %v2872_v42, %v8325_v41  ;;  %v2906_v53 = vsel %vm2894_vm11, %v2873_v25, %v8326_v51  ;;  %v2742_v50 = vsel %vm2731_vm6, %v2711_v47, %v8065_v59  ;;  %v2743_v40 = vsel %vm2731_vm6, %v2712_v26, %v8066_v11  ;;  %v16261_v42 = vld [vmem:[#allocation37_spill] sm:$0xff] }
 0x330   : > { %3140 = vmatmul.mubr.bf16.gmra.mrb[16].mxu0 %v2935_v35  ;;  %v11985_v15 = vpop.permute.xlu1 %8343  ;;  %v8336_v34 = vunpack.i.h.bf16 %v8334_v27  ;;  %v8335_v43 = vunpack.i.l.bf16 %v8334_v27  ;;  %v2775_v30 = vsel %vm2762_vm7, %v2742_v50, %v8145_v0  ;;  %v2776_v38 = vsel %vm2762_vm7, %v2743_v40, %v8146_v58  ;;  %v16264_v40 = vld [vmem:[#allocation104_spill] sm:$0xff] }
 0x331   : > { %7869 = vmatprep.mubr.msk.bf16.mxu0 %vm2700_vm5, %v16257_v46  ;;  %v7995_v16 = vunpack.i.l.bf16 %v11643_v10  ;;  %v2808_v12 = vsel %vm2795_vm8, %v2775_v30, %v8225_v24  ;;  %v2809_v4 = vsel %vm2795_vm8, %v2776_v38, %v8226_v23  ;;  %v2937_v9 = vpack.c.bf16 %v2906_v53, %v2905_v63  ;;  %v16263_v63 = vld [vmem:[#allocation78_spill] sm:$0xff] }
 0x332   : > { %v11998_v6 = vpop.permute.xlu0 %8348  ;;  %v2714_v61 = vsel %vm2700_vm5, %v16258_v13, %v7996_v45  ;;  %v2841_v48 = vsel %vm2828_vm9, %v2808_v12, %v8330_v17  ;;  %v2842_v32 = vsel %vm2828_vm9, %v2809_v4, %v8331_v37  ;;  %v8071_v31 = vunpack.i.h.bf16 %v11703_v28  ;;  %v16262_v37 = vld [vmem:[#allocation16_spill] sm:$0xff] }
 0x333   : > { %v8070_v14 = vunpack.i.l.bf16 %v11703_v28  ;;  %v2874_v62 = vsel %vm2861_vm10, %v2841_v48, %v8335_v43  ;;  %v2875_v2 = vsel %vm2861_vm10, %v2842_v32, %v8336_v34  ;;  %v8151_v18 = vunpack.i.h.bf16 %v11767_v39  ;;  %v16265_v34 = vld [vmem:[#allocation73_spill] sm:$0xff] }
 0x334   : > { %v12006_v3 = vpop.permute.xlu1 %8353  ;;  %v8150_v27 = vunpack.i.l.bf16 %v11767_v39  ;;  %v8341_v60 = vunpack.i.h.bf16 %v8339_v5  ;;  %v8340_v56 = vunpack.i.l.bf16 %v8339_v5  ;;  %v16259_v21 = vpack.c.bf16 %v11315_v33, %v11312_v19 }
 0x335   : > { %v2713_v28 = vsel %vm2700_vm5, %v16260_v22, %v7995_v16  ;;  %v8001_v26 = vunpack.i.h.bf16 %v11647_v20  ;;  %v8231_v29 = vunpack.i.h.bf16 %v11837_v54  ;;  %v8230_v57 = vunpack.i.l.bf16 %v11837_v54 }
 0x336   : > { %v12013_v44 = vpop.permute.xlu0 %8358  ;;  %v8346_v39 = vunpack.i.h.bf16 %v11985_v15  ;;  %v8345_v5 = vunpack.i.l.bf16 %v11985_v15  ;;  %v2907_v52 = vsel %vm2894_vm11, %v2874_v62, %v8340_v56  ;;  %v2908_v19 = vsel %vm2894_vm11, %v2875_v2, %v8341_v60  ;;  %v16268_v2 = vld [vmem:[#allocation70_spill] sm:$0xff] }
 0x337   : > { %v2745_v33 = vsel %vm2731_vm6, %v2714_v61, %v8071_v31  ;;  %v2744_v1 = vsel %vm2731_vm6, %v2713_v28, %v8070_v14  ;;  %v8000_v41 = vunpack.i.l.bf16 %v11647_v20  ;;  %v2716_v59 = vsel %vm2700_vm5, %v10991_v36, %v8001_v26 }
 0x338   : > { %3148 = vmatmul.mubr.bf16.gmra.mrb[20].mxu0 %v2937_v9  ;;  %v12021_v10 = vpop.permute.xlu1 %8363  ;;  %v2777_v54 = vsel %vm2762_vm7, %v2744_v1, %v8150_v27  ;;  %v2778_v11 = vsel %vm2762_vm7, %v2745_v33, %v8151_v18  ;;  %v2939_v49 = vpack.c.bf16 %v2908_v19, %v2907_v52  ;;  %v8356_v20 = vunpack.i.h.bf16 %v12006_v3 }
 0x339   : > { %7870 = vmatprep.mubr.msk.bf16.mxu0 %vm2700_vm5, %v16259_v21  ;;  %v2810_v7 = vsel %vm2795_vm8, %v2777_v54, %v8230_v57  ;;  %v2811_v8 = vsel %vm2795_vm8, %v2778_v11, %v8231_v29  ;;  %v8355_v58 = vunpack.i.l.bf16 %v12006_v3  ;;  %v8076_v0 = vunpack.i.h.bf16 %v11709_v55  ;;  %v16271_v11 = vld [vmem:[#allocation38_spill] sm:$0xff] }
 0x33a   : > { %v12036_v35 = vpop.permute.xlu0 %8368  ;;  %v2843_v47 = vsel %vm2828_vm9, %v2810_v7, %v8345_v5  ;;  %v2844_v45 = vsel %vm2828_vm9, %v2811_v8, %v8346_v39  ;;  %v8075_v46 = vunpack.i.l.bf16 %v11709_v55  ;;  %v8351_v36 = vunpack.i.h.bf16 %v11998_v6  ;;  %v16267_v55 = vld [vmem:[#allocation97_spill] sm:$0xff] }
 0x33b   : > { %v8350_v23 = vunpack.i.l.bf16 %v11998_v6  ;;  %v2715_v25 = vsel %vm2700_vm5, %v16261_v42, %v8000_v41  ;;  %v8006_v17 = vunpack.i.h.bf16 %v16262_v37  ;;  %v8156_v53 = vunpack.i.h.bf16 %v16263_v63  ;;  %v16270_v41 = vld [vmem:[#allocation94_spill] sm:$0xff] }
 0x33c   : > { %v12044_v51 = vpop.permute.xlu1 %8373  ;;  %v8155_v50 = vunpack.i.l.bf16 %v16263_v63  ;;  %v16266_v43 = vpack.c.bf16 %v16264_v40, %v16265_v34  ;;  %v8236_v3 = vunpack.i.h.bf16 %v16267_v55  ;;  %v8235_v6 = vunpack.i.l.bf16 %v16267_v55  ;;  %v16275_v63 = vld [vmem:[#allocation87_spill] sm:$0xff] }
 0x33d   : > { %v2876_v38 = vsel %vm2861_vm10, %v2843_v47, %v8350_v23  ;;  %v2877_v16 = vsel %vm2861_vm10, %v2844_v45, %v8351_v36  ;;  %v8361_v12 = vunpack.i.h.bf16 %v12013_v44  ;;  %v8360_v4 = vunpack.i.l.bf16 %v12013_v44  ;;  %v16273_v47 = vld [vmem:[#allocation58_spill] sm:$0xff] }
 0x33e   : > { %v12053_v15 = vpop.permute.xlu0 %8378  ;;  %v2909_v9 = vsel %vm2894_vm11, %v2876_v38, %v8355_v58  ;;  %v2910_v13 = vsel %vm2894_vm11, %v2877_v16, %v8356_v20  ;;  %v2746_v61 = vsel %vm2731_vm6, %v2715_v25, %v8075_v46  ;;  %v2747_v48 = vsel %vm2731_vm6, %v2716_v59, %v8076_v0  ;;  %v16277_v16 = vld [vmem:[#allocation22_spill] sm:$0xff] }
 0x33f   : > { %v8366_v32 = vunpack.i.h.bf16 %v12021_v10  ;;  %v8365_v31 = vunpack.i.l.bf16 %v12021_v10  ;;  %v8005_v62 = vunpack.i.l.bf16 %v16262_v37  ;;  %v8081_v18 = vunpack.i.h.bf16 %v16268_v2  ;;  %v16269_v10 = vld [vmem:[#allocation92_spill] sm:$0xff] }
 0x340   : > { %3156 = vmatmul.mubr.bf16.gmra.mrb[24].mxu0 %v2939_v49  ;;  %v12063_v24 = vpop.permute.xlu1 %8383  ;;  %v2779_v44 = vsel %vm2762_vm7, %v2746_v61, %v8155_v50  ;;  %v2780_v27 = vsel %vm2762_vm7, %v2747_v48, %v8156_v53  ;;  %v8080_v60 = vunpack.i.l.bf16 %v16268_v2  ;;  %v2941_v28 = vpack.c.bf16 %v2910_v13, %v2909_v9  ;;  %v16272_v49 = vld [vmem:[#allocation57_spill] sm:$0xff]  ;;  %v16279_v2 = vld [vmem:[#allocation39_spill] sm:$0xff] }
 0x341   : > { %7871 = vmatprep.mubr.msk.bf16.mxu0 %vm2700_vm5, %v16266_v43  ;;  %v2812_v56 = vsel %vm2795_vm8, %v2779_v44, %v8235_v6  ;;  %v2813_v21 = vsel %vm2795_vm8, %v2780_v27, %v8236_v3  ;;  %v8161_v26 = vunpack.i.h.bf16 %v16269_v10  ;;  %v8160_v29 = vunpack.i.l.bf16 %v16269_v10  ;;  %v16276_v43 = vld [vmem:[#allocation71_spill] sm:$0xff] }
 0x342   : > { %v12076_v30 = vpop.permute.xlu0 %8388  ;;  %v2845_v57 = vsel %vm2828_vm9, %v2812_v56, %v8360_v4  ;;  %v2846_v39 = vsel %vm2828_vm9, %v2813_v21, %v8361_v12  ;;  %v8376_v5 = vunpack.i.h.bf16 %v12044_v51  ;;  %v8375_v52 = vunpack.i.l.bf16 %v12044_v51  ;;  %v16281_v56 = vld [vmem:[#allocation105_spill] sm:$0xff] }
 0x343   : > { %v2878_v33 = vsel %vm2861_vm10, %v2845_v57, %v8365_v31  ;;  %v2879_v1 = vsel %vm2861_vm10, %v2846_v39, %v8366_v32  ;;  %v2718_v54 = vsel %vm2700_vm5, %v16270_v41, %v8006_v17  ;;  %v2717_v59 = vsel %vm2700_vm5, %v16271_v11, %v8005_v62  ;;  %v16278_v31 = vld [vmem:[#allocation41_spill] sm:$0xff]  ;;  %v16283_v41 = vld [vmem:[#allocation107_spill] sm:$0xff] }
 0x344   : > { %v12088_v14 = vpop.permute.xlu1 %8393  ;;  %v8371_v7 = vunpack.i.h.bf16 %v12036_v35  ;;  %v8370_v8 = vunpack.i.l.bf16 %v12036_v35  ;;  %v16274_v51 = vpack.c.bf16 %v16272_v49, %v16273_v47  ;;  %v2749_v45 = vsel %vm2731_vm6, %v2718_v54, %v8081_v18 }
 0x345   : > { %v2748_v20 = vsel %vm2731_vm6, %v2717_v59, %v8080_v60  ;;  %v2782_v46 = vsel %vm2762_vm7, %v2749_v45, %v8161_v26  ;;  %v8386_v25 = vunpack.i.h.bf16 %v12063_v24  ;;  %v8385_v37 = vunpack.i.l.bf16 %v12063_v24  ;;  %v16280_v60 = vld [vmem:[#allocation56_spill] sm:$0xff] }
 0x346   : > { %v12097_v22 = vpop.permute.xlu0 %8398  ;;  %v2781_v0 = vsel %vm2762_vm7, %v2748_v20, %v8160_v29  ;;  %v2911_v36 = vsel %vm2894_vm11, %v2878_v33, %v8370_v8  ;;  %v2912_v23 = vsel %vm2894_vm11, %v2879_v1, %v8371_v7  ;;  %v2815_v42 = vsel %vm2795_vm8, %v2782_v46, %v8376_v5  ;;  %v16284_v8 = vld [vmem:[#allocation18_spill] sm:$0xff] }
 0x347   : > { %v2814_v35 = vsel %vm2795_vm8, %v2781_v0, %v8375_v52  ;;  %v8011_v53 = vunpack.i.h.bf16 %v16275_v63  ;;  %v8010_v50 = vunpack.i.l.bf16 %v16275_v63  ;;  %v8381_v40 = vunpack.i.h.bf16 %v12053_v15  ;;  %v16285_v20 = vld [vmem:[#allocation74_spill] sm:$0xff] }
 0x348   : > { %3164 = vmatmul.mubr.bf16.gmra.mrb[28].mxu0 %v2941_v28  ;;  %v12105_v19 = vpop.permute.xlu1 %8403  ;;  %v8380_v34 = vunpack.i.l.bf16 %v12053_v15  ;;  %v8086_v55 = vunpack.i.h.bf16 %v16276_v43  ;;  %v8085_v3 = vunpack.i.l.bf16 %v16276_v43  ;;  %v2943_v38 = vpack.c.bf16 %v2912_v23, %v2911_v36  ;;  %v16288_v43 = vld [vmem:[#allocation60_spill] sm:$0xff] }
 0x349   : > { %7872 = vmatprep.mubr.msk.bf16.mxu0 %vm2700_vm5, %v16274_v51  ;;  %v8166_v12 = vunpack.i.h.bf16 %v16277_v16  ;;  %v8165_v24 = vunpack.i.l.bf16 %v16277_v16  ;;  %v2848_v9 = vsel %vm2828_vm9, %v2815_v42, %v8381_v40  ;;  %v8396_v13 = vunpack.i.h.bf16 %v12088_v14 }
 0x34a   : > { %v12121_v58 = vpop.permute.xlu0 %8408  ;;  %v2847_v4 = vsel %vm2828_vm9, %v2814_v35, %v8380_v34  ;;  %v8395_v61 = vunpack.i.l.bf16 %v12088_v14  ;;  %v2881_v32 = vsel %vm2861_vm10, %v2848_v9, %v8386_v25  ;;  %v2720_v62 = vsel %vm2700_vm5, %v16278_v31, %v8011_v53  ;;  %v16287_v53 = vld [vmem:[#allocation42_spill] sm:$0xff]  ;;  %v16291_v31 = vld [vmem:[#allocation68_spill] sm:$0xff] }
 0x34b   : > { %v2880_v48 = vsel %vm2861_vm10, %v2847_v4, %v8385_v37  ;;  %v2719_v18 = vsel %vm2700_vm5, %v16279_v2, %v8010_v50  ;;  %v8391_v44 = vunpack.i.h.bf16 %v12076_v30  ;;  %v8390_v27 = vunpack.i.l.bf16 %v12076_v30  ;;  %v16286_v37 = vld [vmem:[#allocation44_spill] sm:$0xff] }
 0x34c   : > { %v12131_v17 = vpop.permute.xlu1 %8413  ;;  %v16282_v14 = vpack.c.bf16 %v16280_v60, %v16281_v56  ;;  %v2750_v21 = vsel %vm2731_vm6, %v2719_v18, %v8085_v3  ;;  %v2751_v28 = vsel %vm2731_vm6, %v2720_v62, %v8086_v55  ;;  %v8406_v52 = vunpack.i.h.bf16 %v12105_v19  ;;  %v16289_v55 = vld [vmem:[#allocation14_spill] sm:$0xff] }
 0x34d   : > { %v2783_v26 = vsel %vm2762_vm7, %v2750_v21, %v8165_v24  ;;  %v2784_v29 = vsel %vm2762_vm7, %v2751_v28, %v8166_v12  ;;  %v2913_v57 = vsel %vm2894_vm11, %v2880_v48, %v8390_v27  ;;  %v2914_v39 = vsel %vm2894_vm11, %v2881_v32, %v8391_v44  ;;  %v16292_v27 = vld [vmem:[#allocation17_spill] sm:$0xff] }
 0x34e   : > { %v12139_v6 = vpop.permute.xlu0 %8418  ;;  %v2816_v30 = vsel %vm2795_vm8, %v2783_v26, %v8395_v61  ;;  %v2817_v5 = vsel %vm2795_vm8, %v2784_v29, %v8396_v13  ;;  %v8405_v33 = vunpack.i.l.bf16 %v12105_v19  ;;  %v8016_v54 = vunpack.i.h.bf16 %v16283_v41  ;;  %v16293_v21 = vld [vmem:[#allocation77_spill] sm:$0xff] }
 0x34f   : > { %v8015_v11 = vunpack.i.l.bf16 %v16283_v41  ;;  %v8401_v59 = vunpack.i.h.bf16 %v12097_v22  ;;  %v8400_v7 = vunpack.i.l.bf16 %v12097_v22  ;;  %v8091_v49 = vunpack.i.h.bf16 %v16284_v8  ;;  %v16295_v41 = vld [vmem:[#allocation43_spill] sm:$0xff] }
 0x350   : > { %3172 = vmatmul.mubr.bf16.gmra.mrb[32].mxu0 %v2943_v38  ;;  %v12147_v15 = vpop.permute.xlu1 %8423  ;;  %v8090_v47 = vunpack.i.l.bf16 %v16284_v8  ;;  %v2945_v45 = vpack.c.bf16 %v2914_v39, %v2913_v57  ;;  %v8171_v0 = vunpack.i.h.bf16 %v16285_v20  ;;  %v8170_v19 = vunpack.i.l.bf16 %v16285_v20  ;;  %v16297_v8 = vld [vmem:[#allocation15_spill] sm:$0xff] }
 0x351   : > { %7873 = vmatprep.mubr.msk.bf16.mxu0 %vm2700_vm5, %v16282_v14  ;;  %v2849_v46 = vsel %vm2828_vm9, %v2816_v30, %v8400_v7  ;;  %v2850_v36 = vsel %vm2828_vm9, %v2817_v5, %v8401_v59  ;;  %v8416_v23 = vunpack.i.h.bf16 %v12131_v17  ;;  %v8415_v35 = vunpack.i.l.bf16 %v12131_v17 }
 0x352   : > { %v12163_v10 = vpop.permute.xlu0 %8428  ;;  %v2882_v42 = vsel %vm2861_vm10, %v2849_v46, %v8405_v33  ;;  %v2883_v25 = vsel %vm2861_vm10, %v2850_v36, %v8406_v52  ;;  %v2722_v63 = vsel %vm2700_vm5, %v16286_v37, %v8016_v54  ;;  %v2721_v50 = vsel %vm2700_vm5, %v16287_v53, %v8015_v11  ;;  %v16294_v52 = vld [vmem:[#allocation54_spill] sm:$0xff] }
 0x353   : > { %v8411_v40 = vunpack.i.h.bf16 %v12121_v58  ;;  %v8410_v34 = vunpack.i.l.bf16 %v12121_v58  ;;  %v16290_v17 = vpack.c.bf16 %v16288_v43, %v16289_v55  ;;  %v2753_v3 = vsel %vm2731_vm6, %v2722_v63, %v8091_v49 }
 0x354   : > { %v12173_v1 = vpop.permute.xlu1 %8433  ;;  %v2752_v38 = vsel %vm2731_vm6, %v2721_v50, %v8090_v47  ;;  %v2786_v24 = vsel %vm2762_vm7, %v2753_v3, %v8171_v0  ;;  %v8426_v61 = vunpack.i.h.bf16 %v12147_v15  ;;  %v8425_v48 = vunpack.i.l.bf16 %v12147_v15  ;;  %v16299_v47 = vld [vmem:[#allocation67_spill] sm:$0xff] }
 0x355   : > { %v2785_v12 = vsel %vm2762_vm7, %v2752_v38, %v8170_v19  ;;  %v2915_v4 = vsel %vm2894_vm11, %v2882_v42, %v8410_v34  ;;  %v2916_v9 = vsel %vm2894_vm11, %v2883_v25, %v8411_v40  ;;  %v2819_v13 = vsel %vm2795_vm8, %v2786_v24, %v8416_v23  ;;  %v16300_v50 = vld [vmem:[#allocation47_spill] sm:$0xff]  ;;  %v16302_v38 = vld [vmem:[#allocation20_spill] sm:$0xff] }
 0x356   : > { %v12181_v51 = vpop.permute.xlu0 %8438  ;;  %v2818_v58 = vsel %vm2795_vm8, %v2785_v12, %v8415_v35  ;;  %v8021_v62 = vunpack.i.h.bf16 %v16291_v31  ;;  %v8020_v2 = vunpack.i.l.bf16 %v16291_v31  ;;  %v8421_v18 = vunpack.i.h.bf16 %v12139_v6  ;;  %v16301_v34 = vld [vmem:[#allocation19_spill] sm:$0xff] }
 0x357   : > { %v8420_v44 = vunpack.i.l.bf16 %v12139_v6  ;;  %v8096_v60 = vunpack.i.h.bf16 %v16292_v27  ;;  %v8095_v56 = vunpack.i.l.bf16 %v16292_v27  ;;  %v2947_v14 = vpack.c.bf16 %v2916_v9, %v2915_v4  ;;  %v16305_v27 = vld [vmem:[#allocation65_spill] sm:$0xff] }
 0x358   : > { %3180 = vmatmul.mubr.bf16.gmra.mrb[36].mxu0 %v2945_v45  ;;  %v12189_v22 = vpop.permute.xlu1 %8443  ;;  %v8176_v28 = vunpack.i.h.bf16 %v16293_v21  ;;  %v8175_v26 = vunpack.i.l.bf16 %v16293_v21  ;;  %v2852_v29 = vsel %vm2828_vm9, %v2819_v13, %v8421_v18  ;;  %v8436_v57 = vunpack.i.h.bf16 %v12173_v1 }
 0x359   : > { %7874 = vmatprep.mubr.msk.bf16.mxu0 %vm2700_vm5, %v16290_v17  ;;  %v2851_v15 = vsel %vm2828_vm9, %v2818_v58, %v8420_v44  ;;  %v8435_v39 = vunpack.i.l.bf16 %v12173_v1  ;;  %v2885_v5 = vsel %vm2861_vm10, %v2852_v29, %v8426_v61  ;;  %v2724_v33 = vsel %vm2700_vm5, %v16294_v52, %v8021_v62  ;;  %v16296_v1 = vld [vmem:[#allocation81_spill] sm:$0xff]  ;;  %v16304_v62 = vld [vmem:[#allocation88_spill] sm:$0xff] }
 0x35a   : > { %v12205_v16 = vpop.permute.xlu0 %8448  ;;  %v2884_v6 = vsel %vm2861_vm10, %v2851_v15, %v8425_v48  ;;  %v2723_v54 = vsel %vm2700_vm5, %v16295_v41, %v8020_v2  ;;  %v8431_v11 = vunpack.i.h.bf16 %v12163_v10  ;;  %v8430_v59 = vunpack.i.l.bf16 %v12163_v10  ;;  %v16303_v48 = vld [vmem:[#allocation63_spill] sm:$0xff]  ;;  %v16308_v52 = vld [vmem:[#allocation48_spill] sm:$0xff] }
 0x35b   : > { %v16298_v49 = vpack.c.bf16 %v16296_v1, %v16297_v8  ;;  %v8026_v45 = vunpack.i.h.bf16 %v16299_v47  ;;  %v2754_v20 = vsel %vm2731_vm6, %v2723_v54, %v8095_v56  ;;  %v2755_v0 = vsel %vm2731_vm6, %v2724_v33, %v8096_v60  ;;  %v16306_v60 = vld [vmem:[#allocation62_spill] sm:$0xff]  ;;  %v16310_v8 = vld [vmem:[#allocation76_spill] sm:$0xff] }
 0x35c   : > { %v12215_v32 = vpop.permute.xlu1 %8453  ;;  %v2787_v19 = vsel %vm2762_vm7, %v2754_v20, %v8175_v26  ;;  %v2788_v46 = vsel %vm2762_vm7, %v2755_v0, %v8176_v28  ;;  %v2917_v36 = vsel %vm2894_vm11, %v2884_v6, %v8430_v59  ;;  %v2918_v10 = vsel %vm2894_vm11, %v2885_v5, %v8431_v11  ;;  %v16309_v59 = vld [vmem:[#allocation49_spill] sm:$0xff] }
 0x35d   : > { %v2820_v23 = vsel %vm2795_vm8, %v2787_v19, %v8435_v39  ;;  %v2821_v35 = vsel %vm2795_vm8, %v2788_v46, %v8436_v57  ;;  %v8446_v42 = vunpack.i.h.bf16 %v12189_v22  ;;  %v8445_v25 = vunpack.i.l.bf16 %v12189_v22  ;;  %v16311_v20 = vld [vmem:[#allocation21_spill] sm:$0xff] }
 0x35e   : > { %v12229_v30 = vpop.permute.xlu0 %8458  ;;  %v8025_v37 = vunpack.i.l.bf16 %v16299_v47  ;;  %v8441_v63 = vunpack.i.h.bf16 %v12181_v51  ;;  %v8440_v53 = vunpack.i.l.bf16 %v12181_v51  ;;  %v2726_v40 = vsel %vm2700_vm5, %v16300_v50, %v8026_v45  ;;  %v16313_v50 = vld [vmem:[#allocation61_spill] sm:$0xff] }
 0x35f   : > { %v8101_v43 = vunpack.i.h.bf16 %v16301_v34  ;;  %v8100_v55 = vunpack.i.l.bf16 %v16301_v34  ;;  %v2949_v3 = vpack.c.bf16 %v2918_v10, %v2917_v36  ;;  %v8181_v12 = vunpack.i.h.bf16 %v16302_v38 }
 0x360   : > { %3188 = vmatmul.mubr.bf16.gmra.mrb[40].mxu0 %v2947_v14  ;;  %v12239_v7 = vpop.permute.xlu1 %8463  ;;  %v8180_v22 = vunpack.i.l.bf16 %v16302_v38  ;;  %v2853_v4 = vsel %vm2828_vm9, %v2820_v23, %v8440_v53  ;;  %v2854_v9 = vsel %vm2828_vm9, %v2821_v35, %v8441_v63  ;;  %v8456_v51 = vunpack.i.h.bf16 %v12215_v32 }
 0x361   : > { %7875 = vmatprep.mubr.msk.bf16.mxu0 %vm2700_vm5, %v16298_v49  ;;  %v8455_v58 = vunpack.i.l.bf16 %v12215_v32  ;;  %v2886_v13 = vsel %vm2861_vm10, %v2853_v4, %v8445_v25  ;;  %v2887_v61 = vsel %vm2861_vm10, %v2854_v9, %v8446_v42  ;;  %v2725_v31 = vsel %vm2700_vm5, %v16303_v48, %v8025_v37  ;;  %v16312_v42 = vld [vmem:[#allocation69_spill] sm:$0xff] }
 0x362   : > { %v12263_v17 = vpop.permute.xlu0 %8468  ;;  %v8031_v2 = vunpack.i.h.bf16 %v16304_v62  ;;  %v8451_v18 = vunpack.i.h.bf16 %v12205_v16  ;;  %v8450_v44 = vunpack.i.l.bf16 %v12205_v16  ;;  %v16307_v56 = vpack.c.bf16 %v16305_v27, %v16306_v60  ;;  %v16316_v60 = vld [vmem:[#allocation64_spill] sm:$0xff] }
 0x363   : > { %v8030_v32 = vunpack.i.l.bf16 %v16304_v62  ;;  %v2757_v14 = vsel %vm2731_vm6, %v2726_v40, %v8101_v43  ;;  %v2756_v21 = vsel %vm2731_vm6, %v2725_v31, %v8100_v55  ;;  %v8466_v39 = vunpack.i.h.bf16 %v12239_v7  ;;  %v16314_v40 = vld [vmem:[#allocation91_spill] sm:$0xff] }
 0x364   : > { %v8474_v24 = vpop.permute.xlu1 %8473  ;;  %v2789_v28 = vsel %vm2762_vm7, %v2756_v21, %v8180_v22  ;;  %v2790_v26 = vsel %vm2762_vm7, %v2757_v14, %v8181_v12  ;;  %v2919_v15 = vsel %vm2894_vm11, %v2886_v13, %v8450_v44  ;;  %v2920_v29 = vsel %vm2894_vm11, %v2887_v61, %v8451_v18  ;;  %v16315_v61 = vld [vmem:[#allocation96_spill] sm:$0xff] }
 0x365   : > { %v2822_v16 = vsel %vm2795_vm8, %v2789_v28, %v8455_v58  ;;  %v2823_v57 = vsel %vm2795_vm8, %v2790_v26, %v8456_v51  ;;  %v8465_v6 = vunpack.i.l.bf16 %v12239_v7  ;;  %v2728_v33 = vsel %vm2700_vm5, %v16308_v52, %v8031_v2 }
 0x366   : > { %v8479_v5 = vpop.permute.xlu0 %8478  ;;  %v8461_v41 = vunpack.i.h.bf16 %v12229_v30  ;;  %v8460_v54 = vunpack.i.l.bf16 %v12229_v30  ;;  %v2727_v1 = vsel %vm2700_vm5, %v16309_v59, %v8030_v32  ;;  %v8106_v49 = vunpack.i.h.bf16 %v16310_v8  ;;  %v16317_v32 = vld [vmem:[#allocation100_spill] sm:$0xff] }
 0x367   : > { %v8105_v47 = vunpack.i.l.bf16 %v16310_v8  ;;  %v2951_v45 = vpack.c.bf16 %v2920_v29, %v2919_v15  ;;  %v8186_v0 = vunpack.i.h.bf16 %v16311_v20  ;;  %v8185_v19 = vunpack.i.l.bf16 %v16311_v20 }
 0x368   : > { %3196 = vmatmul.mubr.bf16.gmra.mrb[44].mxu0 %v2949_v3  ;;  %v8484_v11 = vpop.permute.xlu1 %8483  ;;  %v2855_v46 = vsel %vm2828_vm9, %v2822_v16, %v8460_v54  ;;  %v2856_v36 = vsel %vm2828_vm9, %v2823_v57, %v8461_v41  ;;  %v8476_v10 = vunpack.i.h.bf16 %v8474_v24  ;;  %v8475_v23 = vunpack.i.l.bf16 %v8474_v24  ;;  %v16318_v54 = vld [vmem:[#allocation66_spill] sm:$0xff] }
 0x369   : > { %7876 = vmatprep.mubr.msk.bf16.mxu0 %vm2700_vm5, %v16307_v56  ;;  %v2888_v30 = vsel %vm2861_vm10, %v2855_v46, %v8465_v6  ;;  %v2889_v35 = vsel %vm2861_vm10, %v2856_v36, %v8466_v39  ;;  %v8036_v25 = vunpack.i.h.bf16 %v16312_v42  ;;  %v8035_v37 = vunpack.i.l.bf16 %v16312_v42  ;;  %v12364_v42 = vld [vmem:[%s15659_s4] ss:$0 sm:$0xff] }
 0x36a   : > { %v8471_v63 = vunpack.i.h.bf16 %v12263_v17  ;;  %v8470_v53 = vunpack.i.l.bf16 %v12263_v17  ;;  %v8111_v34 = vunpack.i.h.bf16 %v16314_v40  ;;  %v8110_v43 = vunpack.i.l.bf16 %v16314_v40  ;;  %v8489_v38 = vpop.permute.xlu0 %8488 }
 0x36b   : > { %v2758_v55 = vsel %vm2731_vm6, %v2727_v1, %v8105_v47  ;;  %v2759_v3 = vsel %vm2731_vm6, %v2728_v33, %v8106_v49  ;;  %v8486_v58 = vunpack.i.h.bf16 %v8484_v11  ;;  %v8485_v13 = vunpack.i.l.bf16 %v8484_v11  ;;  %v16319_v11 = vld [vmem:[#allocation106_spill] sm:$0xff] }
 0x36c   : > { %v2791_v12 = vsel %vm2762_vm7, %v2758_v55, %v8185_v19  ;;  %v2792_v22 = vsel %vm2762_vm7, %v2759_v3, %v8186_v0  ;;  %v8494_v24 = vpop.permute.xlu1 %8493  ;;  %v2921_v4 = vsel %vm2894_vm11, %v2888_v30, %v8470_v53  ;;  %v2922_v17 = vsel %vm2894_vm11, %v2889_v35, %v8471_v63  ;;  %v9054_v55 = vld [vmem:[%s15660_s5 + $0x8] sm:$0xff]  }
 0x36d   : > { %v2824_v9 = vsel %vm2795_vm8, %v2791_v12, %v8475_v23  ;;  %v2825_v51 = vsel %vm2795_vm8, %v2792_v22, %v8476_v10  ;;  %v8191_v48 = vunpack.i.h.bf16 %v16315_v61  ;;  %v8190_v31 = vunpack.i.l.bf16 %v16315_v61 }
 0x36e   : > { %v8481_v62 = vunpack.i.h.bf16 %v8479_v5  ;;  %v8480_v2 = vunpack.i.l.bf16 %v8479_v5  ;;  %v8496_v18 = vunpack.i.h.bf16 %v8494_v24  ;;  %v8495_v44 = vunpack.i.l.bf16 %v8494_v24  ;;  %v8499_v29 = vpop.permute.xlu0 %8498 }
 0x36f   : > { %v2953_v27 = vpack.c.bf16 %v2922_v17, %v2921_v4  ;;  %v2730_v56 = vsel %vm2700_vm5, %v16316_v60, %v8036_v25  ;;  %v2729_v14 = vsel %vm2700_vm5, %v16317_v32, %v8035_v37  ;;  %v8491_v33 = vunpack.i.h.bf16 %v8489_v38  ;;  %v9055_v17 = vld [vmem:[%s15660_s5 + $0x10] sm:$0xff]  }
 0x370   : > { %3204 = vmatmul.mubr.bf16.gmra.mrb[48].mxu0 %v2951_v45  ;;  %v2857_v21 = vsel %vm2828_vm9, %v2824_v9, %v8480_v2  ;;  %v2858_v28 = vsel %vm2828_vm9, %v2825_v51, %v8481_v62  ;;  %v2761_v26 = vsel %vm2731_vm6, %v2730_v56, %v8111_v34  ;;  %v2760_v15 = vsel %vm2731_vm6, %v2729_v14, %v8110_v43 }
 0x371   : > { %7877 = vmatprep.mubr.msk.bf16.mxu0 %vm2700_vm5, %v16313_v50  ;;  %v2890_v16 = vsel %vm2861_vm10, %v2857_v21, %v8485_v13  ;;  %v2891_v57 = vsel %vm2861_vm10, %v2858_v28, %v8486_v58  ;;  %v2793_v5 = vsel %vm2762_vm7, %v2760_v15, %v8190_v31  ;;  %v2794_v52 = vsel %vm2762_vm7, %v2761_v26, %v8191_v48 }
 0x372   : > { %v8490_v41 = vunpack.i.l.bf16 %v8489_v38  ;;  %v16320_v59 = vpack.c.bf16 %v16318_v54, %v16319_v11  ;;  %v2826_v1 = vsel %vm2795_vm8, %v2793_v5, %v8495_v44  ;;  %v2827_v8 = vsel %vm2795_vm8, %v2794_v52, %v8496_v18 }
 0x373   : > { %v8501_v49 = vunpack.i.h.bf16 %v8499_v29  ;;  %v8500_v47 = vunpack.i.l.bf16 %v8499_v29  ;;  %v2924_v20 = vsel %vm2894_vm11, %v2891_v57, %v8491_v33  ;;  %v16325_v12 = vmov 0  }
 0x374   : > { %v2923_v45 = vsel %vm2894_vm11, %v2890_v16, %v8490_v41  ;;  %v9057_v41 = vld [vmem:[%s15660_s5 + $0x20] sm:$0xff]  }
 0x375   : > { %v2859_v0 = vsel %vm2828_vm9, %v2826_v1, %v8500_v47  ;;  %v2860_v19 = vsel %vm2828_vm9, %v2827_v8, %v8501_v49  ;;  %v2955_v46 = vpack.c.bf16 %v2924_v20, %v2923_v45 }
 0x376   : > { %v2892_v36 = vsel %vm2861_vm10, %v2859_v0, %v8465_v6  ;;  %v2893_v10 = vsel %vm2861_vm10, %v2860_v19, %v8466_v39 }
 0x377   : > { %v2925_v23 = vsel %vm2894_vm11, %v2892_v36, %v8470_v53  ;;  %v2926_v30 = vsel %vm2894_vm11, %v2893_v10, %v8471_v63  ;;  %v9058_v10 = vld [vmem:[%s15660_s5 + $0x28] sm:$0xff]  }
 0x378   : > { %3212 = vmatmul.mubr.bf16.gmra.mrb[52].mxu0 %v2953_v27  ;;  %v2957_v35 = vpack.c.bf16 %v2926_v30, %v2925_v23  ;;  %v9056_v27 = vld [vmem:[%s15660_s5 + $0x18] sm:$0xff]  }
 0x379   : > { %7878 = vmatprep.mubr.msk.bf16.mxu0 %vm2700_vm5, %v16320_v59 }
 0x380   : > { %3220 = vmatmul.mubr.bf16.gmra.mrb[56].mxu0 %v2955_v46 }
 0x381   : > { %7879 = vmatprep.mubr.msk.bf16.mxu0 %vm2700_vm5, %v16313_v50  ;;  %v9053_v50 = vld [vmem:[%s15660_s5] sm:$0xff]  }
 0x382   : > { %4769 = vmatpush1.bf16.msra.mxu1 %v9053_v50 }
 0x383   : > { %4770 = vmatprep.subr.bf16.mxu1 %v16325_v12 }
 0x386   : > { %4771 = vmatpush1.bf16.msra.mxu1 %v9054_v55 }
 0x387   : > { %4772 = vmatprep.subr.bf16.mxu1 %v16325_v12 }
 0x388   : > { %3228 = vmatmul.mubr.bf16.gmra.mrb[60].mxu0 %v2957_v35 }
 0x38a   : > { %4773 = vmatpush1.bf16.msra.mxu1 %v9055_v17 }
 0x38b   : > { %4774 = vmatprep.subr.bf16.mxu1 %v16325_v12 }
 0x38e   : > { %4775 = vmatpush1.bf16.msra.mxu1 %v9056_v27 }
 0x38f   : > { %4776 = vmatprep.subr.bf16.mxu1 %v16325_v12 }
 0x392   : > { %4777 = vmatpush1.bf16.msra.mxu1 %v9057_v41 }
 0x393   : > { %4778 = vmatprep.subr.bf16.mxu1 %v16325_v12 }
 0x396   : > { %4779 = vmatpush1.bf16.msra.mxu1 %v9058_v10 }
 0x397   : > { %4780 = vmatprep.subr.bf16.mxu1 %v16325_v12 }
 0x3e3   : > { %v3109_v25 = vpop.f32.mrb[0].mxu0 }
 0x3e4   : > { %v12367_v6 = vadd.f32 %v12364_v42, %v3109_v25  ;;  %v3111_v7 = vpop.f32.mrb[1].mxu0 }
 0x3e5   : > { %v3112_v39 = vpop.f32.mrb[2].mxu0 }
 0x3e6   : > { %16321 = vst [vmem:[#allocation95_spill] sm:$0xff] %v12367_v6  ;;  %9126 = vtanh.f32 %v12367_v6  ;;  %v12371_v37 = vadd.f32 %v12364_v42, %v3112_v39  ;;  %v3114_v53 = vpop.f32.mrb[3].mxu0 }
 0x3e8   : > { %16322 = vst [vmem:[#allocation45_spill] sm:$0xff] %v12371_v37  ;;  %9128 = vtanh.f32 %v12371_v37 }
 0x3eb   : > { %v3117_v63 = vpop.f32.mrb[4].mxu0 }
 0x3ec   : > { %v12378_v40 = vadd.f32 %v12364_v42, %v3117_v63  ;;  %v3119_v34 = vpop.f32.mrb[5].mxu0 }
 0x3ed   : > { %v3120_v43 = vpop.f32.mrb[6].mxu0 }
 0x3ee   : > { %16323 = vst [vmem:[#allocation23_spill] sm:$0xff] %v12378_v40  ;;  %9130 = vtanh.f32 %v12378_v40  ;;  %v12385_v3 = vadd.f32 %v12364_v42, %v3120_v43  ;;  %v3122_v38 = vpop.f32.mrb[7].mxu0 }
 0x3f0   : > { %16324 = vst [vmem:[#allocation84_spill] sm:$0xff] %v12385_v3  ;;  %v9127_v22 = vpop.eup %9126  ;;  %9132 = vtanh.f32 %v12385_v3 }
 0x3f1   : > { %v3324_v24 = vrot.slane %v9127_v22, 1  ;;  %v3374_v4 = vrot.slane %v9127_v22, 7  ;;  %v9059_v22 = vld [vmem:[%s15660_s5 + $0x30] sm:$0xff]  }
 0x3f2   : > { %v9129_v9 = vpop.eup %9128  ;;  %4781 = vmatpush1.bf16.msra.mxu1 %v9059_v22 }
 0x3f3   : > { %v3375_v51 = vrot.slane %v9129_v9, 7  ;;  %v3467_v58 = vrot.slane %v9129_v9, 5  ;;  %v3125_v13 = vpop.f32.mrb[8].mxu0  ;;  %v12394_v61 = vsel %vm354_vm0, %v3324_v24, %v3374_v4  ;;  %4782 = vmatprep.subr.bf16.mxu1 %v16325_v12 }
 0x3f4   : > { %v12397_v48 = vadd.f32 %v12364_v42, %v3125_v13  ;;  %v3127_v31 = vpop.f32.mrb[9].mxu0  ;;  %v3565_v44 = vrot.slane %v12394_v61, 1  ;;  %v3730_v28 = vrot.slane %v12394_v61, 2 }
 0x3f5   : > { %v3128_v62 = vpop.f32.mrb[10].mxu0  ;;  %v12400_v2 = vsel %vm354_vm0, %v3374_v4, %v3375_v51  ;;  %v3515_v18 = vsel %vm354_vm0, %v3375_v51, %v3467_v58 }
 0x3f6   : > { %16326 = vst [vmem:[#allocation28_spill] sm:$0xff] %v12397_v48  ;;  %9134 = vtanh.f32 %v12397_v48  ;;  %v12409_v60 = vadd.f32 %v12364_v42, %v3128_v62  ;;  %v3130_v56 = vpop.f32.mrb[11].mxu0  ;;  %v8502_v32 = vpack.i.bf16 %v12400_v2, %v12394_v61  ;;  %v3566_v14 = vrot.slane %v12400_v2, 1 }
 0x3f7   : > { %v3568_v21 = vrot.slane %v3515_v18, 1  ;;  %v3731_v26 = vrot.slane %v12400_v2, 2  ;;  %v3733_v15 = vrot.slane %v3515_v18, 2 }
 0x3f8   : > { %16327 = vst [vmem:[#allocation27_spill] sm:$0xff] %v12409_v60  ;;  %v9131_v29 = vpop.eup %9130  ;;  %9136 = vtanh.f32 %v12409_v60  ;;  %8503 = vrot.lane.b32.xlu1 %v8502_v32, %s9253_s27  ;;  %v3567_v16 = vsel %vm1858_vm3, %v3565_v44, %v3566_v14 }
 0x3f9   : > { %v3323_v57 = vrot.slane %v9131_v29, 1  ;;  %v3371_v5 = vrot.slane %v9131_v29, 7  ;;  %v3569_v52 = vsel %vm1858_vm3, %v3566_v14, %v3568_v21  ;;  %v3732_v33 = vsel %vm2024_vm4, %v3730_v28, %v3731_v26  ;;  %v9060_v21 = vld [vmem:[%s15660_s5 + $0x38] sm:$0xff]  }
 0x3fa   : > { %v9133_v54 = vpop.eup %9132  ;;  %v8507_v11 = vpack.i.bf16 %v3569_v52, %v3567_v16  ;;  %v3734_v59 = vsel %vm2024_vm4, %v3731_v26, %v3733_v15  ;;  %4783 = vmatpush1.bf16.msra.mxu1 %v9060_v21 }
 0x3fb   : > { %v3372_v1 = vrot.slane %v9133_v54, 7  ;;  %v3466_v8 = vrot.slane %v9133_v54, 5  ;;  %v3133_v49 = vpop.f32.mrb[12].mxu0  ;;  %v8512_v47 = vpack.i.bf16 %v3734_v59, %v3732_v33  ;;  %v12432_v0 = vsel %vm354_vm0, %v3323_v57, %v3371_v5  ;;  %v9061_v54 = vld [vmem:[%s15660_s5 + $0x40] sm:$0xff]   ;;  %4784 = vmatprep.subr.bf16.mxu1 %v16325_v12 }
 0x3fc   : > { %8508 = vrot.lane.b32.xlu0 %v8507_v11, %s9251_s26  ;;  %v12429_v45 = vadd.f32 %v12364_v42, %v3133_v49  ;;  %v3135_v20 = vpop.f32.mrb[13].mxu0  ;;  %v3725_v35 = vrot.slane %v12432_v0, 2  ;;  %v3560_v50 = vrot.slane %v12432_v0, 1 }
 0x3fd   : > { %8513 = vrot.lane.b32.xlu1 %v8512_v47, %s9252_s25  ;;  %v3136_v19 = vpop.f32.mrb[14].mxu0  ;;  %v12436_v46 = vsel %vm354_vm0, %v3371_v5, %v3372_v1  ;;  %v3514_v36 = vsel %vm354_vm0, %v3372_v1, %v3466_v8 }
 0x3fe   : > { %16328 = vst [vmem:[#allocation89_spill] sm:$0xff] %v12429_v45  ;;  %9138 = vtanh.f32 %v12429_v45  ;;  %v12444_v23 = vadd.f32 %v12364_v42, %v3136_v19  ;;  %v3138_v30 = vpop.f32.mrb[15].mxu0  ;;  %v3563_v25 = vrot.slane %v3514_v36, 1  ;;  %v3726_v7 = vrot.slane %v12436_v46, 2  ;;  %4785 = vmatpush1.bf16.msra.mxu1 %v9061_v54 }
 0x3ff   : > { %v3728_v39 = vrot.slane %v3514_v36, 2  ;;  %v3561_v53 = vrot.slane %v12436_v46, 1  ;;  %v8527_v4 = vpack.i.bf16 %v12436_v46, %v12432_v0 }
 0x400   : > { %16329 = vst [vmem:[#allocation34_spill] sm:$0xff] %v12444_v23  ;;  %v9135_v63 = vpop.eup %9134  ;;  %9140 = vtanh.f32 %v12444_v23  ;;  %8518 = vrot.lane.b32.xlu0 %v8507_v11, %s9255_s19  ;;  %v3727_v55 = vsel %vm2024_vm4, %v3725_v35, %v3726_v7 }
 0x401   : > { %v3325_v34 = vrot.slane %v9135_v63, 1  ;;  %v3377_v43 = vrot.slane %v9135_v63, 7  ;;  %8523 = vrot.lane.b32.xlu1 %v8512_v47, %s9256_s13  ;;  %v3729_v38 = vsel %vm2024_vm4, %v3726_v7, %v3728_v39  ;;  %v3562_v9 = vsel %vm1858_vm3, %v3560_v50, %v3561_v53 }
 0x402   : > { %v9137_v24 = vpop.eup %9136  ;;  %v4621_v17 = vpack.c.bf16 %v3729_v38, %v3727_v55  ;;  %v3564_v31 = vsel %vm1858_vm3, %v3561_v53, %v3563_v25  ;;  %v8542_v59 = vpack.i.bf16 %v3729_v38, %v3727_v55 }
 0x403   : > { %v3378_v51 = vrot.slane %v9137_v24, 7  ;;  %v3468_v58 = vrot.slane %v9137_v24, 5  ;;  %v3141_v13 = vpop.f32.mrb[16].mxu0  ;;  %v8537_v18 = vpack.i.bf16 %v3564_v31, %v3562_v9  ;;  %v12470_v27 = vsel %vm354_vm0, %v3325_v34, %v3377_v43 }
 0x404   : > { %8528 = vrot.lane.b32.xlu0 %v8527_v4, %s9257_s14  ;;  %v12466_v62 = vadd.f32 %v12364_v42, %v3141_v13  ;;  %7890 = vmatprep.mubr.msk.bf16.mxu1 %vm2700_vm5, %v4621_v17  ;;  %v3143_v44 = vpop.f32.mrb[17].mxu0  ;;  %v3735_v29 = vrot.slane %v12470_v27, 2  ;;  %v3570_v55 = vrot.slane %v12470_v27, 1 }
 0x405   : > { %v3144_v56 = vpop.f32.mrb[18].mxu0  ;;  %v12473_v32 = vsel %vm354_vm0, %v3377_v43, %v3378_v51  ;;  %v3516_v14 = vsel %vm354_vm0, %v3378_v51, %v3468_v58  ;;  %8538 = vrot.lane.b32.xlu1 %v8537_v18, %s9251_s26 }
 0x406   : > { %16330 = vst [vmem:[#allocation35_spill] sm:$0xff] %v12466_v62  ;;  %9142 = vtanh.f32 %v12466_v62  ;;  %v12482_v28 = vadd.f32 %v12364_v42, %v3144_v56  ;;  %v3146_v26 = vpop.f32.mrb[19].mxu0  ;;  %v3736_v15 = vrot.slane %v12473_v32, 2  ;;  %v3738_v16 = vrot.slane %v3516_v14, 2 }
 0x407   : > { %v3571_v30 = vrot.slane %v12473_v32, 1  ;;  %v3573_v35 = vrot.slane %v3516_v14, 1  ;;  %v8562_v43 = vpack.i.bf16 %v12473_v32, %v12470_v27 }
 0x408   : > { %16331 = vst [vmem:[#allocation93_spill] sm:$0xff] %v12482_v28  ;;  %v9139_v57 = vpop.eup %9138  ;;  %9144 = vtanh.f32 %v12482_v28  ;;  %8533 = vrot.lane.b32.xlu0 %v8527_v4, %s9253_s27  ;;  %v12490_v33 = vsel %vm2024_vm4, %v3735_v29, %v3736_v15  ;;  %v12493_v41 = vsel %vm2024_vm4, %v3736_v15, %v3738_v16 }
 0x409   : > { %v3326_v5 = vrot.slane %v9139_v57, 1  ;;  %v3380_v52 = vrot.slane %v9139_v57, 7  ;;  %8548 = vrot.lane.b32.xlu1 %v8537_v18, %s9258_s15  ;;  %v8577_v9 = vpack.i.bf16 %v12493_v41, %v12490_v33  ;;  %v3572_v51 = vsel %vm1858_vm3, %v3570_v55, %v3571_v30 }
 0x40a   : > { %v9141_v11 = vpop.eup %9140  ;;  %v3574_v58 = vsel %vm1858_vm3, %v3571_v30, %v3573_v35 }
 0x40b   : > { %v3381_v1 = vrot.slane %v9141_v11, 7  ;;  %v3469_v8 = vrot.slane %v9141_v11, 5  ;;  %v3149_v49 = vpop.f32.mrb[20].mxu0  ;;  %v12505_v19 = vsel %vm354_vm0, %v3326_v5, %v3380_v52  ;;  %v8582_v15 = vpack.i.bf16 %v3574_v58, %v3572_v51 }
 0x40c   : > { %8543 = vrot.lane.b32.xlu0 %v8542_v59, %s9252_s25  ;;  %v12502_v47 = vadd.f32 %v12364_v42, %v3149_v49  ;;  %v3151_v20 = vpop.f32.mrb[21].mxu0  ;;  %v3740_v53 = vrot.slane %v12505_v19, 2 }
 0x40d   : > { %v3152_v10 = vpop.f32.mrb[22].mxu0  ;;  %v12511_v12 = vsel %vm354_vm0, %v3380_v52, %v3381_v1  ;;  %v12514_v25 = vsel %vm354_vm0, %v3381_v1, %v3469_v8  ;;  %8553 = vrot.lane.b32.xlu1 %v8537_v18, %s9255_s19 }
 0x40e   : > { %16332 = vst [vmem:[#allocation40_spill] sm:$0xff] %v12502_v47  ;;  %9146 = vtanh.f32 %v12502_v47  ;;  %v12519_v7 = vadd.f32 %v12364_v42, %v3152_v10  ;;  %v3154_v39 = vpop.f32.mrb[23].mxu0  ;;  %v3741_v63 = vrot.slane %v12511_v12, 2  ;;  %v3743_v50 = vrot.slane %v12514_v25, 2 }
 0x410   : > { %16333 = vst [vmem:[#allocation50_spill] sm:$0xff] %v12519_v7  ;;  %v9143_v34 = vpop.eup %9142  ;;  %9148 = vtanh.f32 %v12519_v7  ;;  %8558 = vrot.lane.b32.xlu0 %v8542_v59, %s9256_s13  ;;  %v12530_v38 = vsel %vm2024_vm4, %v3740_v53, %v3741_v63  ;;  %v12533_v4 = vsel %vm2024_vm4, %v3741_v63, %v3743_v50 }
 0x411   : > { %v3327_v22 = vrot.slane %v9143_v34, 1  ;;  %v3383_v24 = vrot.slane %v9143_v34, 7  ;;  %8563 = vrot.lane.b32.xlu1 %v8562_v43, %s9257_s14  ;;  %v3575_v34 = vrot.slane %v12505_v19, 1 }
 0x412   : > { %v9145_v17 = vpop.eup %9144 }
 0x413   : > { %v3384_v31 = vrot.slane %v9145_v17, 7  ;;  %v3470_v18 = vrot.slane %v9145_v17, 5  ;;  %v3157_v44 = vpop.f32.mrb[24].mxu0  ;;  %v12547_v21 = vsel %vm354_vm0, %v3327_v22, %v3383_v24  ;;  %v3578_v17 = vrot.slane %v12514_v25, 1 }
 0x414   : > { %8578 = vrot.lane.b32.xlu0 %v8577_v9, %s9252_s25  ;;  %v12544_v56 = vadd.f32 %v12364_v42, %v3157_v44  ;;  %v3159_v14 = vpop.f32.mrb[25].mxu0  ;;  %16335 = vst [vmem:[#allocation72_spill] sm:$0xff] %v12547_v21  ;;  %v3745_v52 = vrot.slane %v12547_v21, 2 }
 0x415   : > { %v3160_v26 = vpop.f32.mrb[26].mxu0  ;;  %v12550_v29 = vsel %vm354_vm0, %v3383_v24, %v3384_v31  ;;  %v12553_v16 = vsel %vm354_vm0, %v3384_v31, %v3470_v18  ;;  %8568 = vrot.lane.b32.xlu1 %v8562_v43, %s9253_s27  ;;  %v3576_v43 = vrot.slane %v12511_v12, 1  ;;  %v8597_v24 = vpack.i.bf16 %v12511_v12, %v12505_v19 }
 0x416   : > { %16334 = vst [vmem:[#allocation83_spill] sm:$0xff] %v12544_v56  ;;  %9150 = vtanh.f32 %v12544_v56  ;;  %v12558_v57 = vadd.f32 %v12364_v42, %v3160_v26  ;;  %v3162_v5 = vpop.f32.mrb[27].mxu0  ;;  %v3746_v54 = vrot.slane %v12550_v29, 2  ;;  %v3748_v11 = vrot.slane %v12553_v16, 2 }
 0x418   : > { %16336 = vst [vmem:[#allocation103_spill] sm:$0xff] %v12558_v57  ;;  %v9147_v59 = vpop.eup %9146  ;;  %9152 = vtanh.f32 %v12558_v57  ;;  %8583 = vrot.lane.b32.xlu0 %v8582_v15, %s9258_s15  ;;  %v12566_v1 = vsel %vm2024_vm4, %v3745_v52, %v3746_v54  ;;  %v12569_v20 = vsel %vm2024_vm4, %v3746_v54, %v3748_v11  ;;  %v3579_v11 = vsel %vm1858_vm3, %v3576_v43, %v3578_v17 }
 0x419   : > { %v3328_v8 = vrot.slane %v9147_v59, 1  ;;  %v3386_v49 = vrot.slane %v9147_v59, 7  ;;  %8573 = vrot.lane.b32.xlu1 %v8582_v15, %s9251_s26 }
 0x41a   : > { %v9149_v10 = vpop.eup %9148 }
 0x41b   : > { %v3387_v35 = vrot.slane %v9149_v10, 7  ;;  %v3471_v39 = vrot.slane %v9149_v10, 5  ;;  %v3165_v53 = vpop.f32.mrb[28].mxu0  ;;  %v12581_v55 = vsel %vm354_vm0, %v3328_v8, %v3386_v49 }
 0x41c   : > { %8588 = vrot.lane.b32.xlu0 %v8582_v15, %s9255_s19  ;;  %v12576_v63 = vadd.f32 %v12364_v42, %v3165_v53  ;;  %v3167_v50 = vpop.f32.mrb[29].mxu0  ;;  %16338 = vst [vmem:[#allocation102_spill] sm:$0xff] %v12581_v55  ;;  %v3750_v44 = vrot.slane %v12581_v55, 2  ;;  %v8612_v15 = vpack.i.bf16 %v12533_v4, %v12530_v38  ;;  %v3585_v56 = vrot.slane %v12581_v55, 1 }
 0x41d   : > { %v3168_v22 = vpop.f32.mrb[30].mxu0  ;;  %v12587_v51 = vsel %vm354_vm0, %v3386_v49, %v3387_v35  ;;  %v12590_v58 = vsel %vm354_vm0, %v3387_v35, %v3471_v39  ;;  %8593 = vrot.lane.b32.xlu1 %v8577_v9, %s9256_s13  ;;  %v3577_v9 = vsel %vm1858_vm3, %v3575_v34, %v3576_v43  ;;  %v3583_v49 = vrot.slane %v12553_v16, 1 }
 0x41e   : > { %16337 = vst [vmem:[#allocation52_spill] sm:$0xff] %v12576_v63  ;;  %16339 = vst [vmem:[#allocation55_spill] sm:$0xff] %v12587_v51  ;;  %9154 = vtanh.f32 %v12576_v63  ;;  %v12595_v31 = vadd.f32 %v12364_v42, %v3168_v22  ;;  %v3170_v18 = vpop.f32.mrb[31].mxu0  ;;  %v3751_v14 = vrot.slane %v12587_v51, 2  ;;  %v3753_v25 = vrot.slane %v12590_v58, 2 }
 0x41f   : > { %v8617_v50 = vpack.i.bf16 %v3579_v11, %v3577_v9 }
 0x420   : > { %16340 = vst [vmem:[#allocation79_spill] sm:$0xff] %v12595_v31  ;;  %v9151_v26 = vpop.eup %9150  ;;  %9156 = vtanh.f32 %v12595_v31  ;;  %8598 = vrot.lane.b32.xlu0 %v8597_v24, %s9257_s14  ;;  %v12606_v5 = vsel %vm2024_vm4, %v3750_v44, %v3751_v14  ;;  %v12610_v59 = vsel %vm2024_vm4, %v3751_v14, %v3753_v25 }
 0x421   : > { %v3329_v52 = vrot.slane %v9151_v26, 1  ;;  %v3389_v54 = vrot.slane %v9151_v26, 7  ;;  %8613 = vrot.lane.b32.xlu1 %v8612_v15, %s9252_s25 }
 0x422   : > { %v9153_v8 = vpop.eup %9152 }
 0x423   : > { %v3390_v10 = vrot.slane %v9153_v8, 7  ;;  %v3472_v35 = vrot.slane %v9153_v8, 5  ;;  %v3173_v39 = vpop.f32.mrb[32].mxu0  ;;  %v12620_v43 = vsel %vm354_vm0, %v3329_v52, %v3389_v54 }
 0x424   : > { %8603 = vrot.lane.b32.xlu0 %v8597_v24, %s9253_s27  ;;  %v12617_v53 = vadd.f32 %v12364_v42, %v3173_v39  ;;  %v3175_v34 = vpop.f32.mrb[33].mxu0  ;;  %16342 = vst [vmem:[#allocation53_spill] sm:$0xff] %v12620_v43  ;;  %v3755_v14 = vrot.slane %v12620_v43, 2 }
 0x425   : > { %v3176_v22 = vpop.f32.mrb[34].mxu0  ;;  %v12623_v17 = vsel %vm354_vm0, %v3389_v54, %v3390_v10  ;;  %v12626_v18 = vsel %vm354_vm0, %v3390_v10, %v3472_v35  ;;  %8618 = vrot.lane.b32.xlu1 %v8617_v50, %s9258_s15  ;;  %v3580_v35 = vrot.slane %v12547_v21, 1 }
 0x426   : > { %16341 = vst [vmem:[#allocation59_spill] sm:$0xff] %v12617_v53  ;;  %16343 = vst [vmem:[#allocation75_spill] sm:$0xff] %v12623_v17  ;;  %9158 = vtanh.f32 %v12617_v53  ;;  %v12631_v24 = vadd.f32 %v12364_v42, %v3176_v22  ;;  %v3178_v44 = vpop.f32.mrb[35].mxu0  ;;  %v3756_v25 = vrot.slane %v12623_v17, 2  ;;  %v3758_v26 = vrot.slane %v12626_v18, 2 }
 0x427   : > { %v3581_v44 = vrot.slane %v12550_v29, 1 }
 0x428   : > { %16344 = vst [vmem:[#allocation46_spill] sm:$0xff] %v12631_v24  ;;  %v9155_v9 = vpop.eup %9154  ;;  %9160 = vtanh.f32 %v12631_v24  ;;  %8608 = vrot.lane.b32.xlu0 %v8617_v50, %s9251_s26  ;;  %v12639_v52 = vsel %vm2024_vm4, %v3755_v14, %v3756_v25  ;;  %v12642_v8 = vsel %vm2024_vm4, %v3756_v25, %v3758_v26  ;;  %v8632_v25 = vpack.i.bf16 %v12550_v29, %v12547_v21 }
 0x429   : > { %16345 = vst [vmem:[#allocation80_spill] sm:$0xff] %v12639_v52  ;;  %v3330_v54 = vrot.slane %v9155_v9, 1  ;;  %v3392_v11 = vrot.slane %v9155_v9, 7  ;;  %16346 = vst [vmem:[#allocation98_spill] sm:$0xff] %v12642_v8  ;;  %8623 = vrot.lane.b32.xlu1 %v8617_v50, %s9255_s19  ;;  %v3582_v13 = vsel %vm1858_vm3, %v3580_v35, %v3581_v44 }
 0x42a   : > { %v9157_v10 = vpop.eup %9156 }
 0x42b   : > { %v3393_v39 = vrot.slane %v9157_v10, 7  ;;  %v3473_v34 = vrot.slane %v9157_v10, 5  ;;  %v3181_v22 = vpop.f32.mrb[36].mxu0  ;;  %v12656_v50 = vsel %vm354_vm0, %v3330_v54, %v3392_v11  ;;  %v8647_v10 = vpack.i.bf16 %v12569_v20, %v12566_v1 }
 0x42c   : > { %8628 = vrot.lane.b32.xlu0 %v8612_v15, %s9256_s13  ;;  %v12651_v14 = vadd.f32 %v12364_v42, %v3181_v22  ;;  %v3183_v26 = vpop.f32.mrb[37].mxu0  ;;  %16348 = vst [vmem:[#allocation51_spill] sm:$0xff] %v12656_v50 }
 0x42d   : > { %v3184_v9 = vpop.f32.mrb[38].mxu0  ;;  %v12662_v16 = vsel %vm354_vm0, %v3392_v11, %v3393_v39  ;;  %v12665_v15 = vsel %vm354_vm0, %v3393_v39, %v3473_v34  ;;  %8633 = vrot.lane.b32.xlu1 %v8632_v25, %s9257_s14  ;;  %v3760_v26 = vrot.slane %v12656_v50, 2  ;;  %v3584_v11 = vsel %vm1858_vm3, %v3581_v44, %v3583_v49 }
 0x42e   : > { %16347 = vst [vmem:[#allocation99_spill] sm:$0xff] %v12651_v14  ;;  %16349 = vst [vmem:[#allocation101_spill] sm:$0xff] %v12662_v16  ;;  %9162 = vtanh.f32 %v12651_v14  ;;  %v12670_v22 = vadd.f32 %v12364_v42, %v3184_v9  ;;  %v3186_v54 = vpop.f32.mrb[39].mxu0  ;;  %v3761_v30 = vrot.slane %v12662_v16, 2  ;;  %v3763_v36 = vrot.slane %v12665_v15, 2 }
 0x42f   : > { %v8652_v35 = vpack.i.bf16 %v3584_v11, %v3582_v13 }
 0x430   : > { %16350 = vst [vmem:[#allocation82_spill] sm:$0xff] %v12670_v22  ;;  %v9159_v39 = vpop.eup %9158  ;;  %9164 = vtanh.f32 %v12670_v22  ;;  %8648 = vrot.lane.b32.xlu0 %v8647_v10, %s9252_s25  ;;  %v12680_v34 = vsel %vm2024_vm4, %v3760_v26, %v3761_v30  ;;  %v12683_v14 = vsel %vm2024_vm4, %v3761_v30, %v3763_v36 }
 0x431   : > { %16351 = vst [vmem:[#allocation85_spill] sm:$0xff] %v12680_v34  ;;  %v3331_v9 = vrot.slane %v9159_v39, 1  ;;  %v3395_v54 = vrot.slane %v9159_v39, 7  ;;  %16352 = vst [vmem:[#allocation24_spill] sm:$0xff] %v12683_v14  ;;  %8638 = vrot.lane.b32.xlu1 %v8632_v25, %s9253_s27 }
 0x432   : > { %v9161_v24 = vpop.eup %9160 }
 0x433   : > { %v3396_v44 = vrot.slane %v9161_v24, 7  ;;  %v3474_v53 = vrot.slane %v9161_v24, 5  ;;  %v3189_v22 = vpop.f32.mrb[40].mxu0  ;;  %v12693_v39 = vsel %vm354_vm0, %v3331_v9, %v3395_v54 }
 0x434   : > { %8653 = vrot.lane.b32.xlu0 %v8652_v35, %s9258_s15  ;;  %v12690_v26 = vadd.f32 %v12364_v42, %v3189_v22  ;;  %v3191_v31 = vpop.f32.mrb[41].mxu0  ;;  %16354 = vst [vmem:[#allocation26_spill] sm:$0xff] %v12693_v39 }
 0x435   : > { %v3192_v36 = vpop.f32.mrb[42].mxu0  ;;  %v12696_v30 = vsel %vm354_vm0, %v3395_v54, %v3396_v44  ;;  %v12699_v13 = vsel %vm354_vm0, %v3396_v44, %v3474_v53  ;;  %8643 = vrot.lane.b32.xlu1 %v8652_v35, %s9251_s26  ;;  %v3765_v31 = vrot.slane %v12693_v39, 2  ;;  %v3586_v53 = vrot.slane %v12587_v51, 1 }
 0x436   : > { %16353 = vst [vmem:[#allocation25_spill] sm:$0xff] %v12690_v26  ;;  %16355 = vst [vmem:[#allocation86_spill] sm:$0xff] %v12696_v30  ;;  %9166 = vtanh.f32 %v12690_v26  ;;  %v12704_v24 = vadd.f32 %v12364_v42, %v3192_v36  ;;  %v3194_v25 = vpop.f32.mrb[43].mxu0  ;;  %v3766_v22 = vrot.slane %v12696_v30, 2  ;;  %v3768_v11 = vrot.slane %v12699_v13, 2 }
 0x437   : > { %v3588_v25 = vrot.slane %v12590_v58, 1 }
 0x438   : > { %16356 = vst [vmem:[#allocation29_spill] sm:$0xff] %v12704_v24  ;;  %v9163_v9 = vpop.eup %9162  ;;  %9168 = vtanh.f32 %v12704_v24  ;;  %8658 = vrot.lane.b32.xlu0 %v8652_v35, %s9255_s19  ;;  %v12713_v54 = vsel %vm2024_vm4, %v3765_v31, %v3766_v22  ;;  %v12717_v49 = vsel %vm2024_vm4, %v3766_v22, %v3768_v11  ;;  %v8667_v24 = vpack.i.bf16 %v12587_v51, %v12581_v55 }
 0x439   : > { %16357 = vst [vmem:[#allocation30_spill] sm:$0xff] %v12713_v54  ;;  %v3332_v44 = vrot.slane %v9163_v9, 1  ;;  %v3398_v36 = vrot.slane %v9163_v9, 7  ;;  %16358 = vst [vmem:[#allocation32_spill] sm:$0xff] %v12717_v49  ;;  %8663 = vrot.lane.b32.xlu1 %v8647_v10, %s9256_s13  ;;  %v8682_v22 = vpack.i.bf16 %v12610_v59, %v12606_v5  ;;  %v3587_v35 = vsel %vm1858_vm3, %v3585_v56, %v3586_v53 }
 0x43a   : > { %v9165_v26 = vpop.eup %9164 }
 0x43b   : > { %v3399_v63 = vrot.slane %v9165_v26, 7  ;;  %v3475_v57 = vrot.slane %v9165_v26, 5  ;;  %v3197_v31 = vpop.f32.mrb[44].mxu0  ;;  %v12732_v11 = vsel %vm354_vm0, %v3332_v44, %v3398_v36  ;;  %v3589_v26 = vsel %vm1858_vm3, %v3586_v53, %v3588_v25 }
 0x43c   : > { %8668 = vrot.lane.b32.xlu0 %v8667_v24, %s9257_s14  ;;  %v12727_v58 = vadd.f32 %v12364_v42, %v3197_v31  ;;  %v3199_v10 = vpop.f32.mrb[45].mxu0  ;;  %16360 = vst [vmem:[#allocation31_spill] sm:$0xff] %v12732_v11 }
 0x43d   : > { %v3200_v9 = vpop.f32.mrb[46].mxu0  ;;  %v12737_v7 = vsel %vm354_vm0, %v3398_v36, %v3399_v63  ;;  %v12740_v47 = vsel %vm354_vm0, %v3399_v63, %v3475_v57  ;;  %8683 = vrot.lane.b32.xlu1 %v8682_v22, %s9252_s25  ;;  %v3770_v10 = vrot.slane %v12732_v11, 2  ;;  %v8687_v57 = vpack.i.bf16 %v3589_v26, %v3587_v35 }
 0x43e   : > { %16359 = vst [vmem:[#allocation33_spill] sm:$0xff] %v12727_v58  ;;  %16361 = vst [vmem:[#allocation36_spill] sm:$0xff] %v12737_v7  ;;  %9170 = vtanh.f32 %v12727_v58  ;;  %v12745_v31 = vadd.f32 %v12364_v42, %v3200_v9  ;;  %v3202_v44 = vpop.f32.mrb[47].mxu0  ;;  %v3771_v56 = vrot.slane %v12737_v7, 2  ;;  %v3773_v53 = vrot.slane %v12740_v47, 2 }
 0x440   : > { %16362 = vst [vmem:[#allocation90_spill] sm:$0xff] %v12745_v31  ;;  %v9167_v25 = vpop.eup %9166  ;;  %9172 = vtanh.f32 %v12745_v31  ;;  %8673 = vrot.lane.b32.xlu0 %v8667_v24, %s9253_s27  ;;  %v12753_v58 = vsel %vm2024_vm4, %v3770_v10, %v3771_v56  ;;  %v12757_v44 = vsel %vm2024_vm4, %v3771_v56, %v3773_v53 }
 0x441   : > { %v3333_v63 = vrot.slane %v9167_v25, 1  ;;  %v3401_v36 = vrot.slane %v9167_v25, 7  ;;  %16363 = vst [vmem:[#allocation37_spill] sm:$0xff] %v12753_v58  ;;  %8688 = vrot.lane.b32.xlu1 %v8687_v57, %s9258_s15  ;;  %16364 = vst [vmem:[#allocation16_spill] sm:$0xff] %v12757_v44 }
 0x442   : > { %v9169_v9 = vpop.eup %9168 }
 0x443   : > { %v3402_v28 = vrot.slane %v9169_v9, 7  ;;  %v3476_v62 = vrot.slane %v9169_v9, 5  ;;  %v3205_v23 = vpop.f32.mrb[48].mxu0  ;;  %v12769_v25 = vsel %vm354_vm0, %v3333_v63, %v3401_v36  ;;  %v3591_v9 = vrot.slane %v12623_v17, 1 }
 0x444   : > { %8678 = vrot.lane.b32.xlu0 %v8687_v57, %s9251_s26  ;;  %v12761_v31 = vadd.f32 %v12364_v42, %v3205_v23  ;;  %v3207_v24 = vpop.f32.mrb[49].mxu0  ;;  %16367 = vst [vmem:[#allocation73_spill] sm:$0xff] %v12769_v25 }
 0x445   : > { %v3208_v26 = vpop.f32.mrb[50].mxu0  ;;  %v12766_v10 = vsel %vm354_vm0, %v3401_v36, %v3402_v28  ;;  %v12772_v56 = vsel %vm354_vm0, %v3402_v28, %v3476_v62  ;;  %8693 = vrot.lane.b32.xlu1 %v8687_v57, %s9255_s19  ;;  %v3593_v24 = vrot.slane %v12626_v18, 1  ;;  %v8702_v62 = vpack.i.bf16 %v12623_v17, %v12620_v43 }
 0x446   : > { %16365 = vst [vmem:[#allocation78_spill] sm:$0xff] %v12761_v31  ;;  %16366 = vst [vmem:[#allocation104_spill] sm:$0xff] %v12766_v10  ;;  %9174 = vtanh.f32 %v12761_v31  ;;  %v12777_v23 = vadd.f32 %v12364_v42, %v3208_v26  ;;  %v3210_v53 = vpop.f32.mrb[51].mxu0  ;;  %v3776_v35 = vrot.slane %v12766_v10, 2  ;;  %v3778_v63 = vrot.slane %v12772_v56, 2 }
 0x447   : > { %v3590_v28 = vrot.slane %v12620_v43, 1  ;;  %v3775_v57 = vrot.slane %v12769_v25, 2  ;;  %v8717_v18 = vpack.i.bf16 %v12642_v8, %v12639_v52  ;;  %v3594_v3 = vsel %vm1858_vm3, %v3591_v9, %v3593_v24 }
 0x448   : > { %16368 = vst [vmem:[#allocation97_spill] sm:$0xff] %v12777_v23  ;;  %v9171_v36 = vpop.eup %9170  ;;  %9176 = vtanh.f32 %v12777_v23  ;;  %8698 = vrot.lane.b32.xlu0 %v8682_v22, %s9256_s13  ;;  %v12798_v40 = vsel %vm2024_vm4, %v3776_v35, %v3778_v63  ;;  %v3598_v43 = vrot.slane %v12665_v15, 1  ;;  %v3606_v8 = vrot.slane %v12737_v7, 1 }
 0x449   : > { %v3334_v26 = vrot.slane %v9171_v36, 1  ;;  %v3404_v53 = vrot.slane %v9171_v36, 7  ;;  %8703 = vrot.lane.b32.xlu1 %v8702_v62, %s9257_s14  ;;  %v3592_v45 = vsel %vm1858_vm3, %v3590_v28, %v3591_v9  ;;  %v12794_v23 = vsel %vm2024_vm4, %v3775_v57, %v3776_v35 }
 0x44a   : > { %v9173_v31 = vpop.eup %9172  ;;  %v8722_v9 = vpack.i.bf16 %v3594_v3, %v3592_v45 }
 0x44b   : > { %v3405_v22 = vrot.slane %v9173_v31, 7  ;;  %v3477_v60 = vrot.slane %v9173_v31, 5  ;;  %v3213_v48 = vpop.f32.mrb[52].mxu0  ;;  %v12808_v57 = vsel %vm354_vm0, %v3334_v26, %v3404_v53 }
 0x44c   : > { %8718 = vrot.lane.b32.xlu0 %v8717_v18, %s9252_s25  ;;  %v12802_v36 = vadd.f32 %v12364_v42, %v3213_v48  ;;  %v3215_v37 = vpop.f32.mrb[53].mxu0 }
 0x44d   : > { %v3216_v6 = vpop.f32.mrb[54].mxu0  ;;  %v12805_v28 = vsel %vm354_vm0, %v3404_v53, %v3405_v22  ;;  %v12811_v31 = vsel %vm354_vm0, %v3405_v22, %v3477_v60  ;;  %8708 = vrot.lane.b32.xlu1 %v8702_v62, %s9253_s27  ;;  %v3780_v60 = vrot.slane %v12808_v57, 2 }
 0x44e   : > { %16369 = vst [vmem:[#allocation70_spill] sm:$0xff] %v12802_v36  ;;  %9178 = vtanh.f32 %v12802_v36  ;;  %v12818_v48 = vadd.f32 %v12364_v42, %v3216_v6  ;;  %v3218_v37 = vpop.f32.mrb[55].mxu0  ;;  %v3781_v24 = vrot.slane %v12805_v28, 2  ;;  %v3783_v63 = vrot.slane %v12811_v31, 2 }
 0x450   : > { %16370 = vst [vmem:[#allocation92_spill] sm:$0xff] %v12818_v48  ;;  %v9175_v26 = vpop.eup %9174  ;;  %9180 = vtanh.f32 %v12818_v48  ;;  %8723 = vrot.lane.b32.xlu0 %v8722_v9, %s9258_s15  ;;  %v12827_v6 = vsel %vm2024_vm4, %v3780_v60, %v3781_v24  ;;  %v12830_v37 = vsel %vm2024_vm4, %v3781_v24, %v3783_v63  ;;  %v8737_v63 = vpack.i.bf16 %v12662_v16, %v12656_v50 }
 0x451   : > { %v3335_v53 = vrot.slane %v9175_v26, 1  ;;  %v3407_v22 = vrot.slane %v9175_v26, 7  ;;  %8713 = vrot.lane.b32.xlu1 %v8722_v9, %s9251_s26  ;;  %v3596_v26 = vrot.slane %v12662_v16, 1 }
 0x452   : > { %v9177_v35 = vpop.eup %9176 }
 0x453   : > { %v3408_v3 = vrot.slane %v9177_v35, 7  ;;  %v3478_v45 = vrot.slane %v9177_v35, 5  ;;  %v3221_v62 = vpop.f32.mrb[56].mxu0  ;;  %v12842_v35 = vsel %vm354_vm0, %v3335_v53, %v3407_v22  ;;  %v3595_v53 = vrot.slane %v12656_v50, 1 }
 0x454   : > { %8728 = vrot.lane.b32.xlu0 %v8722_v9, %s9255_s19  ;;  %v12834_v48 = vadd.f32 %v12364_v42, %v3221_v62  ;;  %v3223_v36 = vpop.f32.mrb[57].mxu0 }
 0x455   : > { %v3224_v17 = vpop.f32.mrb[58].mxu0  ;;  %v12839_v60 = vsel %vm354_vm0, %v3407_v22, %v3408_v3  ;;  %v12845_v24 = vsel %vm354_vm0, %v3408_v3, %v3478_v45  ;;  %8733 = vrot.lane.b32.xlu1 %v8717_v18, %s9256_s13  ;;  %v8752_v18 = vpack.i.bf16 %v12683_v14, %v12680_v34  ;;  %v3597_v9 = vsel %vm1858_vm3, %v3595_v53, %v3596_v26 }
 0x456   : > { %16371 = vst [vmem:[#allocation94_spill] sm:$0xff] %v12834_v48  ;;  %9182 = vtanh.f32 %v12834_v48  ;;  %v12852_v36 = vadd.f32 %v12364_v42, %v3224_v17  ;;  %v3226_v15 = vpop.f32.mrb[59].mxu0  ;;  %v3786_v22 = vrot.slane %v12839_v60, 2  ;;  %v3788_v3 = vrot.slane %v12845_v24, 2 }
 0x457   : > { %v3785_v17 = vrot.slane %v12842_v35, 2  ;;  %v3599_v48 = vsel %vm1858_vm3, %v3596_v26, %v3598_v43 }
 0x458   : > { %16372 = vst [vmem:[#allocation38_spill] sm:$0xff] %v12852_v36  ;;  %v9179_v45 = vpop.eup %9178  ;;  %9184 = vtanh.f32 %v12852_v36  ;;  %8738 = vrot.lane.b32.xlu0 %v8737_v63, %s9257_s14  ;;  %v12871_v52 = vsel %vm2024_vm4, %v3786_v22, %v3788_v3  ;;  %v8757_v53 = vpack.i.bf16 %v3599_v48, %v3597_v9 }
 0x459   : > { %v3336_v62 = vrot.slane %v9179_v45, 1  ;;  %v3410_v15 = vrot.slane %v9179_v45, 7  ;;  %8753 = vrot.lane.b32.xlu1 %v8752_v18, %s9252_s25  ;;  %v12868_v16 = vsel %vm2024_vm4, %v3785_v17, %v3786_v22  ;;  %v3603_v22 = vrot.slane %v12699_v13, 1 }
 0x45a   : > { %v9181_v50 = vpop.eup %9180 }
 0x45b   : > { %v3411_v36 = vrot.slane %v9181_v50, 7  ;;  %v3479_v55 = vrot.slane %v9181_v50, 5  ;;  %v3229_v51 = vpop.f32.mrb[60].mxu0  ;;  %v12881_v17 = vsel %vm354_vm0, %v3336_v62, %v3410_v15 }
 0x45c   : > { %8743 = vrot.lane.b32.xlu0 %v8737_v63, %s9253_s27  ;;  %v12875_v45 = vadd.f32 %v12364_v42, %v3229_v51  ;;  %v3231_v34 = vpop.f32.mrb[61].mxu0 }
 0x45d   : > { %v3232_v43 = vpop.f32.mrb[62].mxu0  ;;  %v12878_v26 = vsel %vm354_vm0, %v3410_v15, %v3411_v36  ;;  %v12884_v50 = vsel %vm354_vm0, %v3411_v36, %v3479_v55  ;;  %8758 = vrot.lane.b32.xlu1 %v8757_v53, %s9258_s15  ;;  %v3790_v55 = vrot.slane %v12881_v17, 2 }
 0x45e   : > { %16373 = vst [vmem:[#allocation57_spill] sm:$0xff] %v12875_v45  ;;  %9186 = vtanh.f32 %v12875_v45  ;;  %v12891_v51 = vadd.f32 %v12364_v42, %v3232_v43  ;;  %v3234_v34 = vpop.f32.mrb[63].mxu0  ;;  %v3791_v48 = vrot.slane %v12878_v26, 2  ;;  %v3793_v9 = vrot.slane %v12884_v50, 2 }
 0x45f   : > { %v3601_v42 = vrot.slane %v12696_v30, 1  ;;  %v3600_v45 = vrot.slane %v12693_v39, 1 }
 0x460   : > { %16374 = vst [vmem:[#allocation58_spill] sm:$0xff] %v12891_v51  ;;  %v9183_v63 = vpop.eup %9182  ;;  %9188 = vtanh.f32 %v12891_v51  ;;  %8748 = vrot.lane.b32.xlu0 %v8757_v53, %s9251_s26  ;;  %v12901_v15 = vsel %vm2024_vm4, %v3790_v55, %v3791_v48  ;;  %v12905_v51 = vsel %vm2024_vm4, %v3791_v48, %v3793_v9 }
 0x461   : > { %v3337_v36 = vrot.slane %v9183_v63, 1  ;;  %v3413_v3 = vrot.slane %v9183_v63, 7  ;;  %8763 = vrot.lane.b32.xlu1 %v8757_v53, %s9255_s19  ;;  %v8772_v63 = vpack.i.bf16 %v12696_v30, %v12693_v39  ;;  %v3602_v48 = vsel %vm1858_vm3, %v3600_v45, %v3601_v42 }
 0x462   : > { %v9185_v62 = vpop.eup %9184  ;;  %v3604_v9 = vsel %vm1858_vm3, %v3601_v42, %v3603_v22 }
 0x463   : > { %v3414_v43 = vrot.slane %v9185_v62, 7  ;;  %v3480_v34 = vrot.slane %v9185_v62, 5  ;;  %v12915_v55 = vsel %vm354_vm0, %v3337_v36, %v3413_v3 }
 0x464   : > { %8768 = vrot.lane.b32.xlu0 %v8752_v18, %s9256_s13  ;;  %v8787_v18 = vpack.i.bf16 %v12717_v49, %v12713_v54  ;;  %v8792_v54 = vpack.i.bf16 %v3604_v9, %v3602_v48 }
 0x465   : > { %v12912_v53 = vsel %vm354_vm0, %v3413_v3, %v3414_v43  ;;  %v12918_v62 = vsel %vm354_vm0, %v3414_v43, %v3480_v34  ;;  %8773 = vrot.lane.b32.xlu1 %v8772_v63, %s9257_s14  ;;  %v3795_v43 = vrot.slane %v12915_v55, 2 }
 0x466   : > { %v3796_v39 = vrot.slane %v12912_v53, 2  ;;  %v3798_v36 = vrot.slane %v12918_v62, 2 }
 0x468   : > { %v9187_v3 = vpop.eup %9186  ;;  %8788 = vrot.lane.b32.xlu0 %v8787_v18, %s9252_s25  ;;  %v12935_v45 = vsel %vm2024_vm4, %v3795_v43, %v3796_v39  ;;  %v12938_v22 = vsel %vm2024_vm4, %v3796_v39, %v3798_v36  ;;  %v3605_v43 = vrot.slane %v12732_v11, 1 }
 0x469   : > { %v3338_v34 = vrot.slane %v9187_v3, 1  ;;  %v3416_v13 = vrot.slane %v9187_v3, 7  ;;  %8778 = vrot.lane.b32.xlu1 %v8772_v63, %s9253_s27  ;;  %16375 = vst [vmem:[#allocation87_spill] sm:$0xff] %v12935_v45  ;;  %16376 = vst [vmem:[#allocation71_spill] sm:$0xff] %v12938_v22  ;;  %v12944_v3 = vpack.c.bf16 %v12938_v22, %v12935_v45  ;;  %v3608_v63 = vrot.slane %v12740_v47, 1 }
 0x46a   : > { %v9189_v30 = vpop.eup %9188  ;;  %v12932_v14 = vpop.permute.xlu1 %8503 }
 0x46b   : > { %v3417_v42 = vrot.slane %v9189_v30, 7  ;;  %v3481_v49 = vrot.slane %v9189_v30, 5  ;;  %16377 = vst [vmem:[#allocation22_spill] sm:$0xff] %v12944_v3  ;;  %v12951_v9 = vsel %vm354_vm0, %v3338_v34, %v3416_v13  ;;  %v3609_v34 = vsel %vm1858_vm3, %v3606_v8, %v3608_v63 }
 0x46c   : > { %8793 = vrot.lane.b32.xlu0 %v8792_v54, %s9258_s15  ;;  %16379 = vst [vmem:[#allocation39_spill] sm:$0xff] %v12951_v9  ;;  %v4089_v47 = vrot.slane %v12951_v9, 2  ;;  %v3611_v63 = vrot.slane %v12766_v10, 1 }
 0x46d   : > { %v12948_v48 = vsel %vm354_vm0, %v3416_v13, %v3417_v42  ;;  %v12954_v39 = vsel %vm354_vm0, %v3417_v42, %v3481_v49  ;;  %8783 = vrot.lane.b32.xlu1 %v8792_v54, %s9251_s26  ;;  %v3607_v13 = vsel %vm1858_vm3, %v3605_v43, %v3606_v8  ;;  %v8807_v42 = vpack.i.bf16 %v12737_v7, %v12732_v11 }
 0x46e   : > { %16378 = vst [vmem:[#allocation41_spill] sm:$0xff] %v12948_v48  ;;  %16380 = vst [vmem:[#allocation56_spill] sm:$0xff] %v12954_v39  ;;  %v8509_v30 = vpop.permute.xlu0 %8508  ;;  %v4090_v22 = vrot.slane %v12948_v48, 2  ;;  %v4092_v3 = vrot.slane %v12954_v39, 2  ;;  %v8822_v8 = vpack.i.bf16 %v3609_v34, %v3607_v13  ;;  %v3610_v7 = vrot.slane %v12769_v25, 1 }
 0x46f   : > { %v8514_v36 = vpop.permute.xlu1 %8513  ;;  %v8837_v13 = vpack.i.bf16 %v12757_v44, %v12753_v58  ;;  %v8842_v58 = vpack.i.bf16 %v12766_v10, %v12769_v25 }
 0x470   : > { %8798 = vrot.lane.b32.xlu0 %v8792_v54, %s9255_s19  ;;  %v12970_v45 = vsel %vm2024_vm4, %v4089_v47, %v4090_v22  ;;  %v12973_v39 = vsel %vm2024_vm4, %v4090_v22, %v4092_v3  ;;  %v3613_v47 = vrot.slane %v12772_v56, 1  ;;  %v8511_v22 = vunpack.i.h.bf16 %v8509_v30 }
 0x471   : > { %8803 = vrot.lane.b32.xlu1 %v8787_v18, %s9256_s13  ;;  %16381 = vst [vmem:[#allocation105_spill] sm:$0xff] %v12970_v45  ;;  %16382 = vst [vmem:[#allocation107_spill] sm:$0xff] %v12973_v39  ;;  %v8510_v3 = vunpack.i.l.bf16 %v8509_v30  ;;  %v3612_v34 = vsel %vm1858_vm3, %v3610_v7, %v3611_v63  ;;  %v8516_v45 = vunpack.i.h.bf16 %v8514_v36  ;;  %v8515_v9 = vunpack.i.l.bf16 %v8514_v36 }
 0x472   : > { %v12965_v49 = vpop.permute.xlu0 %8518  ;;  %v3614_v39 = vsel %vm1858_vm3, %v3611_v63, %v3613_v47  ;;  %v4403_v30 = vsel %vm2700_vm5, %v12400_v2, %v8511_v22  ;;  %v8506_v36 = vunpack.i.h.bf16 %v12932_v14 }
 0x473   : > { %v12975_v54 = vpop.permute.xlu1 %8523  ;;  %v8852_v63 = vpack.i.bf16 %v3614_v39, %v3612_v34  ;;  %v4433_v2 = vsel %vm2731_vm6, %v4403_v30, %v8516_v45  ;;  %v8520_v45 = vunpack.i.l.bf16 %v12965_v49 }
 0x474   : > { %8808 = vrot.lane.b32.xlu0 %v8807_v42, %s9257_s14 }
 0x475   : > { %8823 = vrot.lane.b32.xlu1 %v8822_v8, %s9258_s15 }
 0x476   : > { %v12981_v18 = vpop.permute.xlu0 %8528 }
 0x477   : > { %v8539_v11 = vpop.permute.xlu1 %8538  ;;  %v8531_v30 = vunpack.i.h.bf16 %v12981_v18 }
 0x478   : > { %8813 = vrot.lane.b32.xlu0 %v8807_v42, %s9253_s27  ;;  %v8541_v56 = vunpack.i.h.bf16 %v8539_v11  ;;  %v8540_v48 = vunpack.i.l.bf16 %v8539_v11  ;;  %v4402_v42 = vsel %vm2700_vm5, %v12394_v61, %v8510_v3  ;;  %v8505_v11 = vunpack.i.l.bf16 %v12932_v14 }
 0x479   : > { %8828 = vrot.lane.b32.xlu1 %v8822_v8, %s9255_s19 }
 0x47a   : > { %v8534_v43 = vpop.permute.xlu0 %8533  ;;  %v4401_v61 = vsel %vm2700_vm5, %v12436_v46, %v8541_v56  ;;  %v4400_v22 = vsel %vm2700_vm5, %v12432_v0, %v8540_v48 }
 0x47b   : > { %v8549_v21 = vpop.permute.xlu1 %8548  ;;  %v8536_v39 = vunpack.i.h.bf16 %v8534_v43  ;;  %v8535_v34 = vunpack.i.l.bf16 %v8534_v43  ;;  %v8526_v43 = vunpack.i.h.bf16 %v12975_v54 }
 0x47c   : > { %8818 = vrot.lane.b32.xlu0 %v8822_v8, %s9251_s26  ;;  %v4432_v8 = vsel %vm2731_vm6, %v4402_v42, %v8515_v9  ;;  %v8521_v9 = vunpack.i.h.bf16 %v12965_v49  ;;  %v8530_v42 = vunpack.i.l.bf16 %v12981_v18  ;;  %v8550_v10 = vunpack.i.l.bf16 %v8549_v21 }
 0x47d   : > { %8838 = vrot.lane.b32.xlu1 %v8837_v13, %s9252_s25 }
 0x47e   : > { %v8544_v7 = vpop.permute.xlu0 %8543 }
 0x47f   : > { %v8546_v47 = vunpack.i.h.bf16 %v8544_v7  ;;  %v8545_v44 = vunpack.i.l.bf16 %v8544_v7  ;;  %v8554_v3 = vpop.permute.xlu1 %8553 }
 0x480   : > { %8833 = vrot.lane.b32.xlu0 %v8837_v13, %s9256_s13  ;;  %v8556_v13 = vunpack.i.h.bf16 %v8554_v3  ;;  %v8555_v56 = vunpack.i.l.bf16 %v8554_v3 }
 0x481   : > { %v13010_v25 = vsel %vm2731_vm6, %v4400_v22, %v8545_v44  ;;  %v13013_v14 = vsel %vm2731_vm6, %v4401_v61, %v8546_v47  ;;  %8843 = vrot.lane.b32.xlu1 %v8842_v58, %s9257_s14  ;;  %v8525_v44 = vunpack.i.l.bf16 %v12975_v54  ;;  %v4462_v47 = vsel %vm2762_vm7, %v4432_v8, %v8535_v34 }
 0x482   : > { %v4460_v46 = vsel %vm2762_vm7, %v13010_v25, %v8505_v11  ;;  %v4461_v0 = vsel %vm2762_vm7, %v13013_v14, %v8506_v36  ;;  %v8559_v48 = vpop.permute.xlu0 %8558  ;;  %v4463_v11 = vsel %vm2762_vm7, %v4433_v2, %v8536_v39  ;;  %v8551_v54 = vunpack.i.h.bf16 %v8549_v21 }
 0x483   : > { %v8564_v49 = vpop.permute.xlu1 %8563  ;;  %v4492_v7 = vsel %vm2795_vm8, %v4460_v46, %v8520_v45  ;;  %v4493_v36 = vsel %vm2795_vm8, %v4461_v0, %v8521_v9  ;;  %v8561_v61 = vunpack.i.h.bf16 %v8559_v48  ;;  %v8560_v22 = vunpack.i.l.bf16 %v8559_v48 }
 0x484   : > { %8848 = vrot.lane.b32.xlu0 %v8842_v58, %s9253_s27  ;;  %v4524_v18 = vsel %vm2828_vm9, %v4492_v7, %v8525_v44  ;;  %v4525_v58 = vsel %vm2828_vm9, %v4493_v36, %v8526_v43  ;;  %v4495_v45 = vsel %vm2795_vm8, %v4463_v11, %v8556_v13  ;;  %v4494_v9 = vsel %vm2795_vm8, %v4462_v47, %v8555_v56 }
 0x485   : > { %8853 = vrot.lane.b32.xlu1 %v8852_v63, %s9251_s26  ;;  %v4556_v2 = vsel %vm2861_vm10, %v4524_v18, %v8530_v42  ;;  %v4557_v8 = vsel %vm2861_vm10, %v4525_v58, %v8531_v30  ;;  %v8566_v39 = vunpack.i.h.bf16 %v8564_v49  ;;  %v8565_v34 = vunpack.i.l.bf16 %v8564_v49 }
 0x486   : > { %v13032_v3 = vpop.permute.xlu0 %8578  ;;  %v4588_v21 = vsel %vm2894_vm11, %v4556_v2, %v8550_v10  ;;  %v4589_v0 = vsel %vm2894_vm11, %v4557_v8, %v8551_v54  ;;  %v4526_v48 = vsel %vm2828_vm9, %v4494_v9, %v8560_v22  ;;  %v4527_v43 = vsel %vm2828_vm9, %v4495_v45, %v8561_v61 }
 0x487   : > { %v8569_v46 = vpop.permute.xlu1 %8568  ;;  %v4620_v44 = vpack.c.bf16 %v4589_v0, %v4588_v21  ;;  %v8867_v56 = vpack.i.bf16 %v12798_v40, %v12794_v23  ;;  %v3616_v49 = vrot.slane %v12805_v28, 1  ;;  %v3618_v10 = vrot.slane %v12811_v31, 1 }
 0x488   : > { %8858 = vrot.lane.b32.xlu0 %v8852_v63, %s9258_s15  ;;  %v16383_v7 = vpack.c.bf16 %v12493_v41, %v12490_v33  ;;  %v4559_v11 = vsel %vm2861_vm10, %v4527_v43, %v8566_v39  ;;  %v3615_v22 = vrot.slane %v12808_v57, 1  ;;  %v8882_v33 = vpack.i.bf16 %v12805_v28, %v12808_v57 }
 0x489   : > { %8863 = vrot.lane.b32.xlu1 %v8852_v63, %s9255_s19  ;;  %4801 = vmatmul.mubr.bf16.vlgmr.msra.gmra.mrb[0].mxu1 %v4620_v44  ;;  %v4558_v63 = vsel %vm2861_vm10, %v4526_v48, %v8565_v34  ;;  %v3619_v18 = vsel %vm1858_vm3, %v3616_v49, %v3618_v10  ;;  %v8571_v45 = vunpack.i.h.bf16 %v8569_v46  ;;  %v8570_v9 = vunpack.i.l.bf16 %v8569_v46 }
 0x48a   : > { %v8584_v13 = vpop.permute.xlu0 %8583  ;;  %7891 = vmatprep.mubr.msk.bf16.mxu1 %vm2700_vm5, %v16383_v7  ;;  %v3617_v54 = vsel %vm1858_vm3, %v3615_v22, %v3616_v49  ;;  %v16384_v21 = vpack.c.bf16 %v12533_v4, %v12530_v38  ;;  %v3621_v48 = vrot.slane %v12839_v60, 1  ;;  %v3623_v46 = vrot.slane %v12845_v24, 1 }
 0x48b   : > { %v8586_v30 = vunpack.i.h.bf16 %v8584_v13  ;;  %v8585_v42 = vunpack.i.l.bf16 %v8584_v13  ;;  %v13054_v36 = vpop.permute.xlu1 %8573  ;;  %v8887_v34 = vpack.i.bf16 %v3619_v18, %v3617_v54  ;;  %v4465_v43 = vsel %vm2762_vm7, %v13013_v14, %v8571_v45 }
 0x48c   : > { %8868 = vrot.lane.b32.xlu0 %v8867_v56, %s9256_s13  ;;  %v4464_v44 = vsel %vm2762_vm7, %v13010_v25, %v8570_v9  ;;  %v8907_v24 = vpack.i.bf16 %v12830_v37, %v12827_v6  ;;  %v3620_v14 = vrot.slane %v12842_v35, 1  ;;  %v8575_v54 = vunpack.i.l.bf16 %v13054_v36 }
 0x48d   : > { %v4590_v47 = vsel %vm2894_vm11, %v4558_v63, %v8585_v42  ;;  %v4591_v61 = vsel %vm2894_vm11, %v4559_v11, %v8586_v30  ;;  %8873 = vrot.lane.b32.xlu1 %v8867_v56, %s9252_s25 }
 0x48e   : > { %v8589_v31 = vpop.permute.xlu0 %8588  ;;  %v4622_v41 = vpack.c.bf16 %v4591_v61, %v4590_v47 }
 0x48f   : > { %v8594_v58 = vpop.permute.xlu1 %8593  ;;  %v8591_v2 = vunpack.i.h.bf16 %v8589_v31  ;;  %v8590_v8 = vunpack.i.l.bf16 %v8589_v31  ;;  %v3622_v31 = vsel %vm1858_vm3, %v3620_v14, %v3621_v48 }
 0x490   : > { %8883 = vrot.lane.b32.xlu0 %v8882_v33, %s9253_s27  ;;  %v8596_v13 = vunpack.i.h.bf16 %v8594_v58  ;;  %v8595_v56 = vunpack.i.l.bf16 %v8594_v58 }
 0x491   : > { %8878 = vrot.lane.b32.xlu1 %v8882_v33, %s9257_s14  ;;  %4809 = vmatmul.mubr.bf16.gmra.mrb[4].mxu1 %v4622_v41  ;;  %v4497_v38 = vsel %vm2795_vm8, %v4465_v43, %v8591_v2  ;;  %v4496_v4 = vsel %vm2795_vm8, %v4464_v44, %v8590_v8  ;;  %v3624_v33 = vsel %vm1858_vm3, %v3621_v48, %v3623_v46  ;;  %v8576_v41 = vunpack.i.h.bf16 %v13054_v36 }
 0x492   : > { %v8599_v39 = vpop.permute.xlu0 %8598  ;;  %7892 = vmatprep.mubr.msk.bf16.mxu1 %vm2700_vm5, %v16384_v21  ;;  %v4529_v25 = vsel %vm2828_vm9, %v4497_v38, %v8596_v13  ;;  %v4528_v7 = vsel %vm2828_vm9, %v4496_v4, %v8595_v56  ;;  %v8912_v2 = vpack.i.bf16 %v12839_v60, %v12842_v35  ;;  %v4404_v36 = vsel %vm2700_vm5, %v12470_v27, %v8575_v54 }
 0x493   : > { %v13073_v0 = vpop.permute.xlu1 %8613  ;;  %v8601_v30 = vunpack.i.h.bf16 %v8599_v39  ;;  %v8600_v42 = vunpack.i.l.bf16 %v8599_v39  ;;  %v8922_v39 = vpack.i.bf16 %v3624_v33, %v3622_v31  ;;  %v16385_v46 = vpack.c.bf16 %v12569_v20, %v12566_v1 }
 0x494   : > { %8888 = vrot.lane.b32.xlu0 %v8887_v34, %s9251_s26  ;;  %v8581_v43 = vunpack.i.h.bf16 %v13032_v3  ;;  %v8580_v44 = vunpack.i.l.bf16 %v13032_v3  ;;  %v3626_v3 = vrot.slane %v12878_v26, 1 }
 0x495   : > { %8898 = vrot.lane.b32.xlu1 %v8887_v34, %s9255_s19  ;;  %v4560_v61 = vsel %vm2861_vm10, %v4528_v7, %v8600_v42  ;;  %v4561_v22 = vsel %vm2861_vm10, %v4529_v25, %v8601_v30 }
 0x496   : > { %v8604_v49 = vpop.permute.xlu0 %8603  ;;  %v4434_v27 = vsel %vm2731_vm6, %v4404_v36, %v8580_v44 }
 0x497   : > { %v8619_v10 = vpop.permute.xlu1 %8618  ;;  %v8606_v21 = vunpack.i.h.bf16 %v8604_v49  ;;  %v8605_v48 = vunpack.i.l.bf16 %v8604_v49  ;;  %v3628_v49 = vrot.slane %v12884_v50, 1  ;;  %v3625_v50 = vrot.slane %v12881_v17, 1 }
 0x498   : > { %8893 = vrot.lane.b32.xlu0 %v8887_v34, %s9258_s15  ;;  %v8621_v63 = vunpack.i.h.bf16 %v8619_v10  ;;  %v8620_v11 = vunpack.i.l.bf16 %v8619_v10  ;;  %v4405_v34 = vsel %vm2700_vm5, %v12473_v32, %v8576_v41 }
 0x499   : > { %8908 = vrot.lane.b32.xlu1 %v8907_v24, %s9252_s25  ;;  %v4435_v30 = vsel %vm2731_vm6, %v4405_v34, %v8581_v43  ;;  %v4466_v42 = vsel %vm2762_vm7, %v4434_v27, %v8605_v48 }
 0x49a   : > { %v13092_v47 = vpop.permute.xlu0 %8608  ;;  %v4592_v18 = vsel %vm2894_vm11, %v4560_v61, %v8620_v11  ;;  %v4593_v58 = vsel %vm2894_vm11, %v4561_v22, %v8621_v63  ;;  %v4467_v20 = vsel %vm2762_vm7, %v4435_v30, %v8606_v21  ;;  %v8937_v22 = vpack.i.bf16 %v12871_v52, %v12868_v16 }
 0x49b   : > { %v8624_v45 = vpop.permute.xlu1 %8623  ;;  %v4624_v9 = vpack.c.bf16 %v4593_v58, %v4592_v18  ;;  %v3627_v58 = vsel %vm1858_vm3, %v3625_v50, %v3626_v3  ;;  %v8952_v21 = vpack.i.bf16 %v12878_v26, %v12881_v17 }
 0x49c   : > { %8903 = vrot.lane.b32.xlu0 %v8907_v24, %s9256_s13  ;;  %v8626_v13 = vunpack.i.h.bf16 %v8624_v45  ;;  %v8625_v56 = vunpack.i.l.bf16 %v8624_v45  ;;  %v3629_v45 = vsel %vm1858_vm3, %v3626_v3, %v3628_v49 }
 0x49d   : > { %4817 = vmatmul.mubr.bf16.gmra.mrb[8].mxu1 %v4624_v9  ;;  %8913 = vrot.lane.b32.xlu1 %v8912_v2, %s9257_s14  ;;  %v8611_v9 = vunpack.i.h.bf16 %v13092_v47 }
 0x49e   : > { %v8629_v8 = vpop.permute.xlu0 %8628  ;;  %7893 = vmatprep.mubr.msk.bf16.mxu1 %vm2700_vm5, %v16385_v46  ;;  %v4499_v10 = vsel %vm2795_vm8, %v4467_v20, %v8626_v13  ;;  %v4498_v24 = vsel %vm2795_vm8, %v4466_v42, %v8625_v56  ;;  %v8957_v46 = vpack.i.bf16 %v3629_v45, %v3627_v58  ;;  %v16386_v56 = vpack.c.bf16 %v12610_v59, %v12606_v5 }
 0x49f   : > { %v8634_v38 = vpop.permute.xlu1 %8633  ;;  %v8631_v32 = vunpack.i.h.bf16 %v8629_v8  ;;  %v8630_v4 = vunpack.i.l.bf16 %v8629_v8  ;;  %v4407_v43 = vsel %vm2700_vm5, %v12511_v12, %v8611_v9  ;;  %v3631_v5 = vrot.slane %v12912_v53, 1 }
 0x4a0   : > { %8918 = vrot.lane.b32.xlu0 %v8912_v2, %s9253_s27  ;;  %v8636_v14 = vunpack.i.h.bf16 %v8634_v38  ;;  %v8635_v25 = vunpack.i.l.bf16 %v8634_v38  ;;  %v8610_v2 = vunpack.i.l.bf16 %v13092_v47  ;;  %v8616_v38 = vunpack.i.h.bf16 %v13073_v0 }
 0x4a1   : > { %8923 = vrot.lane.b32.xlu1 %v8922_v39, %s9251_s26  ;;  %v4531_v63 = vsel %vm2828_vm9, %v4499_v10, %v8631_v32  ;;  %v4530_v11 = vsel %vm2828_vm9, %v4498_v24, %v8630_v4  ;;  %v8615_v32 = vunpack.i.l.bf16 %v13073_v0  ;;  %v3633_v59 = vrot.slane %v12918_v62, 1 }
 0x4a2   : > { %v13120_v1 = vpop.permute.xlu0 %8648  ;;  %v4562_v54 = vsel %vm2861_vm10, %v4530_v11, %v8635_v25  ;;  %v4563_v18 = vsel %vm2861_vm10, %v4531_v63, %v8636_v14  ;;  %v4406_v47 = vsel %vm2700_vm5, %v12505_v19, %v8610_v2  ;;  %v4437_v19 = vsel %vm2731_vm6, %v4407_v43, %v8616_v38  ;;  %v16389_v38 = vld [vmem:[#allocation80_spill] sm:$0xff] }
 0x4a3   : > { %v8639_v7 = vpop.permute.xlu1 %8638  ;;  %v4436_v12 = vsel %vm2731_vm6, %v4406_v47, %v8615_v32  ;;  %v8977_v62 = vpack.i.bf16 %v12905_v51, %v12901_v15  ;;  %v3630_v11 = vrot.slane %v12915_v55, 1  ;;  %v3634_v45 = vsel %vm1858_vm3, %v3631_v5, %v3633_v59 }
 0x4a4   : > { %8928 = vrot.lane.b32.xlu0 %v8922_v39, %s9258_s15  ;;  %v8641_v44 = vunpack.i.h.bf16 %v8639_v7  ;;  %v8640_v13 = vunpack.i.l.bf16 %v8639_v7 }
 0x4a5   : > { %8933 = vrot.lane.b32.xlu1 %v8922_v39, %s9255_s19  ;;  %v3632_v58 = vsel %vm1858_vm3, %v3630_v11, %v3631_v5 }
 0x4a6   : > { %v8654_v61 = vpop.permute.xlu0 %8653  ;;  %v4469_v42 = vsel %vm2762_vm7, %v4437_v19, %v8641_v44  ;;  %v4468_v0 = vsel %vm2762_vm7, %v4436_v12, %v8640_v13 }
 0x4a7   : > { %v8656_v31 = vunpack.i.h.bf16 %v8654_v61  ;;  %v8655_v33 = vunpack.i.l.bf16 %v8654_v61  ;;  %v13135_v41 = vpop.permute.xlu1 %8643 }
 0x4a8   : > { %8938 = vrot.lane.b32.xlu0 %v8937_v22, %s9256_s13  ;;  %v8646_v9 = vunpack.i.h.bf16 %v13135_v41  ;;  %v8645_v2 = vunpack.i.l.bf16 %v13135_v41  ;;  %v16387_v41 = vld [vmem:[#allocation72_spill] sm:$0xff] }
 0x4a9   : > { %v4594_v8 = vsel %vm2894_vm11, %v4562_v54, %v8655_v33  ;;  %v4595_v39 = vsel %vm2894_vm11, %v4563_v18, %v8656_v31  ;;  %8943 = vrot.lane.b32.xlu1 %v8937_v22, %s9252_s25 }
 0x4aa   : > { %v8659_v34 = vpop.permute.xlu0 %8658  ;;  %v4626_v36 = vpack.c.bf16 %v4595_v39, %v4594_v8  ;;  %v4409_v43 = vsel %vm2700_vm5, %v12550_v29, %v8646_v9  ;;  %v4408_v47 = vsel %vm2700_vm5, %v16387_v41, %v8645_v2 }
 0x4ab   : > { %v8664_v48 = vpop.permute.xlu1 %8663  ;;  %v8661_v4 = vunpack.i.h.bf16 %v8659_v34  ;;  %v8660_v27 = vunpack.i.l.bf16 %v8659_v34 }
 0x4ac   : > { %4825 = vmatmul.mubr.bf16.gmra.mrb[12].mxu1 %v4626_v36  ;;  %8953 = vrot.lane.b32.xlu0 %v8952_v21, %s9253_s27  ;;  %v8666_v3 = vunpack.i.h.bf16 %v8664_v48  ;;  %v8665_v49 = vunpack.i.l.bf16 %v8664_v48 }
 0x4ad   : > { %7894 = vmatprep.mubr.msk.bf16.mxu1 %vm2700_vm5, %v16386_v56  ;;  %8948 = vrot.lane.b32.xlu1 %v8952_v21, %s9257_s14  ;;  %v4501_v10 = vsel %vm2795_vm8, %v4469_v42, %v8661_v4  ;;  %v4500_v24 = vsel %vm2795_vm8, %v4468_v0, %v8660_v27  ;;  %v8982_v21 = vpack.i.bf16 %v12912_v53, %v12915_v55  ;;  %v16388_v56 = vld [vmem:[#allocation98_spill] sm:$0xff]  ;;  %v8651_v4 = vunpack.i.h.bf16 %v13120_v1 }
 0x4ae   : > { %v8669_v30 = vpop.permute.xlu0 %8668  ;;  %v4533_v61 = vsel %vm2828_vm9, %v4501_v10, %v8666_v3  ;;  %v4532_v22 = vsel %vm2828_vm9, %v4500_v24, %v8665_v49  ;;  %v16390_v32 = vpack.c.bf16 %v16388_v56, %v16389_v38  ;;  %v8650_v27 = vunpack.i.l.bf16 %v13120_v1  ;;  %v16391_v1 = vld [vmem:[#allocation41_spill] sm:$0xff]  ;;  %v16392_v24 = vld [vmem:[#allocation56_spill] sm:$0xff] }
 0x4af   : > { %v13163_v20 = vpop.permute.xlu1 %8683  ;;  %v8671_v14 = vunpack.i.h.bf16 %v8669_v30  ;;  %v8670_v25 = vunpack.i.l.bf16 %v8669_v30  ;;  %v4439_v42 = vsel %vm2731_vm6, %v4409_v43, %v8651_v4  ;;  %v3989_v10 = vrot.slane %v16391_v1, 1 }
 0x4b0   : > { %8958 = vrot.lane.b32.xlu0 %v8957_v46, %s9251_s26  ;;  %v4438_v59 = vsel %vm2731_vm6, %v4408_v47, %v8650_v27  ;;  %v16397_v27 = vld [vmem:[#allocation102_spill] sm:$0xff] }
 0x4b1   : > { %8968 = vrot.lane.b32.xlu1 %v8957_v46, %s9255_s19  ;;  %v4564_v54 = vsel %vm2861_vm10, %v4532_v22, %v8670_v25  ;;  %v4565_v18 = vsel %vm2861_vm10, %v4533_v61, %v8671_v14  ;;  %v3991_v14 = vrot.slane %v16392_v24, 1 }
 0x4b2   : > { %v8674_v7 = vpop.permute.xlu0 %8673 }
 0x4b3   : > { %v8689_v63 = vpop.permute.xlu1 %8688  ;;  %v8676_v44 = vunpack.i.h.bf16 %v8674_v7  ;;  %v8675_v13 = vunpack.i.l.bf16 %v8674_v7 }
 0x4b4   : > { %8963 = vrot.lane.b32.xlu0 %v8957_v46, %s9258_s15  ;;  %v8691_v50 = vunpack.i.h.bf16 %v8689_v63  ;;  %v8690_v31 = vunpack.i.l.bf16 %v8689_v63  ;;  %v8992_v46 = vpack.i.bf16 %v3634_v45, %v3632_v58  ;;  %v16395_v58 = vld [vmem:[#allocation71_spill] sm:$0xff] }
 0x4b5   : > { %8978 = vrot.lane.b32.xlu1 %v8977_v62, %s9252_s25  ;;  %v4471_v3 = vsel %vm2762_vm7, %v4439_v42, %v8676_v44  ;;  %v4470_v49 = vsel %vm2762_vm7, %v4438_v59, %v8675_v13  ;;  %v8686_v59 = vunpack.i.h.bf16 %v13163_v20  ;;  %v8685_v42 = vunpack.i.l.bf16 %v13163_v20 }
 0x4b6   : > { %v13180_v33 = vpop.permute.xlu0 %8678  ;;  %v4596_v8 = vsel %vm2894_vm11, %v4564_v54, %v8690_v31  ;;  %v4597_v39 = vsel %vm2894_vm11, %v4565_v18, %v8691_v50  ;;  %v16393_v50 = vld [vmem:[#allocation39_spill] sm:$0xff] }
 0x4b7   : > { %v8694_v34 = vpop.permute.xlu1 %8693  ;;  %v4628_v36 = vpack.c.bf16 %v4597_v39, %v4596_v8  ;;  %v3988_v31 = vrot.slane %v16393_v50, 1  ;;  %v16394_v18 = vld [vmem:[#allocation87_spill] sm:$0xff]  ;;  %v3992_v39 = vsel %vm1858_vm3, %v3989_v10, %v3991_v14  ;;  %v8680_v43 = vunpack.i.l.bf16 %v13180_v33 }
 0x4b8   : > { %8973 = vrot.lane.b32.xlu0 %v8977_v62, %s9256_s13  ;;  %v8696_v30 = vunpack.i.h.bf16 %v8694_v34  ;;  %v8695_v12 = vunpack.i.l.bf16 %v8694_v34  ;;  %v9007_v45 = vpack.i.bf16 %v16395_v58, %v16394_v18 }
 0x4b9   : > { %4833 = vmatmul.mubr.bf16.gmra.mrb[16].mxu1 %v4628_v36  ;;  %8983 = vrot.lane.b32.xlu1 %v8982_v21, %s9257_s14  ;;  %v3990_v8 = vsel %vm1858_vm3, %v3988_v31, %v3989_v10  ;;  %v9012_v36 = vpack.i.bf16 %v16391_v1, %v16393_v50 }
 0x4ba   : > { %v8699_v48 = vpop.permute.xlu0 %8698  ;;  %7895 = vmatprep.mubr.msk.bf16.mxu1 %vm2700_vm5, %v16390_v32  ;;  %v4503_v25 = vsel %vm2795_vm8, %v4471_v3, %v8696_v30  ;;  %v4502_v7 = vsel %vm2795_vm8, %v4470_v49, %v8695_v12  ;;  %v9022_v56 = vpack.i.bf16 %v3992_v39, %v3990_v8  ;;  %v16396_v32 = vld [vmem:[#allocation55_spill] sm:$0xff] }
 0x4bb   : > { %v8704_v19 = vpop.permute.xlu1 %8703  ;;  %v8701_v29 = vunpack.i.h.bf16 %v8699_v48  ;;  %v8700_v5 = vunpack.i.l.bf16 %v8699_v48 }
 0x4bc   : > { %8988 = vrot.lane.b32.xlu0 %v8982_v21, %s9253_s27  ;;  %v8706_v63 = vunpack.i.h.bf16 %v8704_v19  ;;  %v8705_v62 = vunpack.i.l.bf16 %v8704_v19  ;;  %v16398_v19 = vld [vmem:[#allocation24_spill] sm:$0xff] }
 0x4bd   : > { %8993 = vrot.lane.b32.xlu1 %v8992_v46, %s9251_s26  ;;  %v4535_v61 = vsel %vm2828_vm9, %v4503_v25, %v8701_v29  ;;  %v4534_v22 = vsel %vm2828_vm9, %v4502_v7, %v8700_v5  ;;  %v16399_v29 = vld [vmem:[#allocation85_spill] sm:$0xff]  ;;  %v16402_v7 = vld [vmem:[#allocation107_spill] sm:$0xff] }
 0x4be   : > { %v13208_v0 = vpop.permute.xlu0 %8718  ;;  %v4566_v21 = vsel %vm2861_vm10, %v4534_v22, %v8705_v62  ;;  %v4567_v48 = vsel %vm2861_vm10, %v4535_v61, %v8706_v63  ;;  %v16400_v5 = vpack.c.bf16 %v16398_v19, %v16399_v29  ;;  %v16401_v25 = vld [vmem:[#allocation105_spill] sm:$0xff] }
 0x4bf   : > { %v8709_v11 = vpop.permute.xlu1 %8708  ;;  %v9037_v63 = vpack.i.bf16 %v16402_v7, %v16401_v25  ;;  %v13257_v62 = vld [vmem:[%s9341_s20] sm:$0xff] }
 0x4c0   : > { %8998 = vrot.lane.b32.xlu0 %v8992_v46, %s9258_s15  ;;  %v8711_v30 = vunpack.i.h.bf16 %v8709_v11  ;;  %v8710_v12 = vunpack.i.l.bf16 %v8709_v11  ;;  %v16403_v11 = vld [vmem:[#allocation6_spill] sm:$0xff]  ;;  %v16406_v29 = vld [vmem:[#allocation53_spill] sm:$0xff] }
 0x4c1   : > { %9003 = vrot.lane.b32.xlu1 %v8992_v46, %s9255_s19  ;;  %v8681_v46 = vunpack.i.h.bf16 %v13180_v33  ;;  %v4410_v33 = vsel %vm2700_vm5, %v16397_v27, %v8680_v43  ;;  %v7035_v20 = vrot.slane %v13257_v62, %v16403_v11 }
 0x4c2   : > { %v8724_v54 = vpop.permute.xlu0 %8723  ;;  %v4440_v10 = vsel %vm2731_vm6, %v4410_v33, %v8685_v42  ;;  %v13278_v33 = vld [vmem:[%s9341_s20 + $0x8] sm:$0xff]  ;;  %v16407_v42 = vld [vmem:[#allocation32_spill] sm:$0xff]  ;;  %s6961_s20 = sld [smem:[#allocation2]] }
 0x4c3   : > { %v8726_v9 = vunpack.i.h.bf16 %v8724_v54  ;;  %v8725_v2 = vunpack.i.l.bf16 %v8724_v54  ;;  %v13225_v34 = vpop.permute.xlu1 %8713  ;;  %v4411_v4 = vsel %vm2700_vm5, %v16396_v32, %v8681_v46  ;;  %v4472_v22 = vsel %vm2762_vm7, %v4440_v10, %v8710_v12  ;;  %v16405_v12 = vld [vmem:[#allocation75_spill] sm:$0xff] }
 0x4c4   : > { %9008 = vrot.lane.b32.xlu0 %v9007_v45, %s9256_s13  ;;  %v4441_v24 = vsel %vm2731_vm6, %v4411_v4, %v8686_v59  ;;  %v8720_v10 = vunpack.i.l.bf16 %v13208_v0 }
 0x4c5   : > { %v4598_v41 = vsel %vm2894_vm11, %v4566_v21, %v8725_v2  ;;  %v4599_v47 = vsel %vm2894_vm11, %v4567_v48, %v8726_v9  ;;  %9013 = vrot.lane.b32.xlu1 %v9012_v36, %s9257_s14  ;;  %v4473_v61 = vsel %vm2762_vm7, %v4441_v24, %v8711_v30  ;;  %v7123_v30 = vrot.slane %v13278_v33, %v16403_v11 }
 0x4c6   : > { %v8729_v44 = vpop.permute.xlu0 %8728  ;;  %v4630_v13 = vpack.c.bf16 %v4599_v47, %v4598_v41  ;;  %v16404_v41 = vld [vmem:[#allocation7_spill] sm:$0xff] }
 0x4c7   : > { %v8734_v38 = vpop.permute.xlu1 %8733  ;;  %v8731_v3 = vunpack.i.h.bf16 %v8729_v44  ;;  %v8730_v49 = vunpack.i.l.bf16 %v8729_v44  ;;  %v7046_v47 = vrot.slane %v13257_v62, %v16404_v41  ;;  %v8716_v44 = vunpack.i.h.bf16 %v13225_v34 }
 0x4c8   : > { %4841 = vmatmul.mubr.bf16.gmra.mrb[20].mxu1 %v4630_v13  ;;  %9023 = vrot.lane.b32.xlu0 %v9022_v56, %s9258_s15  ;;  %v8736_v50 = vunpack.i.h.bf16 %v8734_v38  ;;  %v8735_v31 = vunpack.i.l.bf16 %v8734_v38  ;;  %v8715_v13 = vunpack.i.l.bf16 %v13225_v34 }
 0x4c9   : > { %7896 = vmatprep.mubr.msk.bf16.mxu1 %vm2700_vm5, %v16400_v5  ;;  %9018 = vrot.lane.b32.xlu1 %v9007_v45, %s9252_s25  ;;  %v4505_v54 = vsel %vm2795_vm8, %v4473_v61, %v8731_v3  ;;  %v4504_v18 = vsel %vm2795_vm8, %v4472_v22, %v8730_v49  ;;  %v4413_v19 = vsel %vm2700_vm5, %v16405_v12, %v8716_v44  ;;  %v16408_v3 = vld [vmem:[#allocation30_spill] sm:$0xff]  ;;  %v16411_v44 = vld [vmem:[#allocation101_spill] sm:$0xff] }
 0x4ca   : > { %v8739_v1 = vpop.permute.xlu0 %8738  ;;  %v4537_v8 = vsel %vm2828_vm9, %v4505_v54, %v8736_v50  ;;  %v4536_v39 = vsel %vm2828_vm9, %v4504_v18, %v8735_v31  ;;  %v4412_v34 = vsel %vm2700_vm5, %v16406_v29, %v8715_v13  ;;  %v16409_v49 = vpack.c.bf16 %v16407_v42, %v16408_v3  ;;  %v16412_v13 = vld [vmem:[#allocation51_spill] sm:$0xff] }
 0x4cb   : > { %v13251_v14 = vpop.permute.xlu1 %8753  ;;  %v8741_v58 = vunpack.i.h.bf16 %v8739_v1  ;;  %v8740_v45 = vunpack.i.l.bf16 %v8739_v1  ;;  %v8721_v1 = vunpack.i.h.bf16 %v13208_v0  ;;  %v4442_v22 = vsel %vm2731_vm6, %v4412_v34, %v8720_v10 }
 0x4cc   : > { %9028 = vrot.lane.b32.xlu0 %v9012_v36, %s9253_s27  ;;  %v7134_v54 = vrot.slane %v13278_v33, %v16404_v41  ;;  %v16410_v41 = vld [vmem:[#allocation8_spill] sm:$0xff]  ;;  %v8756_v29 = vunpack.i.h.bf16 %v13251_v14  ;;  %v8755_v34 = vunpack.i.l.bf16 %v13251_v14 }
 0x4cd   : > { %9033 = vrot.lane.b32.xlu1 %v9022_v56, %s9255_s19  ;;  %v4568_v46 = vsel %vm2861_vm10, %v4536_v39, %v8740_v45  ;;  %v4569_v43 = vsel %vm2861_vm10, %v4537_v8, %v8741_v58  ;;  %v4443_v50 = vsel %vm2731_vm6, %v4413_v19, %v8721_v1 }
 0x4ce   : > { %v8744_v9 = vpop.permute.xlu0 %8743 }
 0x4cf   : > { %v8759_v2 = vpop.permute.xlu1 %8758  ;;  %v8746_v5 = vunpack.i.h.bf16 %v8744_v9  ;;  %v8745_v59 = vunpack.i.l.bf16 %v8744_v9 }
 0x4d0   : > { %9038 = vrot.lane.b32.xlu0 %v9037_v63, %s9256_s13  ;;  %v8761_v36 = vunpack.i.h.bf16 %v8759_v2  ;;  %v8760_v21 = vunpack.i.l.bf16 %v8759_v2 }
 0x4d1   : > { %7041 = vbcast.lane.b32.xlu1 %v7035_v20, 264  ;;  %v4475_v18 = vsel %vm2762_vm7, %v4443_v50, %v8746_v5  ;;  %v4474_v0 = vsel %vm2762_vm7, %v4442_v22, %v8745_v59 }
 0x4d2   : > { %v8749_v48 = vpop.permute.xlu0 %8748  ;;  %v4600_v56 = vsel %vm2894_vm11, %v4568_v46, %v8760_v21  ;;  %v4601_v38 = vsel %vm2894_vm11, %v4569_v43, %v8761_v36 }
 0x4d3   : > { %v8764_v32 = vpop.permute.xlu1 %8763  ;;  %v4632_v4 = vpack.c.bf16 %v4601_v38, %v4600_v56  ;;  %v8751_v58 = vunpack.i.h.bf16 %v8749_v48  ;;  %v8750_v45 = vunpack.i.l.bf16 %v8749_v48 }
 0x4d4   : > { %7037 = vbcast.lane.b32.xlu0 %v7035_v20, 256  ;;  %v8766_v24 = vunpack.i.h.bf16 %v8764_v32  ;;  %v8765_v63 = vunpack.i.l.bf16 %v8764_v32 }
 0x4d5   : > { %4849 = vmatmul.mubr.bf16.gmra.mrb[24].mxu1 %v4632_v4  ;;  %7048 = vbcast.lane.b32.xlu1 %v7046_v47, 256  ;;  %v4415_v48 = vsel %vm2700_vm5, %v16411_v44, %v8751_v58  ;;  %v4414_v56 = vsel %vm2700_vm5, %v16412_v13, %v8750_v45 }
 0x4d6   : > { %v8769_v27 = vpop.permute.xlu0 %8768  ;;  %7897 = vmatprep.mubr.msk.bf16.mxu1 %vm2700_vm5, %v16409_v49  ;;  %v4507_v9 = vsel %vm2795_vm8, %v4475_v18, %v8766_v24  ;;  %v4506_v2 = vsel %vm2795_vm8, %v4474_v0, %v8765_v63  ;;  %v7145_v49 = vrot.slane %v13278_v33, %v16410_v41  ;;  %v4444_v1 = vsel %vm2731_vm6, %v4414_v56, %v8755_v34  ;;  %v16413_v18 = vld [vmem:[#allocation16_spill] sm:$0xff]  ;;  %v16414_v0 = vld [vmem:[#allocation37_spill] sm:$0xff] }
 0x4d7   : > { %v8774_v11 = vpop.permute.xlu1 %8773  ;;  %v8771_v20 = vunpack.i.h.bf16 %v8769_v27  ;;  %v8770_v61 = vunpack.i.l.bf16 %v8769_v27  ;;  %v4445_v10 = vsel %vm2731_vm6, %v4415_v48, %v8756_v29  ;;  %v16415_v58 = vpack.c.bf16 %v16413_v18, %v16414_v0  ;;  %v16417_v29 = vld [vmem:[#allocation10_spill] sm:$0xff] }
 0x4d8   : > { %7052 = vbcast.lane.b32.xlu0 %v7046_v47, 264  ;;  %v8776_v8 = vunpack.i.h.bf16 %v8774_v11  ;;  %v8775_v39 = vunpack.i.l.bf16 %v8774_v11  ;;  %v7057_v47 = vrot.slane %v13257_v62, %v16410_v41  ;;  %v7079_v34 = vrot.slane %v13257_v62, %v16417_v29 }
 0x4d9   : > { %7125 = vbcast.lane.b32.xlu1 %v7123_v30, 256  ;;  %v4539_v21 = vsel %vm2828_vm9, %v4507_v9, %v8771_v20  ;;  %v4538_v46 = vsel %vm2828_vm9, %v4506_v2, %v8770_v61  ;;  %v16416_v9 = vld [vmem:[#allocation9_spill] sm:$0xff] }
 0x4da   : > { %v13294_v31 = vpop.permute.xlu0 %8788  ;;  %v4570_v12 = vsel %vm2861_vm10, %v4538_v46, %v8775_v39  ;;  %v4571_v19 = vsel %vm2861_vm10, %v4539_v21, %v8776_v8  ;;  %v7068_v2 = vrot.slane %v13257_v62, %v16416_v9  ;;  %v7156_v13 = vrot.slane %v13278_v33, %v16416_v9 }
 0x4db   : > { %v8779_v36 = vpop.permute.xlu1 %8778 }
 0x4dc   : > { %7129 = vbcast.lane.b32.xlu0 %v7123_v30, 264  ;;  %v8781_v4 = vunpack.i.h.bf16 %v8779_v36  ;;  %v8780_v27 = vunpack.i.l.bf16 %v8779_v36 }
 0x4dd   : > { %7136 = vbcast.lane.b32.xlu1 %v7134_v54, 256 }
 0x4de   : > { %v8794_v43 = vpop.permute.xlu0 %8793  ;;  %v4477_v11 = vsel %vm2762_vm7, %v4445_v10, %v8781_v4  ;;  %v4476_v14 = vsel %vm2762_vm7, %v4444_v1, %v8780_v27 }
 0x4df   : > { %v8796_v38 = vunpack.i.h.bf16 %v8794_v43  ;;  %v8795_v32 = vunpack.i.l.bf16 %v8794_v43  ;;  %v8784_v30 = vpop.permute.xlu1 %8783 }
 0x4e0   : > { %7140 = vbcast.lane.b32.xlu0 %v7134_v54, 264  ;;  %v8786_v27 = vunpack.i.h.bf16 %v8784_v30 }
 0x4e1   : > { %v4602_v5 = vsel %vm2894_vm11, %v4570_v12, %v8795_v32  ;;  %v4603_v59 = vsel %vm2894_vm11, %v4571_v19, %v8796_v38  ;;  %7059 = vbcast.lane.b32.xlu1 %v7057_v47, 256  ;;  %v8785_v12 = vunpack.i.l.bf16 %v8784_v30 }
 0x4e2   : > { %v8799_v42 = vpop.permute.xlu0 %8798  ;;  %v4634_v3 = vpack.c.bf16 %v4603_v59, %v4602_v5  ;;  %v16418_v5 = vpack.c.bf16 %v12798_v40, %v12794_v23  ;;  %v7167_v40 = vrot.slane %v13278_v33, %v16417_v29 }
 0x4e3   : > { %v8801_v24 = vunpack.i.h.bf16 %v8799_v42  ;;  %v8800_v63 = vunpack.i.l.bf16 %v8799_v42  ;;  %v8804_v20 = vpop.permute.xlu1 %8803  ;;  %v16419_v42 = vld [vmem:[#allocation86_spill] sm:$0xff] }
 0x4e4   : > { %4857 = vmatmul.mubr.bf16.gmra.mrb[28].mxu1 %v4634_v3  ;;  %7063 = vbcast.lane.b32.xlu0 %v7057_v47, 264  ;;  %v8806_v50 = vunpack.i.h.bf16 %v8804_v20  ;;  %v8805_v54 = vunpack.i.l.bf16 %v8804_v20  ;;  %v4417_v3 = vsel %vm2700_vm5, %v16419_v42, %v8786_v27 }
 0x4e5   : > { %v4509_v61 = vsel %vm2795_vm8, %v4477_v11, %v8801_v24  ;;  %v4508_v22 = vsel %vm2795_vm8, %v4476_v14, %v8800_v63  ;;  %7898 = vmatprep.mubr.msk.bf16.mxu1 %vm2700_vm5, %v16415_v58  ;;  %7147 = vbcast.lane.b32.xlu1 %v7145_v49, 256  ;;  %v8791_v24 = vunpack.i.h.bf16 %v13294_v31  ;;  %v8790_v63 = vunpack.i.l.bf16 %v13294_v31  ;;  %v16421_v58 = vld [vmem:[#allocation11_spill] sm:$0xff] }
 0x4e6   : > { %v8809_v45 = vpop.permute.xlu0 %8808  ;;  %v4541_v36 = vsel %vm2828_vm9, %v4509_v61, %v8806_v50  ;;  %v4540_v21 = vsel %vm2828_vm9, %v4508_v22, %v8805_v54 }
 0x4e7   : > { %v8811_v8 = vunpack.i.h.bf16 %v8809_v45  ;;  %v8810_v39 = vunpack.i.l.bf16 %v8809_v45  ;;  %v8824_v46 = vpop.permute.xlu1 %8823  ;;  %v4447_v14 = vsel %vm2731_vm6, %v4417_v3, %v8791_v24  ;;  %v7090_v45 = vrot.slane %v13257_v62, %v16421_v58 }
 0x4e8   : > { %7151 = vbcast.lane.b32.xlu0 %v7145_v49, 264  ;;  %v8826_v43 = vunpack.i.h.bf16 %v8824_v46  ;;  %v8825_v41 = vunpack.i.l.bf16 %v8824_v46  ;;  %v16420_v49 = vld [vmem:[#allocation26_spill] sm:$0xff]  ;;  %v16423_v3 = vpack.c.bf16 %v12830_v37, %v12827_v6 }
 0x4e9   : > { %v4572_v47 = vsel %vm2861_vm10, %v4540_v21, %v8810_v39  ;;  %v4573_v44 = vsel %vm2861_vm10, %v4541_v36, %v8811_v8  ;;  %7070 = vbcast.lane.b32.xlu1 %v7068_v2, 256  ;;  %v4416_v30 = vsel %vm2700_vm5, %v16420_v49, %v8785_v12  ;;  %v16422_v12 = vld [vmem:[#allocation12_spill] sm:$0xff] }
 0x4ea   : > { %v8814_v48 = vpop.permute.xlu0 %8813  ;;  %v4604_v56 = vsel %vm2894_vm11, %v4572_v47, %v8825_v41  ;;  %v4605_v38 = vsel %vm2894_vm11, %v4573_v44, %v8826_v43  ;;  %v4446_v23 = vsel %vm2731_vm6, %v4416_v30, %v8790_v63  ;;  %v7178_v41 = vrot.slane %v13278_v33, %v16421_v58  ;;  %v16424_v63 = vld [vmem:[#allocation36_spill] sm:$0xff] }
 0x4eb   : > { %v8829_v32 = vpop.permute.xlu1 %8828  ;;  %v4636_v4 = vpack.c.bf16 %v4605_v38, %v4604_v56  ;;  %v8816_v1 = vunpack.i.h.bf16 %v8814_v48  ;;  %v8815_v10 = vunpack.i.l.bf16 %v8814_v48  ;;  %v7101_v29 = vrot.slane %v13257_v62, %v16422_v12 }
 0x4ec   : > { %7074 = vbcast.lane.b32.xlu0 %v7068_v2, 264  ;;  %v8831_v20 = vunpack.i.h.bf16 %v8829_v32  ;;  %v8830_v61 = vunpack.i.l.bf16 %v8829_v32  ;;  %v7189_v30 = vrot.slane %v13278_v33, %v16422_v12 }
 0x4ed   : > { %4865 = vmatmul.mubr.bf16.gmra.mrb[32].mxu1 %v4636_v4  ;;  %7158 = vbcast.lane.b32.xlu1 %v7156_v13, 256  ;;  %v4479_v50 = vsel %vm2762_vm7, %v4447_v14, %v8816_v1  ;;  %v4478_v54 = vsel %vm2762_vm7, %v4446_v23, %v8815_v10 }
 0x4ee   : > { %v13338_v19 = vpop.permute.xlu0 %8818  ;;  %7899 = vmatprep.mubr.msk.bf16.mxu1 %vm2700_vm5, %v16418_v5  ;;  %v4511_v9 = vsel %vm2795_vm8, %v4479_v50, %v8831_v20  ;;  %v4510_v2 = vsel %vm2795_vm8, %v4478_v54, %v8830_v61  ;;  %v16426_v61 = vld [vmem:[#allocation13_spill] sm:$0xff] }
 0x4ef   : > { %v13346_v59 = vpop.permute.xlu1 %8838  ;;  %v8821_v5 = vunpack.i.h.bf16 %v13338_v19  ;;  %v8820_v42 = vunpack.i.l.bf16 %v13338_v19 }
 0x4f0   : > { %7162 = vbcast.lane.b32.xlu0 %v7156_v13, 264  ;;  %v8841_v1 = vunpack.i.h.bf16 %v13346_v59  ;;  %v8840_v10 = vunpack.i.l.bf16 %v13346_v59 }
 0x4f1   : > { %7081 = vbcast.lane.b32.xlu1 %v7079_v34, 256  ;;  %v4419_v19 = vsel %vm2700_vm5, %v16424_v63, %v8821_v5 }
 0x4f2   : > { %v8834_v11 = vpop.permute.xlu0 %8833 }
 0x4f3   : > { %v8844_v22 = vpop.permute.xlu1 %8843  ;;  %v8836_v18 = vunpack.i.h.bf16 %v8834_v11  ;;  %v8835_v0 = vunpack.i.l.bf16 %v8834_v11  ;;  %v16425_v11 = vld [vmem:[#allocation31_spill] sm:$0xff] }
 0x4f4   : > { %7085 = vbcast.lane.b32.xlu0 %v7079_v34, 264  ;;  %v8846_v8 = vunpack.i.h.bf16 %v8844_v22  ;;  %v8845_v39 = vunpack.i.l.bf16 %v8844_v22  ;;  %v4418_v6 = vsel %vm2700_vm5, %v16425_v11, %v8820_v42  ;;  %v7112_v22 = vrot.slane %v13257_v62, %v16426_v61 }
 0x4f5   : > { %7169 = vbcast.lane.b32.xlu1 %v7167_v40, 256  ;;  %v4543_v21 = vsel %vm2828_vm9, %v4511_v9, %v8836_v18  ;;  %v4542_v46 = vsel %vm2828_vm9, %v4510_v2, %v8835_v0  ;;  %v4448_v54 = vsel %vm2731_vm6, %v4418_v6, %v8840_v10  ;;  %v4449_v18 = vsel %vm2731_vm6, %v4419_v19, %v8841_v1  ;;  %v16428_v10 = vld [vmem:[#allocation73_spill] sm:$0xff] }
 0x4f6   : > { %v8849_v31 = vpop.permute.xlu0 %8848  ;;  %v4574_v13 = vsel %vm2861_vm10, %v4542_v46, %v8845_v39  ;;  %v4575_v56 = vsel %vm2861_vm10, %v4543_v21, %v8846_v8  ;;  %v7200_v62 = vrot.slane %v13278_v33, %v16426_v61  ;;  %v16429_v19 = vpack.c.bf16 %v12871_v52, %v12868_v16 }
 0x4f7   : > { %v13364_v36 = vpop.permute.xlu1 %8853  ;;  %v8851_v37 = vunpack.i.h.bf16 %v8849_v31 }
 0x4f8   : > { %7173 = vbcast.lane.b32.xlu0 %v7167_v40, 264  ;;  %v8850_v40 = vunpack.i.l.bf16 %v8849_v31 }
 0x4f9   : > { %7092 = vbcast.lane.b32.xlu1 %v7090_v45, 256  ;;  %v4481_v31 = vsel %vm2762_vm7, %v4449_v18, %v8851_v37 }
 0x4fa   : > { %v8859_v43 = vpop.permute.xlu0 %8858  ;;  %v4480_v9 = vsel %vm2762_vm7, %v4448_v54, %v8850_v40 }
 0x4fb   : > { %v8861_v47 = vunpack.i.h.bf16 %v8859_v43  ;;  %v8860_v44 = vunpack.i.l.bf16 %v8859_v43  ;;  %v8864_v48 = vpop.permute.xlu1 %8863 }
 0x4fc   : > { %7096 = vbcast.lane.b32.xlu0 %v7090_v45, 264  ;;  %v8866_v23 = vunpack.i.h.bf16 %v8864_v48  ;;  %v8865_v14 = vunpack.i.l.bf16 %v8864_v48 }
 0x4fd   : > { %v4606_v38 = vsel %vm2894_vm11, %v4574_v13, %v8860_v44  ;;  %v4607_v32 = vsel %vm2894_vm11, %v4575_v56, %v8861_v47  ;;  %7180 = vbcast.lane.b32.xlu1 %v7178_v41, 256  ;;  %v8856_v13 = vunpack.i.h.bf16 %v13364_v36  ;;  %v8855_v56 = vunpack.i.l.bf16 %v13364_v36  ;;  %v16427_v36 = vld [vmem:[#allocation104_spill] sm:$0xff] }
 0x4fe   : > { %v8869_v4 = vpop.permute.xlu0 %8868  ;;  %v4638_v27 = vpack.c.bf16 %v4607_v32, %v4606_v38  ;;  %v4513_v2 = vsel %vm2795_vm8, %v4481_v31, %v8866_v23  ;;  %v4512_v8 = vsel %vm2795_vm8, %v4480_v9, %v8865_v14 }
 0x4ff   : > { %v13376_v34 = vpop.permute.xlu1 %8873  ;;  %v8871_v50 = vunpack.i.h.bf16 %v8869_v4  ;;  %v8870_v59 = vunpack.i.l.bf16 %v8869_v4  ;;  %v4421_v1 = vsel %vm2700_vm5, %v16427_v36, %v8856_v13 }
 0x500   : > { %4873 = vmatmul.mubr.bf16.gmra.mrb[36].mxu1 %v4638_v27  ;;  %7184 = vbcast.lane.b32.xlu0 %v7178_v41, 264  ;;  %v8876_v32 = vunpack.i.h.bf16 %v13376_v34  ;;  %v8875_v4 = vunpack.i.l.bf16 %v13376_v34 }
 0x501   : > { %7900 = vmatprep.mubr.msk.bf16.mxu1 %vm2700_vm5, %v16423_v3  ;;  %7103 = vbcast.lane.b32.xlu1 %v7101_v29, 256  ;;  %v4544_v21 = vsel %vm2828_vm9, %v4512_v8, %v8870_v59  ;;  %v4545_v46 = vsel %vm2828_vm9, %v4513_v2, %v8871_v50 }
 0x502   : > { %v13384_v49 = vpop.permute.xlu0 %8883  ;;  %v4451_v11 = vsel %vm2731_vm6, %v4421_v1, %v8876_v32 }
 0x503   : > { %v8879_v24 = vpop.permute.xlu1 %8878  ;;  %v8885_v5 = vunpack.i.l.bf16 %v13384_v49 }
 0x504   : > { %7107 = vbcast.lane.b32.xlu0 %v7101_v29, 264  ;;  %v8881_v0 = vunpack.i.h.bf16 %v8879_v24  ;;  %v8880_v58 = vunpack.i.l.bf16 %v8879_v24  ;;  %v8886_v29 = vunpack.i.h.bf16 %v13384_v49  ;;  %v4420_v24 = vsel %vm2700_vm5, %v16428_v10, %v8855_v56 }
 0x505   : > { %7191 = vbcast.lane.b32.xlu1 %v7189_v30, 256  ;;  %v4450_v49 = vsel %vm2731_vm6, %v4420_v24, %v8875_v4 }
 0x506   : > { %v13394_v20 = vpop.permute.xlu0 %8888  ;;  %v4576_v44 = vsel %vm2861_vm10, %v4544_v21, %v8880_v58  ;;  %v4577_v48 = vsel %vm2861_vm10, %v4545_v46, %v8881_v0  ;;  %v4483_v37 = vsel %vm2762_vm7, %v4451_v11, %v8886_v29  ;;  %v4482_v40 = vsel %vm2762_vm7, %v4450_v49, %v8885_v5 }
 0x507   : > { %v8899_v45 = vpop.permute.xlu1 %8898  ;;  %v8891_v46 = vunpack.i.h.bf16 %v13394_v20 }
 0x508   : > { %7195 = vbcast.lane.b32.xlu0 %v7189_v30, 264  ;;  %v8901_v42 = vunpack.i.h.bf16 %v8899_v45  ;;  %v8900_v3 = vunpack.i.l.bf16 %v8899_v45 }
 0x509   : > { %7114 = vbcast.lane.b32.xlu1 %v7112_v22, 256 }
 0x50a   : > { %v8894_v39 = vpop.permute.xlu0 %8893  ;;  %v4515_v23 = vsel %vm2795_vm8, %v4483_v37, %v8901_v42  ;;  %v4514_v14 = vsel %vm2795_vm8, %v4482_v40, %v8900_v3 }
 0x50b   : > { %v8896_v43 = vunpack.i.h.bf16 %v8894_v39  ;;  %v8895_v41 = vunpack.i.l.bf16 %v8894_v39  ;;  %v13408_v47 = vpop.permute.xlu1 %8908 }
 0x50c   : > { %7118 = vbcast.lane.b32.xlu0 %v7112_v22, 264 }
 0x50d   : > { %v4608_v38 = vsel %vm2894_vm11, %v4576_v44, %v8895_v41  ;;  %v4609_v33 = vsel %vm2894_vm11, %v4577_v48, %v8896_v43  ;;  %7202 = vbcast.lane.b32.xlu1 %v7200_v62, 256  ;;  %v8890_v43 = vunpack.i.l.bf16 %v13394_v20  ;;  %v8911_v41 = vunpack.i.h.bf16 %v13408_v47 }
 0x50e   : > { %v8904_v27 = vpop.permute.xlu0 %8903  ;;  %v4640_v12 = vpack.c.bf16 %v4609_v33, %v4608_v38  ;;  %v8910_v44 = vunpack.i.l.bf16 %v13408_v47 }
 0x50f   : > { %v8914_v30 = vpop.permute.xlu1 %8913  ;;  %v8906_v63 = vunpack.i.h.bf16 %v8904_v27  ;;  %v8905_v34 = vunpack.i.l.bf16 %v8904_v27 }
 0x510   : > { %4881 = vmatmul.mubr.bf16.gmra.mrb[40].mxu1 %v4640_v12  ;;  %7206 = vbcast.lane.b32.xlu0 %v7200_v62, 264  ;;  %v8916_v61 = vunpack.i.h.bf16 %v8914_v30  ;;  %v8915_v22 = vunpack.i.l.bf16 %v8914_v30  ;;  %v16430_v62 = vpack.c.bf16 %v12905_v51, %v12901_v15  ;;  %v4423_v51 = vsel %vm2700_vm5, %v12805_v28, %v8891_v46 }
 0x511   : > { %7901 = vmatprep.mubr.msk.bf16.mxu1 %vm2700_vm5, %v16429_v19  ;;  %v4547_v52 = vsel %vm2828_vm9, %v4515_v23, %v8906_v63  ;;  %v4546_v16 = vsel %vm2828_vm9, %v4514_v14, %v8905_v34  ;;  %v4422_v15 = vsel %vm2700_vm5, %v12808_v57, %v8890_v43  ;;  %v4453_v12 = vsel %vm2731_vm6, %v4423_v51, %v8911_v41 }
 0x512   : > { %v8919_v6 = vpop.permute.xlu0 %8918  ;;  %v4578_v58 = vsel %vm2861_vm10, %v4546_v16, %v8915_v22  ;;  %v4579_v45 = vsel %vm2861_vm10, %v4547_v52, %v8916_v61  ;;  %v4452_v20 = vsel %vm2731_vm6, %v4422_v15, %v8910_v44 }
 0x513   : > { %v13434_v50 = vpop.permute.xlu1 %8923  ;;  %v8921_v13 = vunpack.i.h.bf16 %v8919_v6  ;;  %v8920_v56 = vunpack.i.l.bf16 %v8919_v6 }
 0x514   : > { %v8926_v49 = vunpack.i.h.bf16 %v13434_v50  ;;  %v8925_v11 = vunpack.i.l.bf16 %v13434_v50 }
 0x515   : > { %v4485_v42 = vsel %vm2762_vm7, %v4453_v12, %v8921_v13  ;;  %v4484_v3 = vsel %vm2762_vm7, %v4452_v20, %v8920_v56 }
 0x516   : > { %v8929_v59 = vpop.permute.xlu0 %8928  ;;  %v4424_v50 = vsel %vm2700_vm5, %v12842_v35, %v8925_v11 }
 0x517   : > { %v8931_v54 = vunpack.i.h.bf16 %v8929_v59  ;;  %v8930_v18 = vunpack.i.l.bf16 %v8929_v59  ;;  %v8934_v0 = vpop.permute.xlu1 %8933 }
 0x518   : > { %v8936_v38 = vunpack.i.h.bf16 %v8934_v0  ;;  %v8935_v33 = vunpack.i.l.bf16 %v8934_v0 }
 0x519   : > { %v4610_v31 = vsel %vm2894_vm11, %v4578_v58, %v8930_v18  ;;  %v4611_v9 = vsel %vm2894_vm11, %v4579_v45, %v8931_v54  ;;  %v4425_v18 = vsel %vm2700_vm5, %v12839_v60, %v8926_v49  ;;  %v16431_v45 = vld [vmem:[#allocation22_spill] sm:$0xff] }
 0x51a   : > { %v8939_v2 = vpop.permute.xlu0 %8938  ;;  %v4642_v8 = vpack.c.bf16 %v4611_v9, %v4610_v31  ;;  %v4517_v30 = vsel %vm2795_vm8, %v4485_v42, %v8936_v38  ;;  %v4516_v28 = vsel %vm2795_vm8, %v4484_v3, %v8935_v33 }
 0x51b   : > { %v8944_v39 = vpop.permute.xlu1 %8943  ;;  %v8941_v4 = vunpack.i.h.bf16 %v8939_v2  ;;  %v8940_v27 = vunpack.i.l.bf16 %v8939_v2 }
 0x51c   : > { %4889 = vmatmul.mubr.bf16.gmra.mrb[44].mxu1 %v4642_v8  ;;  %v8946_v40 = vunpack.i.h.bf16 %v8944_v39  ;;  %v8945_v23 = vunpack.i.l.bf16 %v8944_v39 }
 0x51d   : > { %7902 = vmatprep.mubr.msk.bf16.mxu1 %vm2700_vm5, %v16430_v62  ;;  %v4548_v57 = vsel %vm2828_vm9, %v4516_v28, %v8940_v27  ;;  %v4549_v1 = vsel %vm2828_vm9, %v4517_v30, %v8941_v4 }
 0x51e   : > { %v8954_v21 = vpop.permute.xlu0 %8953  ;;  %v4454_v31 = vsel %vm2731_vm6, %v4424_v50, %v8945_v23  ;;  %v4455_v9 = vsel %vm2731_vm6, %v4425_v18, %v8946_v40 }
 0x51f   : > { %v8949_v48 = vpop.permute.xlu1 %8948  ;;  %v8956_v22 = vunpack.i.h.bf16 %v8954_v21  ;;  %v8955_v52 = vunpack.i.l.bf16 %v8954_v21 }
 0x520   : > { %v8951_v47 = vunpack.i.h.bf16 %v8949_v48  ;;  %v8950_v29 = vunpack.i.l.bf16 %v8949_v48 }
 0x521   : > { %v4487_v8 = vsel %vm2762_vm7, %v4455_v9, %v8956_v22  ;;  %v4486_v39 = vsel %vm2762_vm7, %v4454_v31, %v8955_v52 }
 0x522   : > { %v13450_v32 = vpop.permute.xlu0 %8958  ;;  %v4580_v34 = vsel %vm2861_vm10, %v4548_v57, %v8950_v29  ;;  %v4581_v19 = vsel %vm2861_vm10, %v4549_v1, %v8951_v47 }
 0x523   : > { %v8969_v5 = vpop.permute.xlu1 %8968  ;;  %v8961_v62 = vunpack.i.h.bf16 %v13450_v32  ;;  %v8960_v60 = vunpack.i.l.bf16 %v13450_v32 }
 0x524   : > { %v8971_v16 = vunpack.i.h.bf16 %v8969_v5  ;;  %v8970_v59 = vunpack.i.l.bf16 %v8969_v5 }
 0x525   : > { %v4427_v4 = vsel %vm2700_vm5, %v12878_v26, %v8961_v62  ;;  %v4426_v27 = vsel %vm2700_vm5, %v12881_v17, %v8960_v60 }
 0x526   : > { %v8964_v36 = vpop.permute.xlu0 %8963  ;;  %v4519_v35 = vsel %vm2795_vm8, %v4487_v8, %v8971_v16  ;;  %v4518_v21 = vsel %vm2795_vm8, %v4486_v39, %v8970_v59 }
 0x527   : > { %v8966_v10 = vunpack.i.h.bf16 %v8964_v36  ;;  %v8965_v24 = vunpack.i.l.bf16 %v8964_v36  ;;  %v8979_v63 = vpop.permute.xlu1 %8978 }
 0x528   : > { %v8981_v13 = vunpack.i.h.bf16 %v8979_v63  ;;  %v8980_v56 = vunpack.i.l.bf16 %v8979_v63 }
 0x529   : > { %v4612_v6 = vsel %vm2894_vm11, %v4580_v34, %v8965_v24  ;;  %v4613_v37 = vsel %vm2894_vm11, %v4581_v19, %v8966_v10 }
 0x52a   : > { %v8974_v14 = vpop.permute.xlu0 %8973  ;;  %v4644_v61 = vpack.c.bf16 %v4613_v37, %v4612_v6  ;;  %v4456_v17 = vsel %vm2731_vm6, %v4426_v27, %v8980_v56  ;;  %v4457_v3 = vsel %vm2731_vm6, %v4427_v4, %v8981_v13  ;;  %v16432_v37 = vpack.c.bf16 %v16402_v7, %v16401_v25 }
 0x52b   : > { %v13470_v54 = vpop.permute.xlu1 %8983  ;;  %v8976_v0 = vunpack.i.h.bf16 %v8974_v14  ;;  %v8975_v58 = vunpack.i.l.bf16 %v8974_v14 }
 0x52c   : > { %4897 = vmatmul.mubr.bf16.gmra.mrb[48].mxu1 %v4644_v61  ;;  %v8986_v46 = vunpack.i.h.bf16 %v13470_v54  ;;  %v8985_v43 = vunpack.i.l.bf16 %v13470_v54 }
 0x52d   : > { %7903 = vmatprep.mubr.msk.bf16.mxu1 %vm2700_vm5, %v16431_v45  ;;  %v4551_v44 = vsel %vm2828_vm9, %v4519_v35, %v8976_v0  ;;  %v4550_v48 = vsel %vm2828_vm9, %v4518_v21, %v8975_v58 }
 0x52e   : > { %v8989_v2 = vpop.permute.xlu0 %8988  ;;  %v4582_v12 = vsel %vm2861_vm10, %v4550_v48, %v8985_v43  ;;  %v4583_v47 = vsel %vm2861_vm10, %v4551_v44, %v8986_v46 }
 0x52f   : > { %v8994_v41 = vpop.permute.xlu1 %8993  ;;  %v8991_v33 = vunpack.i.h.bf16 %v8989_v2  ;;  %v8990_v51 = vunpack.i.l.bf16 %v8989_v2 }
 0x530   : > { %v8996_v23 = vunpack.i.h.bf16 %v8994_v41  ;;  %v8995_v14 = vunpack.i.l.bf16 %v8994_v41 }
 0x531   : > { %v4489_v36 = vsel %vm2762_vm7, %v4457_v3, %v8991_v33  ;;  %v4488_v57 = vsel %vm2762_vm7, %v4456_v17, %v8990_v51  ;;  %v16434_v3 = vld [vmem:[#allocation45_spill] sm:$0xff] }
 0x532   : > { %v13490_v38 = vpop.permute.xlu0 %8998  ;;  %v4429_v7 = vsel %vm2700_vm5, %v12912_v53, %v8996_v23  ;;  %v4428_v9 = vsel %vm2700_vm5, %v12915_v55, %v8995_v14 }
 0x533   : > { %v9001_v32 = vunpack.i.h.bf16 %v13490_v38  ;;  %v9000_v15 = vunpack.i.l.bf16 %v13490_v38  ;;  %v9004_v20 = vpop.permute.xlu1 %9003 }
 0x534   : > { %v9006_v29 = vunpack.i.h.bf16 %v9004_v20  ;;  %v9005_v5 = vunpack.i.l.bf16 %v9004_v20 }
 0x535   : > { %v4614_v42 = vsel %vm2894_vm11, %v4582_v12, %v9000_v15  ;;  %v4615_v26 = vsel %vm2894_vm11, %v4583_v47, %v9001_v32  ;;  %v13555_v47 = vld [vmem:[%s15661_s6] ss:$0 sm:$0xff] }
 0x536   : > { %v9009_v30 = vpop.permute.xlu0 %9008  ;;  %v4646_v28 = vpack.c.bf16 %v4615_v26, %v4614_v42  ;;  %v4521_v24 = vsel %vm2795_vm8, %v4489_v36, %v9006_v29  ;;  %v4520_v63 = vsel %vm2795_vm8, %v4488_v57, %v9005_v5  ;;  %v16433_v5 = vld [vmem:[#allocation95_spill] sm:$0xff] }
 0x537   : > { %v9011_v1 = vunpack.i.h.bf16 %v9009_v30  ;;  %v9010_v10 = vunpack.i.l.bf16 %v9009_v30  ;;  %v9014_v34 = vpop.permute.xlu1 %9013 }
 0x538   : > { %4905 = vmatmul.mubr.bf16.gmra.mrb[52].mxu1 %v4646_v28  ;;  %v9016_v11 = vunpack.i.h.bf16 %v9014_v34  ;;  %v9015_v6 = vunpack.i.l.bf16 %v9014_v34  ;;  %v13569_v28 = vld [vmem:[%s15662_s7 + $0x2] ss:$0 sm:$0xff] }
 0x539   : > { %v4552_v19 = vsel %vm2828_vm9, %v4520_v63, %v9010_v10  ;;  %v4553_v49 = vsel %vm2828_vm9, %v4521_v24, %v9011_v1  ;;  %7904 = vmatprep.mubr.msk.bf16.mxu1 %vm2700_vm5, %v16432_v37  ;;  %v13577_v10 = vld [vmem:[%s15662_s7] ss:$0 sm:$0xff] }
 0x53a   : > { %v9024_v40 = vpop.permute.xlu0 %9023  ;;  %v4584_v16 = vsel %vm2861_vm10, %v4552_v19, %v9015_v6  ;;  %v4585_v59 = vsel %vm2861_vm10, %v4553_v49, %v9016_v11 }
 0x53b   : > { %v9026_v61 = vunpack.i.h.bf16 %v9024_v40  ;;  %v9025_v22 = vunpack.i.l.bf16 %v9024_v40  ;;  %v9019_v52 = vpop.permute.xlu1 %9018 }
 0x53c   : > { %v9021_v18 = vunpack.i.h.bf16 %v9019_v52  ;;  %v9020_v50 = vunpack.i.l.bf16 %v9019_v52 }
 0x53d   : > { %v4616_v0 = vsel %vm2894_vm11, %v4584_v16, %v9025_v22  ;;  %v4617_v58 = vsel %vm2894_vm11, %v4585_v59, %v9026_v61 }
 0x53e   : > { %v9029_v31 = vpop.permute.xlu0 %9028  ;;  %v4648_v25 = vpack.c.bf16 %v4617_v58, %v4616_v0  ;;  %v4459_v39 = vsel %vm2731_vm6, %v4429_v7, %v9021_v18  ;;  %v4458_v62 = vsel %vm2731_vm6, %v4428_v9, %v9020_v50  ;;  %v16435_v18 = vld [vmem:[#allocation23_spill] sm:$0xff] }
 0x53f   : > { %v9031_v2 = vunpack.i.h.bf16 %v9029_v31  ;;  %v9030_v8 = vunpack.i.l.bf16 %v9029_v31  ;;  %v9034_v60 = vpop.permute.xlu1 %9033 }
 0x540   : > { %4913 = vmatmul.mubr.bf16.gmra.mrb[56].mxu1 %v4648_v25  ;;  %v9036_v41 = vunpack.i.h.bf16 %v9034_v60  ;;  %v9035_v44 = vunpack.i.l.bf16 %v9034_v60 }
 0x541   : > { %v4491_v35 = vsel %vm2762_vm7, %v4459_v39, %v9031_v2  ;;  %v4490_v21 = vsel %vm2762_vm7, %v4458_v62, %v9030_v8  ;;  %7905 = vmatprep.mubr.msk.bf16.mxu1 %vm2700_vm5, %v16431_v45  ;;  %v16436_v39 = vld [vmem:[#allocation84_spill] sm:$0xff] }
 0x542   : > { %v9039_v53 = vpop.permute.xlu0 %9038  ;;  %v4522_v13 = vsel %vm2795_vm8, %v4490_v21, %v9035_v44  ;;  %v4523_v56 = vsel %vm2795_vm8, %v4491_v35, %v9036_v41 }
 0x543   : > { %v9041_v48 = vunpack.i.h.bf16 %v9039_v53  ;;  %v9040_v55 = vunpack.i.l.bf16 %v9039_v53 }
 0x545   : > { %v4554_v33 = vsel %vm2828_vm9, %v4522_v13, %v9040_v55  ;;  %v4555_v51 = vsel %vm2828_vm9, %v4523_v56, %v9041_v48  ;;  %v13615_v56 = vld [vmem:[%s15662_s7 + $0x4] ss:$0 sm:$0xff] }
 0x546   : > { %v4586_v4 = vsel %vm2861_vm10, %v4554_v33, %v8985_v43  ;;  %v4587_v27 = vsel %vm2861_vm10, %v4555_v51, %v8986_v46  ;;  %v13620_v33 = vld [vmem:[%s15662_s7 + $0x5] ss:$0 sm:$0xff] }
 0x547   : > { %v4618_v45 = vsel %vm2894_vm11, %v4586_v4, %v9000_v15  ;;  %v4619_v20 = vsel %vm2894_vm11, %v4587_v27, %v9001_v32  ;;  %v13563_v32 = vld [vmem:[%s15662_s7 + $0x1] ss:$0 sm:$0xff] }
 0x548   : > { %v4650_v12 = vpack.c.bf16 %v4619_v20, %v4618_v45  ;;  %v13631_v45 = vld [vmem:[%s15662_s7 + $0x3] ss:$0 sm:$0xff] }
 0x54a   : > { %4921 = vmatmul.mubr.bf16.gmra.mrb[60].mxu1 %v4650_v12 }
 0x55c   : > { %v4802_v43 = vpop.f32.mrb[0].mxu1 }
 0x55d   : > { %v4936_v54 = vadd.f32 %v13555_v47, %v4802_v43  ;;  %v4804_v29 = vpop.f32.mrb[1].mxu1 }
 0x55e   : > { %v4805_v46 = vpop.f32.mrb[2].mxu1 }
 0x55f   : > { %v4968_v42 = vadd.f32 %v4936_v54, %v16433_v5  ;;  %v4937_v15 = vadd.f32 %v13555_v47, %v4805_v46  ;;  %v4807_v26 = vpop.f32.mrb[3].mxu1 }
 0x561   : > { %v5017_v38 = vrot.slane %v4968_v42, 1  ;;  %v5067_v17 = vrot.slane %v4968_v42, 7  ;;  %v4969_v30 = vadd.f32 %v4937_v15, %v16434_v3 }
 0x563   : > { %v13572_v36 = vsel %vm354_vm0, %v5017_v38, %v5067_v17  ;;  %v5068_v57 = vrot.slane %v4969_v30, 7  ;;  %v5161_v1 = vrot.slane %v4969_v30, 5 }
 0x564   : > { %v5302_v24 = vmul.f32 %v13563_v32, %v13572_v36  ;;  %v4810_v63 = vpop.f32.mrb[4].mxu1  ;;  %v5535_v34 = vmul.f32 %v13569_v28, %v13572_v36  ;;  %v5233_v23 = vmul.f32 %v13577_v10, %v13572_v36 }
 0x565   : > { %v13584_v19 = vsel %vm354_vm0, %v5067_v17, %v5068_v57  ;;  %v13587_v49 = vsel %vm354_vm0, %v5068_v57, %v5161_v1  ;;  %v4938_v11 = vadd.f32 %v13555_v47, %v4810_v63  ;;  %v4812_v6 = vpop.f32.mrb[5].mxu1  ;;  %v13652_v57 = vmul.f32 %v13631_v45, %v13572_v36  ;;  %v16437_v1 = vld [vmem:[#allocation28_spill] sm:$0xff] }
 0x566   : > { %v5303_v37 = vmul.f32 %v13563_v32, %v13584_v19  ;;  %v4813_v40 = vpop.f32.mrb[6].mxu1  ;;  %v5304_v14 = vmul.f32 %v13563_v32, %v13587_v49  ;;  %v5536_v61 = vmul.f32 %v13569_v28, %v13584_v19  ;;  %v5537_v22 = vmul.f32 %v13569_v28, %v13587_v49 }
 0x567   : > { %v4815_v52 = vpop.f32.mrb[7].mxu1  ;;  %v5394_v16 = vrot.slane %v5302_v24, 1  ;;  %v4970_v50 = vadd.f32 %v4938_v11, %v16435_v18  ;;  %v4939_v0 = vadd.f32 %v13555_v47, %v4813_v40  ;;  %v5627_v58 = vrot.slane %v5535_v34, 2 }
 0x568   : > { %v5395_v59 = vrot.slane %v5303_v37, 1  ;;  %v5397_v31 = vrot.slane %v5304_v14, 1  ;;  %v5628_v25 = vrot.slane %v5536_v61, 2  ;;  %v5630_v7 = vrot.slane %v5537_v22, 2  ;;  %v16438_v52 = vld [vmem:[#allocation27_spill] sm:$0xff] }
 0x569   : > { %v5234_v9 = vmul.f32 %v13577_v10, %v13584_v19  ;;  %v5016_v2 = vrot.slane %v4970_v50, 1  ;;  %v5064_v8 = vrot.slane %v4970_v50, 7  ;;  %v4971_v62 = vadd.f32 %v4939_v0, %v16436_v39  ;;  %v13671_v39 = vld [vmem:[%s15662_s7 + $0x6] ss:$0 sm:$0xff] }
 0x56a   : > { %v5398_v60 = vsel %vm1858_vm3, %v5395_v59, %v5397_v31  ;;  %v5631_v35 = vsel %vm2024_vm4, %v5628_v25, %v5630_v7  ;;  %v5396_v21 = vsel %vm1858_vm3, %v5394_v16, %v5395_v59  ;;  %v5629_v41 = vsel %vm2024_vm4, %v5627_v58, %v5628_v25 }
 0x56b   : > { %v13610_v44 = vsel %vm354_vm0, %v5016_v2, %v5064_v8  ;;  %v5065_v53 = vrot.slane %v4971_v62, 7  ;;  %v5160_v48 = vrot.slane %v4971_v62, 5  ;;  %v5497_v55 = vadd.f32 %v5398_v60, %v5234_v9  ;;  %v13676_v62 = vld [vmem:[%s15662_s7 + $0x7] ss:$0 sm:$0xff] }
 0x56c   : > { %v5496_v13 = vadd.f32 %v5396_v21, %v5233_v23  ;;  %v5840_v54 = vmul.f32 %v13615_v56, %v13610_v44  ;;  %v6088_v29 = vmul.f32 %v13620_v33, %v13610_v44  ;;  %v5767_v30 = vmul.f32 %v13631_v45, %v13610_v44 }
 0x56d   : > { %v13623_v51 = vsel %vm354_vm0, %v5064_v8, %v5065_v53  ;;  %v13626_v4 = vsel %vm354_vm0, %v5065_v53, %v5160_v48  ;;  %v5730_v27 = vadd.f32 %v5631_v35, %v5497_v55  ;;  %v13666_v2 = vmul.f32 %v13615_v56, %v13587_v49  ;;  %v13691_v53 = vld [vmem:[%s15662_s7 + $0x8] ss:$0 sm:$0xff] }
 0x56e   : > { %v5768_v12 = vmul.f32 %v13631_v45, %v13623_v51  ;;  %v5841_v43 = vmul.f32 %v13615_v56, %v13623_v51  ;;  %v5842_v42 = vmul.f32 %v13615_v56, %v13626_v4  ;;  %v6089_v15 = vmul.f32 %v13620_v33, %v13623_v51 }
 0x56f   : > { %v6090_v26 = vmul.f32 %v13620_v33, %v13626_v4  ;;  %v5729_v40 = vadd.f32 %v5629_v41, %v5496_v13  ;;  %v5938_v23 = vrot.slane %v5840_v54, 1  ;;  %v6186_v14 = vrot.slane %v6088_v29, 2 }
 0x570   : > { %v4818_v20 = vpop.f32.mrb[8].mxu1  ;;  %v5800_v17 = vadd.f32 %v5768_v12, %v5730_v27  ;;  %v5939_v3 = vrot.slane %v5841_v43, 1  ;;  %v5941_v11 = vrot.slane %v5842_v42, 1  ;;  %v6187_v6 = vrot.slane %v6089_v15, 2 }
 0x571   : > { %v4940_v46 = vadd.f32 %v13555_v47, %v4818_v20  ;;  %v4820_v5 = vpop.f32.mrb[9].mxu1  ;;  %v6189_v37 = vrot.slane %v6090_v26, 2  ;;  %v5799_v0 = vadd.f32 %v5767_v30, %v5729_v40  ;;  %v13680_v35 = vmul.f32 %v13615_v56, %v13572_v36 }
 0x572   : > { %v4821_v38 = vpop.f32.mrb[10].mxu1  ;;  %v5942_v59 = vsel %vm1858_vm3, %v5939_v3, %v5941_v11  ;;  %v5940_v58 = vsel %vm1858_vm3, %v5938_v23, %v5939_v3  ;;  %v6188_v9 = vsel %vm2024_vm4, %v6186_v14, %v6187_v6  ;;  %v5299_v12 = vmul.f32 %v13563_v32, %v13610_v44 }
 0x573   : > { %v4972_v24 = vadd.f32 %v4940_v46, %v16437_v1  ;;  %v4941_v63 = vadd.f32 %v13555_v47, %v4821_v38  ;;  %v4823_v34 = vpop.f32.mrb[11].mxu1  ;;  %v6048_v18 = vadd.f32 %v5942_v59, %v5800_v17  ;;  %v6190_v50 = vsel %vm2024_vm4, %v6187_v6, %v6189_v37  ;;  %v16439_v59 = vld [vmem:[#allocation89_spill] sm:$0xff] }
 0x574   : > { %v6047_v60 = vadd.f32 %v5940_v58, %v5799_v0  ;;  %v5936_v5 = vrot.slane %v13666_v2, 1  ;;  %v13714_v42 = vmul.f32 %v13620_v33, %v13587_v49  ;;  %v13718_v34 = vmul.f32 %v13563_v32, %v13623_v51 }
 0x575   : > { %v5018_v61 = vrot.slane %v4972_v24, 1  ;;  %v5070_v22 = vrot.slane %v4972_v24, 7  ;;  %v4973_v16 = vadd.f32 %v4941_v63, %v16438_v52  ;;  %v6296_v8 = vadd.f32 %v6190_v50, %v6048_v18 }
 0x576   : > { %v6295_v46 = vadd.f32 %v6188_v9, %v6047_v60  ;;  %v5389_v11 = vrot.slane %v5299_v12, 1  ;;  %v5532_v23 = vmul.f32 %v13569_v28, %v13610_v44  ;;  %v5231_v9 = vmul.f32 %v13577_v10, %v13610_v44 }
 0x577   : > { %v13661_v31 = vsel %vm354_vm0, %v5018_v61, %v5070_v22  ;;  %v5071_v25 = vrot.slane %v4973_v16, 7  ;;  %v5162_v7 = vrot.slane %v4973_v16, 5  ;;  %v5390_v16 = vrot.slane %v13718_v34, 1 }
 0x578   : > { %v6335_v48 = vmul.f32 %v13671_v39, %v13661_v31  ;;  %v6406_v55 = vmul.f32 %v13676_v62, %v13661_v31  ;;  %v6641_v20 = vmul.f32 %v13691_v53, %v13661_v31  ;;  %v5838_v60 = vmul.f32 %v13615_v56, %v13584_v19 }
 0x579   : > { %v13683_v21 = vsel %vm354_vm0, %v5070_v22, %v5071_v25  ;;  %v13686_v41 = vsel %vm354_vm0, %v5071_v25, %v5162_v7  ;;  %v5533_v25 = vmul.f32 %v13569_v28, %v13623_v51 }
 0x57a   : > { %v6336_v13 = vmul.f32 %v13671_v39, %v13683_v21  ;;  %v6407_v27 = vmul.f32 %v13676_v62, %v13683_v21  ;;  %v6408_v43 = vmul.f32 %v13676_v62, %v13686_v41  ;;  %v6642_v54 = vmul.f32 %v13691_v53, %v13683_v21 }
 0x57b   : > { %v6643_v29 = vmul.f32 %v13691_v53, %v13686_v41  ;;  %v6365_v30 = vadd.f32 %v6335_v48, %v6295_v46  ;;  %v6498_v24 = vrot.slane %v6406_v55, 1  ;;  %v6733_v63 = vrot.slane %v6641_v20, 2 }
 0x57c   : > { %v6366_v15 = vadd.f32 %v6336_v13, %v6296_v8  ;;  %v6499_v26 = vrot.slane %v6407_v27, 1  ;;  %v6501_v38 = vrot.slane %v6408_v43, 1  ;;  %v6734_v17 = vrot.slane %v6642_v54, 2  ;;  %v16440_v13 = vld [vmem:[#allocation34_spill] sm:$0xff] }
 0x57d   : > { %v6736_v3 = vrot.slane %v6643_v29, 2  ;;  %v5391_v8 = vsel %vm1858_vm3, %v5389_v11, %v5390_v16  ;;  %v5301_v48 = vmul.f32 %v13563_v32, %v13626_v4  ;;  %v5534_v55 = vmul.f32 %v13569_v28, %v13626_v4 }
 0x57e   : > { %v6502_v49 = vsel %vm1858_vm3, %v6499_v26, %v6501_v38  ;;  %v6500_v22 = vsel %vm1858_vm3, %v6498_v24, %v6499_v26  ;;  %v6735_v52 = vsel %vm2024_vm4, %v6733_v63, %v6734_v17  ;;  %v5494_v43 = vadd.f32 %v5391_v8, %v5231_v9 }
 0x57f   : > { %v4826_v1 = vpop.f32.mrb[12].mxu1  ;;  %v6737_v40 = vsel %vm2024_vm4, %v6734_v17, %v6736_v3  ;;  %v6601_v61 = vadd.f32 %v6502_v49, %v6366_v15  ;;  %v6600_v58 = vadd.f32 %v6500_v22, %v6365_v30  ;;  %v5622_v54 = vrot.slane %v5532_v23, 2 }
 0x580   : > { %v4942_v6 = vadd.f32 %v13555_v47, %v4826_v1  ;;  %v4828_v37 = vpop.f32.mrb[13].mxu1  ;;  %v5623_v29 = vrot.slane %v5533_v25, 2  ;;  %v5933_v38 = vrot.slane %v13680_v35, 1  ;;  %v5934_v3 = vrot.slane %v5838_v60, 1 }
 0x581   : > { %v4829_v14 = vpop.f32.mrb[14].mxu1  ;;  %v6836_v7 = vadd.f32 %v6737_v40, %v6601_v61  ;;  %v6835_v20 = vadd.f32 %v6735_v52, %v6600_v58  ;;  %v6085_v30 = vmul.f32 %v13620_v33, %v13572_v36  ;;  %v6086_v1 = vmul.f32 %v13620_v33, %v13584_v19 }
 0x582   : > { %v13729_v18 = vadd.f32 %v4942_v6, %v16439_v59  ;;  %v4943_v50 = vadd.f32 %v13555_v47, %v4829_v14  ;;  %v4831_v0 = vpop.f32.mrb[15].mxu1  ;;  %v5624_v17 = vsel %vm2024_vm4, %v5622_v54, %v5623_v29  ;;  %v6184_v24 = vrot.slane %v13714_v42, 2 }
 0x583   : > { %v6874_v12 = vsel %vm2700_vm5, %v6836_v7, 0.0  ;;  %v6871_v26 = vsel %vm2700_vm5, %v6835_v20, 0.0  ;;  %v5392_v63 = vrot.slane %v5301_v48, 1  ;;  %v13764_v35 = vadd.f32 %v5624_v17, %v5494_v43 }
 0x584   : > { %v13744_v27 = vadd.f32 %v4943_v50, %v16440_v13  ;;  %v5073_v46 = vrot.slane %v13729_v18, 7  ;;  %6875 = vadd.xlane.f32.xlu1 %v6874_v12  ;;  %6872 = vadd.xlane.f32.xlu0 %v6871_v26  ;;  %v5625_v11 = vrot.slane %v5534_v55, 2  ;;  %v13768_v6 = vmul.f32 %v13563_v32, %v13686_v41 }
 0x585   : > { %v5935_v36 = vsel %vm1858_vm3, %v5933_v38, %v5934_v3  ;;  %v6181_v37 = vrot.slane %v6085_v30, 2  ;;  %v5797_v42 = vadd.f32 %v13652_v57, %v13764_v35  ;;  %v6182_v49 = vrot.slane %v6086_v1, 2 }
 0x586   : > { %v5074_v15 = vrot.slane %v13744_v27, 7  ;;  %v6403_v40 = vmul.f32 %v13676_v62, %v13610_v44  ;;  %v6404_v23 = vmul.f32 %v13676_v62, %v13623_v51  ;;  %v13779_v14 = vmul.f32 %v13569_v28, %v13686_v41 }
 0x587   : > { %v5163_v61 = vrot.slane %v13744_v27, 5  ;;  %v6638_v22 = vmul.f32 %v13691_v53, %v13610_v44  ;;  %v6639_v52 = vmul.f32 %v13691_v53, %v13623_v51  ;;  %v6045_v57 = vadd.f32 %v5935_v36, %v5797_v42 }
 0x588   : > { %v13762_v34 = vsel %vm354_vm0, %v5073_v46, %v5074_v15  ;;  %v6183_v59 = vsel %vm2024_vm4, %v6181_v37, %v6182_v49  ;;  %v6493_v50 = vrot.slane %v6403_v40, 1  ;;  %v6494_v0 = vrot.slane %v6404_v23, 1  ;;  %v16441_v37 = vld [vmem:[#allocation35_spill] sm:$0xff] }
 0x589   : > { %v6728_v58 = vrot.slane %v6638_v22, 2  ;;  %v6729_v25 = vrot.slane %v6639_v52, 2  ;;  %v5232_v7 = vmul.f32 %v13577_v10, %v13623_v51  ;;  %v5393_v9 = vsel %vm1858_vm3, %v5390_v16, %v5392_v63 }
 0x58a   : > { %v6293_v60 = vadd.f32 %v6183_v59, %v6045_v57  ;;  %v6333_v48 = vmul.f32 %v13671_v39, %v13610_v44  ;;  %v6495_v55 = vsel %vm1858_vm3, %v6493_v50, %v6494_v0  ;;  %v5626_v13 = vsel %vm2024_vm4, %v5623_v29, %v5625_v11 }
 0x58b   : > { %v6730_v12 = vsel %vm2024_vm4, %v6728_v58, %v6729_v25  ;;  %v5495_v43 = vadd.f32 %v5393_v9, %v5232_v7  ;;  %v5937_v54 = vsel %vm1858_vm3, %v5934_v3, %v5936_v5  ;;  %v6185_v26 = vsel %vm2024_vm4, %v6182_v49, %v6184_v24 }
 0x58c   : > { %v4834_v8 = vpop.f32.mrb[16].mxu1  ;;  %v6363_v38 = vadd.f32 %v6333_v48, %v6293_v60  ;;  %v5766_v17 = vmul.f32 %v13631_v45, %v13584_v19  ;;  %v6405_v44 = vmul.f32 %v13676_v62, %v13626_v4  ;;  %v6640_v29 = vmul.f32 %v13691_v53, %v13626_v4  ;;  %v16442_v4 = vld [vmem:[#allocation93_spill] sm:$0xff] }
 0x58d   : > { %v4836_v20 = vpop.f32.mrb[17].mxu1  ;;  %v5728_v1 = vadd.f32 %v5626_v13, %v5495_v43  ;;  %v4944_v63 = vadd.f32 %v13555_v47, %v4834_v8  ;;  %v5770_v5 = vmul.f32 %v13631_v45, %v13683_v21  ;;  %v13811_v19 = vmul.f32 %v13615_v56, %v13683_v21 }
 0x58e   : > { %v4837_v16 = vpop.f32.mrb[18].mxu1  ;;  %v6598_v3 = vadd.f32 %v6495_v55, %v6363_v38  ;;  %v6496_v24 = vrot.slane %v6405_v44, 1  ;;  %v6731_v11 = vrot.slane %v6640_v29, 2  ;;  %v5845_v57 = vmul.f32 %v13615_v56, %v13686_v41 }
 0x58f   : > { %v4839_v30 = vpop.f32.mrb[19].mxu1  ;;  %v4945_v2 = vadd.f32 %v13555_v47, %v4837_v16  ;;  %v5798_v36 = vadd.f32 %v5766_v17, %v5728_v1  ;;  %v13814_v42 = vadd.f32 %v4944_v63, %v16441_v37  ;;  %v5802_v40 = vadd.f32 %v5770_v5, %v5728_v1 }
 0x590   : > { %v6833_v23 = vadd.f32 %v6730_v12, %v6598_v3  ;;  %v6497_v22 = vsel %vm1858_vm3, %v6494_v0, %v6496_v24  ;;  %v6732_v52 = vsel %vm2024_vm4, %v6729_v25, %v6731_v11  ;;  %v5019_v59 = vrot.slane %v13729_v18, 1 }
 0x591   : > { %v13817_v49 = vadd.f32 %v4945_v2, %v16442_v4  ;;  %v6046_v50 = vadd.f32 %v5937_v54, %v5798_v36  ;;  %v5076_v58 = vrot.slane %v13814_v42, 7  ;;  %v13829_v9 = vsel %vm354_vm0, %v5074_v15, %v5163_v61 }
 0x592   : > { %v6865_v8 = vsel %vm2700_vm5, %v6833_v23, 0.0  ;;  %v5944_v0 = vrot.slane %v13811_v19, 1  ;;  %v5946_v25 = vrot.slane %v5845_v57, 1  ;;  %v6334_v48 = vmul.f32 %v13671_v39, %v13623_v51 }
 0x593   : > { %v5077_v7 = vrot.slane %v13817_v49, 7  ;;  %6866 = vadd.xlane.f32.xlu1 %v6865_v8  ;;  %v6294_v60 = vadd.f32 %v6185_v26, %v6046_v50  ;;  %v6092_v27 = vmul.f32 %v13620_v33, %v13683_v21  ;;  %v5402_v15 = vrot.slane %v13768_v6, 1 }
 0x594   : > { %v5947_v61 = vsel %vm1858_vm3, %v5944_v0, %v5946_v25  ;;  %v6093_v13 = vmul.f32 %v13620_v33, %v13686_v41  ;;  %v5635_v20 = vrot.slane %v13779_v14, 2  ;;  %v13852_v51 = vsel %vm354_vm0, %v5019_v59, %v5073_v46 }
 0x595   : > { %v13840_v55 = vsel %vm354_vm0, %v5076_v58, %v5077_v7  ;;  %v6364_v12 = vadd.f32 %v6334_v48, %v6294_v60  ;;  %v6050_v43 = vadd.f32 %v5947_v61, %v5802_v40  ;;  %v6192_v54 = vrot.slane %v6092_v27, 2 }
 0x596   : > { %v6194_v26 = vrot.slane %v6093_v13, 2  ;;  %v6410_v16 = vmul.f32 %v13676_v62, %v13762_v34  ;;  %v6411_v38 = vmul.f32 %v13676_v62, %v13829_v9  ;;  %v13860_v41 = vmul.f32 %v13563_v32, %v13829_v9 }
 0x597   : > { %v6599_v17 = vadd.f32 %v6497_v22, %v6364_v12  ;;  %v6338_v18 = vmul.f32 %v13671_v39, %v13762_v34  ;;  %v6645_v46 = vmul.f32 %v13691_v53, %v13762_v34  ;;  %v6646_v63 = vmul.f32 %v13691_v53, %v13829_v9 }
 0x598   : > { %v6195_v29 = vsel %vm2024_vm4, %v6192_v54, %v6194_v26  ;;  %v6504_v30 = vrot.slane %v6410_v16, 1  ;;  %v6506_v1 = vrot.slane %v6411_v38, 1  ;;  %v5769_v11 = vmul.f32 %v13631_v45, %v13661_v31 }
 0x599   : > { %v6834_v5 = vadd.f32 %v6732_v52, %v6599_v17  ;;  %v6298_v3 = vadd.f32 %v6195_v29, %v6050_v43  ;;  %v6739_v24 = vrot.slane %v6645_v46, 2  ;;  %v6741_v37 = vrot.slane %v6646_v63, 2 }
 0x59a   : > { %v6507_v36 = vsel %vm1858_vm3, %v6504_v30, %v6506_v1  ;;  %v5843_v4 = vmul.f32 %v13615_v56, %v13661_v31  ;;  %v6091_v40 = vmul.f32 %v13620_v33, %v13661_v31  ;;  %v5164_v52 = vrot.slane %v13817_v49, 5  ;;  %v16444_v1 = vld [vmem:[#allocation50_spill] sm:$0xff] }
 0x59b   : > { %v4842_v44 = vpop.f32.mrb[20].mxu1  ;;  %v6868_v22 = vsel %vm2700_vm5, %v6834_v5, 0.0  ;;  %v6368_v57 = vadd.f32 %v6338_v18, %v6298_v3  ;;  %v5801_v59 = vadd.f32 %v5769_v11, %v13764_v35  ;;  %v6742_v50 = vsel %vm2024_vm4, %v6739_v24, %v6741_v37  ;;  %v16443_v18 = vld [vmem:[#allocation40_spill] sm:$0xff] }
 0x59c   : > { %v4844_v2 = vpop.f32.mrb[21].mxu1  ;;  %6869 = vadd.xlane.f32.xlu0 %v6868_v22  ;;  %v5943_v8 = vrot.slane %v5843_v4, 1  ;;  %v6191_v25 = vrot.slane %v6091_v40, 2  ;;  %v6409_v60 = vmul.f32 %v13676_v62, %v13852_v51  ;;  %v6644_v27 = vmul.f32 %v13691_v53, %v13852_v51 }
 0x59d   : > { %v4845_v19 = vpop.f32.mrb[22].mxu1  ;;  %v6603_v48 = vadd.f32 %v6507_v36, %v6368_v57  ;;  %v4946_v61 = vadd.f32 %v13555_v47, %v4842_v44  ;;  %v6337_v43 = vmul.f32 %v13671_v39, %v13852_v51  ;;  %v13907_v63 = vmul.f32 %v13569_v28, %v13829_v9 }
 0x59e   : > { %v4847_v23 = vpop.f32.mrb[23].mxu1  ;;  %v4947_v13 = vadd.f32 %v13555_v47, %v4845_v19  ;;  %v5945_v12 = vsel %vm1858_vm3, %v5943_v8, %v5944_v0  ;;  %v6193_v35 = vsel %vm2024_vm4, %v6191_v25, %v6192_v54  ;;  %v6503_v26 = vrot.slane %v6409_v60, 1 }
 0x59f   : > { %v6838_v16 = vadd.f32 %v6742_v50, %v6603_v48  ;;  %v6049_v38 = vadd.f32 %v5945_v12, %v5801_v59  ;;  %v6738_v17 = vrot.slane %v6644_v27, 2  ;;  %v13891_v46 = vadd.f32 %v4946_v61, %v16443_v18 }
 0x5a0   : > { %v6505_v29 = vsel %vm1858_vm3, %v6503_v26, %v6504_v30  ;;  %v13895_v44 = vadd.f32 %v4947_v13, %v16444_v1  ;;  %v13899_v0 = vmul.f32 %v13563_v32, %v13683_v21  ;;  %v13903_v54 = vmul.f32 %v13569_v28, %v13683_v21 }
 0x5a1   : > { %v6880_v2 = vsel %vm2700_vm5, %v6838_v16, 0.0  ;;  %v6297_v5 = vadd.f32 %v6193_v35, %v6049_v38  ;;  %v6740_v30 = vsel %vm2024_vm4, %v6738_v17, %v6739_v24  ;;  %v5020_v3 = vrot.slane %v13814_v42, 1 }
 0x5a2   : > { %6881 = vadd.xlane.f32.xlu1 %v6880_v2  ;;  %v5079_v11 = vrot.slane %v13891_v46, 7  ;;  %v5080_v19 = vrot.slane %v13895_v44, 7  ;;  %v5400_v36 = vrot.slane %v13899_v0, 1  ;;  %v5236_v4 = vmul.f32 %v13577_v10, %v13683_v21 }
 0x5a3   : > { %v6367_v37 = vadd.f32 %v6337_v43, %v6297_v5  ;;  %v5633_v40 = vrot.slane %v13903_v54, 2  ;;  %v13920_v23 = vmul.f32 %v13615_v56, %v13762_v34  ;;  %v5407_v24 = vrot.slane %v13860_v41, 1 }
 0x5a4   : > { %v13926_v22 = vsel %vm354_vm0, %v5077_v7, %v5164_v52  ;;  %v13933_v57 = vsel %vm354_vm0, %v5079_v11, %v5080_v19  ;;  %v5403_v21 = vsel %vm1858_vm3, %v5400_v36, %v5402_v15  ;;  %v5640_v59 = vrot.slane %v13907_v63, 2 }
 0x5a5   : > { %v6602_v50 = vadd.f32 %v6505_v29, %v6367_v37  ;;  %v5499_v8 = vadd.f32 %v5403_v21, %v5236_v4  ;;  %v5772_v49 = vmul.f32 %v13631_v45, %v13762_v34  ;;  %v5636_v52 = vsel %vm2024_vm4, %v5633_v40, %v5635_v20 }
 0x5a6   : > { %v5848_v25 = vmul.f32 %v13615_v56, %v13829_v9  ;;  %v5949_v60 = vrot.slane %v13920_v23, 1  ;;  %v6095_v6 = vmul.f32 %v13620_v33, %v13762_v34  ;;  %v13952_v48 = vsel %vm354_vm0, %v5020_v3, %v5076_v58 }
 0x5a7   : > { %v13956_v27 = vmul.f32 %v13563_v32, %v13926_v22  ;;  %v6837_v14 = vadd.f32 %v6740_v30, %v6602_v50  ;;  %v5732_v20 = vadd.f32 %v5636_v52, %v5499_v8  ;;  %v13960_v13 = vmul.f32 %v13569_v28, %v13926_v22 }
 0x5a8   : > { %v4850_v7 = vpop.f32.mrb[24].mxu1  ;;  %v5951_v12 = vrot.slane %v5848_v25, 1  ;;  %v6096_v35 = vmul.f32 %v13620_v33, %v13829_v9  ;;  %v6197_v43 = vrot.slane %v6095_v6, 2  ;;  %v6413_v16 = vmul.f32 %v13676_v62, %v13840_v55 }
 0x5a9   : > { %v4852_v15 = vpop.f32.mrb[25].mxu1  ;;  %v6877_v58 = vsel %vm2700_vm5, %v6837_v14, 0.0  ;;  %v5804_v26 = vadd.f32 %v5772_v49, %v5732_v20  ;;  %v6414_v38 = vmul.f32 %v13676_v62, %v13926_v22  ;;  %v6648_v29 = vmul.f32 %v13691_v53, %v13840_v55 }
 0x5aa   : > { %v4853_v61 = vpop.f32.mrb[26].mxu1  ;;  %6878 = vadd.xlane.f32.xlu0 %v6877_v58  ;;  %v5952_v17 = vsel %vm1858_vm3, %v5949_v60, %v5951_v12  ;;  %v6199_v18 = vrot.slane %v6096_v35, 2  ;;  %v6649_v9 = vmul.f32 %v13691_v53, %v13926_v22  ;;  %v6340_v0 = vmul.f32 %v13671_v39, %v13840_v55 }
 0x5ab   : > { %v4855_v42 = vpop.f32.mrb[27].mxu1  ;;  %v6052_v1 = vadd.f32 %v5952_v17, %v5804_v26  ;;  %v6509_v54 = vrot.slane %v6413_v16, 1  ;;  %v6511_v2 = vrot.slane %v6414_v38, 1  ;;  %v6744_v30 = vrot.slane %v6648_v29, 2 }
 0x5ac   : > { %v6200_v5 = vsel %vm2024_vm4, %v6197_v43, %v6199_v18  ;;  %v6746_v3 = vrot.slane %v6649_v9, 2  ;;  %v5305_v37 = vmul.f32 %v13563_v32, %v13661_v31  ;;  %v5235_v21 = vmul.f32 %v13577_v10, %v13661_v31 }
 0x5ad   : > { %v6300_v4 = vadd.f32 %v6200_v5, %v6052_v1  ;;  %v6512_v23 = vsel %vm1858_vm3, %v6509_v54, %v6511_v2  ;;  %v5538_v50 = vmul.f32 %v13569_v28, %v13661_v31  ;;  %v5846_v52 = vmul.f32 %v13615_v56, %v13852_v51 }
 0x5ae   : > { %v6747_v8 = vsel %vm2024_vm4, %v6744_v30, %v6746_v3  ;;  %v5399_v49 = vrot.slane %v5305_v37, 1  ;;  %v6094_v25 = vmul.f32 %v13620_v33, %v13852_v51  ;;  %v5771_v14 = vmul.f32 %v13631_v45, %v13852_v51  ;;  %v16445_v37 = vld [vmem:[#allocation83_spill] sm:$0xff] }
 0x5af   : > { %v6370_v6 = vadd.f32 %v6340_v0, %v6300_v4  ;;  %v5632_v15 = vrot.slane %v5538_v50, 2  ;;  %v6412_v20 = vmul.f32 %v13676_v62, %v13952_v48  ;;  %v5948_v31 = vrot.slane %v5846_v52, 1 }
 0x5b0   : > { %v5401_v12 = vsel %vm1858_vm3, %v5399_v49, %v5400_v36  ;;  %v6196_v35 = vrot.slane %v6094_v25, 2  ;;  %v6647_v42 = vmul.f32 %v13691_v53, %v13952_v48  ;;  %v4948_v9 = vadd.f32 %v13555_v47, %v4850_v7 }
 0x5b1   : > { %v6605_v58 = vadd.f32 %v6512_v23, %v6370_v6  ;;  %v5498_v26 = vadd.f32 %v5401_v12, %v5235_v21  ;;  %v5634_v16 = vsel %vm2024_vm4, %v5632_v15, %v5633_v40  ;;  %v6508_v38 = vrot.slane %v6412_v20, 1 }
 0x5b2   : > { %v5950_v17 = vsel %vm1858_vm3, %v5948_v31, %v5949_v60  ;;  %v6198_v18 = vsel %vm2024_vm4, %v6196_v35, %v6197_v43  ;;  %v6743_v29 = vrot.slane %v6647_v42, 2  ;;  %v4949_v2 = vadd.f32 %v13555_v47, %v4853_v61 }
 0x5b3   : > { %v6840_v1 = vadd.f32 %v6747_v8, %v6605_v58  ;;  %v5731_v0 = vadd.f32 %v5634_v16, %v5498_v26  ;;  %v6510_v36 = vsel %vm1858_vm3, %v6508_v38, %v6509_v54  ;;  %v5165_v3 = vrot.slane %v13895_v44, 5  ;;  %v16446_v54 = vld [vmem:[#allocation103_spill] sm:$0xff] }
 0x5b4   : > { %v6745_v40 = vsel %vm2024_vm4, %v6743_v29, %v6744_v30  ;;  %v14007_v4 = vadd.f32 %v4948_v9, %v16445_v37  ;;  %v14011_v60 = vmul.f32 %v13563_v32, %v13762_v34  ;;  %v14015_v21 = vadd.f32 %v4949_v2, %v16446_v54 }
 0x5b5   : > { %v6886_v43 = vsel %vm2700_vm5, %v6840_v1, 0.0  ;;  %v5803_v23 = vadd.f32 %v5771_v14, %v5731_v0  ;;  %v14019_v61 = vmul.f32 %v13569_v28, %v13762_v34  ;;  %v5021_v30 = vrot.slane %v13891_v46, 1 }
 0x5b6   : > { %6887 = vadd.xlane.f32.xlu1 %v6886_v43  ;;  %v6339_v8 = vmul.f32 %v13671_v39, %v13952_v48  ;;  %v5238_v49 = vmul.f32 %v13577_v10, %v13762_v34  ;;  %v5405_v52 = vrot.slane %v14011_v60, 1  ;;  %v5082_v15 = vrot.slane %v14007_v4, 7 }
 0x5b7   : > { %v14002_v5 = vpop.f32.mrb[28].mxu1  ;;  %v6051_v6 = vadd.f32 %v5950_v17, %v5803_v23  ;;  %v5083_v14 = vrot.slane %v14015_v21, 7  ;;  %v5638_v20 = vrot.slane %v14019_v61, 2  ;;  %v14035_v12 = vsel %vm354_vm0, %v5080_v19, %v5165_v3 }
 0x5b8   : > { %v4860_v7 = vpop.f32.mrb[29].mxu1  ;;  %v5408_v34 = vsel %vm1858_vm3, %v5405_v52, %v5407_v24  ;;  %v14044_v31 = vmul.f32 %v13615_v56, %v13840_v55  ;;  %v5851_v35 = vmul.f32 %v13615_v56, %v13926_v22  ;;  %v5774_v19 = vmul.f32 %v13631_v45, %v13840_v55 }
 0x5b9   : > { %v14021_v50 = vpop.f32.mrb[30].mxu1  ;;  %v6299_v42 = vadd.f32 %v6198_v18, %v6051_v6  ;;  %v14053_v44 = vsel %vm354_vm0, %v5082_v15, %v5083_v14  ;;  %v5501_v41 = vadd.f32 %v5408_v34, %v5238_v49  ;;  %v5412_v24 = vrot.slane %v13956_v27, 1 }
 0x5ba   : > { %v4863_v25 = vpop.f32.mrb[31].mxu1  ;;  %v5645_v58 = vrot.slane %v13960_v13, 2  ;;  %v5641_v26 = vsel %vm2024_vm4, %v5638_v20, %v5640_v59  ;;  %v5954_v16 = vrot.slane %v14044_v31, 1  ;;  %v5956_v18 = vrot.slane %v5851_v35, 1 }
 0x5bb   : > { %v6369_v38 = vadd.f32 %v6339_v8, %v6299_v42  ;;  %v5734_v17 = vadd.f32 %v5641_v26, %v5501_v41  ;;  %v6098_v29 = vmul.f32 %v13620_v33, %v13840_v55  ;;  %v14070_v9 = vsel %vm354_vm0, %v5021_v30, %v5079_v11 }
 0x5bc   : > { %v14074_v63 = vmul.f32 %v13563_v32, %v14035_v12  ;;  %v14078_v59 = vmul.f32 %v13569_v28, %v14035_v12  ;;  %v6099_v1 = vmul.f32 %v13620_v33, %v13926_v22  ;;  %v5957_v3 = vsel %vm1858_vm3, %v5954_v16, %v5956_v18 }
 0x5bd   : > { %v6604_v0 = vadd.f32 %v6510_v36, %v6369_v38  ;;  %v5806_v2 = vadd.f32 %v5774_v19, %v5734_v17  ;;  %v6202_v37 = vrot.slane %v6098_v29, 2  ;;  %v6416_v7 = vmul.f32 %v13676_v62, %v13933_v57 }
 0x5be   : > { %v6204_v11 = vrot.slane %v6099_v1, 2  ;;  %v6417_v43 = vmul.f32 %v13676_v62, %v14035_v12  ;;  %v6651_v23 = vmul.f32 %v13691_v53, %v13933_v57  ;;  %v6342_v36 = vmul.f32 %v13671_v39, %v13933_v57 }
 0x5bf   : > { %v6839_v30 = vadd.f32 %v6745_v40, %v6604_v0  ;;  %v6054_v22 = vadd.f32 %v5957_v3, %v5806_v2  ;;  %v6652_v8 = vmul.f32 %v13691_v53, %v14035_v12  ;;  %v6514_v6 = vrot.slane %v6416_v7, 1 }
 0x5c0   : > { %v14083_v46 = vpop.f32.mrb[32].mxu1  ;;  %v6205_v25 = vsel %vm2024_vm4, %v6202_v37, %v6204_v11  ;;  %v6516_v34 = vrot.slane %v6417_v43, 1  ;;  %v6749_v31 = vrot.slane %v6651_v23, 2  ;;  %v5308_v40 = vmul.f32 %v13563_v32, %v13852_v51 }
 0x5c1   : > { %v4868_v54 = vpop.f32.mrb[33].mxu1  ;;  %v6883_v42 = vsel %vm2700_vm5, %v6839_v30, 0.0  ;;  %v6302_v41 = vadd.f32 %v6205_v25, %v6054_v22  ;;  %v6751_v19 = vrot.slane %v6652_v8, 2  ;;  %v5237_v38 = vmul.f32 %v13577_v10, %v13852_v51 }
 0x5c2   : > { %v14095_v49 = vpop.f32.mrb[34].mxu1  ;;  %6884 = vadd.xlane.f32.xlu0 %v6883_v42  ;;  %v6517_v26 = vsel %vm1858_vm3, %v6514_v6, %v6516_v34  ;;  %v5541_v17 = vmul.f32 %v13569_v28, %v13852_v51  ;;  %v5849_v18 = vmul.f32 %v13615_v56, %v13952_v48  ;;  %v5404_v0 = vrot.slane %v5308_v40, 1  ;;  %v16447_v40 = vld [vmem:[#allocation52_spill] sm:$0xff] }
 0x5c3   : > { %v4871_v35 = vpop.f32.mrb[35].mxu1  ;;  %v6372_v29 = vadd.f32 %v6342_v36, %v6302_v41  ;;  %v6752_v1 = vsel %vm2024_vm4, %v6749_v31, %v6751_v19  ;;  %v6097_v2 = vmul.f32 %v13620_v33, %v13952_v48  ;;  %v5773_v11 = vmul.f32 %v13631_v45, %v13952_v48 }
 0x5c4   : > { %v5637_v3 = vrot.slane %v5541_v17, 2  ;;  %v5953_v7 = vrot.slane %v5849_v18, 1  ;;  %v6415_v43 = vmul.f32 %v13676_v62, %v14070_v9  ;;  %v5406_v51 = vsel %vm1858_vm3, %v5404_v0, %v5405_v52  ;;  %v16448_v17 = vld [vmem:[#allocation79_spill] sm:$0xff] }
 0x5c5   : > { %v6607_v23 = vadd.f32 %v6517_v26, %v6372_v29  ;;  %v6201_v54 = vrot.slane %v6097_v2, 2  ;;  %v6650_v30 = vmul.f32 %v13691_v53, %v14070_v9  ;;  %v5500_v22 = vadd.f32 %v5406_v51, %v5237_v38 }
 0x5c6   : > { %v5639_v36 = vsel %vm2024_vm4, %v5637_v3, %v5638_v20  ;;  %v5955_v8 = vsel %vm1858_vm3, %v5953_v7, %v5954_v16  ;;  %v6513_v25 = vrot.slane %v6415_v43, 1  ;;  %v4950_v60 = vadd.f32 %v13555_v47, %v14002_v5 }
 0x5c7   : > { %v6842_v34 = vadd.f32 %v6752_v1, %v6607_v23  ;;  %v6203_v35 = vsel %vm2024_vm4, %v6201_v54, %v6202_v37  ;;  %v6748_v42 = vrot.slane %v6650_v30, 2  ;;  %v5166_v52 = vrot.slane %v14015_v21, 5 }
 0x5c8   : > { %v5733_v41 = vadd.f32 %v5639_v36, %v5500_v22  ;;  %v6515_v19 = vsel %vm1858_vm3, %v6513_v25, %v6514_v6  ;;  %v4951_v61 = vadd.f32 %v13555_v47, %v14021_v50  ;;  %v14134_v26 = vadd.f32 %v4950_v60, %v16447_v40 }
 0x5c9   : > { %v6892_v20 = vsel %vm2700_vm5, %v6842_v34, 0.0  ;;  %v6750_v16 = vsel %vm2024_vm4, %v6748_v42, %v6749_v31  ;;  %v14138_v37 = vmul.f32 %v13563_v32, %v13840_v55  ;;  %v5022_v5 = vrot.slane %v14007_v4, 1 }
 0x5ca   : > { %6893 = vadd.xlane.f32.xlu1 %v6892_v20  ;;  %v5805_v38 = vadd.f32 %v5773_v11, %v5733_v41  ;;  %v14142_v6 = vadd.f32 %v4951_v61, %v16448_v17  ;;  %v14146_v47 = vmul.f32 %v13569_v28, %v13840_v55  ;;  %v6341_v50 = vmul.f32 %v13671_v39, %v14070_v9 }
 0x5cb   : > { %v5240_v31 = vmul.f32 %v13577_v10, %v13840_v55  ;;  %v5410_v18 = vrot.slane %v14138_v37, 1  ;;  %v14155_v29 = vmul.f32 %v13615_v56, %v13933_v57  ;;  %v5085_v0 = vrot.slane %v14134_v26, 7  ;;  %v14271_v37 = vld [vmem:[%s15661_s6] ss:$0 sm:$0xff] }
 0x5cc   : > { %v6053_v1 = vadd.f32 %v5955_v8, %v5805_v38  ;;  %v5086_v2 = vrot.slane %v14142_v6, 7  ;;  %v5643_v3 = vrot.slane %v14146_v47, 2  ;;  %v14163_v11 = vsel %vm354_vm0, %v5083_v14, %v5166_v52 }
 0x5cd   : > { %v5413_v10 = vsel %vm1858_vm3, %v5410_v18, %v5412_v24  ;;  %v5854_v55 = vmul.f32 %v13615_v56, %v14035_v12  ;;  %v5959_v7 = vrot.slane %v14155_v29, 1  ;;  %v5776_v27 = vmul.f32 %v13631_v45, %v13933_v57 }
 0x5ce   : > { %v6301_v43 = vadd.f32 %v6203_v35, %v6053_v1  ;;  %v14178_v21 = vsel %vm354_vm0, %v5085_v0, %v5086_v2  ;;  %v5503_v14 = vadd.f32 %v5413_v10, %v5240_v31  ;;  %v5417_v23 = vrot.slane %v14074_v63, 1 }
 0x5cf   : > { %v5650_v24 = vrot.slane %v14078_v59, 2  ;;  %v5646_v51 = vsel %vm2024_vm4, %v5643_v3, %v5645_v58  ;;  %v5961_v54 = vrot.slane %v5854_v55, 1  ;;  %v6101_v8 = vmul.f32 %v13620_v33, %v13933_v57 }
 0x5d0   : > { %v6371_v22 = vadd.f32 %v6341_v50, %v6301_v43  ;;  %v5736_v36 = vadd.f32 %v5646_v51, %v5503_v14  ;;  %v6102_v25 = vmul.f32 %v13620_v33, %v14035_v12  ;;  %v14198_v13 = vsel %vm354_vm0, %v5022_v5, %v5082_v15  ;;  %v14228_v43 = vld [vmem:[%s15662_s7 + $0x1] ss:$0 sm:$0xff]  ;;  %v14235_v14 = vld [vmem:[%s15662_s7 + $0x2] ss:$0 sm:$0xff] }
 0x5d1   : > { %v14202_v58 = vmul.f32 %v13563_v32, %v14163_v11  ;;  %v14206_v35 = vmul.f32 %v13569_v28, %v14163_v11  ;;  %v5962_v42 = vsel %vm1858_vm3, %v5959_v7, %v5961_v54  ;;  %v6207_v4 = vrot.slane %v6101_v8, 2 }
 0x5d2   : > { %v6606_v12 = vadd.f32 %v6515_v19, %v6371_v22  ;;  %v5808_v52 = vadd.f32 %v5776_v27, %v5736_v36  ;;  %v6209_v41 = vrot.slane %v6102_v25, 2  ;;  %v6419_v61 = vmul.f32 %v13676_v62, %v14053_v44  ;;  %v14244_v22 = vld [vmem:[%s15662_s7] ss:$0 sm:$0xff] }
 0x5d3   : > { %v14189_v30 = vpop.f32.mrb[36].mxu1  ;;  %v6420_v32 = vmul.f32 %v13676_v62, %v14163_v11  ;;  %v6654_v28 = vmul.f32 %v13691_v53, %v14053_v44  ;;  %v6655_v20 = vmul.f32 %v13691_v53, %v14163_v11  ;;  %v6344_v38 = vmul.f32 %v13671_v39, %v14053_v44 }
 0x5d4   : > { %v4876_v34 = vpop.f32.mrb[37].mxu1  ;;  %v6841_v40 = vadd.f32 %v6750_v16, %v6606_v12  ;;  %v6056_v5 = vadd.f32 %v5962_v42, %v5808_v52  ;;  %v6210_v19 = vsel %vm2024_vm4, %v6207_v4, %v6209_v41  ;;  %v6519_v17 = vrot.slane %v6419_v61, 1 }
 0x5d5   : > { %v14211_v60 = vpop.f32.mrb[38].mxu1  ;;  %v6521_v50 = vrot.slane %v6420_v32, 1  ;;  %v6754_v31 = vrot.slane %v6654_v28, 2  ;;  %v6756_v1 = vrot.slane %v6655_v20, 2  ;;  %v5311_v16 = vmul.f32 %v14228_v43, %v13952_v48 }
 0x5d6   : > { %v4879_v15 = vpop.f32.mrb[39].mxu1  ;;  %v6889_v10 = vsel %vm2700_vm5, %v6841_v40, 0.0  ;;  %v6304_v55 = vadd.f32 %v6210_v19, %v6056_v5  ;;  %v5544_v27 = vmul.f32 %v14235_v14, %v13952_v48  ;;  %v5239_v36 = vmul.f32 %v14244_v22, %v13952_v48 }
 0x5d7   : > { %6890 = vadd.xlane.f32.xlu0 %v6889_v10  ;;  %v6522_v51 = vsel %vm1858_vm3, %v6519_v17, %v6521_v50  ;;  %v6757_v54 = vsel %vm2024_vm4, %v6754_v31, %v6756_v1  ;;  %v5852_v8 = vmul.f32 %v13615_v56, %v14070_v9  ;;  %v5409_v34 = vrot.slane %v5311_v16, 1  ;;  %v16449_v1 = vld [vmem:[#allocation59_spill] sm:$0xff] }
 0x5d8   : > { %v6374_v25 = vadd.f32 %v6344_v38, %v6304_v55  ;;  %v5642_v42 = vrot.slane %v5544_v27, 2  ;;  %v6100_v12 = vmul.f32 %v13620_v33, %v14070_v9  ;;  %v5775_v52 = vmul.f32 %v13631_v45, %v14070_v9  ;;  %v16450_v55 = vld [vmem:[#allocation46_spill] sm:$0xff] }
 0x5d9   : > { %v5958_v41 = vrot.slane %v5852_v8, 1  ;;  %v6418_v15 = vmul.f32 %v13676_v62, %v14198_v13  ;;  %v6653_v61 = vmul.f32 %v13691_v53, %v14198_v13  ;;  %v5411_v32 = vsel %vm1858_vm3, %v5409_v34, %v5410_v18 }
 0x5da   : > { %v6609_v48 = vadd.f32 %v6522_v51, %v6374_v25  ;;  %v5644_v28 = vsel %vm2024_vm4, %v5642_v42, %v5643_v3  ;;  %v6206_v33 = vrot.slane %v6100_v12, 2  ;;  %v5502_v20 = vadd.f32 %v5411_v32, %v5239_v36 }
 0x5db   : > { %v5960_v45 = vsel %vm1858_vm3, %v5958_v41, %v5959_v7  ;;  %v6518_v40 = vrot.slane %v6418_v15, 1  ;;  %v6753_v5 = vrot.slane %v6653_v61, 2  ;;  %v4952_v47 = vadd.f32 %v14271_v37, %v14083_v46 }
 0x5dc   : > { %v6844_v19 = vadd.f32 %v6757_v54, %v6609_v48  ;;  %v6208_v38 = vsel %vm2024_vm4, %v6206_v33, %v6207_v4  ;;  %v4953_v18 = vadd.f32 %v14271_v37, %v14095_v49  ;;  %v5422_v29 = vrot.slane %v14202_v58, 1 }
 0x5dd   : > { %v5735_v3 = vadd.f32 %v5644_v28, %v5502_v20  ;;  %v6520_v7 = vsel %vm1858_vm3, %v6518_v40, %v6519_v17  ;;  %v6755_v50 = vsel %vm2024_vm4, %v6753_v5, %v6754_v31  ;;  %v14282_v10 = vadd.f32 %v4952_v47, %v16449_v1  ;;  %v14342_v5 = vld [vmem:[%s15662_s7 + $0x3] ss:$0 sm:$0xff] }
 0x5de   : > { %v6898_v4 = vsel %vm2700_vm5, %v6844_v19, 0.0  ;;  %v14285_v16 = vadd.f32 %v4953_v18, %v16450_v55  ;;  %v14289_v46 = vmul.f32 %v14228_v43, %v13933_v57  ;;  %v5167_v49 = vrot.slane %v14142_v6, 5 }
 0x5df   : > { %6899 = vadd.xlane.f32.xlu1 %v6898_v4  ;;  %v5807_v27 = vadd.f32 %v5775_v52, %v5735_v3  ;;  %v14294_v17 = vmul.f32 %v14235_v14, %v13933_v57  ;;  %v14298_v31 = vmul.f32 %v13615_v56, %v14053_v44  ;;  %v5023_v54 = vrot.slane %v14134_v26, 1  ;;  %v14312_v56 = vld [vmem:[%s15662_s7 + $0x4] ss:$0 sm:$0xff] }
 0x5e0   : > { %v6343_v36 = vmul.f32 %v13671_v39, %v14198_v13  ;;  %v5088_v8 = vrot.slane %v14282_v10, 7  ;;  %v5089_v25 = vrot.slane %v14285_v16, 7  ;;  %v5415_v12 = vrot.slane %v14289_v46, 1 }
 0x5e1   : > { %v6055_v42 = vadd.f32 %v5960_v45, %v5807_v27  ;;  %v5648_v52 = vrot.slane %v14294_v17, 2  ;;  %v5857_v41 = vmul.f32 %v14312_v56, %v14163_v11  ;;  %v5655_v61 = vrot.slane %v14206_v35, 2 }
 0x5e2   : > { %v14324_v48 = vsel %vm354_vm0, %v5088_v8, %v5089_v25  ;;  %v5242_v32 = vmul.f32 %v14244_v22, %v13933_v57  ;;  %v5964_v28 = vrot.slane %v14298_v31, 1  ;;  %v14332_v20 = vsel %vm354_vm0, %v5086_v2, %v5167_v49  ;;  %v14354_v2 = vld [vmem:[%s15662_s7 + $0x5] ss:$0 sm:$0xff] }
 0x5e3   : > { %v14300_v51 = vpop.f32.mrb[40].mxu1  ;;  %v6303_v45 = vadd.f32 %v6208_v38, %v6055_v42  ;;  %v5418_v40 = vsel %vm1858_vm3, %v5415_v12, %v5417_v23  ;;  %v5778_v57 = vmul.f32 %v14342_v5, %v14053_v44  ;;  %v5651_v6 = vsel %vm2024_vm4, %v5648_v52, %v5650_v24 }
 0x5e4   : > { %v4884_v34 = vpop.f32.mrb[41].mxu1  ;;  %v5505_v19 = vadd.f32 %v5418_v40, %v5242_v32  ;;  %v5966_v63 = vrot.slane %v5857_v41, 1  ;;  %v6104_v23 = vmul.f32 %v14354_v2, %v14053_v44  ;;  %v14361_v38 = vsel %vm354_vm0, %v5023_v54, %v5085_v0 }
 0x5e5   : > { %v14316_v15 = vpop.f32.mrb[42].mxu1  ;;  %v6373_v47 = vadd.f32 %v6343_v36, %v6303_v45  ;;  %v5024_v59 = vrot.slane %v14282_v10, 1  ;;  %v6105_v24 = vmul.f32 %v14354_v2, %v14163_v11  ;;  %v5168_v18 = vrot.slane %v14285_v16, 5 }
 0x5e6   : > { %v4887_v33 = vpop.f32.mrb[43].mxu1  ;;  %v5738_v3 = vadd.f32 %v5651_v6, %v5505_v19  ;;  %v5967_v4 = vsel %vm1858_vm3, %v5964_v28, %v5966_v63  ;;  %v6212_v1 = vrot.slane %v6104_v23, 2  ;;  %v6422_v26 = vmul.f32 %v13676_v62, %v14178_v21 }
 0x5e7   : > { %v6608_v55 = vadd.f32 %v6520_v7, %v6373_v47  ;;  %v6214_v49 = vrot.slane %v6105_v24, 2  ;;  %v6423_v0 = vmul.f32 %v13676_v62, %v14332_v20  ;;  %v6346_v11 = vmul.f32 %v13671_v39, %v14178_v21 }
 0x5e8   : > { %v5810_v27 = vadd.f32 %v5778_v57, %v5738_v3  ;;  %v6657_v54 = vmul.f32 %v13691_v53, %v14178_v21  ;;  %v6658_v36 = vmul.f32 %v13691_v53, %v14332_v20  ;;  %v6524_v42 = vrot.slane %v6422_v26, 1 }
 0x5e9   : > { %v6843_v34 = vadd.f32 %v6755_v50, %v6608_v55  ;;  %v6215_v7 = vsel %vm2024_vm4, %v6212_v1, %v6214_v49  ;;  %v6526_v41 = vrot.slane %v6423_v0, 1  ;;  %v5314_v62 = vmul.f32 %v14228_v43, %v14070_v9 }
 0x5ea   : > { %v6058_v32 = vadd.f32 %v5967_v4, %v5810_v27  ;;  %v6759_v33 = vrot.slane %v6657_v54, 2  ;;  %v6761_v45 = vrot.slane %v6658_v36, 2  ;;  %v5241_v57 = vmul.f32 %v14244_v22, %v14070_v9  ;;  %v14413_v54 = vld [vmem:[%s15662_s7 + $0x8] ss:$0 sm:$0xff] }
 0x5eb   : > { %v6895_v40 = vsel %vm2700_vm5, %v6843_v34, 0.0  ;;  %v6527_v39 = vsel %vm1858_vm3, %v6524_v42, %v6526_v41  ;;  %v5547_v53 = vmul.f32 %v14235_v14, %v14070_v9  ;;  %v5414_v63 = vrot.slane %v5314_v62, 1  ;;  %v14401_v9 = vld [vmem:[%s15662_s7 + $0x7] ss:$0 sm:$0xff] }
 0x5ec   : > { %6896 = vadd.xlane.f32.xlu0 %v6895_v40  ;;  %v6306_v19 = vadd.f32 %v6215_v7, %v6058_v32  ;;  %v6762_v6 = vsel %vm2024_vm4, %v6759_v33, %v6761_v45  ;;  %v5855_v23 = vmul.f32 %v14312_v56, %v14198_v13  ;;  %v5777_v3 = vmul.f32 %v14342_v5, %v14198_v13 }
 0x5ed   : > { %v5647_v24 = vrot.slane %v5547_v53, 2  ;;  %v6103_v4 = vmul.f32 %v14354_v2, %v14198_v13  ;;  %v6421_v55 = vmul.f32 %v14401_v9, %v14361_v38  ;;  %v5416_v0 = vsel %vm1858_vm3, %v5414_v63, %v5415_v12 }
 0x5ee   : > { %v6376_v26 = vadd.f32 %v6346_v11, %v6306_v19  ;;  %v5963_v27 = vrot.slane %v5855_v23, 1  ;;  %v6656_v36 = vmul.f32 %v14413_v54, %v14361_v38  ;;  %v5504_v7 = vadd.f32 %v5416_v0, %v5241_v57  ;;  %v16451_v0 = vld [vmem:[#allocation99_spill] sm:$0xff] }
 0x5ef   : > { %v14389_v50 = vpop.f32.mrb[44].mxu1  ;;  %v5649_v41 = vsel %vm2024_vm4, %v5647_v24, %v5648_v52  ;;  %v6211_v11 = vrot.slane %v6103_v4, 2  ;;  %v6523_v32 = vrot.slane %v6421_v55, 1  ;;  %v14422_v46 = vmul.f32 %v14228_v43, %v14332_v20 }
 0x5f0   : > { %v4892_v47 = vpop.f32.mrb[45].mxu1  ;;  %v6611_v12 = vadd.f32 %v6527_v39, %v6376_v26  ;;  %v5965_v45 = vsel %vm1858_vm3, %v5963_v27, %v5964_v28  ;;  %v6758_v62 = vrot.slane %v6656_v36, 2  ;;  %v14430_v40 = vsel %vm354_vm0, %v5024_v59, %v5088_v8  ;;  %v14445_v8 = vld [vmem:[%s15662_s7 + $0x6] ss:$0 sm:$0xff] }
 0x5f1   : > { %v14405_v49 = vpop.f32.mrb[46].mxu1  ;;  %v5737_v17 = vadd.f32 %v5649_v41, %v5504_v7  ;;  %v6213_v52 = vsel %vm2024_vm4, %v6211_v11, %v6212_v1  ;;  %v6525_v57 = vsel %vm1858_vm3, %v6523_v32, %v6524_v42  ;;  %v14437_v53 = vsel %vm354_vm0, %v5089_v25, %v5168_v18 }
 0x5f2   : > { %v4895_v34 = vpop.f32.mrb[47].mxu1  ;;  %v6846_v39 = vadd.f32 %v6762_v6, %v6611_v12  ;;  %v6760_v31 = vsel %vm2024_vm4, %v6758_v62, %v6759_v33  ;;  %v5318_v28 = vmul.f32 %v14228_v43, %v14053_v44  ;;  %v6345_v59 = vmul.f32 %v14445_v8, %v14361_v38 }
 0x5f3   : > { %v5809_v10 = vadd.f32 %v5777_v3, %v5737_v17  ;;  %v5551_v16 = vmul.f32 %v14235_v14, %v14053_v44  ;;  %v14453_v25 = vmul.f32 %v14312_v56, %v14178_v21  ;;  %v4954_v1 = vadd.f32 %v14271_v37, %v14189_v30 }
 0x5f4   : > { %v6904_v18 = vsel %vm2700_vm5, %v6846_v39, 0.0  ;;  %v5244_v42 = vmul.f32 %v14244_v22, %v14053_v44  ;;  %v5420_v33 = vrot.slane %v5318_v28, 1  ;;  %v5860_v63 = vmul.f32 %v14312_v56, %v14332_v20 }
 0x5f5   : > { %6905 = vadd.xlane.f32.xlu1 %v6904_v18  ;;  %v6057_v19 = vadd.f32 %v5965_v45, %v5809_v10  ;;  %v5653_v6 = vrot.slane %v5551_v16, 2  ;;  %v5969_v23 = vrot.slane %v14453_v25, 1  ;;  %v5780_v24 = vmul.f32 %v14342_v5, %v14178_v21 }
 0x5f6   : > { %v5423_v47 = vsel %vm1858_vm3, %v5420_v33, %v5422_v29  ;;  %v6107_v30 = vmul.f32 %v14354_v2, %v14178_v21  ;;  %v6108_v44 = vmul.f32 %v14354_v2, %v14332_v20  ;;  %v5971_v26 = vrot.slane %v5860_v63, 1 }
 0x5f7   : > { %v6305_v3 = vadd.f32 %v6213_v52, %v6057_v19  ;;  %v5507_v4 = vadd.f32 %v5423_v47, %v5244_v42  ;;  %v5656_v55 = vsel %vm2024_vm4, %v5653_v6, %v5655_v61  ;;  %v14476_v58 = vadd.f32 %v4954_v1, %v16451_v0 }
 0x5f8   : > { %v6217_v29 = vrot.slane %v6107_v30, 2  ;;  %v6219_v27 = vrot.slane %v6108_v44, 2  ;;  %v6425_v36 = vmul.f32 %v14401_v9, %v14324_v48  ;;  %v5972_v41 = vsel %vm1858_vm3, %v5969_v23, %v5971_v26 }
 0x5f9   : > { %v6375_v34 = vadd.f32 %v6345_v59, %v6305_v3  ;;  %v5740_v7 = vadd.f32 %v5656_v55, %v5507_v4  ;;  %v6426_v11 = vmul.f32 %v14401_v9, %v14437_v53  ;;  %v6660_v61 = vmul.f32 %v14413_v54, %v14324_v48 }
 0x5fa   : > { %v6220_v35 = vsel %vm2024_vm4, %v6217_v29, %v6219_v27  ;;  %v6529_v32 = vrot.slane %v6425_v36, 1  ;;  %v6661_v12 = vmul.f32 %v14413_v54, %v14437_v53  ;;  %v6348_v17 = vmul.f32 %v14445_v8, %v14324_v48 }
 0x5fb   : > { %v6610_v45 = vadd.f32 %v6525_v57, %v6375_v34  ;;  %v5812_v62 = vadd.f32 %v5780_v24, %v5740_v7  ;;  %v6531_v52 = vrot.slane %v6426_v11, 1  ;;  %v6764_v28 = vrot.slane %v6660_v61, 2 }
 0x5fc   : > { %v6766_v10 = vrot.slane %v6661_v12, 2  ;;  %v5317_v59 = vmul.f32 %v14228_v43, %v14198_v13  ;;  %v5550_v16 = vmul.f32 %v14235_v14, %v14198_v13  ;;  %v5243_v42 = vmul.f32 %v14244_v22, %v14198_v13 }
 0x5fd   : > { %v6845_v18 = vadd.f32 %v6760_v31, %v6610_v45  ;;  %v6060_v1 = vadd.f32 %v5972_v41, %v5812_v62  ;;  %v6532_v57 = vsel %vm1858_vm3, %v6529_v32, %v6531_v52  ;;  %v5858_v30 = vmul.f32 %v14312_v56, %v14361_v38 }
 0x5fe   : > { %v6767_v63 = vsel %vm2024_vm4, %v6764_v28, %v6766_v10  ;;  %v5419_v47 = vrot.slane %v5317_v59, 1  ;;  %v5652_v24 = vrot.slane %v5550_v16, 2  ;;  %v5779_v31 = vmul.f32 %v14342_v5, %v14361_v38  ;;  %v16452_v10 = vld [vmem:[#allocation82_spill] sm:$0xff] }
 0x5ff   : > { %v14490_v39 = vpop.f32.mrb[48].mxu1  ;;  %v6901_v3 = vsel %vm2700_vm5, %v6845_v18, 0.0  ;;  %v6308_v4 = vadd.f32 %v6220_v35, %v6060_v1  ;;  %v6106_v55 = vmul.f32 %v14354_v2, %v14361_v38  ;;  %v5968_v0 = vrot.slane %v5858_v30, 1 }
 0x600   : > { %v4900_v25 = vpop.f32.mrb[49].mxu1  ;;  %6902 = vadd.xlane.f32.xlu0 %v6901_v3  ;;  %v5421_v13 = vsel %vm1858_vm3, %v5419_v47, %v5420_v33  ;;  %v5654_v26 = vsel %vm2024_vm4, %v5652_v24, %v5653_v6  ;;  %v6424_v27 = vmul.f32 %v14401_v9, %v14430_v40  ;;  %v6659_v41 = vmul.f32 %v14413_v54, %v14430_v40 }
 0x601   : > { %v14499_v19 = vpop.f32.mrb[50].mxu1  ;;  %v6378_v36 = vadd.f32 %v6348_v17, %v6308_v4  ;;  %v5506_v34 = vadd.f32 %v5421_v13, %v5243_v42  ;;  %v6216_v7 = vrot.slane %v6106_v55, 2  ;;  %v5970_v11 = vsel %vm1858_vm3, %v5968_v0, %v5969_v23  ;;  %v16454_v42 = vld [vmem:[#allocation29_spill] sm:$0xff] }
 0x602   : > { %v4903_v44 = vpop.f32.mrb[51].mxu1  ;;  %v6528_v35 = vrot.slane %v6424_v27, 1  ;;  %v4955_v61 = vadd.f32 %v14271_v37, %v14211_v60  ;;  %v4956_v33 = vadd.f32 %v14271_v37, %v14300_v51  ;;  %v6763_v62 = vrot.slane %v6659_v41, 2  ;;  %v16453_v51 = vld [vmem:[#allocation25_spill] sm:$0xff] }
 0x603   : > { %v6613_v6 = vadd.f32 %v6532_v57, %v6378_v36  ;;  %v5739_v12 = vadd.f32 %v5654_v26, %v5506_v34  ;;  %v6218_v45 = vsel %vm2024_vm4, %v6216_v7, %v6217_v29  ;;  %v5555_v17 = vmul.f32 %v14235_v14, %v14332_v20 }
 0x604   : > { %v6530_v52 = vsel %vm1858_vm3, %v6528_v35, %v6529_v32  ;;  %v4987_v59 = vadd.f32 %v4955_v61, %v16452_v10  ;;  %v4957_v23 = vadd.f32 %v14271_v37, %v14316_v15  ;;  %v6765_v25 = vsel %vm2024_vm4, %v6763_v62, %v6764_v28 }
 0x605   : > { %v6848_v16 = vadd.f32 %v6767_v63, %v6613_v6  ;;  %v5811_v60 = vadd.f32 %v5779_v31, %v5739_v12  ;;  %v14529_v18 = vadd.f32 %v4956_v33, %v16453_v51  ;;  %v5091_v29 = vrot.slane %v14476_v58, 7 }
 0x606   : > { %v6347_v1 = vmul.f32 %v14445_v8, %v14430_v40  ;;  %v5092_v20 = vrot.slane %v4987_v59, 7  ;;  %v14536_v47 = vadd.f32 %v4957_v23, %v16454_v42  ;;  %v14540_v15 = vmul.f32 %v14228_v43, %v14178_v21 }
 0x607   : > { %v6910_v32 = vsel %vm2700_vm5, %v6848_v16, 0.0  ;;  %v6059_v57 = vadd.f32 %v5970_v11, %v5811_v60  ;;  %v5427_v63 = vrot.slane %v14422_v46, 1  ;;  %v5660_v24 = vrot.slane %v5555_v17, 2 }
 0x608   : > { %6911 = vadd.xlane.f32.xlu1 %v6910_v32  ;;  %v14546_v30 = vsel %vm354_vm0, %v5091_v29, %v5092_v20  ;;  %v14550_v44 = vmul.f32 %v14235_v14, %v14178_v21  ;;  %v5169_v31 = vrot.slane %v4987_v59, 5  ;;  %v5094_v55 = vrot.slane %v14529_v18, 7 }
 0x609   : > { %v6307_v4 = vadd.f32 %v6218_v45, %v6059_v57  ;;  %v5095_v13 = vrot.slane %v14536_v47, 7  ;;  %v5425_v46 = vrot.slane %v14540_v15, 1  ;;  %v14560_v36 = vmul.f32 %v14228_v43, %v14437_v53 }
 0x60a   : > { %v5658_v0 = vrot.slane %v14550_v44, 2  ;;  %v5246_v41 = vmul.f32 %v14244_v22, %v14178_v21  ;;  %v5025_v11 = vrot.slane %v14476_v58, 1  ;;  %v5862_v33 = vmul.f32 %v14312_v56, %v14324_v48 }
 0x60b   : > { %v14542_v28 = vpop.f32.mrb[52].mxu1  ;;  %v6377_v34 = vadd.f32 %v6347_v1, %v6307_v4  ;;  %v14567_v7 = vsel %vm354_vm0, %v5094_v55, %v5095_v13  ;;  %v5428_v35 = vsel %vm1858_vm3, %v5425_v46, %v5427_v63  ;;  %v14577_v12 = vsel %vm354_vm0, %v5092_v20, %v5169_v31 }
 0x60c   : > { %v4908_v3 = vpop.f32.mrb[53].mxu1  ;;  %v5661_v61 = vsel %vm2024_vm4, %v5658_v0, %v5660_v24  ;;  %v5509_v45 = vadd.f32 %v5428_v35, %v5246_v41  ;;  %v5782_v62 = vmul.f32 %v14342_v5, %v14324_v48  ;;  %v5863_v21 = vmul.f32 %v14312_v56, %v14437_v53 }
 0x60d   : > { %v14554_v26 = vpop.f32.mrb[54].mxu1  ;;  %v6612_v6 = vadd.f32 %v6530_v52, %v6377_v34  ;;  %v5974_v17 = vrot.slane %v5862_v33, 1  ;;  %v6110_v58 = vmul.f32 %v14354_v2, %v14324_v48  ;;  %v6111_v10 = vmul.f32 %v14354_v2, %v14437_v53 }
 0x60e   : > { %v4911_v27 = vpop.f32.mrb[55].mxu1  ;;  %v5432_v59 = vrot.slane %v14560_v36, 1  ;;  %v14590_v52 = vmul.f32 %v14235_v14, %v14437_v53  ;;  %v5742_v16 = vadd.f32 %v5661_v61, %v5509_v45  ;;  %v14595_v51 = vsel %vm354_vm0, %v5025_v11, %v5091_v29 }
 0x60f   : > { %v6847_v23 = vadd.f32 %v6765_v25, %v6612_v6  ;;  %v5976_v1 = vrot.slane %v5863_v21, 1  ;;  %v6222_v20 = vrot.slane %v6110_v58, 2  ;;  %v6224_v32 = vrot.slane %v6111_v10, 2 }
 0x610   : > { %v5814_v15 = vadd.f32 %v5782_v62, %v5742_v16  ;;  %v6428_v63 = vmul.f32 %v14401_v9, %v14546_v30  ;;  %v6429_v53 = vmul.f32 %v14401_v9, %v14577_v12  ;;  %v6663_v44 = vmul.f32 %v14413_v54, %v14546_v30 }
 0x611   : > { %v6907_v42 = vsel %vm2700_vm5, %v6847_v23, 0.0  ;;  %v5977_v24 = vsel %vm1858_vm3, %v5974_v17, %v5976_v1  ;;  %v6225_v29 = vsel %vm2024_vm4, %v6222_v20, %v6224_v32  ;;  %v6664_v3 = vmul.f32 %v14413_v54, %v14577_v12 }
 0x612   : > { %6908 = vadd.xlane.f32.xlu0 %v6907_v42  ;;  %v6062_v31 = vadd.f32 %v5977_v24, %v5814_v15  ;;  %v6350_v27 = vmul.f32 %v14445_v8, %v14546_v30  ;;  %v6534_v34 = vrot.slane %v6428_v63, 1  ;;  %v6536_v41 = vrot.slane %v6429_v53, 1 }
 0x613   : > { %v14592_v60 = vpop.f32.mrb[56].mxu1  ;;  %v6769_v11 = vrot.slane %v6663_v44, 2  ;;  %v6771_v35 = vrot.slane %v6664_v3, 2  ;;  %v5320_v61 = vmul.f32 %v14228_v43, %v14361_v38  ;;  %v5553_v33 = vmul.f32 %v14235_v14, %v14361_v38 }
 0x614   : > { %v4916_v57 = vpop.f32.mrb[57].mxu1  ;;  %v6310_v6 = vadd.f32 %v6225_v29, %v6062_v31  ;;  %v6537_v45 = vsel %vm1858_vm3, %v6534_v34, %v6536_v41  ;;  %v5245_v62 = vmul.f32 %v14244_v22, %v14361_v38  ;;  %v5861_v21 = vmul.f32 %v14312_v56, %v14430_v40 }
 0x615   : > { %v14602_v25 = vpop.f32.mrb[58].mxu1  ;;  %v6772_v58 = vsel %vm2024_vm4, %v6769_v11, %v6771_v35  ;;  %v5424_v10 = vrot.slane %v5320_v61, 1  ;;  %v5657_v23 = vrot.slane %v5553_v33, 2  ;;  %v6109_v16 = vmul.f32 %v14354_v2, %v14430_v40 }
 0x616   : > { %v4919_v4 = vpop.f32.mrb[59].mxu1  ;;  %v6380_v1 = vadd.f32 %v6350_v27, %v6310_v6  ;;  %v5781_v32 = vmul.f32 %v14342_v5, %v14430_v40  ;;  %v5973_v57 = vrot.slane %v5861_v21, 1  ;;  %v6427_v42 = vmul.f32 %v14401_v9, %v14595_v51  ;;  %v16456_v21 = vld [vmem:[#allocation90_spill] sm:$0xff] }
 0x617   : > { %v5426_v38 = vsel %vm1858_vm3, %v5424_v10, %v5425_v46  ;;  %v5659_v15 = vsel %vm2024_vm4, %v5657_v23, %v5658_v0  ;;  %v6221_v63 = vrot.slane %v6109_v16, 2  ;;  %v6662_v53 = vmul.f32 %v14413_v54, %v14595_v51 }
 0x618   : > { %v6615_v24 = vadd.f32 %v6537_v45, %v6380_v1  ;;  %v5508_v29 = vadd.f32 %v5426_v38, %v5245_v62  ;;  %v5975_v44 = vsel %vm1858_vm3, %v5973_v57, %v5974_v17  ;;  %v6533_v3 = vrot.slane %v6427_v42, 1  ;;  %v16455_v62 = vld [vmem:[#allocation33_spill] sm:$0xff] }
 0x619   : > { %v6223_v31 = vsel %vm2024_vm4, %v6221_v63, %v6222_v20  ;;  %v6768_v27 = vrot.slane %v6662_v53, 2  ;;  %v4958_v41 = vadd.f32 %v14271_v37, %v14389_v50  ;;  %v4959_v46 = vadd.f32 %v14271_v37, %v14405_v49 }
 0x61a   : > { %v5665_v35 = vrot.slane %v14590_v52, 2  ;;  %v6850_v61 = vadd.f32 %v6772_v58, %v6615_v24  ;;  %v5741_v33 = vadd.f32 %v5659_v15, %v5508_v29  ;;  %v6535_v6 = vsel %vm1858_vm3, %v6533_v3, %v6534_v34 }
 0x61b   : > { %v6770_v45 = vsel %vm2024_vm4, %v6768_v27, %v6769_v11  ;;  %v14646_v20 = vadd.f32 %v4958_v41, %v16455_v62  ;;  %v14649_v10 = vadd.f32 %v4959_v46, %v16456_v21  ;;  %v14653_v50 = vmul.f32 %v14228_v43, %v14324_v48 }
 0x61c   : > { %v5170_v52 = vrot.slane %v14536_v47, 5  ;;  %v6916_v58 = vsel %vm2700_vm5, %v6850_v61, 0.0  ;;  %v5813_v34 = vadd.f32 %v5781_v32, %v5741_v33  ;;  %v14659_v23 = vmul.f32 %v14235_v14, %v14324_v48 }
 0x61d   : > { %v14633_v4 = vpop.f32.mrb[60].mxu1  ;;  %v5026_v11 = vrot.slane %v14529_v18, 1  ;;  %6917 = vadd.xlane.f32.xlu1 %v6916_v58  ;;  %v6349_v16 = vmul.f32 %v14445_v8, %v14595_v51  ;;  %v5097_v1 = vrot.slane %v14646_v20, 7  ;;  %v5098_v57 = vrot.slane %v14649_v10, 7 }
 0x61e   : > { %v4924_v0 = vpop.f32.mrb[61].mxu1  ;;  %v6061_v42 = vadd.f32 %v5975_v44, %v5813_v34  ;;  %v5430_v38 = vrot.slane %v14653_v50, 1  ;;  %v5663_v15 = vrot.slane %v14659_v23, 2  ;;  %v5865_v32 = vmul.f32 %v14312_v56, %v14546_v30 }
 0x61f   : > { %v14642_v17 = vpop.f32.mrb[62].mxu1  ;;  %v14675_v63 = vsel %vm354_vm0, %v5097_v1, %v5098_v57  ;;  %v5248_v53 = vmul.f32 %v14244_v22, %v14324_v48  ;;  %v5866_v24 = vmul.f32 %v14312_v56, %v14577_v12  ;;  %v14684_v29 = vsel %vm354_vm0, %v5095_v13, %v5170_v52 }
 0x620   : > { %v4927_v49 = vpop.f32.mrb[63].mxu1  ;;  %v6309_v44 = vadd.f32 %v6223_v31, %v6061_v42  ;;  %v5433_v3 = vsel %vm1858_vm3, %v5430_v38, %v5432_v59  ;;  %v5784_v27 = vmul.f32 %v14342_v5, %v14546_v30  ;;  %v5666_v46 = vsel %vm2024_vm4, %v5663_v15, %v5665_v35 }
 0x621   : > { %v5511_v41 = vadd.f32 %v5433_v3, %v5248_v53  ;;  %v5979_v48 = vrot.slane %v5865_v32, 1  ;;  %v5981_v0 = vrot.slane %v5866_v24, 1  ;;  %v14694_v61 = vmul.f32 %v14228_v43, %v14577_v12 }
 0x622   : > { %v14699_v47 = vsel %vm354_vm0, %v5026_v11, %v5094_v55  ;;  %v6379_v13 = vadd.f32 %v6349_v16, %v6309_v44  ;;  %v6113_v36 = vmul.f32 %v14354_v2, %v14546_v30  ;;  %v14705_v59 = vmul.f32 %v14235_v14, %v14577_v12 }
 0x623   : > { %v5744_v31 = vadd.f32 %v5666_v46, %v5511_v41  ;;  %v5982_v35 = vsel %vm1858_vm3, %v5979_v48, %v5981_v0  ;;  %v6114_v33 = vmul.f32 %v14354_v2, %v14577_v12  ;;  %v6431_v18 = vmul.f32 %v14401_v9, %v14567_v7 }
 0x624   : > { %v6614_v62 = vadd.f32 %v6535_v6, %v6379_v13  ;;  %v6227_v21 = vrot.slane %v6113_v36, 2  ;;  %v6432_v55 = vmul.f32 %v14401_v9, %v14684_v29  ;;  %v6666_v52 = vmul.f32 %v14413_v54, %v14567_v7 }
 0x625   : > { %v5816_v50 = vadd.f32 %v5784_v27, %v5744_v31  ;;  %v6229_v49 = vrot.slane %v6114_v33, 2  ;;  %v6667_v58 = vmul.f32 %v14413_v54, %v14684_v29  ;;  %v6352_v12 = vmul.f32 %v14445_v8, %v14567_v7 }
 0x626   : > { %v6849_v34 = vadd.f32 %v6770_v45, %v6614_v62  ;;  %v6539_v6 = vrot.slane %v6431_v18, 1  ;;  %v6541_v23 = vrot.slane %v6432_v55, 1  ;;  %v6774_v42 = vrot.slane %v6666_v52, 2 }
 0x627   : > { %v6064_v11 = vadd.f32 %v5982_v35, %v5816_v50  ;;  %v6230_v16 = vsel %vm2024_vm4, %v6227_v21, %v6229_v49  ;;  %v6776_v32 = vrot.slane %v6667_v58, 2  ;;  %v5323_v44 = vmul.f32 %v14228_v43, %v14430_v40 }
 0x628   : > { %v6913_v53 = vsel %vm2700_vm5, %v6849_v34, 0.0  ;;  %v6542_v24 = vsel %vm1858_vm3, %v6539_v6, %v6541_v23  ;;  %v5556_v45 = vmul.f32 %v14235_v14, %v14430_v40  ;;  %v5247_v41 = vmul.f32 %v14244_v22, %v14430_v40 }
 0x629   : > { %6914 = vadd.xlane.f32.xlu0 %v6913_v53  ;;  %v6312_v3 = vadd.f32 %v6230_v16, %v6064_v11  ;;  %v6777_v27 = vsel %vm2024_vm4, %v6774_v42, %v6776_v32  ;;  %v5864_v46 = vmul.f32 %v14312_v56, %v14595_v51  ;;  %v5429_v0 = vrot.slane %v5323_v44, 1  ;;  %v16457_v16 = vld [vmem:[#allocation78_spill] sm:$0xff] }
 0x62a   : > { %v5662_v13 = vrot.slane %v5556_v45, 2  ;;  %v5783_v36 = vmul.f32 %v14342_v5, %v14595_v51  ;;  %v6112_v31 = vmul.f32 %v14354_v2, %v14595_v51  ;;  %v6430_v62 = vmul.f32 %v14401_v9, %v14699_v47 }
 0x62b   : > { %v6382_v35 = vadd.f32 %v6352_v12, %v6312_v3  ;;  %v5978_v33 = vrot.slane %v5864_v46, 1  ;;  %v6665_v18 = vmul.f32 %v14413_v54, %v14699_v47  ;;  %v5431_v40 = vsel %vm1858_vm3, %v5429_v0, %v5430_v38 }
 0x62c   : > { %v5664_v55 = vsel %vm2024_vm4, %v5662_v13, %v5663_v15  ;;  %v6226_v50 = vrot.slane %v6112_v31, 2  ;;  %v4960_v49 = vadd.f32 %v14271_v37, %v14490_v39  ;;  %v5510_v58 = vadd.f32 %v5431_v40, %v5247_v41 }
 0x62d   : > { %v6617_v52 = vadd.f32 %v6542_v24, %v6382_v35  ;;  %v5980_v34 = vsel %vm1858_vm3, %v5978_v33, %v5979_v48  ;;  %v6538_v12 = vrot.slane %v6430_v62, 1  ;;  %v6773_v11 = vrot.slane %v6665_v18, 2 }
 0x62e   : > { %v6228_v23 = vsel %vm2024_vm4, %v6226_v50, %v6227_v21  ;;  %v14747_v32 = vadd.f32 %v4960_v49, %v16457_v16  ;;  %v4961_v38 = vadd.f32 %v14271_v37, %v14499_v19  ;;  %v5437_v15 = vrot.slane %v14694_v61, 1  ;;  %v16458_v21 = vld [vmem:[#allocation97_spill] sm:$0xff] }
 0x62f   : > { %v6852_v53 = vadd.f32 %v6777_v27, %v6617_v52  ;;  %v5743_v44 = vadd.f32 %v5664_v55, %v5510_v58  ;;  %v6540_v39 = vsel %vm1858_vm3, %v6538_v12, %v6539_v6  ;;  %v5670_v24 = vrot.slane %v14705_v59, 2 }
 0x630   : > { %v5171_v48 = vrot.slane %v14649_v10, 5  ;;  %v6775_v45 = vsel %vm2024_vm4, %v6773_v11, %v6774_v42  ;;  %v14757_v3 = vadd.f32 %v4961_v38, %v16458_v21  ;;  %v5327_v19 = vmul.f32 %v14228_v43, %v14546_v30 }
 0x631   : > { %v6922_v41 = vsel %vm2700_vm5, %v6852_v53, 0.0  ;;  %v5815_v46 = vadd.f32 %v5783_v36, %v5743_v44  ;;  %v14764_v61 = vmul.f32 %v14235_v14, %v14546_v30  ;;  %v5027_v6 = vrot.slane %v14646_v20, 1 }
 0x632   : > { %6923 = vadd.xlane.f32.xlu1 %v6922_v41  ;;  %v6351_v59 = vmul.f32 %v14445_v8, %v14699_v47  ;;  %v5100_v42 = vrot.slane %v14747_v32, 7  ;;  %v5101_v27 = vrot.slane %v14757_v3, 7  ;;  %v5435_v13 = vrot.slane %v5327_v19, 1 }
 0x633   : > { %v6063_v0 = vadd.f32 %v5980_v34, %v5815_v46  ;;  %v5668_v36 = vrot.slane %v14764_v61, 2  ;;  %v5868_v31 = vmul.f32 %v14312_v56, %v14567_v7  ;;  %v5250_v33 = vmul.f32 %v14244_v22, %v14546_v30 }
 0x634   : > { %v14779_v35 = vsel %vm354_vm0, %v5100_v42, %v5101_v27  ;;  %v5869_v62 = vmul.f32 %v14312_v56, %v14684_v29  ;;  %v6116_v18 = vmul.f32 %v14354_v2, %v14567_v7  ;;  %v14790_v40 = vsel %vm354_vm0, %v5098_v57, %v5171_v48 }
 0x635   : > { %v6311_v55 = vadd.f32 %v6228_v23, %v6063_v0  ;;  %v5438_v50 = vsel %vm1858_vm3, %v5435_v13, %v5437_v15  ;;  %v5786_v49 = vmul.f32 %v14342_v5, %v14567_v7  ;;  %v5671_v30 = vsel %vm2024_vm4, %v5668_v36, %v5670_v24 }
 0x636   : > { %v5513_v52 = vadd.f32 %v5438_v50, %v5250_v33  ;;  %v5984_v58 = vrot.slane %v5868_v31, 1  ;;  %v5986_v34 = vrot.slane %v5869_v62, 1  ;;  %v6117_v11 = vmul.f32 %v14354_v2, %v14684_v29 }
 0x637   : > { %v6381_v12 = vadd.f32 %v6351_v59, %v6311_v55  ;;  %v14801_v10 = vsel %vm354_vm0, %v5027_v6, %v5097_v1  ;;  %v6232_v16 = vrot.slane %v6116_v18, 2  ;;  %v6434_v53 = vmul.f32 %v14401_v9, %v14675_v63 }
 0x638   : > { %v5746_v57 = vadd.f32 %v5671_v30, %v5513_v52  ;;  %v5987_v23 = vsel %vm1858_vm3, %v5984_v58, %v5986_v34  ;;  %v6234_v15 = vrot.slane %v6117_v11, 2  ;;  %v6435_v44 = vmul.f32 %v14401_v9, %v14790_v40 }
 0x639   : > { %v6616_v38 = vadd.f32 %v6540_v39, %v6381_v12  ;;  %v6354_v48 = vmul.f32 %v14445_v8, %v14675_v63  ;;  %v6669_v20 = vmul.f32 %v14413_v54, %v14675_v63  ;;  %v6670_v1 = vmul.f32 %v14413_v54, %v14790_v40 }
 0x63a   : > { %v5818_v24 = vadd.f32 %v5786_v49, %v5746_v57  ;;  %v6235_v39 = vsel %vm2024_vm4, %v6232_v16, %v6234_v15  ;;  %v6544_v41 = vrot.slane %v6434_v53, 1  ;;  %v6546_v46 = vrot.slane %v6435_v44, 1 }
 0x63b   : > { %v6851_v21 = vadd.f32 %v6775_v45, %v6616_v38  ;;  %v6779_v61 = vrot.slane %v6669_v20, 2  ;;  %v6781_v6 = vrot.slane %v6670_v1, 2  ;;  %v5326_v59 = vmul.f32 %v14228_v43, %v14595_v51 }
 0x63c   : > { %v6066_v19 = vadd.f32 %v5987_v23, %v5818_v24  ;;  %v6547_v31 = vsel %vm1858_vm3, %v6544_v41, %v6546_v46  ;;  %v5249_v33 = vmul.f32 %v14244_v22, %v14595_v51  ;;  %v5559_v45 = vmul.f32 %v14235_v14, %v14595_v51 }
 0x63d   : > { %v6919_v0 = vsel %vm2700_vm5, %v6851_v21, 0.0  ;;  %v6782_v18 = vsel %vm2024_vm4, %v6779_v61, %v6781_v6  ;;  %v5434_v55 = vrot.slane %v5326_v59, 1  ;;  %v5867_v50 = vmul.f32 %v14312_v56, %v14699_v47  ;;  %v16459_v6 = vld [vmem:[#allocation70_spill] sm:$0xff] }
 0x63e   : > { %6920 = vadd.xlane.f32.xlu0 %v6919_v0  ;;  %v6314_v62 = vadd.f32 %v6235_v39, %v6066_v19  ;;  %v5667_v49 = vrot.slane %v5559_v45, 2  ;;  %v5785_v52 = vmul.f32 %v14342_v5, %v14699_v47  ;;  %v6115_v30 = vmul.f32 %v14354_v2, %v14699_v47  ;;  %v16460_v0 = vld [vmem:[#allocation92_spill] sm:$0xff] }
 0x63f   : > { %v6433_v34 = vmul.f32 %v14401_v9, %v14801_v10  ;;  %v5436_v51 = vsel %vm1858_vm3, %v5434_v55, %v5435_v13  ;;  %v5983_v11 = vrot.slane %v5867_v50, 1  ;;  %v6668_v57 = vmul.f32 %v14413_v54, %v14801_v10 }
 0x640   : > { %v6384_v12 = vadd.f32 %v6354_v48, %v6314_v62  ;;  %v5512_v23 = vadd.f32 %v5436_v51, %v5249_v33  ;;  %v5669_v38 = vsel %vm2024_vm4, %v5667_v49, %v5668_v36  ;;  %v6231_v15 = vrot.slane %v6115_v30, 2 }
 0x641   : > { %v6543_v53 = vrot.slane %v6433_v34, 1  ;;  %v5985_v24 = vsel %vm1858_vm3, %v5983_v11, %v5984_v58  ;;  %v6778_v20 = vrot.slane %v6668_v57, 2  ;;  %v4962_v1 = vadd.f32 %v14271_v37, %v14542_v28 }
 0x642   : > { %v6619_v44 = vadd.f32 %v6547_v31, %v6384_v12  ;;  %v5745_v21 = vadd.f32 %v5669_v38, %v5512_v23  ;;  %v6233_v48 = vsel %vm2024_vm4, %v6231_v15, %v6232_v16  ;;  %v4963_v39 = vadd.f32 %v14271_v37, %v14554_v26 }
 0x643   : > { %v6545_v13 = vsel %vm1858_vm3, %v6543_v53, %v6544_v41  ;;  %v5331_v36 = vmul.f32 %v14228_v43, %v14684_v29  ;;  %v6780_v19 = vsel %vm2024_vm4, %v6778_v20, %v6779_v61  ;;  %v14847_v58 = vadd.f32 %v4962_v1, %v16459_v6 }
 0x644   : > { %v6854_v46 = vadd.f32 %v6782_v18, %v6619_v44  ;;  %v5817_v59 = vadd.f32 %v5785_v52, %v5745_v21  ;;  %v14850_v28 = vadd.f32 %v4963_v39, %v16460_v0  ;;  %v5564_v16 = vmul.f32 %v14235_v14, %v14684_v29 }
 0x645   : > { %v6353_v26 = vmul.f32 %v14445_v8, %v14801_v10  ;;  %v5103_v31 = vrot.slane %v14847_v58, 7  ;;  %v5442_v33 = vrot.slane %v5331_v36, 1  ;;  %v5028_v45 = vrot.slane %v14747_v32, 1 }
 0x646   : > { %v6928_v41 = vsel %vm2700_vm5, %v6854_v46, 0.0  ;;  %v6065_v37 = vadd.f32 %v5985_v24, %v5817_v59  ;;  %v5104_v61 = vrot.slane %v14850_v28, 7  ;;  %v5172_v62 = vrot.slane %v14757_v3, 5  ;;  %v14900_v24 = vpop.permute.xlu0 %7037 }
 0x647   : > { %6929 = vadd.xlane.f32.xlu1 %v6928_v41  ;;  %v5330_v18 = vmul.f32 %v14228_v43, %v14567_v7  ;;  %v5675_v50 = vrot.slane %v5564_v16, 2  ;;  %v5252_v30 = vmul.f32 %v14244_v22, %v14567_v7  ;;  %v5563_v34 = vmul.f32 %v14235_v14, %v14567_v7 }
 0x648   : > { %v6313_v29 = vadd.f32 %v6233_v48, %v6065_v37  ;;  %v14868_v55 = vsel %vm354_vm0, %v5103_v31, %v5104_v61  ;;  %v5871_v43 = vmul.f32 %v14312_v56, %v14675_v63  ;;  %v14879_v12 = vsel %vm354_vm0, %v5028_v45, %v5100_v42  ;;  %v14915_v37 = vld [vmem:[%s15662_s7 + $0x1] ss:$0 sm:$0xff] }
 0x649   : > { %v5440_v49 = vrot.slane %v5330_v18, 1  ;;  %v14884_v51 = vsel %vm354_vm0, %v5101_v27, %v5172_v62  ;;  %v5872_v22 = vmul.f32 %v14312_v56, %v14790_v40  ;;  %v5673_v7 = vrot.slane %v5563_v34, 2 }
 0x64a   : > { %v6383_v52 = vadd.f32 %v6353_v26, %v6313_v29  ;;  %v5989_v23 = vrot.slane %v5871_v43, 1  ;;  %v5788_v32 = vmul.f32 %v14342_v5, %v14675_v63  ;;  %v6119_v42 = vmul.f32 %v14354_v2, %v14675_v63  ;;  %v14929_v29 = vld [vmem:[%s15662_s7] ss:$0 sm:$0xff] }
 0x64b   : > { %v5443_v11 = vsel %vm1858_vm3, %v5440_v49, %v5442_v33  ;;  %v5991_v38 = vrot.slane %v5872_v22, 1  ;;  %v6120_v3 = vmul.f32 %v14354_v2, %v14790_v40  ;;  %v5676_v15 = vsel %vm2024_vm4, %v5673_v7, %v5675_v50  ;;  %v14922_v33 = vld [vmem:[%s15662_s7 + $0x2] ss:$0 sm:$0xff]  ;;  %v14939_v22 = vpop.permute.xlu0 %7052 }
 0x64c   : > { %v6618_v57 = vadd.f32 %v6545_v13, %v6383_v52  ;;  %v5515_v14 = vadd.f32 %v5443_v11, %v5252_v30  ;;  %v6437_v53 = vmul.f32 %v14401_v9, %v14779_v35  ;;  %v6438_v44 = vmul.f32 %v14401_v9, %v14884_v51 }
 0x64d   : > { %v5992_v1 = vsel %vm1858_vm3, %v5989_v23, %v5991_v38  ;;  %v6237_v21 = vrot.slane %v6119_v42, 2  ;;  %v6239_v48 = vrot.slane %v6120_v3, 2  ;;  %v6672_v46 = vmul.f32 %v14413_v54, %v14779_v35  ;;  %v14944_v38 = vpop.permute.xlu1 %7041 }
 0x64e   : > { %v6853_v27 = vadd.f32 %v6780_v19, %v6618_v57  ;;  %v5748_v20 = vadd.f32 %v5676_v15, %v5515_v14  ;;  %v6549_v39 = vrot.slane %v6437_v53, 1  ;;  %v6551_v36 = vrot.slane %v6438_v44, 1 }
 0x64f   : > { %v6240_v6 = vsel %vm2024_vm4, %v6237_v21, %v6239_v48  ;;  %v6356_v59 = vmul.f32 %v14445_v8, %v14779_v35  ;;  %v6673_v0 = vmul.f32 %v14413_v54, %v14884_v51  ;;  %v6784_v41 = vrot.slane %v6672_v46, 2 }
 0x650   : > { %v6925_v13 = vsel %vm2700_vm5, %v6853_v27, 0.0  ;;  %v5820_v19 = vadd.f32 %v5788_v32, %v5748_v20  ;;  %v6552_v16 = vsel %vm1858_vm3, %v6549_v39, %v6551_v36  ;;  %v5329_v26 = vmul.f32 %v14915_v37, %v14699_v47  ;;  %v16461_v36 = vld [vmem:[#allocation94_spill] sm:$0xff] }
 0x651   : > { %6926 = vadd.xlane.f32.xlu0 %v6925_v13  ;;  %v5562_v45 = vmul.f32 %v14922_v33, %v14699_v47  ;;  %v6786_v18 = vrot.slane %v6673_v0, 2  ;;  %v5251_v50 = vmul.f32 %v14929_v29, %v14699_v47  ;;  %v5870_v52 = vmul.f32 %v14312_v56, %v14801_v10  ;;  %v14981_v0 = vpop.permute.xlu1 %7048 }
 0x652   : > { %v6068_v62 = vadd.f32 %v5992_v1, %v5820_v19  ;;  %v5439_v30 = vrot.slane %v5329_v26, 1  ;;  %v5787_v43 = vmul.f32 %v14342_v5, %v14801_v10  ;;  %v6118_v11 = vmul.f32 %v14354_v2, %v14801_v10 }
 0x653   : > { %v5672_v34 = vrot.slane %v5562_v45, 2  ;;  %v6787_v14 = vsel %vm2024_vm4, %v6784_v41, %v6786_v18  ;;  %v5988_v32 = vrot.slane %v5870_v52, 1  ;;  %v6436_v47 = vmul.f32 %v14401_v9, %v14879_v12 }
 0x654   : > { %v6316_v57 = vadd.f32 %v6240_v6, %v6068_v62  ;;  %v5441_v56 = vsel %vm1858_vm3, %v5439_v30, %v5440_v49  ;;  %v6236_v3 = vrot.slane %v6118_v11, 2  ;;  %v6671_v5 = vmul.f32 %v14413_v54, %v14879_v12  ;;  %v14956_v49 = vld [vmem:[%s15661_s6] ss:$0 sm:$0xff]  ;;  %v14971_v6 = vpop.permute.xlu0 %7129 }
 0x655   : > { %v5674_v42 = vsel %vm2024_vm4, %v5672_v34, %v5673_v7  ;;  %v5514_v27 = vadd.f32 %v5441_v56, %v5251_v50  ;;  %v5990_v15 = vsel %vm1858_vm3, %v5988_v32, %v5989_v23  ;;  %v6548_v53 = vrot.slane %v6436_v47, 1  ;;  %16462 = vst [vmem:[#allocation18_spill] sm:$0xff] %v14971_v6 }
 0x656   : > { %v6386_v2 = vadd.f32 %v6356_v59, %v6316_v57  ;;  %v5173_v44 = vrot.slane %v14850_v28, 5  ;;  %v6238_v20 = vsel %vm2024_vm4, %v6236_v3, %v6237_v21  ;;  %v6783_v9 = vrot.slane %v6671_v5, 2  ;;  %v16465_v3 = vld [vmem:[#allocation57_spill] sm:$0xff] }
 0x657   : > { %v4964_v7 = vadd.f32 %v14956_v49, %v14592_v60  ;;  %v5334_v54 = vmul.f32 %v14915_v37, %v14790_v40  ;;  %v5747_v48 = vadd.f32 %v5674_v42, %v5514_v27  ;;  %v6550_v23 = vsel %vm1858_vm3, %v6548_v53, %v6549_v39  ;;  %v15042_v53 = vld [vmem:[%s15662_s7 + $0x4] ss:$0 sm:$0xff] }
 0x658   : > { %v6621_v1 = vadd.f32 %v6552_v16, %v6386_v2  ;;  %v5567_v13 = vmul.f32 %v14922_v33, %v14790_v40  ;;  %v6785_v21 = vsel %vm2024_vm4, %v6783_v9, %v6784_v41  ;;  %v4965_v19 = vadd.f32 %v14956_v49, %v14602_v25  ;;  %v16463_v41 = vld [vmem:[#allocation38_spill] sm:$0xff]  ;;  %v15025_v56 = vpop.permute.xlu0 %7140  ;;  %v15035_v2 = vpop.permute.xlu1 %7125 }
 0x659   : > { %v14967_v46 = vadd.f32 %v4964_v7, %v16461_v36  ;;  %v14975_v60 = vmul.f32 %v14915_v37, %v14884_v51  ;;  %v14979_v39 = vmul.f32 %v14922_v33, %v14884_v51  ;;  %v5819_v40 = vadd.f32 %v5787_v43, %v5747_v48  ;;  %16464 = vst [vmem:[#allocation74_spill] sm:$0xff] %v15025_v56  ;;  %v15060_v48 = vld [vmem:[%s15662_s7 + $0x5] ss:$0 sm:$0xff] }
 0x65a   : > { %v6856_v59 = vadd.f32 %v6787_v14, %v6621_v1  ;;  %v5029_v16 = vrot.slane %v14847_v58, 1  ;;  %v14987_v25 = vsel %vm354_vm0, %v5104_v61, %v5173_v44  ;;  %v14990_v26 = vadd.f32 %v4965_v19, %v16463_v41  ;;  %16466 = vst [vmem:[#allocation44_spill] sm:$0xff] %v15035_v2 }
 0x65b   : > { %v6067_v62 = vadd.f32 %v5990_v15, %v5819_v40  ;;  %v6355_v18 = vmul.f32 %v14445_v8, %v14879_v12  ;;  %v4966_v50 = vadd.f32 %v14956_v49, %v14633_v4  ;;  %v5447_v52 = vrot.slane %v5334_v54, 1  ;;  %v15053_v54 = vld [vmem:[%s15662_s7 + $0x3] ss:$0 sm:$0xff] }
 0x65c   : > { %v6934_v45 = vsel %vm2700_vm5, %v6856_v59, 0.0  ;;  %v5680_v30 = vrot.slane %v5567_v13, 2  ;;  %v15869_v28 = vrot.slane %v14967_v46, 7  ;;  %v15870_v61 = vrot.slane %v14990_v26, 7 }
 0x65d   : > { %6935 = vadd.xlane.f32.xlu1 %v6934_v45  ;;  %v6315_v11 = vadd.f32 %v6238_v20, %v6067_v62  ;;  %v15003_v57 = vmul.f32 %v14915_v37, %v14675_v63  ;;  %v15008_v4 = vsel %vm354_vm0, %v5029_v16, %v5103_v31  ;;  %v15012_v14 = vmul.f32 %v14915_v37, %v14987_v25 }
 0x65e   : > { %v15019_v32 = vsel %vm354_vm0, %v15869_v28, %v15870_v61  ;;  %v15023_v47 = vmul.f32 %v14922_v33, %v14675_v63  ;;  %v15029_v58 = vmul.f32 %v14922_v33, %v14987_v25  ;;  %v15033_v5 = vadd.f32 %v4966_v50, %v16465_v3 }
 0x65f   : > { %v6385_v31 = vadd.f32 %v6355_v18, %v6315_v11  ;;  %v5445_v27 = vrot.slane %v15003_v57, 1  ;;  %v5874_v44 = vmul.f32 %v15042_v53, %v14779_v35  ;;  %v5875_v20 = vmul.f32 %v15042_v53, %v14884_v51  ;;  %v15073_v18 = vld [vmem:[%s15662_s7 + $0x7] ss:$0 sm:$0xff]  ;;  %v15085_v57 = vld [vmem:[%s15662_s7 + $0x8] ss:$0 sm:$0xff] }
 0x660   : > { %v5678_v15 = vrot.slane %v15023_v47, 2  ;;  %v5254_v7 = vmul.f32 %v14929_v29, %v14675_v63  ;;  %v5790_v1 = vmul.f32 %v15053_v54, %v14779_v35  ;;  %v6122_v13 = vmul.f32 %v15060_v48, %v14779_v35 }
 0x661   : > { %v6620_v9 = vadd.f32 %v6550_v23, %v6385_v31  ;;  %v5448_v23 = vsel %vm1858_vm3, %v5445_v27, %v5447_v52  ;;  %v5994_v36 = vrot.slane %v5874_v44, 1  ;;  %v5996_v19 = vrot.slane %v5875_v20, 1  ;;  %v15079_v52 = vpop.permute.xlu0 %7063  ;;  %v15089_v31 = vpop.permute.xlu1 %7136 }
 0x662   : > { %v5681_v63 = vsel %vm2024_vm4, %v5678_v15, %v5680_v30  ;;  %v5517_v40 = vadd.f32 %v5448_v23, %v5254_v7  ;;  %v6123_v16 = vmul.f32 %v15060_v48, %v14884_v51  ;;  %v6242_v41 = vrot.slane %v6122_v13, 2  ;;  %16467 = vst [vmem:[#allocation42_spill] sm:$0xff] %v15089_v31 }
 0x663   : > { %v6855_v59 = vadd.f32 %v6785_v21, %v6620_v9  ;;  %v5174_v45 = vrot.slane %v14990_v26, 5  ;;  %v5997_v62 = vsel %vm1858_vm3, %v5994_v36, %v5996_v19  ;;  %v6440_v50 = vmul.f32 %v15073_v18, %v14868_v55 }
 0x664   : > { %v6441_v21 = vmul.f32 %v15073_v18, %v14987_v25  ;;  %v5750_v30 = vadd.f32 %v5681_v63, %v5517_v40  ;;  %v6244_v11 = vrot.slane %v6123_v16, 2  ;;  %v6675_v47 = vmul.f32 %v15085_v57, %v14868_v55 }
 0x665   : > { %v6931_v51 = vsel %vm2700_vm5, %v6855_v59, 0.0  ;;  %v6358_v3 = vmul.f32 %v14445_v8, %v14868_v55  ;;  %v6554_v44 = vrot.slane %v6440_v50, 1  ;;  %v6676_v9 = vmul.f32 %v15085_v57, %v14987_v25 }
 0x666   : > { %6932 = vadd.xlane.f32.xlu0 %v6931_v51  ;;  %v6556_v20 = vrot.slane %v6441_v21, 1  ;;  %v5822_v7 = vadd.f32 %v5790_v1, %v5750_v30  ;;  %v6245_v13 = vsel %vm2024_vm4, %v6242_v41, %v6244_v11  ;;  %v6789_v23 = vrot.slane %v6675_v47, 2 }
 0x667   : > { %v5332_v63 = vmul.f32 %v14915_v37, %v14801_v10  ;;  %v6791_v59 = vrot.slane %v6676_v9, 2  ;;  %v5253_v40 = vmul.f32 %v14929_v29, %v14801_v10  ;;  %v5565_v8 = vmul.f32 %v14922_v33, %v14801_v10 }
 0x668   : > { %v6557_v19 = vsel %vm1858_vm3, %v6554_v44, %v6556_v20  ;;  %v6070_v16 = vadd.f32 %v5997_v62, %v5822_v7  ;;  %v5873_v1 = vmul.f32 %v15042_v53, %v14879_v12  ;;  %v6121_v21 = vmul.f32 %v15060_v48, %v14879_v12  ;;  %v15112_v20 = vpop.permute.xlu0 %7151 }
 0x669   : > { %v5444_v50 = vrot.slane %v5332_v63, 1  ;;  %v6792_v51 = vsel %vm2024_vm4, %v6789_v23, %v6791_v59  ;;  %v5677_v30 = vrot.slane %v5565_v8, 2  ;;  %v5789_v11 = vmul.f32 %v15053_v54, %v14879_v12  ;;  %16468 = vst [vmem:[#allocation60_spill] sm:$0xff] %v15112_v20  ;;  %v15115_v63 = vpop.permute.xlu1 %7059 }
 0x66a   : > { %v6439_v47 = vmul.f32 %v15073_v18, %v15008_v4  ;;  %v6318_v10 = vadd.f32 %v6245_v13, %v6070_v16  ;;  %v5993_v9 = vrot.slane %v5873_v1, 1  ;;  %v6241_v7 = vrot.slane %v6121_v21, 2 }
 0x66b   : > { %v5446_v62 = vsel %vm1858_vm3, %v5444_v50, %v5445_v27  ;;  %v5679_v34 = vsel %vm2024_vm4, %v5677_v30, %v5678_v15  ;;  %v6674_v8 = vmul.f32 %v15085_v57, %v15008_v4  ;;  %v4967_v13 = vadd.f32 %v14956_v49, %v14642_v17  ;;  %v16469_v30 = vld [vmem:[#allocation58_spill] sm:$0xff] }
 0x66c   : > { %v5516_v43 = vadd.f32 %v5446_v62, %v5253_v40  ;;  %v6553_v59 = vrot.slane %v6439_v47, 1  ;;  %v6388_v42 = vadd.f32 %v6358_v3, %v6318_v10  ;;  %v5995_v28 = vsel %vm1858_vm3, %v5993_v9, %v5994_v36 }
 0x66d   : > { %v6243_v61 = vsel %vm2024_vm4, %v6241_v7, %v6242_v41  ;;  %v6788_v40 = vrot.slane %v6674_v8, 2  ;;  %v5031_v15 = vrot.slane %v15033_v5, 1  ;;  %v5109_v1 = vrot.slane %v15033_v5, 7 }
 0x66e   : > { %v5749_v16 = vadd.f32 %v5679_v34, %v5516_v43  ;;  %v6555_v50 = vsel %vm1858_vm3, %v6553_v59, %v6554_v44  ;;  %v6623_v21 = vadd.f32 %v6557_v19, %v6388_v42  ;;  %v4999_v3 = vadd.f32 %v4967_v13, %v16469_v30  ;;  %v15137_v34 = vpop.permute.xlu0 %7074  ;;  %v15147_v19 = vpop.permute.xlu1 %7147 }
 0x66f   : > { %v16470_v36 = vrot.slane %v14990_v26, 7  ;;  %v6790_v17 = vsel %vm2024_vm4, %v6788_v40, %v6789_v23  ;;  %v5335_v49 = vmul.f32 %v14915_v37, %v14879_v12  ;;  %v16471_v5 = vrot.slane %v14967_v46, 7  ;;  %16473 = vst [vmem:[#allocation14_spill] sm:$0xff] %v15147_v19  ;;  %v15152_v23 = vld [vmem:[%s15662_s7 + $0x6] ss:$0 sm:$0xff] }
 0x670   : > { %v5821_v47 = vadd.f32 %v5789_v11, %v5749_v16  ;;  %v16472_v42 = vrot.slane %v14967_v46, 1  ;;  %v6858_v26 = vadd.f32 %v6792_v51, %v6623_v21  ;;  %v6357_v10 = vmul.f32 %v15152_v23, %v15008_v4 }
 0x671   : > { %v15132_v41 = vsel %vm354_vm0, %v16470_v36, %v5174_v45  ;;  %v5110_v45 = vrot.slane %v4999_v3, 7  ;;  %v5175_v62 = vrot.slane %v4999_v3, 5  ;;  %v5336_v46 = vmul.f32 %v14915_v37, %v14779_v35 }
 0x672   : > { %v15145_v44 = vsel %vm354_vm0, %v16472_v42, %v16471_v5  ;;  %v6069_v11 = vadd.f32 %v5995_v28, %v5821_v47  ;;  %v15160_v9 = vmul.f32 %v14915_v37, %v15132_v41  ;;  %v15164_v51 = vmul.f32 %v14922_v33, %v15132_v41  ;;  %v15187_v47 = vpop.permute.xlu0 %7162 }
 0x673   : > { %v6940_v28 = vsel %vm2700_vm5, %v6858_v26, 0.0  ;;  %v15168_v7 = vsel %vm354_vm0, %v5109_v1, %v5110_v45  ;;  %v15171_v59 = vsel %vm354_vm0, %v5031_v15, %v5109_v1  ;;  %v5449_v13 = vrot.slane %v5335_v49, 1  ;;  %16474 = vst [vmem:[#allocation68_spill] sm:$0xff] %v15187_v47  ;;  %v15191_v26 = vpop.permute.xlu1 %7070 }
 0x674   : > { %6941 = vadd.xlane.f32.xlu1 %v6940_v28  ;;  %v6317_v8 = vadd.f32 %v6243_v61, %v6069_v11  ;;  %v5450_v16 = vrot.slane %v5336_v46, 1  ;;  %v5255_v40 = vmul.f32 %v14929_v29, %v14879_v12  ;;  %v5568_v21 = vmul.f32 %v14922_v33, %v14879_v12 }
 0x675   : > { %v5569_v30 = vmul.f32 %v14922_v33, %v14779_v35  ;;  %v5876_v3 = vmul.f32 %v15042_v53, %v15008_v4  ;;  %v15182_v15 = vsel %vm354_vm0, %v5110_v45, %v5175_v62  ;;  %v5791_v1 = vmul.f32 %v15053_v54, %v15008_v4 }
 0x676   : > { %v6387_v36 = vadd.f32 %v6357_v10, %v6317_v8  ;;  %v5451_v61 = vsel %vm1858_vm3, %v5449_v13, %v5450_v16  ;;  %v5682_v5 = vrot.slane %v5568_v21, 2  ;;  %v5877_v42 = vmul.f32 %v15042_v53, %v14868_v55 }
 0x677   : > { %v5518_v49 = vadd.f32 %v5451_v61, %v5255_v40  ;;  %v5683_v12 = vrot.slane %v5569_v30, 2  ;;  %v5998_v10 = vrot.slane %v5876_v3, 1  ;;  %v6124_v45 = vmul.f32 %v15060_v48, %v15008_v4 }
 0x678   : > { %v6622_v11 = vadd.f32 %v6555_v50, %v6387_v36  ;;  %v6125_v62 = vmul.f32 %v15060_v48, %v14868_v55  ;;  %v5999_v28 = vrot.slane %v5877_v42, 1  ;;  %v15200_v8 = vmul.f32 %v15152_v23, %v15145_v44 }
 0x679   : > { %v5684_v46 = vsel %vm2024_vm4, %v5682_v5, %v5683_v12  ;;  %v6442_v13 = vmul.f32 %v15073_v18, %v15145_v44  ;;  %v6246_v50 = vrot.slane %v6124_v45, 2  ;;  %v6443_v36 = vmul.f32 %v15073_v18, %v15019_v32 }
 0x67a   : > { %v6857_v40 = vadd.f32 %v6790_v17, %v6622_v11  ;;  %v5751_v21 = vadd.f32 %v5684_v46, %v5518_v49  ;;  %v6247_v30 = vrot.slane %v6125_v62, 2  ;;  %v6000_v3 = vsel %vm1858_vm3, %v5998_v10, %v5999_v28  ;;  %v15213_v49 = vpop.permute.xlu0 %7085 }
 0x67b   : > { %v6558_v61 = vrot.slane %v6442_v13, 1  ;;  %v6677_v5 = vmul.f32 %v15085_v57, %v15145_v44  ;;  %v6678_v17 = vmul.f32 %v15085_v57, %v15019_v32  ;;  %v6559_v11 = vrot.slane %v6443_v36, 1  ;;  %v15220_v13 = vpop.permute.xlu1 %7158 }
 0x67c   : > { %v6937_v42 = vsel %vm2700_vm5, %v6857_v40, 0.0  ;;  %v5823_v43 = vadd.f32 %v5791_v1, %v5751_v21  ;;  %v6248_v27 = vsel %vm2024_vm4, %v6246_v50, %v6247_v30  ;;  %v5256_v45 = vmul.f32 %v14929_v29, %v14779_v35  ;;  %16476 = vst [vmem:[#allocation17_spill] sm:$0xff] %v15220_v13 }
 0x67d   : > { %6938 = vadd.xlane.f32.xlu0 %v6937_v42  ;;  %v6793_v10 = vrot.slane %v6677_v5, 2  ;;  %v16475_v62 = vrot.slane %v14975_v60, 1  ;;  %v6794_v40 = vrot.slane %v6678_v17, 2  ;;  %v16477_v21 = vrot.slane %v14979_v39, 2 }
 0x67e   : > { %v6071_v1 = vadd.f32 %v6000_v3, %v5823_v43  ;;  %v5792_v42 = vmul.f32 %v15053_v54, %v14868_v55  ;;  %v15228_v36 = vsel %vm1858_vm3, %v6558_v61, %v6559_v11  ;;  %v5878_v35 = vmul.f32 %v15042_v53, %v14987_v25 }
 0x67f   : > { %v5453_v46 = vsel %vm1858_vm3, %v5450_v16, %v16475_v62  ;;  %v5686_v50 = vsel %vm2024_vm4, %v5683_v12, %v16477_v21  ;;  %v6126_v60 = vmul.f32 %v15060_v48, %v14987_v25  ;;  %v15236_v43 = vmul.f32 %v15042_v53, %v15182_v15 }
 0x680   : > { %v5519_v5 = vadd.f32 %v5453_v46, %v5256_v45  ;;  %v6319_v39 = vadd.f32 %v6248_v27, %v6071_v1  ;;  %v15239_v16 = vsel %vm2024_vm4, %v6793_v10, %v6794_v40  ;;  %v6444_v12 = vmul.f32 %v15073_v18, %v15132_v41  ;;  %v15251_v10 = vpop.permute.xlu0 %7173 }
 0x681   : > { %v6001_v61 = vrot.slane %v5878_v35, 1  ;;  %v6249_v17 = vrot.slane %v6126_v60, 2  ;;  %v6679_v45 = vmul.f32 %v15085_v57, %v15132_v41  ;;  %v15248_v25 = vmul.f32 %v15060_v48, %v15182_v15  ;;  %16478 = vst [vmem:[#allocation77_spill] sm:$0xff] %v15251_v10  ;;  %v15255_v35 = vpop.permute.xlu1 %7081 }
 0x682   : > { %v5752_v3 = vadd.f32 %v5686_v50, %v5519_v5  ;;  %v6389_v27 = vadd.f32 %v15200_v8, %v6319_v39  ;;  %v6561_v46 = vrot.slane %v6444_v12, 1  ;;  %v6127_v62 = vmul.f32 %v15060_v48, %v15145_v44 }
 0x683   : > { %v6002_v21 = vsel %vm1858_vm3, %v5999_v28, %v6001_v61  ;;  %v6250_v50 = vsel %vm2024_vm4, %v6247_v30, %v6249_v17  ;;  %v6796_v5 = vrot.slane %v6679_v45, 2  ;;  %v5338_v30 = vmul.f32 %v14915_v37, %v15008_v4 }
 0x684   : > { %v5824_v1 = vadd.f32 %v5792_v42, %v5752_v3  ;;  %v6624_v13 = vadd.f32 %v15228_v36, %v6389_v27  ;;  %v15261_v47 = vsel %vm1858_vm3, %v6559_v11, %v6561_v46  ;;  %v15265_v42 = vmul.f32 %v15152_v23, %v15019_v32 }
 0x685   : > { %v15268_v28 = vsel %vm2024_vm4, %v6794_v40, %v6796_v5  ;;  %v5257_v61 = vmul.f32 %v14929_v29, %v15008_v4  ;;  %v5339_v11 = vmul.f32 %v14915_v37, %v14868_v55  ;;  %v5454_v45 = vrot.slane %v5338_v30, 1  ;;  %v15287_v5 = vpop.permute.xlu0 %7096  ;;  %v15292_v12 = vpop.permute.xlu1 %7169 }
 0x686   : > { %v6072_v39 = vadd.f32 %v6002_v21, %v5824_v1  ;;  %v6859_v3 = vadd.f32 %v15239_v16, %v6624_v13  ;;  %v5571_v27 = vmul.f32 %v14922_v33, %v15008_v4  ;;  %v5572_v40 = vmul.f32 %v14922_v33, %v14868_v55  ;;  %16479 = vst [vmem:[#allocation54_spill] sm:$0xff] %v15287_v5 }
 0x687   : > { %v5455_v1 = vrot.slane %v5339_v11, 1  ;;  %v5793_v13 = vmul.f32 %v15053_v54, %v15145_v44  ;;  %v5879_v21 = vmul.f32 %v15042_v53, %v15145_v44  ;;  %v5880_v4 = vmul.f32 %v15042_v53, %v15019_v32  ;;  %16480 = vst [vmem:[#allocation43_spill] sm:$0xff] %v15292_v12 }
 0x688   : > { %v6320_v17 = vadd.f32 %v6250_v50, %v6072_v39  ;;  %v6943_v46 = vsel %vm2700_vm5, %v6859_v3, 0.0  ;;  %v5687_v39 = vrot.slane %v5571_v27, 2  ;;  %v5688_v30 = vrot.slane %v5572_v40, 2 }
 0x689   : > { %6944 = vadd.xlane.f32.xlu0 %v6943_v46  ;;  %v5456_v3 = vsel %vm1858_vm3, %v5454_v45, %v5455_v1  ;;  %v6003_v11 = vrot.slane %v5879_v21, 1  ;;  %v6128_v60 = vmul.f32 %v15060_v48, %v15019_v32  ;;  %v6004_v27 = vrot.slane %v5880_v4, 1  ;;  %v15314_v4 = vpop.permute.xlu0 %7184 }
 0x68a   : > { %v6390_v50 = vadd.f32 %v15265_v42, %v6320_v17  ;;  %v5520_v10 = vadd.f32 %v5456_v3, %v5257_v61  ;;  %v5689_v17 = vsel %vm2024_vm4, %v5687_v39, %v5688_v30  ;;  %v6251_v40 = vrot.slane %v6127_v62, 2  ;;  %16481 = vst [vmem:[#allocation81_spill] sm:$0xff] %v15314_v4 }
 0x68b   : > { %v6252_v20 = vrot.slane %v6128_v60, 2  ;;  %v6361_v12 = vmul.f32 %v15152_v23, %v15171_v59  ;;  %v6445_v45 = vmul.f32 %v15073_v18, %v15171_v59  ;;  %v6005_v19 = vsel %vm1858_vm3, %v6003_v11, %v6004_v27 }
 0x68c   : > { %v6625_v46 = vadd.f32 %v15261_v47, %v6390_v50  ;;  %v5753_v56 = vadd.f32 %v5689_v17, %v5520_v10  ;;  %v6446_v50 = vmul.f32 %v15073_v18, %v15168_v7  ;;  %v6680_v62 = vmul.f32 %v15085_v57, %v15171_v59  ;;  %v15319_v17 = vpop.permute.xlu1 %7092 }
 0x68d   : > { %v6253_v61 = vsel %vm2024_vm4, %v6251_v40, %v6252_v20  ;;  %v6563_v39 = vrot.slane %v6445_v45, 1  ;;  %v6681_v60 = vmul.f32 %v15085_v57, %v15168_v7  ;;  %v5258_v11 = vmul.f32 %v14929_v29, %v14868_v55 }
 0x68e   : > { %v6860_v21 = vadd.f32 %v15268_v28, %v6625_v46  ;;  %v5825_v46 = vadd.f32 %v5793_v13, %v5753_v56  ;;  %v6564_v10 = vrot.slane %v6446_v50, 1  ;;  %v6798_v40 = vrot.slane %v6680_v62, 2 }
 0x68f   : > { %v6799_v45 = vrot.slane %v6681_v60, 2  ;;  %v16482_v6 = vrot.slane %v15012_v14, 1  ;;  %v16483_v2 = vrot.slane %v15029_v58, 2  ;;  %v5794_v55 = vmul.f32 %v15053_v54, %v15019_v32 }
 0x690   : > { %v6946_v3 = vsel %vm2700_vm5, %v6860_v21, 0.0  ;;  %v6073_v5 = vadd.f32 %v6005_v19, %v5825_v46  ;;  %v6565_v56 = vsel %vm1858_vm3, %v6563_v39, %v6564_v10  ;;  %v5881_v50 = vmul.f32 %v15042_v53, %v15132_v41 }
 0x691   : > { %6947 = vadd.xlane.f32.xlu1 %v6946_v3  ;;  %v5458_v31 = vsel %vm1858_vm3, %v5455_v1, %v16482_v6  ;;  %v5691_v4 = vsel %vm2024_vm4, %v5688_v30, %v16483_v2  ;;  %v6800_v21 = vsel %vm2024_vm4, %v6798_v40, %v6799_v45  ;;  %v6129_v14 = vmul.f32 %v15060_v48, %v15132_v41  ;;  %v15345_v41 = vpop.permute.xlu0 %7107 }
 0x692   : > { %v5521_v13 = vadd.f32 %v5458_v31, %v5258_v11  ;;  %v6362_v6 = vmul.f32 %v15152_v23, %v15168_v7  ;;  %v6321_v58 = vadd.f32 %v6253_v61, %v6073_v5  ;;  %v6447_v19 = vmul.f32 %v15073_v18, %v15182_v15 }
 0x693   : > { %v6682_v31 = vmul.f32 %v15085_v57, %v15182_v15  ;;  %v6006_v1 = vrot.slane %v5881_v50, 1  ;;  %v6254_v30 = vrot.slane %v6129_v14, 2  ;;  %v5259_v39 = vmul.f32 %v14929_v29, %v15145_v44 }
 0x694   : > { %v5754_v2 = vadd.f32 %v5691_v4, %v5521_v13  ;;  %v5341_v62 = vmul.f32 %v14915_v37, %v15145_v44  ;;  %v6391_v60 = vadd.f32 %v6361_v12, %v6321_v58  ;;  %v6566_v5 = vrot.slane %v6447_v19, 1  ;;  %v15347_v4 = vpop.permute.xlu1 %7180 }
 0x695   : > { %v6801_v61 = vrot.slane %v6682_v31, 2  ;;  %v6007_v18 = vsel %vm1858_vm3, %v6004_v27, %v6006_v1  ;;  %v6255_v57 = vsel %vm2024_vm4, %v6252_v20, %v6254_v30  ;;  %v5342_v15 = vmul.f32 %v14915_v37, %v15019_v32 }
 0x696   : > { %v5826_v23 = vadd.f32 %v5794_v55, %v5754_v2  ;;  %v5459_v3 = vrot.slane %v5341_v62, 1  ;;  %v6626_v46 = vadd.f32 %v6565_v56, %v6391_v60  ;;  %v6567_v40 = vsel %vm1858_vm3, %v6564_v10, %v6566_v5  ;;  %v15368_v2 = vpop.permute.xlu0 %7195 }
 0x697   : > { %v6802_v13 = vsel %vm2024_vm4, %v6799_v45, %v6801_v61  ;;  %v5460_v12 = vrot.slane %v5342_v15, 1  ;;  %v5574_v55 = vmul.f32 %v14922_v33, %v15145_v44  ;;  %v5575_v50 = vmul.f32 %v14922_v33, %v15019_v32 }
 0x698   : > { %v6074_v11 = vadd.f32 %v6007_v18, %v5826_v23  ;;  %v5795_v20 = vmul.f32 %v15053_v54, %v15171_v59  ;;  %v6861_v27 = vadd.f32 %v6800_v21, %v6626_v46  ;;  %v5882_v37 = vmul.f32 %v15042_v53, %v15171_v59  ;;  %v15371_v1 = vpop.permute.xlu1 %7103 }
 0x699   : > { %v5883_v10 = vmul.f32 %v15042_v53, %v15168_v7  ;;  %v5461_v45 = vsel %vm1858_vm3, %v5459_v3, %v5460_v12  ;;  %v5692_v56 = vrot.slane %v5574_v55, 2  ;;  %v5693_v58 = vrot.slane %v5575_v50, 2 }
 0x69a   : > { %v6322_v14 = vadd.f32 %v6255_v57, %v6074_v11  ;;  %v6130_v44 = vmul.f32 %v15060_v48, %v15171_v59  ;;  %v6949_v33 = vsel %vm2700_vm5, %v6861_v27, 0.0  ;;  %v5522_v21 = vadd.f32 %v5461_v45, %v5259_v39  ;;  %v15394_v55 = vpop.permute.xlu0 %7118 }
 0x69b   : > { %v6008_v31 = vrot.slane %v5882_v37, 1  ;;  %6950 = vadd.xlane.f32.xlu0 %v6949_v33  ;;  %v5694_v30 = vsel %vm2024_vm4, %v5692_v56, %v5693_v58  ;;  %v6009_v53 = vrot.slane %v5883_v10, 1  ;;  %v6131_v62 = vmul.f32 %v15060_v48, %v15168_v7 }
 0x69c   : > { %v6392_v19 = vadd.f32 %v6362_v6, %v6322_v14  ;;  %v6256_v60 = vrot.slane %v6130_v44, 2  ;;  %v5755_v5 = vadd.f32 %v5694_v30, %v5522_v21  ;;  %v5260_v59 = vmul.f32 %v14929_v29, %v15019_v32 }
 0x69d   : > { %v16484_v61 = vrot.slane %v15160_v9, 1  ;;  %v6010_v39 = vsel %vm1858_vm3, %v6008_v31, %v6009_v53  ;;  %v6257_v18 = vrot.slane %v6131_v62, 2  ;;  %v16485_v57 = vrot.slane %v15164_v51, 2 }
 0x69e   : > { %v6627_v23 = vadd.f32 %v6567_v40, %v6392_v19  ;;  %v5796_v48 = vmul.f32 %v15053_v54, %v15168_v7  ;;  %v5827_v46 = vadd.f32 %v5795_v20, %v5755_v5  ;;  %v16486_v40 = vrot.slane %v15236_v43, 1  ;;  %v15397_v54 = vpop.permute.xlu1 %7191  ;;  %v15400_v14 = vpop.permute.xlu0 %7206 }
 0x69f   : > { %v5463_v6 = vsel %vm1858_vm3, %v5460_v12, %v16484_v61  ;;  %v5696_v15 = vsel %vm2024_vm4, %v5693_v58, %v16485_v57  ;;  %v6258_v32 = vsel %vm2024_vm4, %v6256_v60, %v6257_v18  ;;  %v16487_v9 = vrot.slane %v15248_v25, 2 }
 0x6a0   : > { %v6862_v3 = vadd.f32 %v6802_v13, %v6627_v23  ;;  %v5523_v11 = vadd.f32 %v5463_v6, %v5260_v59  ;;  %v6012_v29 = vsel %vm1858_vm3, %v6009_v53, %v16486_v40  ;;  %v6075_v50 = vadd.f32 %v6010_v39, %v5827_v46 }
 0x6a1   : > { %v6260_v12 = vsel %vm2024_vm4, %v6257_v18, %v16487_v9  ;;  %v15413_v31 = vstv %s6961_s20  ;;  %vm7554_vm0 = vcmask 1044484   ;;  %vm7560_vm3 = vcmask 1047559  }
 0x6a2   : > { %v6952_v51 = vsel %vm2700_vm5, %v6862_v3, 0.0  ;;  %v5756_v27 = vadd.f32 %v5696_v15, %v5523_v11  ;;  %v6323_v7 = vadd.f32 %v6258_v32, %v6075_v50  ;;  %v15403_v10 = vpop.permute.xlu1 %7114 }
 0x6a3   : > { %6953 = vadd.xlane.f32.xlu1 %v6952_v51 }
 0x6a4   : > { %v5828_v13 = vadd.f32 %v5796_v48, %v5756_v27  ;;  %v6393_v43 = vadd.f32 %v15200_v8, %v6323_v7  ;;  %v6873_v8 = vpop.xlane.xlu0 %6872 }
 0x6a6   : > { %v6076_v20 = vadd.f32 %v6012_v29, %v5828_v13  ;;  %v6628_v25 = vadd.f32 %v15228_v36, %v6393_v43  ;;  %v15410_v19 = vpop.permute.xlu1 %7202 }
 0x6a8   : > { %v6324_v37 = vadd.f32 %v6260_v12, %v6076_v20  ;;  %v6863_v45 = vadd.f32 %v15239_v16, %v6628_v25  ;;  %v6870_v21 = vpop.xlane.xlu0 %6869 }
 0x6a9   : > { %v6965_v53 = vadd.f32 %v15413_v31, %v6870_v21 }
 0x6aa   : > { %v6394_v56 = vadd.f32 %v15265_v42, %v6324_v37  ;;  %v6955_v58 = vsel %vm2700_vm5, %v6863_v45, 0.0  ;;  %v6876_v16 = vpop.xlane.xlu1 %6875  ;;  %v6966_v42 = vadd.f32 %v15413_v31, %v6873_v8 }
 0x6ab   : > { %6956 = vadd.xlane.f32.xlu0 %v6955_v58 }
 0x6ac   : > { %v6629_v44 = vadd.f32 %v15261_v47, %v6394_v56  ;;  %v6879_v30 = vpop.xlane.xlu0 %6878  ;;  %v15416_v47 = vstv %s6996_s12 }
 0x6ad   : > { %v7000_v60 = vmul.f32 %v15416_v47, %v6966_v42  ;;  %v6999_v5 = vmul.f32 %v15416_v47, %v6965_v53  ;;  %v6968_v59 = vadd.f32 %v15413_v31, %v6879_v30 }
 0x6ae   : > { %v6864_v33 = vadd.f32 %v15268_v28, %v6629_v44  ;;  %v6867_v62 = vpop.xlane.xlu1 %6866  ;;  %v6967_v28 = vadd.f32 %v15413_v31, %v6876_v16 }
 0x6af   : > { %v7242_v39 = vadd.f32 %v14981_v0, %v7000_v60  ;;  %v6964_v18 = vadd.f32 %v15413_v31, %v6867_v62  ;;  %v7241_v15 = vadd.f32 %v14944_v38, %v6999_v5  ;;  %v7002_v48 = vmul.f32 %v15416_v47, %v6968_v59 }
 0x6b0   : > { %v6958_v36 = vsel %vm2700_vm5, %v6864_v33, 0.0  ;;  %v6885_v23 = vpop.xlane.xlu0 %6884  ;;  %v7001_v6 = vmul.f32 %v15416_v47, %v6967_v28 }
 0x6b1   : > { %6959 = vadd.xlane.f32.xlu1 %v6958_v36  ;;  %v6970_v3 = vadd.f32 %v15413_v31, %v6885_v23  ;;  %v6998_v40 = vmul.f32 %v15416_v47, %v6964_v18  ;;  %v7244_v0 = vadd.f32 %v15115_v63, %v7002_v48 }
 0x6b2   : > { %v6882_v61 = vpop.xlane.xlu1 %6881  ;;  %v7243_v11 = vadd.f32 %v14939_v22, %v7001_v6  ;;  %v16488_v6 = vld [vmem:[#allocation54_spill] sm:$0xff] }
 0x6b3   : > { %v6969_v29 = vadd.f32 %v15413_v31, %v6882_v61  ;;  %v7004_v9 = vmul.f32 %v15416_v47, %v6970_v3  ;;  %v7240_v51 = vadd.f32 %v14900_v24, %v6998_v40 }
 0x6b4   : > { %v6891_v57 = vpop.xlane.xlu0 %6890 }
 0x6b5   : > { %v6972_v38 = vadd.f32 %v15413_v31, %v6891_v57  ;;  %v7003_v50 = vmul.f32 %v15416_v47, %v6969_v29  ;;  %v7246_v7 = vadd.f32 %v15191_v26, %v7004_v9  ;;  %v16489_v57 = vld [vmem:[#allocation44_spill] sm:$0xff] }
 0x6b6   : > { %v6888_v46 = vpop.xlane.xlu1 %6887 }
 0x6b7   : > { %v6971_v22 = vadd.f32 %v15413_v31, %v6888_v46  ;;  %v7006_v13 = vmul.f32 %v15416_v47, %v6972_v38  ;;  %v7245_v20 = vadd.f32 %v15079_v52, %v7003_v50 }
 0x6b8   : > { %v6897_v32 = vpop.xlane.xlu0 %6896 }
 0x6b9   : > { %v6974_v63 = vadd.f32 %v15413_v31, %v6897_v32  ;;  %v7005_v25 = vmul.f32 %v15416_v47, %v6971_v22  ;;  %v7248_v45 = vadd.f32 %v15255_v35, %v7006_v13  ;;  %v16492_v22 = vld [vmem:[#allocation14_spill] sm:$0xff] }
 0x6ba   : > { %v6894_v12 = vpop.xlane.xlu1 %6893 }
 0x6bb   : > { %v6973_v24 = vadd.f32 %v15413_v31, %v6894_v12  ;;  %v7008_v56 = vmul.f32 %v15416_v47, %v6974_v63  ;;  %v7247_v8 = vadd.f32 %v15137_v34, %v7005_v25 }
 0x6bc   : > { %v6903_v27 = vpop.xlane.xlu0 %6902 }
 0x6bd   : > { %v6976_v26 = vadd.f32 %v15413_v31, %v6903_v27  ;;  %v7007_v52 = vmul.f32 %v15416_v47, %v6973_v24  ;;  %v7250_v21 = vadd.f32 %v15319_v17, %v7008_v56 }
 0x6be   : > { %v6900_v43 = vpop.xlane.xlu1 %6899 }
 0x6bf   : > { %v6975_v33 = vadd.f32 %v15413_v31, %v6900_v43  ;;  %v7010_v35 = vmul.f32 %v15416_v47, %v6976_v26  ;;  %v7249_v53 = vadd.f32 %v15213_v49, %v7007_v52  ;;  %v16494_v43 = vld [vmem:[#allocation60_spill] sm:$0xff] }
 0x6c0   : > { %v6909_v37 = vpop.xlane.xlu0 %6908 }
 0x6c1   : > { %7308 = vperm.xlu0 %9043, %v7241_v15   ;;  %v6978_v44 = vadd.f32 %v15413_v31, %v6909_v37  ;;  %v7009_v34 = vmul.f32 %v15416_v47, %v6975_v33  ;;  %v7252_v60 = vadd.f32 %v15371_v1, %v7010_v35  ;;  %v16497_v35 = vld [vmem:[#allocation77_spill] sm:$0xff] }
 0x6c2   : > { %7311 = vperm.xlu1 %9042, %v7242_v39   ;;  %v6906_v58 = vpop.xlane.xlu1 %6905 }
 0x6c3   : > { %v7012_v42 = vmul.f32 %v15416_v47, %v6978_v44  ;;  %v6977_v62 = vadd.f32 %v15413_v31, %v6906_v58  ;;  %v7251_v49 = vadd.f32 %v16488_v6, %v7009_v34  ;;  %v16498_v34 = vld [vmem:[#allocation43_spill] sm:$0xff]  ;;  %v16499_v6 = vld [vmem:[#allocation81_spill] sm:$0xff] }
 0x6c4   : > { %v6915_v36 = vpop.xlane.xlu0 %6914 }
 0x6c5   : > { %7317 = vperm.xlu0 %9043, %v7244_v0   ;;  %v6980_v30 = vadd.f32 %v15413_v31, %v6915_v36  ;;  %v7254_v23 = vadd.f32 %v15403_v10, %v7012_v42  ;;  %v7011_v39 = vmul.f32 %v15416_v47, %v6977_v62  ;;  %v16490_v0 = vld [vmem:[#allocation42_spill] sm:$0xff] }
 0x6c6   : > { %7314 = vperm.xlu1 %9042, %v7243_v11   ;;  %v6912_v16 = vpop.xlane.xlu1 %6911 }
 0x6c7   : > { %v6979_v17 = vadd.f32 %v15413_v31, %v6912_v16  ;;  %v7014_v59 = vmul.f32 %v15416_v47, %v6980_v30  ;;  %v7253_v3 = vadd.f32 %v15345_v41, %v7011_v39 }
 0x6c9   : > { %7323 = vperm.xlu0 %9043, %v7246_v7   ;;  %v7013_v18 = vmul.f32 %v15416_v47, %v6979_v17  ;;  %v7256_v15 = vadd.f32 %v16489_v57, %v7014_v59  ;;  %v16493_v7 = vld [vmem:[#allocation74_spill] sm:$0xff] }
 0x6ca   : > { %7305 = vperm.xlu1 %9042, %v7240_v51   ;;  %v6918_v5 = vpop.xlane.xlu1 %6917  ;;  %v16491_v51 = vld [vmem:[#allocation18_spill] sm:$0xff] }
 0x6cb   : > { %v6921_v28 = vpop.xlane.xlu0 %6920  ;;  %v6981_v1 = vadd.f32 %v15413_v31, %v6918_v5  ;;  %v7255_v11 = vadd.f32 %v15394_v55, %v7013_v18 }
 0x6cc   : > { %v6982_v61 = vadd.f32 %v15413_v31, %v6921_v28 }
 0x6cd   : > { %7329 = vperm.xlu0 %9043, %v7248_v45   ;;  %v7015_v40 = vmul.f32 %v15416_v47, %v6981_v1  ;;  %v16495_v45 = vld [vmem:[#allocation68_spill] sm:$0xff] }
 0x6ce   : > { %7320 = vperm.xlu1 %9042, %v7245_v20   ;;  %v6924_v48 = vpop.xlane.xlu1 %6923  ;;  %v7016_v10 = vmul.f32 %v15416_v47, %v6982_v61 }
 0x6cf   : > { %v6983_v29 = vadd.f32 %v15413_v31, %v6924_v48  ;;  %v7257_v50 = vadd.f32 %v16491_v51, %v7015_v40 }
 0x6d0   : > { %v7258_v9 = vadd.f32 %v16490_v0, %v7016_v10 }
 0x6d1   : > { %7335 = vperm.xlu0 %9043, %v7250_v21   ;;  %v7017_v41 = vmul.f32 %v15416_v47, %v6983_v29 }
 0x6d2   : > { %7326 = vperm.xlu1 %9042, %v7247_v8   ;;  %v16496_v8 = vld [vmem:[#allocation17_spill] sm:$0xff] }
 0x6d3   : > { %v7259_v13 = vadd.f32 %v16493_v7, %v7017_v41 }
 0x6d4   : > { %v6930_v38 = vpop.xlane.xlu1 %6929 }
 0x6d5   : > { %7341 = vperm.xlu0 %9043, %v7252_v60   ;;  %v6985_v55 = vadd.f32 %v15413_v31, %v6930_v38 }
 0x6d6   : > { %7332 = vperm.xlu1 %9042, %v7249_v53  }
 0x6d7   : > { %v7019_v63 = vmul.f32 %v15416_v47, %v6985_v55 }
 0x6d9   : > { %7347 = vperm.xlu0 %9043, %v7254_v23   ;;  %v7261_v20 = vadd.f32 %v16494_v43, %v7019_v63  ;;  %v16501_v63 = vld [vmem:[#allocation5_spill] sm:$0xff] }
 0x6da   : > { %7338 = vperm.xlu1 %9042, %v7251_v49  }
 0x6dd   : > { %7353 = vperm.xlu0 %9043, %v7256_v15  }
 0x6de   : > { %v6927_v46 = vpop.xlane.xlu0 %6926  ;;  %7344 = vperm.xlu1 %9042, %v7253_v3  }
 0x6df   : > { %v6984_v32 = vadd.f32 %v15413_v31, %v6927_v46 }
 0x6e1   : > { %v7018_v12 = vmul.f32 %v15416_v47, %v6984_v32  ;;  %7359 = vperm.xlu0 %9043, %v7258_v9  }
 0x6e2   : > { %7350 = vperm.xlu1 %9042, %v7255_v11  }
 0x6e3   : > { %v7260_v27 = vadd.f32 %v16492_v22, %v7018_v12  ;;  %v16500_v22 = vlaneseq }
 0x6e5   : > { %7365 = vperm.xlu0 %9043, %v7260_v27   ;;  %v7401_v27 = vand.u32 127, %v16500_v22  ;;  %vm7759_vm4 = vcmp.lt.s32.totalorder %v16500_v22, 256 }
 0x6e6   : > { %7356 = vperm.xlu1 %9042, %v7257_v50  }
 0x6ea   : > { %7362 = vperm.xlu1 %9042, %v7259_v13   ;;  %v6936_v25 = vpop.xlane.xlu1 %6935 }
 0x6eb   : > { %v6987_v24 = vadd.f32 %v15413_v31, %v6936_v25 }
 0x6ed   : > { %v7021_v37 = vmul.f32 %v15416_v47, %v6987_v24 }
 0x6ee   : > { %7368 = vperm.xlu1 %9042, %v7261_v20  }
 0x6ef   : > { %v7263_v56 = vadd.f32 %v16495_v45, %v7021_v37  ;;  %v9259_v37 = vmov 1983009808  }
 0x6f0   : > { %v7573_v45 = vunpack.c.l.s4 %v9259_v37 }
 0x6f2   : > { %7374 = vperm.xlu1 %9042, %v7263_v56  }
 0x6f3   : > { %v6933_v26 = vpop.xlane.xlu0 %6932 }
 0x6f4   : > { %v6986_v58 = vadd.f32 %v15413_v31, %v6933_v26 }
 0x6f6   : > { %v7020_v44 = vmul.f32 %v15416_v47, %v6986_v58 }
 0x6f8   : > { %v7262_v52 = vadd.f32 %v16496_v8, %v7020_v44 }
 0x6fa   : > { %7371 = vperm.xlu0 %9043, %v7262_v52   ;;  %v9260_v52 = vmov 1934713408  }
 0x701   : > { %v6942_v33 = vpop.xlane.xlu1 %6941 }
 0x702   : > { %v6989_v36 = vadd.f32 %v15413_v31, %v6942_v33  ;;  %v7588_v33 = vunpack.c.l.s4 %v9260_v52 }
 0x704   : > { %v7023_v21 = vmul.f32 %v15416_v47, %v6989_v36 }
 0x706   : > { %v7265_v16 = vadd.f32 %v16497_v35, %v7023_v21 }
 0x708   : > { %7380 = vperm.xlu1 %9042, %v7265_v16  }
 0x70a   : > { %v6939_v42 = vpop.xlane.xlu0 %6938 }
 0x70b   : > { %v6988_v30 = vadd.f32 %v15413_v31, %v6939_v42 }
 0x70d   : > { %v7022_v53 = vmul.f32 %v15416_v47, %v6988_v30 }
 0x70f   : > { %v7264_v62 = vadd.f32 %v16498_v34, %v7022_v53 }
 0x711   : > { %7377 = vperm.xlu0 %9043, %v7264_v62   ;;  %v7574_v62 = vunpack.c.0.s8 %v7573_v45 }
 0x716   : > { %v6945_v28 = vpop.xlane.xlu0 %6944 }
 0x717   : > { %v6990_v60 = vadd.f32 %v15413_v31, %v6945_v28 }
 0x719   : > { %v7024_v17 = vmul.f32 %v15416_v47, %v6990_v60 }
 0x71b   : > { %v7266_v23 = vadd.f32 %v15347_v4, %v7024_v17 }
 0x71d   : > { %7383 = vperm.xlu0 %9043, %v7266_v23  }
 0x71e   : > { %v6948_v5 = vpop.xlane.xlu1 %6947 }
 0x71f   : > { %v6991_v59 = vadd.f32 %v15413_v31, %v6948_v5 }
 0x721   : > { %v7025_v61 = vmul.f32 %v15416_v47, %v6991_v59 }
 0x723   : > { %v7267_v49 = vadd.f32 %v16499_v6, %v7025_v61 }
 0x725   : > { %7386 = vperm.xlu1 %9042, %v7267_v49  }
 0x728   : > { %v6951_v39 = vpop.xlane.xlu0 %6950 }
 0x729   : > { %v6992_v18 = vadd.f32 %v15413_v31, %v6951_v39 }
 0x72b   : > { %v7026_v1 = vmul.f32 %v15416_v47, %v6992_v18  ;;  %v7589_v18 = vunpack.c.0.s8 %v7588_v33 }
 0x72d   : > { %v7268_v57 = vadd.f32 %v15397_v54, %v7026_v1 }
 0x72f   : > { %7389 = vperm.xlu0 %9043, %v7268_v57  }
 0x730   : > { %v6954_v15 = vpop.xlane.xlu1 %6953 }
 0x731   : > { %v6993_v48 = vadd.f32 %v15413_v31, %v6954_v15 }
 0x733   : > { %v7027_v4 = vmul.f32 %v15416_v47, %v6993_v48 }
 0x735   : > { %v7269_v10 = vadd.f32 %v15368_v2, %v7027_v4 }
 0x737   : > { %7392 = vperm.xlu1 %9042, %v7269_v10   ;;  %v15547_v10 = vsub.s32 %v7574_v62, %v16501_v63 }
 0x738   : > { %v6957_v3 = vpop.xlane.xlu0 %6956 }
 0x739   : > { %v6994_v46 = vadd.f32 %v15413_v31, %v6957_v3 }
 0x73b   : > { %v7028_v11 = vmul.f32 %v15416_v47, %v6994_v46 }
 0x73d   : > { %v7270_v29 = vadd.f32 %v15410_v19, %v7028_v11  ;;  %v7406_v19 = vadd.s32 4294967288, %v7401_v27 }
 0x73e   : > { %v6960_v40 = vpop.xlane.xlu1 %6959 }
 0x73f   : > { %v6995_v32 = vadd.f32 %v15413_v31, %v6960_v40  ;;  %7395 = vperm.xlu0 %9043, %v7270_v29   ;;  %v15518_v43 = vsub.s32 %v7406_v19, %v16501_v63  ;;  %v15554_v29 = vsub.s32 %v7589_v18, %v16501_v63 }
 0x740   : > { %v7309_v9 = vpop.permute.xlu0 %7308 }
 0x741   : > { %v7029_v54 = vmul.f32 %v15416_v47, %v6995_v32  ;;  %v15515_v47 = vsub.s32 %v7401_v27, %v16501_v63  ;;  %v7410_v56 = vrot.slane %v7309_v9, %v15518_v43 }
 0x742   : > { %v7312_v0 = vpop.permute.xlu1 %7311 }
 0x743   : > { %v7271_v38 = vadd.f32 %v15400_v14, %v7029_v54  ;;  %v7416_v36 = vrot.slane %v7312_v0, %v15515_v47 }
 0x744   : > { %v7318_v12 = vpop.permute.xlu0 %7317 }
 0x745   : > { %7398 = vperm.xlu1 %9042, %v7271_v38   ;;  %v7425_v44 = vrot.slane %v7318_v12, %v15515_v47 }
 0x746   : > { %v7315_v2 = vpop.permute.xlu1 %7314 }
 0x747   : > { %v7420_v26 = vrot.slane %v7315_v2, %v15518_v43 }
 0x748   : > { %v7324_v50 = vpop.permute.xlu0 %7323 }
 0x749   : > { %v7434_v35 = vrot.slane %v7324_v50, %v15515_v47  ;;  %v7421_v28 = vsel %vm7411_vm12, %v7420_v26, %v7416_v36  ;;  %v9261_v50 = vmov 0.0  }
 0x74a   : > { %v7306_v51 = vpop.permute.xlu1 %7305 }
 0x74b   : > { %v7405_v14 = vrot.slane %v7306_v51, %v15515_v47 }
 0x74c   : > { %v7330_v55 = vpop.permute.xlu0 %7329 }
 0x74d   : > { %v7412_v21 = vsel %vm7411_vm12, %v7410_v56, %v7405_v14  ;;  %v7443_v30 = vrot.slane %v7330_v55, %v15515_v47 }
 0x74e   : > { %v7321_v41 = vpop.permute.xlu1 %7320  ;;  %v7549_v5 = vsel %vm7548_vm13, %v7421_v28, %v7412_v21 }
 0x74f   : > { %v7429_v20 = vrot.slane %v7321_v41, %v15518_v43 }
 0x750   : > { %v7336_v13 = vpop.permute.xlu0 %7335 }
 0x751   : > { %v7430_v42 = vsel %vm7411_vm12, %v7429_v20, %v7425_v44  ;;  %v7452_v17 = vrot.slane %v7336_v13, %v15515_v47 }
 0x752   : > { %v7327_v7 = vpop.permute.xlu1 %7326  ;;  %v7551_v6 = vsel %vm7550_vm14, %v7430_v42, %v7549_v5 }
 0x753   : > { %v7438_v58 = vrot.slane %v7327_v7, %v15518_v43 }
 0x754   : > { %v7342_v25 = vpop.permute.xlu0 %7341 }
 0x755   : > { %v7439_v60 = vsel %vm7411_vm12, %v7438_v58, %v7434_v35  ;;  %v7461_v61 = vrot.slane %v7342_v25, %v15515_v47 }
 0x756   : > { %v7333_v31 = vpop.permute.xlu1 %7332  ;;  %v7553_v1 = vsel %vm7552_vm15, %v7439_v60, %v7551_v6 }
 0x757   : > { %v7447_v8 = vrot.slane %v7333_v31, %v15518_v43 }
 0x758   : > { %v7348_v34 = vpop.permute.xlu0 %7347 }
 0x759   : > { %v7448_v59 = vsel %vm7411_vm12, %v7447_v8, %v7443_v30  ;;  %v7470_v39 = vrot.slane %v7348_v34, %v15515_v47 }
 0x75a   : > { %v7339_v24 = vpop.permute.xlu1 %7338  ;;  %v7555_v4 = vsel %vm7554_vm0, %v7448_v59, %v7553_v1 }
 0x75b   : > { %v7456_v16 = vrot.slane %v7339_v24, %v15518_v43 }
 0x75c   : > { %v7354_v48 = vpop.permute.xlu0 %7353 }
 0x75d   : > { %v7457_v49 = vsel %vm7411_vm12, %v7456_v16, %v7452_v17  ;;  %v7479_v7 = vrot.slane %v7354_v48, %v15515_v47 }
 0x75e   : > { %v7345_v53 = vpop.permute.xlu1 %7344  ;;  %v7557_v46 = vsel %vm7556_vm1, %v7457_v49, %v7555_v4 }
 0x75f   : > { %v7465_v23 = vrot.slane %v7345_v53, %v15518_v43 }
 0x760   : > { %v7360_v0 = vpop.permute.xlu0 %7359 }
 0x761   : > { %v7466_v57 = vsel %vm7411_vm12, %v7465_v23, %v7461_v61  ;;  %v7488_v2 = vrot.slane %v7360_v0, %v15515_v47 }
 0x762   : > { %v7351_v15 = vpop.permute.xlu1 %7350  ;;  %v7559_v11 = vsel %vm7558_vm2, %v7466_v57, %v7557_v46 }
 0x763   : > { %v7474_v3 = vrot.slane %v7351_v15, %v15518_v43 }
 0x764   : > { %v7366_v51 = vpop.permute.xlu0 %7365 }
 0x765   : > { %v7475_v40 = vsel %vm7411_vm12, %v7474_v3, %v7470_v39  ;;  %v7497_v31 = vrot.slane %v7366_v51, %v15515_v47 }
 0x766   : > { %v7561_v32 = vsel %vm7560_vm3, %v7475_v40, %v7559_v11  ;;  %v7357_v54 = vpop.permute.xlu1 %7356 }
 0x767   : > { %v7578_v9 = vrot.slane %v7561_v32, %v15547_v10  ;;  %v7571_v41 = vcombine.high %v7561_v32, %v9261_v50  ;;  %v7483_v19 = vrot.slane %v7357_v54, %v15518_v43 }
 0x769   : > { %v15559_v38 = vrot.slane %v7578_v9, %v15554_v29  ;;  %v7586_v27 = vcombine.high %v7578_v9, %v9261_v50  ;;  %v7585_v24 = vrot.slane %v7571_v41, %v15547_v10  ;;  %v7484_v45 = vsel %vm7411_vm12, %v7483_v19, %v7479_v7 }
 0x76a   : > { %v7363_v12 = vpop.permute.xlu1 %7362 }
 0x76b   : > { %v7616_v55 = vcombine.high %v15559_v38, %v9261_v50  ;;  %v7492_v13 = vrot.slane %v7363_v12, %v15518_v43  ;;  %v7600_v25 = vrot.slane %v7586_v27, %v15554_v29  ;;  %v7608_v44 = vrot.slane %v7585_v24, %v15554_v29 }
 0x76c   : > { %v7601_v35 = vcombine.high %v7585_v24, %v9261_v50 }
 0x76d   : > { %7670 = vrot.lane.b32.xlu0 %v7616_v55, %s9251_s26  ;;  %v7493_v14 = vsel %vm7411_vm12, %v7492_v13, %v7488_v2  ;;  %v7617_v52 = vcombine.high %v7600_v25, %v9261_v50  ;;  %v7618_v21 = vcombine.high %v7608_v44, %v9261_v50 }
 0x76e   : > { %v7369_v20 = vpop.permute.xlu1 %7368  ;;  %v7562_v56 = vsel %vm7548_vm13, %v7493_v14, %v7484_v45  ;;  %v7615_v53 = vrot.slane %v7601_v35, %v15554_v29 }
 0x76f   : > { %v7501_v37 = vrot.slane %v7369_v20, %v15518_v43 }
 0x770   : > { %v7619_v34 = vcombine.high %v7615_v53, %v9261_v50 }
 0x771   : > { %7674 = vrot.lane.b32.xlu0 %v7600_v25, %s9252_s25  ;;  %v7502_v26 = vsel %vm7411_vm12, %v7501_v37, %v7497_v31 }
 0x772   : > { %v7563_v58 = vsel %vm7550_vm14, %v7502_v26, %v7562_v56  ;;  %v7375_v8 = vpop.permute.xlu1 %7374 }
 0x773   : > { %v7510_v33 = vrot.slane %v7375_v8, %v15518_v43  ;;  %v9262_v8 = vmov 1966171168  }
 0x775   : > { %7682 = vrot.lane.b32.xlu0 %v7608_v44, %s9255_s19 }
 0x779   : > { %7678 = vrot.lane.b32.xlu0 %v7617_v52, %s9253_s27  ;;  %v7372_v36 = vpop.permute.xlu0 %7371  ;;  %v7743_v52 = vunpack.c.l.s4 %v9262_v8 }
 0x77a   : > { %v7506_v16 = vrot.slane %v7372_v36, %v15515_v47 }
 0x77c   : > { %v7511_v42 = vsel %vm7411_vm12, %v7510_v33, %v7506_v16 }
 0x77d   : > { %7686 = vrot.lane.b32.xlu0 %v7618_v21, %s9256_s13  ;;  %v7564_v30 = vsel %vm7552_vm15, %v7511_v42, %v7563_v58  ;;  %v7744_v42 = vunpack.c.0.s8 %v7743_v52 }
 0x781   : > { %7690 = vrot.lane.b32.xlu0 %v7615_v53, %s9257_s14 }
 0x785   : > { %7694 = vrot.lane.b32.xlu0 %v7619_v34, %s9258_s15 }
 0x787   : > { %v7381_v62 = vpop.permute.xlu1 %7380 }
 0x788   : > { %v7519_v28 = vrot.slane %v7381_v62, %v15518_v43 }
 0x790   : > { %v7378_v60 = vpop.permute.xlu0 %7377 }
 0x791   : > { %v7515_v17 = vrot.slane %v7378_v60, %v15515_v47 }
 0x793   : > { %v7520_v23 = vsel %vm7411_vm12, %v7519_v28, %v7515_v17  ;;  %v7747_v17 = vsub.s32 %v7744_v42, %v16501_v63 }
 0x794   : > { %v7565_v5 = vsel %vm7554_vm0, %v7520_v23, %v7564_v30 }
 0x79c   : > { %v7384_v59 = vpop.permute.xlu0 %7383 }
 0x79d   : > { %v7524_v39 = vrot.slane %v7384_v59, %v15515_v47 }
 0x7a4   : > { %v7387_v61 = vpop.permute.xlu1 %7386 }
 0x7a5   : > { %v7528_v18 = vrot.slane %v7387_v61, %v15518_v43 }
 0x7a7   : > { %v7529_v48 = vsel %vm7411_vm12, %v7528_v18, %v7524_v39 }
 0x7a8   : > { %v7566_v40 = vsel %vm7556_vm1, %v7529_v48, %v7565_v5 }
 0x7ae   : > { %v7390_v6 = vpop.permute.xlu0 %7389 }
 0x7af   : > { %v7533_v1 = vrot.slane %v7390_v6, %v15515_v47 }
 0x7b6   : > { %v7393_v49 = vpop.permute.xlu1 %7392 }
 0x7b7   : > { %v7537_v57 = vrot.slane %v7393_v49, %v15518_v43 }
 0x7b9   : > { %v7538_v3 = vsel %vm7411_vm12, %v7537_v57, %v7533_v1 }
 0x7ba   : > { %v7567_v32 = vsel %vm7558_vm2, %v7538_v3, %v7566_v40 }
 0x7be   : > { %v7396_v15 = vpop.permute.xlu0 %7395 }
 0x7bf   : > { %v7542_v4 = vrot.slane %v7396_v15, %v15515_v47 }
 0x7c4   : > { %v7399_v46 = vpop.permute.xlu1 %7398 }
 0x7c5   : > { %v7546_v11 = vrot.slane %v7399_v46, %v15518_v43 }
 0x7c7   : > { %v7547_v54 = vsel %vm7411_vm12, %v7546_v11, %v7542_v4 }
 0x7c8   : > { %v7568_v0 = vsel %vm7560_vm3, %v7547_v54, %v7567_v32 }
 0x7c9   : > { %v7627_v9 = vrot.slane %v7568_v0, %v15547_v10  ;;  %v7620_v12 = vcombine.high %v7568_v0, %v9261_v50 }
 0x7cb   : > { %v7642_v2 = vrot.slane %v7627_v9, %v15554_v29  ;;  %v7635_v51 = vcombine.high %v7627_v9, %v9261_v50  ;;  %v7634_v41 = vrot.slane %v7620_v12, %v15547_v10 }
 0x7cd   : > { %v7665_v47 = vcombine.high %v7642_v2, %v9261_v50  ;;  %v7649_v43 = vrot.slane %v7635_v51, %v15554_v29  ;;  %v7657_v55 = vrot.slane %v7634_v41, %v15554_v29  ;;  %v7650_v19 = vcombine.high %v7634_v41, %v9261_v50 }
 0x7cf   : > { %7698 = vrot.lane.b32.xlu1 %v7665_v47, %s9251_s26  ;;  %v7666_v27 = vcombine.high %v7649_v43, %v9261_v50  ;;  %v7667_v7 = vcombine.high %v7657_v55, %v9261_v50  ;;  %v7664_v13 = vrot.slane %v7650_v19, %v15554_v29  ;;  %s7836_s26 = sshll.u32 %s16503_s10, 1 }
 0x7d1   : > { %v7668_v10 = vcombine.high %v7664_v13, %v9261_v50 }
 0x7d3   : > { %7702 = vrot.lane.b32.xlu1 %v7649_v43, %s9252_s25 }
 0x7d7   : > { %7710 = vrot.lane.b32.xlu1 %v7657_v55, %s9255_s19  ;;  %s344_s19 = scalar_lea.vmem %s15664_s9, %s7836_s26 }
 0x7db   : > { %7706 = vrot.lane.b32.xlu1 %v7666_v27, %s9253_s27 }
 0x7df   : > { %7714 = vrot.lane.b32.xlu1 %v7667_v7, %s9256_s13  ;;  %v7671_v31 = vpop.permute.xlu0 %7670 }
 0x7e0   : > { %v7725_v29 = vsel %vm2700_vm5, %v15559_v38, %v7671_v31 }
 0x7e3   : > { %7718 = vrot.lane.b32.xlu1 %v7664_v13, %s9257_s14  ;;  %v7675_v14 = vpop.permute.xlu0 %7674 }
 0x7e4   : > { %v7726_v33 = vsel %vm2731_vm6, %v7725_v29, %v7675_v14 }
 0x7e7   : > { %7722 = vrot.lane.b32.xlu1 %v7668_v10, %s9258_s15  ;;  %v7683_v20 = vpop.permute.xlu0 %7682 }
 0x7eb   : > { %v7679_v24 = vpop.permute.xlu0 %7678 }
 0x7ec   : > { %v7727_v21 = vsel %vm2762_vm7, %v7726_v33, %v7679_v24 }
 0x7ed   : > { %v7728_v30 = vsel %vm2795_vm8, %v7727_v21, %v7683_v20 }
 0x7ef   : > { %v7687_v56 = vpop.permute.xlu0 %7686 }
 0x7f0   : > { %v7729_v38 = vsel %vm2828_vm9, %v7728_v30, %v7687_v56 }
 0x7f3   : > { %v7691_v58 = vpop.permute.xlu0 %7690 }
 0x7f4   : > { %v7730_v28 = vsel %vm2861_vm10, %v7729_v38, %v7691_v58 }
 0x7f7   : > { %v7695_v53 = vpop.permute.xlu0 %7694 }
 0x7f8   : > { %v7731_v5 = vsel %vm2894_vm11, %v7730_v28, %v7695_v53 }
 0x841   : > { %v7699_v25 = vpop.permute.xlu1 %7698 }
 0x842   : > { %v7732_v50 = vsel %vm2700_vm5, %v7642_v2, %v7699_v25 }
 0x845   : > { %v7703_v37 = vpop.permute.xlu1 %7702 }
 0x846   : > { %v7733_v36 = vsel %vm2731_vm6, %v7732_v50, %v7703_v37 }
 0x849   : > { %v7711_v45 = vpop.permute.xlu1 %7710 }
 0x84d   : > { %v7707_v26 = vpop.permute.xlu1 %7706 }
 0x84e   : > { %v7734_v35 = vsel %vm2762_vm7, %v7733_v36, %v7707_v26 }
 0x84f   : > { %v7735_v34 = vsel %vm2795_vm8, %v7734_v35, %v7711_v45 }
 0x851   : > { %v7715_v44 = vpop.permute.xlu1 %7714 }
 0x852   : > { %v7736_v62 = vsel %vm2828_vm9, %v7735_v34, %v7715_v44 }
 0x855   : > { %v7719_v16 = vpop.permute.xlu1 %7718 }
 0x856   : > { %v7737_v60 = vsel %vm2861_vm10, %v7736_v62, %v7719_v16 }
 0x859   : > { %v7723_v23 = vpop.permute.xlu1 %7722 }
 0x85a   : > { %v7738_v59 = vsel %vm2894_vm11, %v7737_v60, %v7723_v23 }
 0x85b   : > { %v7741_v61 = vcombine.low %v7731_v5, %v7738_v59 }
 0x85d   : > { %v7748_v6 = vrot.slane %v7741_v61, %v7747_v17 }
 0x85f   : > { %v7755_v49 = vrot.slane %v7748_v6, %v7747_v17 }
 0x861   : > { %7761 = vst.msk [vmem:[%s344_s19] sm:$0x3] %vm7759_vm4, %v7755_v49 }
 0x862 PF: > { %s20_s30 = sadd.s32 1, %s9245_s30  }
 0x863   : > { %p17_p1 = scmp.ge.s32.totalorder %s20_s30, 4  }
 0x865   :  { %19 = sbr.rel (!%p17_p1) target bundleno = 1 (0x1), region = 107 }
 0x86c   :  { %7781 = vsyncpa [#allocation3], 1 }
 0x86d   :  { %7783 = vsyncpa [#allocation3 + $0x1], 1 }

</bundles_post_ra>
